<compile_context>
chip_gen: v7x
topology: tpu7x:2x2x1
jax: 0.10.0
libtpu: 0.0.40
codegen_flags: <defaults>
</compile_context>

<pallas_src>
import jax
import jax.numpy as jnp
from jax import lax
from jax.experimental import pallas as pl
from jax.experimental.pallas import tpu as pltpu


def _round_up(v, m):
    return (v + m - 1) // m * m


def make_rdb_kernel(G0, C, G, H, W, Wp):
    Hp = H + 2
    Ctot = G0 + C * G
    taps = [(dy, dx) for dy in range(3) for dx in range(3)]

    def kernel(x_ref, w_ref, b_ref, wlff_ref, blff_ref, o_ref, buf, pbuf):
        f32 = jnp.float32

        # Zero only the 1-pixel border ring (+ right alignment pad columns);
        # the interior channels are fully rewritten every grid step.
        buf[0:1, :, :] = jnp.zeros((1, Wp, Ctot), buf.dtype)
        buf[H + 1:H + 2, :, :] = jnp.zeros((1, Wp, Ctot), buf.dtype)
        buf[:, 0:1, :] = jnp.zeros((Hp, 1, Ctot), buf.dtype)
        buf[:, W + 1:Wp, :] = jnp.zeros((Hp, Wp - W - 1, Ctot), buf.dtype)

        # Input features -> interior of the padded frame (bf16 for the MXU).
        buf[1:H + 1, 1:W + 1, 0:G0] = x_ref[0].astype(buf.dtype)

        # C dense stages: conv3x3 -> bias -> ReLU -> "concat" (write channel slab).
        for i in range(C):
            cin = G0 + i * G
            frame = buf[:, :, 0:cin].reshape(Hp * Wp, cin)            # bf16
            w_i = w_ref[i, 0:cin, :]                                  # (cin, 9G) bf16
            p = jnp.dot(frame, w_i, preferred_element_type=f32)       # (Hp*Wp, 9G)
            pbuf[:, :, 0:9 * G] = p.reshape(Hp, Wp, 9 * G)

            # Sum the 9 shifted windows of P; bias folded into the first term.
            acc = b_ref[i].reshape(1, 1, G) + pbuf[0:H, 0:W, 0:G]
            for t in range(1, 9):
                dy, dx = taps[t]
                acc = acc + pbuf[dy:dy + H, dx:dx + W, t * G:(t + 1) * G]
            out = jnp.maximum(acc, 0.0)
            buf[1:H + 1, 1:W + 1, cin:cin + G] = out.astype(buf.dtype)

        # LFF 1x1 conv over all Ctot channels (single matmul) + residual.
        frame = buf[:, :, :].reshape(Hp * Wp, Ctot)                   # bf16
        lff = jnp.dot(frame, wlff_ref[...], preferred_element_type=f32)
        pbuf[:, :, 0:G0] = lff.reshape(Hp, Wp, G0)
        o_ref[0] = (pbuf[1:H + 1, 1:W + 1, 0:G0]
                    + blff_ref[...].reshape(1, 1, G0)
                    + x_ref[0])

    return kernel


def rdb_pallas(x, conv_ws, conv_bs, w_lff, b_lff, *, G0, C, G):
    """x: (N,H,W,G0) f32; conv_ws[i]: (3,3,G0+i*G,G); conv_bs[i]: (G,);
       w_lff: (1,1,Ctot,G0); b_lff: (G0,)."""
    N, H, W, _ = x.shape
    Ctot = G0 + C * G
    Hp = H + 2
    Wp = _round_up(W + 2, 16)          # tile-aligned padded width
    PC = max(9 * G, G0)

    # Pack all dense-stage 3x3 weights into ONE operand: (C, Ctot, 9*G) bf16,
    # K = input channel, N ordered tap-major (tap = dy*3 + dx).
    w_stack = []
    for i, w in enumerate(conv_ws):
        cin = G0 + i * G
        wp = jnp.transpose(w, (2, 0, 1, 3)).reshape(cin, 9 * G)
        wp = jnp.pad(wp, ((0, Ctot - cin), (0, 0)))
        w_stack.append(wp)
    w_all = jnp.stack(w_stack, axis=0).astype(jnp.bfloat16)           # (C, Ctot, 9G)
    b_all = jnp.stack([b.reshape(1, G) for b in conv_bs], axis=0)     # (C, 1, G) f32
    wlff2 = w_lff.reshape(Ctot, G0).astype(jnp.bfloat16)              # (Ctot, G0)
    blff2 = b_lff.reshape(1, G0).astype(jnp.float32)                  # (1, G0)

    kernel = make_rdb_kernel(G0, C, G, H, W, Wp)

    def full(a):
        return pl.BlockSpec(a.shape, lambda n, nd=a.ndim: (0,) * nd)

    return pl.pallas_call(
        kernel,
        out_shape=jax.ShapeDtypeStruct((N, H, W, G0), jnp.float32),
        grid=(N,),
        in_specs=[
            pl.BlockSpec((1, H, W, G0), lambda n: (n, 0, 0, 0)),
            full(w_all), full(b_all), full(wlff2), full(blff2),
        ],
        out_specs=pl.BlockSpec((1, H, W, G0), lambda n: (n, 0, 0, 0)),
        scratch_shapes=[
            pltpu.VMEM((Hp, Wp, Ctot), jnp.bfloat16),   # concatenated feature frame
            pltpu.VMEM((Hp, Wp, PC), jnp.float32),      # per-stage matmul result
        ],
        compiler_params=pltpu.CompilerParams(
            dimension_semantics=("parallel",),
            vmem_limit_bytes=64 * 1024 * 1024,
        ),
    )(x, w_all, b_all, wlff2, blff2)


def rdb_reference(x, conv_ws, conv_bs, w_lff, b_lff):
    # Pure-JAX reference (NHWC / HWIO) mirroring the PyTorch RDB forward.
    # Conv inputs are cast to bf16 (f32 accumulation) to match the kernel's
    # bf16 MXU inputs.
    dn = ("NHWC", "HWIO", "NHWC")
    bf16, f32 = jnp.bfloat16, jnp.float32
    feat = x
    for w, b in zip(conv_ws, conv_bs):
        out = lax.conv_general_dilated(
            feat.astype(bf16), w.astype(bf16), (1, 1), "SAME",
            dimension_numbers=dn, preferred_element_type=f32)
        out = jnp.maximum(out + b.reshape(1, 1, 1, -1), 0.0)
        feat = jnp.concatenate([feat, out], axis=-1)
    lff = lax.conv_general_dilated(
        feat.astype(bf16), w_lff.astype(bf16), (1, 1), "SAME",
        dimension_numbers=dn, preferred_element_type=f32)
    lff = lff + b_lff.reshape(1, 1, 1, -1)
    return lff + x


if __name__ == "__main__":
    # Small shapes: batch=2, G0=8, C=3 dense blocks, growth G=8, spatial 16x16.
    N, G0, C, G, H, W = 2, 8, 3, 8, 16, 16
    Ctot = G0 + C * G

    key = jax.random.PRNGKey(0)
    keys = jax.random.split(key, 2 * C + 3)

    x = jax.random.normal(keys[0], (N, H, W, G0), jnp.float32)

    conv_ws, conv_bs = [], []
    for i in range(C):
        cin = G0 + i * G
        conv_ws.append(
            0.1 * jax.random.normal(keys[1 + 2 * i], (3, 3, cin, G), jnp.float32))
        conv_bs.append(
            0.1 * jax.random.normal(keys[2 + 2 * i], (G,), jnp.float32))
    w_lff = 0.1 * jax.random.normal(keys[2 * C + 1], (1, 1, Ctot, G0), jnp.float32)
    b_lff = 0.1 * jax.random.normal(keys[2 * C + 2], (G0,), jnp.float32)

    out = jax.block_until_ready(
        rdb_pallas(x, conv_ws, conv_bs, w_lff, b_lff, G0=G0, C=C, G=G))
    ref = jax.block_until_ready(rdb_reference(x, conv_ws, conv_bs, w_lff, b_lff))

    assert out.shape == (N, H, W, G0), out.shape
    err = float(jnp.max(jnp.abs(out - ref)))
    assert err < 2e-2, err
    print("KERNEL_OK")
</pallas_src>

<mosaic_0001>
module attributes {stable_mosaic.version = 11 : i64} {
  func.func @kernel(%arg0: i32, %arg1: memref<1x16x16x8xf32, #tpu.memory_space<vmem>>, %arg2: memref<3x32x72xbf16, #tpu.memory_space<vmem>>, %arg3: memref<3x1x8xf32, #tpu.memory_space<vmem>>, %arg4: memref<32x8xbf16, #tpu.memory_space<vmem>>, %arg5: memref<1x8xf32, #tpu.memory_space<vmem>>, %arg6: memref<1x16x16x8xf32, #tpu.memory_space<vmem>>, %arg7: memref<18x32x32xbf16, #tpu.memory_space<vmem>>, %arg8: memref<18x32x72xf32, #tpu.memory_space<vmem>>) attributes {dimension_semantics = [#tpu.dimension_semantics<parallel>], iteration_bounds = array<i64: 2>, scalar_prefetch = 0 : i64, scratch_operands = 2 : i64, tpu.core_type = #tpu.core_type<tc>, window_params = [{transform_indices = @transform_0, window_bounds = array<i64: 1, 16, 16, 8>}, {pipeline_mode = #tpu.pipeline_mode<synchronous>, transform_indices = @transform_1, window_bounds = array<i64: 3, 32, 72>}, {pipeline_mode = #tpu.pipeline_mode<synchronous>, transform_indices = @transform_2, window_bounds = array<i64: 3, 1, 8>}, {pipeline_mode = #tpu.pipeline_mode<synchronous>, transform_indices = @transform_3, window_bounds = array<i64: 32, 8>}, {pipeline_mode = #tpu.pipeline_mode<synchronous>, transform_indices = @transform_4, window_bounds = array<i64: 1, 8>}, {transform_indices = @transform_5, window_bounds = array<i64: 1, 16, 16, 8>}]} {
    %cst = arith.constant 0.000000e+00 : bf16
    %0 = vector.broadcast %cst : bf16 to vector<1x32x32xbf16>
    %c0 = arith.constant 0 : index
    %c0_0 = arith.constant 0 : index
    %c0_1 = arith.constant 0 : index
    %1 = vector.load %arg7[%c0, %c0_0, %c0_1] : memref<18x32x32xbf16, #tpu.memory_space<vmem>>, vector<1x32x32xbf16>
    tpu.vector_store %arg7[%c0, %c0_0, %c0_1], %0 {strides = array<i32>} : memref<18x32x32xbf16, #tpu.memory_space<vmem>>, vector<1x32x32xbf16>,
    %cst_2 = arith.constant 0.000000e+00 : bf16
    %2 = vector.broadcast %cst_2 : bf16 to vector<1x32x32xbf16>
    %c17 = arith.constant 17 : index
    %c0_3 = arith.constant 0 : index
    %c0_4 = arith.constant 0 : index
    %3 = vector.load %arg7[%c17, %c0_3, %c0_4] : memref<18x32x32xbf16, #tpu.memory_space<vmem>>, vector<1x32x32xbf16>
    tpu.vector_store %arg7[%c17, %c0_3, %c0_4], %2 {strides = array<i32>} : memref<18x32x32xbf16, #tpu.memory_space<vmem>>, vector<1x32x32xbf16>,
    %cst_5 = arith.constant 0.000000e+00 : bf16
    %4 = vector.broadcast %cst_5 : bf16 to vector<18x1x32xbf16>
    %c0_6 = arith.constant 0 : index
    %c0_7 = arith.constant 0 : index
    %c0_8 = arith.constant 0 : index
    %5 = vector.load %arg7[%c0_6, %c0_7, %c0_8] : memref<18x32x32xbf16, #tpu.memory_space<vmem>>, vector<18x1x32xbf16>
    tpu.vector_store %arg7[%c0_6, %c0_7, %c0_8], %4 {strides = array<i32>} : memref<18x32x32xbf16, #tpu.memory_space<vmem>>, vector<18x1x32xbf16>,
    %cst_9 = arith.constant 0.000000e+00 : bf16
    %6 = vector.broadcast %cst_9 : bf16 to vector<18x15x32xbf16>
    %c0_10 = arith.constant 0 : index
    %c17_11 = arith.constant 17 : index
    %c0_12 = arith.constant 0 : index
    %7 = vector.load %arg7[%c0_10, %c17_11, %c0_12] : memref<18x32x32xbf16, #tpu.memory_space<vmem>>, vector<18x15x32xbf16>
    tpu.vector_store %arg7[%c0_10, %c17_11, %c0_12], %6 {strides = array<i32>} : memref<18x32x32xbf16, #tpu.memory_space<vmem>>, vector<18x15x32xbf16>,
    %c0_13 = arith.constant 0 : index
    %c0_14 = arith.constant 0 : index
    %c0_15 = arith.constant 0 : index
    %c0_16 = arith.constant 0 : index
    %8 = vector.load %arg1[%c0_13, %c0_14, %c0_15, %c0_16] : memref<1x16x16x8xf32, #tpu.memory_space<vmem>>, vector<1x16x16x8xf32>
    %9 = vector.shape_cast %8 : vector<1x16x16x8xf32> to vector<16x16x8xf32>
    %10 = arith.truncf %9 : vector<16x16x8xf32> to vector<16x16x8xbf16>
    %c1 = arith.constant 1 : index
    %c1_17 = arith.constant 1 : index
    %c0_18 = arith.constant 0 : index
    %11 = vector.load %arg7[%c1, %c1_17, %c0_18] : memref<18x32x32xbf16, #tpu.memory_space<vmem>>, vector<16x16x8xbf16>
    tpu.vector_store %arg7[%c1, %c1_17, %c0_18], %10 {strides = array<i32>} : memref<18x32x32xbf16, #tpu.memory_space<vmem>>, vector<16x16x8xbf16>,
    %c0_19 = arith.constant 0 : index
    %c0_20 = arith.constant 0 : index
    %c0_21 = arith.constant 0 : index
    %12 = vector.load %arg7[%c0_19, %c0_20, %c0_21] : memref<18x32x32xbf16, #tpu.memory_space<vmem>>, vector<18x32x8xbf16>
    %13 = vector.shape_cast %12 : vector<18x32x8xbf16> to vector<576x8xbf16>
    %c0_22 = arith.constant 0 : index
    %c0_23 = arith.constant 0 : index
    %c0_24 = arith.constant 0 : index
    %14 = vector.load %arg2[%c0_22, %c0_23, %c0_24] : memref<3x32x72xbf16, #tpu.memory_space<vmem>>, vector<1x8x72xbf16>
    %15 = vector.shape_cast %14 : vector<1x8x72xbf16> to vector<8x72xbf16>
    %cst_25 = arith.constant dense<0.000000e+00> : vector<576x72xf32>
    %16 = tpu.matmul %13, %15, %cst_25 {dimension_numbers = #tpu.dot_dimension_numbers<[1], [0], [0], [1], [0, 0, 1, 1], [], []>} : vector<576x8xbf16>, vector<8x72xbf16>, vector<576x72xf32> -> vector<576x72xf32>
    %17 = vector.shape_cast %16 : vector<576x72xf32> to vector<18x32x72xf32>
    %c0_26 = arith.constant 0 : index
    %c0_27 = arith.constant 0 : index
    %c0_28 = arith.constant 0 : index
    %18 = vector.load %arg8[%c0_26, %c0_27, %c0_28] : memref<18x32x72xf32, #tpu.memory_space<vmem>>, vector<18x32x72xf32>
    tpu.vector_store %arg8[%c0_26, %c0_27, %c0_28], %17 {strides = array<i32>} : memref<18x32x72xf32, #tpu.memory_space<vmem>>, vector<18x32x72xf32>,
    %c0_29 = arith.constant 0 : index
    %c0_30 = arith.constant 0 : index
    %c0_31 = arith.constant 0 : index
    %19 = vector.load %arg3[%c0_29, %c0_30, %c0_31] : memref<3x1x8xf32, #tpu.memory_space<vmem>>, vector<1x1x8xf32>
    %20 = vector.shape_cast %19 : vector<1x1x8xf32> to vector<1x8xf32>
    %21 = vector.shape_cast %20 : vector<1x8xf32> to vector<1x1x8xf32>
    %c0_32 = arith.constant 0 : index
    %c0_33 = arith.constant 0 : index
    %c0_34 = arith.constant 0 : index
    %22 = vector.load %arg8[%c0_32, %c0_33, %c0_34] : memref<18x32x72xf32, #tpu.memory_space<vmem>>, vector<16x16x8xf32>
    %23 = vector.broadcast %21 : vector<1x1x8xf32> to vector<16x16x8xf32>
    %24 = arith.addf %23, %22 : vector<16x16x8xf32>
    %c0_35 = arith.constant 0 : index
    %c1_36 = arith.constant 1 : index
    %c8 = arith.constant 8 : index
    %25 = vector.load %arg8[%c0_35, %c1_36, %c8] : memref<18x32x72xf32, #tpu.memory_space<vmem>>, vector<16x16x8xf32>
    %26 = arith.addf %24, %25 : vector<16x16x8xf32>
    %c0_37 = arith.constant 0 : index
    %c2 = arith.constant 2 : index
    %c16 = arith.constant 16 : index
    %27 = vector.load %arg8[%c0_37, %c2, %c16] : memref<18x32x72xf32, #tpu.memory_space<vmem>>, vector<16x16x8xf32>
    %28 = arith.addf %26, %27 : vector<16x16x8xf32>
    %c1_38 = arith.constant 1 : index
    %c0_39 = arith.constant 0 : index
    %c24 = arith.constant 24 : index
    %29 = vector.load %arg8[%c1_38, %c0_39, %c24] : memref<18x32x72xf32, #tpu.memory_space<vmem>>, vector<16x16x8xf32>
    %30 = arith.addf %28, %29 : vector<16x16x8xf32>
    %c1_40 = arith.constant 1 : index
    %c1_41 = arith.constant 1 : index
    %c32 = arith.constant 32 : index
    %31 = vector.load %arg8[%c1_40, %c1_41, %c32] : memref<18x32x72xf32, #tpu.memory_space<vmem>>, vector<16x16x8xf32>
    %32 = arith.addf %30, %31 : vector<16x16x8xf32>
    %c1_42 = arith.constant 1 : index
    %c2_43 = arith.constant 2 : index
    %c40 = arith.constant 40 : index
    %33 = vector.load %arg8[%c1_42, %c2_43, %c40] : memref<18x32x72xf32, #tpu.memory_space<vmem>>, vector<16x16x8xf32>
    %34 = arith.addf %32, %33 : vector<16x16x8xf32>
    %c2_44 = arith.constant 2 : index
    %c0_45 = arith.constant 0 : index
    %c48 = arith.constant 48 : index
    %35 = vector.load %arg8[%c2_44, %c0_45, %c48] : memref<18x32x72xf32, #tpu.memory_space<vmem>>, vector<16x16x8xf32>
    %36 = arith.addf %34, %35 : vector<16x16x8xf32>
    %c2_46 = arith.constant 2 : index
    %c1_47 = arith.constant 1 : index
    %c56 = arith.constant 56 : index
    %37 = vector.load %arg8[%c2_46, %c1_47, %c56] : memref<18x32x72xf32, #tpu.memory_space<vmem>>, vector<16x16x8xf32>
    %38 = arith.addf %36, %37 : vector<16x16x8xf32>
    %c2_48 = arith.constant 2 : index
    %c2_49 = arith.constant 2 : index
    %c64 = arith.constant 64 : index
    %39 = vector.load %arg8[%c2_48, %c2_49, %c64] : memref<18x32x72xf32, #tpu.memory_space<vmem>>, vector<16x16x8xf32>
    %40 = arith.addf %38, %39 : vector<16x16x8xf32>
    %cst_50 = arith.constant 0.000000e+00 : f32
    %41 = vector.broadcast %cst_50 : f32 to vector<16x16x8xf32>
    %42 = arith.maximumf %40, %41 : vector<16x16x8xf32>
    %43 = arith.truncf %42 : vector<16x16x8xf32> to vector<16x16x8xbf16>
    %c1_51 = arith.constant 1 : index
    %c1_52 = arith.constant 1 : index
    %c8_53 = arith.constant 8 : index
    %44 = vector.load %arg7[%c1_51, %c1_52, %c8_53] : memref<18x32x32xbf16, #tpu.memory_space<vmem>>, vector<16x16x8xbf16>
    tpu.vector_store %arg7[%c1_51, %c1_52, %c8_53], %43 {strides = array<i32>} : memref<18x32x32xbf16, #tpu.memory_space<vmem>>, vector<16x16x8xbf16>,
    %c0_54 = arith.constant 0 : index
    %c0_55 = arith.constant 0 : index
    %c0_56 = arith.constant 0 : index
    %45 = vector.load %arg7[%c0_54, %c0_55, %c0_56] : memref<18x32x32xbf16, #tpu.memory_space<vmem>>, vector<18x32x16xbf16>
    %46 = vector.shape_cast %45 : vector<18x32x16xbf16> to vector<576x16xbf16>
    %c1_57 = arith.constant 1 : index
    %c0_58 = arith.constant 0 : index
    %c0_59 = arith.constant 0 : index
    %47 = vector.load %arg2[%c1_57, %c0_58, %c0_59] : memref<3x32x72xbf16, #tpu.memory_space<vmem>>, vector<1x16x72xbf16>
    %48 = vector.shape_cast %47 : vector<1x16x72xbf16> to vector<16x72xbf16>
    %cst_60 = arith.constant dense<0.000000e+00> : vector<576x72xf32>
    %49 = tpu.matmul %46, %48, %cst_60 {dimension_numbers = #tpu.dot_dimension_numbers<[1], [0], [0], [1], [0, 0, 1, 1], [], []>} : vector<576x16xbf16>, vector<16x72xbf16>, vector<576x72xf32> -> vector<576x72xf32>
    %50 = vector.shape_cast %49 : vector<576x72xf32> to vector<18x32x72xf32>
    %c0_61 = arith.constant 0 : index
    %c0_62 = arith.constant 0 : index
    %c0_63 = arith.constant 0 : index
    %51 = vector.load %arg8[%c0_61, %c0_62, %c0_63] : memref<18x32x72xf32, #tpu.memory_space<vmem>>, vector<18x32x72xf32>
    tpu.vector_store %arg8[%c0_61, %c0_62, %c0_63], %50 {strides = array<i32>} : memref<18x32x72xf32, #tpu.memory_space<vmem>>, vector<18x32x72xf32>,
    %c1_64 = arith.constant 1 : index
    %c0_65 = arith.constant 0 : index
    %c0_66 = arith.constant 0 : index
    %52 = vector.load %arg3[%c1_64, %c0_65, %c0_66] : memref<3x1x8xf32, #tpu.memory_space<vmem>>, vector<1x1x8xf32>
    %53 = vector.shape_cast %52 : vector<1x1x8xf32> to vector<1x8xf32>
    %54 = vector.shape_cast %53 : vector<1x8xf32> to vector<1x1x8xf32>
    %c0_67 = arith.constant 0 : index
    %c0_68 = arith.constant 0 : index
    %c0_69 = arith.constant 0 : index
    %55 = vector.load %arg8[%c0_67, %c0_68, %c0_69] : memref<18x32x72xf32, #tpu.memory_space<vmem>>, vector<16x16x8xf32>
    %56 = vector.broadcast %54 : vector<1x1x8xf32> to vector<16x16x8xf32>
    %57 = arith.addf %56, %55 : vector<16x16x8xf32>
    %c0_70 = arith.constant 0 : index
    %c1_71 = arith.constant 1 : index
    %c8_72 = arith.constant 8 : index
    %58 = vector.load %arg8[%c0_70, %c1_71, %c8_72] : memref<18x32x72xf32, #tpu.memory_space<vmem>>, vector<16x16x8xf32>
    %59 = arith.addf %57, %58 : vector<16x16x8xf32>
    %c0_73 = arith.constant 0 : index
    %c2_74 = arith.constant 2 : index
    %c16_75 = arith.constant 16 : index
    %60 = vector.load %arg8[%c0_73, %c2_74, %c16_75] : memref<18x32x72xf32, #tpu.memory_space<vmem>>, vector<16x16x8xf32>
    %61 = arith.addf %59, %60 : vector<16x16x8xf32>
    %c1_76 = arith.constant 1 : index
    %c0_77 = arith.constant 0 : index
    %c24_78 = arith.constant 24 : index
    %62 = vector.load %arg8[%c1_76, %c0_77, %c24_78] : memref<18x32x72xf32, #tpu.memory_space<vmem>>, vector<16x16x8xf32>
    %63 = arith.addf %61, %62 : vector<16x16x8xf32>
    %c1_79 = arith.constant 1 : index
    %c1_80 = arith.constant 1 : index
    %c32_81 = arith.constant 32 : index
    %64 = vector.load %arg8[%c1_79, %c1_80, %c32_81] : memref<18x32x72xf32, #tpu.memory_space<vmem>>, vector<16x16x8xf32>
    %65 = arith.addf %63, %64 : vector<16x16x8xf32>
    %c1_82 = arith.constant 1 : index
    %c2_83 = arith.constant 2 : index
    %c40_84 = arith.constant 40 : index
    %66 = vector.load %arg8[%c1_82, %c2_83, %c40_84] : memref<18x32x72xf32, #tpu.memory_space<vmem>>, vector<16x16x8xf32>
    %67 = arith.addf %65, %66 : vector<16x16x8xf32>
    %c2_85 = arith.constant 2 : index
    %c0_86 = arith.constant 0 : index
    %c48_87 = arith.constant 48 : index
    %68 = vector.load %arg8[%c2_85, %c0_86, %c48_87] : memref<18x32x72xf32, #tpu.memory_space<vmem>>, vector<16x16x8xf32>
    %69 = arith.addf %67, %68 : vector<16x16x8xf32>
    %c2_88 = arith.constant 2 : index
    %c1_89 = arith.constant 1 : index
    %c56_90 = arith.constant 56 : index
    %70 = vector.load %arg8[%c2_88, %c1_89, %c56_90] : memref<18x32x72xf32, #tpu.memory_space<vmem>>, vector<16x16x8xf32>
    %71 = arith.addf %69, %70 : vector<16x16x8xf32>
    %c2_91 = arith.constant 2 : index
    %c2_92 = arith.constant 2 : index
    %c64_93 = arith.constant 64 : index
    %72 = vector.load %arg8[%c2_91, %c2_92, %c64_93] : memref<18x32x72xf32, #tpu.memory_space<vmem>>, vector<16x16x8xf32>
    %73 = arith.addf %71, %72 : vector<16x16x8xf32>
    %cst_94 = arith.constant 0.000000e+00 : f32
    %74 = vector.broadcast %cst_94 : f32 to vector<16x16x8xf32>
    %75 = arith.maximumf %73, %74 : vector<16x16x8xf32>
    %76 = arith.truncf %75 : vector<16x16x8xf32> to vector<16x16x8xbf16>
    %c1_95 = arith.constant 1 : index
    %c1_96 = arith.constant 1 : index
    %c16_97 = arith.constant 16 : index
    %77 = vector.load %arg7[%c1_95, %c1_96, %c16_97] : memref<18x32x32xbf16, #tpu.memory_space<vmem>>, vector<16x16x8xbf16>
    tpu.vector_store %arg7[%c1_95, %c1_96, %c16_97], %76 {strides = array<i32>} : memref<18x32x32xbf16, #tpu.memory_space<vmem>>, vector<16x16x8xbf16>,
    %c0_98 = arith.constant 0 : index
    %c0_99 = arith.constant 0 : index
    %c0_100 = arith.constant 0 : index
    %78 = vector.load %arg7[%c0_98, %c0_99, %c0_100] : memref<18x32x32xbf16, #tpu.memory_space<vmem>>, vector<18x32x24xbf16>
    %79 = vector.shape_cast %78 : vector<18x32x24xbf16> to vector<576x24xbf16>
    %c2_101 = arith.constant 2 : index
    %c0_102 = arith.constant 0 : index
    %c0_103 = arith.constant 0 : index
    %80 = vector.load %arg2[%c2_101, %c0_102, %c0_103] : memref<3x32x72xbf16, #tpu.memory_space<vmem>>, vector<1x24x72xbf16>
    %81 = vector.shape_cast %80 : vector<1x24x72xbf16> to vector<24x72xbf16>
    %cst_104 = arith.constant dense<0.000000e+00> : vector<576x72xf32>
    %82 = tpu.matmul %79, %81, %cst_104 {dimension_numbers = #tpu.dot_dimension_numbers<[1], [0], [0], [1], [0, 0, 1, 1], [], []>} : vector<576x24xbf16>, vector<24x72xbf16>, vector<576x72xf32> -> vector<576x72xf32>
    %83 = vector.shape_cast %82 : vector<576x72xf32> to vector<18x32x72xf32>
    %c0_105 = arith.constant 0 : index
    %c0_106 = arith.constant 0 : index
    %c0_107 = arith.constant 0 : index
    %84 = vector.load %arg8[%c0_105, %c0_106, %c0_107] : memref<18x32x72xf32, #tpu.memory_space<vmem>>, vector<18x32x72xf32>
    tpu.vector_store %arg8[%c0_105, %c0_106, %c0_107], %83 {strides = array<i32>} : memref<18x32x72xf32, #tpu.memory_space<vmem>>, vector<18x32x72xf32>,
    %c2_108 = arith.constant 2 : index
    %c0_109 = arith.constant 0 : index
    %c0_110 = arith.constant 0 : index
    %85 = vector.load %arg3[%c2_108, %c0_109, %c0_110] : memref<3x1x8xf32, #tpu.memory_space<vmem>>, vector<1x1x8xf32>
    %86 = vector.shape_cast %85 : vector<1x1x8xf32> to vector<1x8xf32>
    %87 = vector.shape_cast %86 : vector<1x8xf32> to vector<1x1x8xf32>
    %c0_111 = arith.constant 0 : index
    %c0_112 = arith.constant 0 : index
    %c0_113 = arith.constant 0 : index
    %88 = vector.load %arg8[%c0_111, %c0_112, %c0_113] : memref<18x32x72xf32, #tpu.memory_space<vmem>>, vector<16x16x8xf32>
    %89 = vector.broadcast %87 : vector<1x1x8xf32> to vector<16x16x8xf32>
    %90 = arith.addf %89, %88 : vector<16x16x8xf32>
    %c0_114 = arith.constant 0 : index
    %c1_115 = arith.constant 1 : index
    %c8_116 = arith.constant 8 : index
    %91 = vector.load %arg8[%c0_114, %c1_115, %c8_116] : memref<18x32x72xf32, #tpu.memory_space<vmem>>, vector<16x16x8xf32>
    %92 = arith.addf %90, %91 : vector<16x16x8xf32>
    %c0_117 = arith.constant 0 : index
    %c2_118 = arith.constant 2 : index
    %c16_119 = arith.constant 16 : index
    %93 = vector.load %arg8[%c0_117, %c2_118, %c16_119] : memref<18x32x72xf32, #tpu.memory_space<vmem>>, vector<16x16x8xf32>
    %94 = arith.addf %92, %93 : vector<16x16x8xf32>
    %c1_120 = arith.constant 1 : index
    %c0_121 = arith.constant 0 : index
    %c24_122 = arith.constant 24 : index
    %95 = vector.load %arg8[%c1_120, %c0_121, %c24_122] : memref<18x32x72xf32, #tpu.memory_space<vmem>>, vector<16x16x8xf32>
    %96 = arith.addf %94, %95 : vector<16x16x8xf32>
    %c1_123 = arith.constant 1 : index
    %c1_124 = arith.constant 1 : index
    %c32_125 = arith.constant 32 : index
    %97 = vector.load %arg8[%c1_123, %c1_124, %c32_125] : memref<18x32x72xf32, #tpu.memory_space<vmem>>, vector<16x16x8xf32>
    %98 = arith.addf %96, %97 : vector<16x16x8xf32>
    %c1_126 = arith.constant 1 : index
    %c2_127 = arith.constant 2 : index
    %c40_128 = arith.constant 40 : index
    %99 = vector.load %arg8[%c1_126, %c2_127, %c40_128] : memref<18x32x72xf32, #tpu.memory_space<vmem>>, vector<16x16x8xf32>
    %100 = arith.addf %98, %99 : vector<16x16x8xf32>
    %c2_129 = arith.constant 2 : index
    %c0_130 = arith.constant 0 : index
    %c48_131 = arith.constant 48 : index
    %101 = vector.load %arg8[%c2_129, %c0_130, %c48_131] : memref<18x32x72xf32, #tpu.memory_space<vmem>>, vector<16x16x8xf32>
    %102 = arith.addf %100, %101 : vector<16x16x8xf32>
    %c2_132 = arith.constant 2 : index
    %c1_133 = arith.constant 1 : index
    %c56_134 = arith.constant 56 : index
    %103 = vector.load %arg8[%c2_132, %c1_133, %c56_134] : memref<18x32x72xf32, #tpu.memory_space<vmem>>, vector<16x16x8xf32>
    %104 = arith.addf %102, %103 : vector<16x16x8xf32>
    %c2_135 = arith.constant 2 : index
    %c2_136 = arith.constant 2 : index
    %c64_137 = arith.constant 64 : index
    %105 = vector.load %arg8[%c2_135, %c2_136, %c64_137] : memref<18x32x72xf32, #tpu.memory_space<vmem>>, vector<16x16x8xf32>
    %106 = arith.addf %104, %105 : vector<16x16x8xf32>
    %cst_138 = arith.constant 0.000000e+00 : f32
    %107 = vector.broadcast %cst_138 : f32 to vector<16x16x8xf32>
    %108 = arith.maximumf %106, %107 : vector<16x16x8xf32>
    %109 = arith.truncf %108 : vector<16x16x8xf32> to vector<16x16x8xbf16>
    %c1_139 = arith.constant 1 : index
    %c1_140 = arith.constant 1 : index
    %c24_141 = arith.constant 24 : index
    %110 = vector.load %arg7[%c1_139, %c1_140, %c24_141] : memref<18x32x32xbf16, #tpu.memory_space<vmem>>, vector<16x16x8xbf16>
    tpu.vector_store %arg7[%c1_139, %c1_140, %c24_141], %109 {strides = array<i32>} : memref<18x32x32xbf16, #tpu.memory_space<vmem>>, vector<16x16x8xbf16>,
    %c0_142 = arith.constant 0 : index
    %c0_143 = arith.constant 0 : index
    %c0_144 = arith.constant 0 : index
    %111 = vector.load %arg7[%c0_142, %c0_143, %c0_144] : memref<18x32x32xbf16, #tpu.memory_space<vmem>>, vector<18x32x32xbf16>
    %112 = vector.shape_cast %111 : vector<18x32x32xbf16> to vector<576x32xbf16>
    %c0_145 = arith.constant 0 : index
    %c0_146 = arith.constant 0 : index
    %113 = vector.load %arg4[%c0_145, %c0_146] : memref<32x8xbf16, #tpu.memory_space<vmem>>, vector<32x8xbf16>
    %cst_147 = arith.constant dense<0.000000e+00> : vector<576x8xf32>
    %114 = tpu.matmul %112, %113, %cst_147 {dimension_numbers = #tpu.dot_dimension_numbers<[1], [0], [0], [1], [0, 0, 1, 1], [], []>} : vector<576x32xbf16>, vector<32x8xbf16>, vector<576x8xf32> -> vector<576x8xf32>
    %115 = vector.shape_cast %114 : vector<576x8xf32> to vector<18x32x8xf32>
    %c0_148 = arith.constant 0 : index
    %c0_149 = arith.constant 0 : index
    %c0_150 = arith.constant 0 : index
    %116 = vector.load %arg8[%c0_148, %c0_149, %c0_150] : memref<18x32x72xf32, #tpu.memory_space<vmem>>, vector<18x32x8xf32>
    tpu.vector_store %arg8[%c0_148, %c0_149, %c0_150], %115 {strides = array<i32>} : memref<18x32x72xf32, #tpu.memory_space<vmem>>, vector<18x32x8xf32>,
    %c1_151 = arith.constant 1 : index
    %c1_152 = arith.constant 1 : index
    %c0_153 = arith.constant 0 : index
    %117 = vector.load %arg8[%c1_151, %c1_152, %c0_153] : memref<18x32x72xf32, #tpu.memory_space<vmem>>, vector<16x16x8xf32>
    %c0_154 = arith.constant 0 : index
    %c0_155 = arith.constant 0 : index
    %118 = vector.load %arg5[%c0_154, %c0_155] : memref<1x8xf32, #tpu.memory_space<vmem>>, vector<1x8xf32>
    %119 = vector.shape_cast %118 : vector<1x8xf32> to vector<1x1x8xf32>
    %120 = vector.broadcast %119 : vector<1x1x8xf32> to vector<16x16x8xf32>
    %121 = arith.addf %117, %120 : vector<16x16x8xf32>
    %c0_156 = arith.constant 0 : index
    %c0_157 = arith.constant 0 : index
    %c0_158 = arith.constant 0 : index
    %c0_159 = arith.constant 0 : index
    %122 = vector.load %arg1[%c0_156, %c0_157, %c0_158, %c0_159] : memref<1x16x16x8xf32, #tpu.memory_space<vmem>>, vector<1x16x16x8xf32>
    %123 = vector.shape_cast %122 : vector<1x16x16x8xf32> to vector<16x16x8xf32>
    %124 = arith.addf %121, %123 : vector<16x16x8xf32>
    %c0_160 = arith.constant 0 : index
    %c0_161 = arith.constant 0 : index
    %c0_162 = arith.constant 0 : index
    %c0_163 = arith.constant 0 : index
    %125 = vector.load %arg6[%c0_160, %c0_161, %c0_162, %c0_163] : memref<1x16x16x8xf32, #tpu.memory_space<vmem>>, vector<1x16x16x8xf32>
    %126 = vector.shape_cast %125 : vector<1x16x16x8xf32> to vector<16x16x8xf32>
    %127 = vector.shape_cast %124 : vector<16x16x8xf32> to vector<1x16x16x8xf32>
    tpu.vector_store %arg6[%c0_160, %c0_161, %c0_162, %c0_163], %127 {strides = array<i32>} : memref<1x16x16x8xf32, #tpu.memory_space<vmem>>, vector<1x16x16x8xf32>,
    return
  }
  func.func @transform_0(%arg0: i32) -> (i32, i32, i32, i32) {
    %c0_i32 = arith.constant 0 : i32
    %c0_i32_0 = arith.constant 0 : i32
    %c0_i32_1 = arith.constant 0 : i32
    %c0_i32_2 = arith.constant 0 : i32
    return %arg0, %c0_i32, %c0_i32_0, %c0_i32_1 : i32, i32, i32, i32
  }
  func.func @transform_1(%arg0: i32) -> (i32, i32, i32) {
    %c0_i32 = arith.constant 0 : i32
    %c0_i32_0 = arith.constant 0 : i32
    %c0_i32_1 = arith.constant 0 : i32
    %c0_i32_2 = arith.constant 0 : i32
    return %c0_i32, %c0_i32_0, %c0_i32_1 : i32, i32, i32
  }
  func.func @transform_2(%arg0: i32) -> (i32, i32, i32) {
    %c0_i32 = arith.constant 0 : i32
    %c0_i32_0 = arith.constant 0 : i32
    %c0_i32_1 = arith.constant 0 : i32
    %c0_i32_2 = arith.constant 0 : i32
    return %c0_i32, %c0_i32_0, %c0_i32_1 : i32, i32, i32
  }
  func.func @transform_3(%arg0: i32) -> (i32, i32) {
    %c0_i32 = arith.constant 0 : i32
    %c0_i32_0 = arith.constant 0 : i32
    %c0_i32_1 = arith.constant 0 : i32
    return %c0_i32, %c0_i32_0 : i32, i32
  }
  func.func @transform_4(%arg0: i32) -> (i32, i32) {
    %c0_i32 = arith.constant 0 : i32
    %c0_i32_0 = arith.constant 0 : i32
    %c0_i32_1 = arith.constant 0 : i32
    return %c0_i32, %c0_i32_0 : i32, i32
  }
  func.func @transform_5(%arg0: i32) -> (i32, i32, i32, i32) {
    %c0_i32 = arith.constant 0 : i32
    %c0_i32_0 = arith.constant 0 : i32
    %c0_i32_1 = arith.constant 0 : i32
    %c0_i32_2 = arith.constant 0 : i32
    return %arg0, %c0_i32, %c0_i32_0, %c0_i32_1 : i32, i32, i32, i32
  }
}

</mosaic_0001>

<bundles_post_ra>
// kernel: tpu_custom_call.1
= control target key start
LH: loop header
LB: loop body
LE: loop exit
PB: predicated region body
PF: predicated region fallthrough
CT: control target
= control target key end

     0   :  { %10 = vsyncpa [#allocation5], 0  ;;  %s14873_s0 = inlined_call_operand.hbm [shape: f32[2,16,16,8], index: 0, kind: input, shape index: {}]   ;;  %s14874_s1 = inlined_call_operand.hbm [shape: bf16[3,32,72], index: 1, kind: input, shape index: {}]   ;;  %s14875_s2 = inlined_call_operand.hbm [shape: f32[3,1,8], index: 2, kind: input, shape index: {}]   ;;  %s14876_s3 = inlined_call_operand.hbm [shape: bf16[32,8], index: 3, kind: input, shape index: {}]   ;;  %s14877_s4 = inlined_call_operand.hbm [shape: f32[1,8], index: 4, kind: input, shape index: {}]   ;;  %s14878_s5 = inlined_call_operand.hbm [shape: f32[2,16,16,8], index: 5, kind: output, shape index: {}]  }
   0x1   :  { %12 = vsyncpa [#allocation5 + $0x1], 0 }
   0x2   :  { %13 = vsyncpa [#allocation8], 0 }
   0x3   :  { %14 = vsyncpa [#allocation11], 0 }
   0x4   :  { %15 = vsyncpa [#allocation6], 0 }
   0x5   :  { %17 = vsyncpa [#allocation6 + $0x1], 0  ;;  %s10170_s18 = smov 0   ;;  %s10172_s19 = smov 0  }
   0x6   :  { %s10174_s20 = smov 0   ;;  %s10176_s21 = smov 0  }
   0x7 LB: > { %s10191_s22 = sadd.s32 4294967295, %s10113_s21   ;;  %s9096_s23 = sadd.s32 4294967294, %s10113_s21   ;;  %s10113_s21 = sphi %s10176_s21, %s15754_s21   ;;  %s10109_s20 = sphi %s10174_s20, %s15753_s20   ;;  %s10105_s19 = sphi %s10172_s19, %s15752_s19   ;;  %s10101_s18 = sphi %s10170_s18, %s15751_s18  }
   0x8   : > { %p43_p0 = scmp.ne.s32.totalorder %s10105_s19, %s10101_s18  ;;  %p14879_p1 = scmp.eq.s32.totalorder %s10191_s22, 0 }
   0x9   : > { %p157_p3 = scmp.eq.s32.totalorder %s9096_s23, 1  ;;  %p9097_p5 = scmp.ge.s32.totalorder %s10113_s21, 1 }
   0xa   : > { %p10200_p4 = por %p14879_p1, %p43_p0  ;;  %p164_p7 = scmp.lt.s32.totalorder %s10113_s21, 3 }
   0xb   : > { %p10205_p6 = por %p157_p3, %p43_p0  ;;  %s10115_s27 = smov [#allocation7]  }
   0xc   : > { %s14911_s24 = scalar_select %p10200_p4, 1, 0 }
   0xd   : > { %s14912_s25 = scalar_select %p10205_p6, 1, 0 }
   0xe   : > { %p10210_p8 = pnand %p9097_p5, %p164_p7  ;;  %s176_s28 = sshll.u32 %s10115_s27, 4  ;;  %s10214_s28 = int_to_ptr.vmem [resolvable:$true] %s176_s28 }
   0xf   : > { %s10116_s30 = smov [#allocation10]   ;;  %s10117_s7 = smov [#allocation9]  }
  0x10   : > { %s14913_s26 = scalar_select %p10210_p8, 1, 0 }
  0x11   : > { %p9745_p9 = pneg %p10210_p8  ;;  %s202_s6 = sshll.u32 %s10116_s30, 4  ;;  %s10225_s6 = int_to_ptr.vmem [resolvable:$true] %s202_s6 }
  0x12   : > { %s10227_s8 = sshll.u32 %s10117_s7, 4  ;;  %s9897_s11 = scalar_lea.hbm %s14874_s1, 768  ;;  %s190_s8 = int_to_ptr.vmem [resolvable:$true] %s10227_s8 }
  0x13   : > { %p10221_p11 = pnand %p9745_p9, %p14879_p1  ;;  %p9898_p12 = scmp.ne.s32.totalorder %s14874_s1, %s9897_s11 }
  0x14   : > { %p9904_p5 = scmp.lt.u32.totalorder %s9897_s11, %s14874_s1 }
  0x15   : > { %p10237_p13 = pneg %p10221_p11 }
  0x17   : > { %p9900_p0 = pnand %p10237_p13, %p9898_p12 }
  0x19   : > { %p9901_p3 = pneg %p9900_p0 }
  0x1b   : > { %p9906_p7 = pnand %p9904_p5, %p9901_p3 }
  0x1d   : > { %9909 = shalt.err (!%p9906_p7)
}
  0x1e   : > { %s9910_s17 = scalar_lea.vmem %s10214_s28, 768  ;;  %p9918_p2 = scmp.lt.s32.totalorder %s10214_s28, %s10214_s28 }
  0x1f   : > { %p9911_p9 = scmp.ne.s32.totalorder %s10214_s28, %s9910_s17  ;;  %p9919_p6 = scmp.lt.s32.totalorder %s9910_s17, %s9910_s17 }
  0x21   : > { %p9913_p10 = pnand %p9911_p9, %p10237_p13  ;;  %p9920_p12 = por %p9919_p6, %p9918_p2 }
  0x23   : > { %p9914_p1 = pneg %p9913_p10 }
  0x25   : > { %p9921_p0 = pnand %p9920_p12, %p9914_p1 }
  0x27   : > { %9924 = shalt.err (!%p9921_p0)
}
  0x28   : > { %s10118_s23 = smov 64   ;;  %s10119_s27 = smov 4  }
  0x29   : > { %9748 = dma.hbm_to_vmem [thread:$0]  (!%p10221_p11), %s14874_s1, 768, %s10214_s28, [#allocation8], %s10118_s23, %s10118_s23, %s10119_s27  }
  0x2a   : > { %s9925_s11 = scalar_lea.hbm %s14876_s3, 256 }
  0x2b   : > { %p9926_p2 = scmp.ne.s32.totalorder %s14876_s3, %s9925_s11  ;;  %p9932_p10 = scmp.lt.u32.totalorder %s9925_s11, %s14876_s3 }
  0x2d   : > { %p9928_p1 = pnand %p9926_p2, %p10237_p13 }
  0x2f   : > { %p9929_p6 = pneg %p9928_p1 }
  0x31   : > { %p9934_p3 = pnand %p9932_p10, %p9929_p6 }
  0x33   : > { %9937 = shalt.err (!%p9934_p3)
}
  0x34   : > { %s9938_s28 = scalar_lea.vmem %s10225_s6, 256  ;;  %p9946_p12 = scmp.lt.s32.totalorder %s10225_s6, %s10225_s6 }
  0x35   : > { %p9939_p5 = scmp.ne.s32.totalorder %s10225_s6, %s9938_s28  ;;  %p9947_p0 = scmp.lt.s32.totalorder %s9938_s28, %s9938_s28 }
  0x37   : > { %p9941_p7 = pnand %p9939_p5, %p10237_p13  ;;  %p9948_p2 = por %p9947_p0, %p9946_p12 }
  0x39   : > { %p9942_p9 = pneg %p9941_p7 }
  0x3b   : > { %p9949_p1 = pnand %p9948_p2, %p9942_p9 }
  0x3d   : > { %9952 = shalt.err (!%p9949_p1)
}
  0x3e   : > { %9754 = dma.hbm_to_vmem [thread:$0]  (!%p10221_p11), %s14876_s3, 256, %s10225_s6, [#allocation11], %s10118_s23, %s10118_s23, %s10119_s27  }
  0x3f   : > { %s9953_s10 = scalar_lea.hbm %s14875_s2, 48 }
  0x40   : > { %p9954_p6 = scmp.ne.s32.totalorder %s14875_s2, %s9953_s10  ;;  %p9960_p5 = scmp.lt.u32.totalorder %s9953_s10, %s14875_s2 }
  0x42   : > { %p9956_p10 = pnand %p9954_p6, %p10237_p13 }
  0x44   : > { %p9957_p3 = pneg %p9956_p10 }
  0x46   : > { %p9962_p7 = pnand %p9960_p5, %p9957_p3 }
  0x48   : > { %9965 = shalt.err (!%p9962_p7)
}
  0x49   : > { %s9966_s16 = scalar_lea.vmem %s190_s8, 48  ;;  %s9973_s6 = scalar_lea.vmem %s190_s8, 64 }
  0x4a   : > { %p9967_p9 = scmp.ne.s32.totalorder %s190_s8, %s9966_s16  ;;  %p9974_p2 = scmp.lt.s32.totalorder %s190_s8, %s190_s8 }
  0x4b   : > { %p9975_p1 = scmp.lt.s32.totalorder %s9973_s6, %s9966_s16 }
  0x4c   : > { %p9969_p12 = pnand %p9967_p9, %p10237_p13 }
  0x4d   : > { %p9976_p4 = por %p9975_p1, %p9974_p2 }
  0x4e   : > { %p9970_p0 = pneg %p9969_p12 }
  0x50   : > { %p9977_p8 = pnand %p9976_p4, %p9970_p0 }
  0x52   : > { %9980 = shalt.err (!%p9977_p8)
}
  0x53   : > { %s10120_s23 = smov 16   ;;  %s10121_s27 = smov 1  }
  0x54   : > { %9751 = dma.hbm_to_vmem [thread:$0]  (!%p10221_p11), %s14875_s2, 48, %s190_s8, [#allocation8], %s10120_s23, %s10120_s23, %s10121_s27  }
  0x55   : > { %s10122_s30 = smov [#allocation12]   ;;  %s9981_s11 = scalar_lea.hbm %s14877_s4, 16 }
  0x56   : > { %s216_s7 = sshll.u32 %s10122_s30, 4  ;;  %p9982_p4 = scmp.ne.s32.totalorder %s14877_s4, %s9981_s11  ;;  %s217_s7 = int_to_ptr.vmem [resolvable:$true] %s216_s7 }
  0x57   : > { %p9988_p10 = scmp.lt.u32.totalorder %s9981_s11, %s14877_s4 }
  0x58   : > { %p9984_p8 = pnand %p9982_p4, %p10237_p13 }
  0x5a   : > { %p9985_p6 = pneg %p9984_p8 }
  0x5c   : > { %p9990_p3 = pnand %p9988_p10, %p9985_p6 }
  0x5e   : > { %9993 = shalt.err (!%p9990_p3)
}
  0x5f   : > { %s9994_s8 = scalar_lea.vmem %s217_s7, 16  ;;  %s10001_s6 = scalar_lea.vmem %s217_s7, 32 }
  0x60   : > { %p9995_p5 = scmp.ne.s32.totalorder %s217_s7, %s9994_s8  ;;  %p10002_p12 = scmp.lt.s32.totalorder %s217_s7, %s217_s7 }
  0x61   : > { %p10003_p0 = scmp.lt.s32.totalorder %s10001_s6, %s9994_s8 }
  0x62   : > { %p9997_p7 = pnand %p9995_p5, %p10237_p13 }
  0x63   : > { %p10004_p2 = por %p10003_p0, %p10002_p12 }
  0x64   : > { %p9998_p9 = pneg %p9997_p7 }
  0x66   : > { %p10005_p1 = pnand %p10004_p2, %p9998_p9 }
  0x68   : > { %10008 = shalt.err (!%p10005_p1)
}
  0x69   : > { %9757 = dma.hbm_to_vmem [thread:$0]  (!%p10221_p11), %s14877_s4, 16, %s217_s7, [#allocation11]  }
  0x6a   : > { %s10319_s14 = sadd.s32 1, %s10113_s21   ;;  %s30_s28 = sadd.s32 1, %s10109_s20 }
  0x6b   : > { %s27_s29 = ssub.s32 %s10113_s21, %s10319_s14  ;;  %p37_p13 = scmp.ne.s32.totalorder %s10109_s20, %s10105_s19 }
  0x6c   : > { %p28_p4 = scmp.eq.s32.totalorder %s27_s29, 0  ;;  %p38_p8 = scmp.eq.s32.totalorder %s10113_s21, 0 }
  0x6d   : > { %p14916_p6 = scmp.eq.s32.totalorder %s10191_s22, 1  ;;  %p9770_p3 = scmp.lt.s32.totalorder %s10113_s21, 2 }
  0x6e   : > { %s10335_s30 = scalar_select %p28_p4, %s10109_s20, %s30_s28  }
  0x6f   : > { %p10329_p10 = por %p14916_p6, %p37_p13  ;;  %p39_p5 = por %p38_p8, %p37_p13 }
  0x70   : > { %s227_s9 = sand.u32 1, %s10109_s20   ;;  %s9271_s7 = sshll.u32 %s10113_s21, 12 }
  0x71   : > { %s9103_s10 = sshll.u32 %s227_s9, 8  ;;  %s10342_s13 = scalar_lea.hbm %s14873_s0, %s9271_s7 }
  0x72   : > { %s231_s15 = scalar_lea.vmem [#allocation4], %s9103_s10  ;;  %p10346_p11 = pnand %p9770_p3, %p39_p5 }
  0x73   : > { %s238_s16 = sshll.u32 %s231_s15, 4  ;;  %s10350_s6 = scalar_lea.sflag [#allocation5], %s227_s9  ;;  %s10344_s16 = int_to_ptr.vmem [resolvable:$true] %s238_s16 }
  0x74   : > { %s10009_s23 = scalar_lea.hbm %s10342_s13, 4096  ;;  %p10011_p9 = pneg %p10346_p11 }
  0x75   : > { %p10010_p7 = scmp.ne.s32.totalorder %s10342_s13, %s10009_s23  ;;  %s10014_s29 = scalar_lea.hbm %s14873_s0, 8192 }
  0x76   : > { %p10015_p2 = scmp.lt.u32.totalorder %s10342_s13, %s14873_s0  ;;  %p10016_p1 = scmp.lt.u32.totalorder %s10014_s29, %s10009_s23 }
  0x77   : > { %p10012_p12 = pnand %p10011_p9, %p10010_p7  ;;  %p10018_p4 = scmp.lt.u32.totalorder %s10009_s23, %s10342_s13 }
  0x78   : > { %p10017_p13 = por %p10016_p1, %p10015_p2 }
  0x79   : > { %p10013_p0 = pneg %p10012_p12 }
  0x7a   : > { %p10019_p8 = por %p10018_p4, %p10017_p13 }
  0x7c   : > { %p10020_p6 = pnand %p10019_p8, %p10013_p0 }
  0x7e   : > { %10023 = shalt.err (!%p10020_p6)
}
  0x7f   : > { %s10024_s9 = scalar_lea.vmem %s10344_s16, 4096  ;;  %s10123_s11 = smov [#allocation4]  }
  0x80   : > { %p10025_p3 = scmp.ne.s32.totalorder %s10344_s16, %s10024_s9  ;;  %s10029_s12 = sshll.u32 %s10123_s11, 4  ;;  %s10030_s12 = int_to_ptr.vmem [resolvable:$false] %s10029_s12 }
  0x81   : > { %s10031_s15 = scalar_lea.vmem %s10030_s12, 8192  ;;  %p10032_p12 = scmp.lt.s32.totalorder %s10344_s16, %s10030_s12 }
  0x82   : > { %p10027_p5 = pnand %p10025_p3, %p10011_p9  ;;  %p10033_p2 = scmp.lt.s32.totalorder %s10031_s15, %s10024_s9 }
  0x84   : > { %p10028_p7 = pneg %p10027_p5  ;;  %p10034_p1 = por %p10033_p2, %p10032_p12 }
  0x86   : > { %p10035_p13 = pnand %p10034_p1, %p10028_p7 }
  0x88   : > { %10038 = shalt.err (!%p10035_p13)
}
  0x89   : > { %s10124_s23 = smov 128   ;;  %s10125_s27 = smov 8  }
  0x8a   : > { %9761 = dma.hbm_to_vmem [thread:$0]  (!%p10346_p11), %s10342_s13, 4096, %s10344_s16, %s10350_s6, %s10124_s23, %s10124_s23, %s10125_s27  }
  0x8b   : > { %p14919_p9 = scmp.ne.s32.totalorder %s14913_s26, 0 }
  0x8d   : > { %250 = sbr.rel (%p14919_p9) target bundleno = 3164 (0xc5c), region = 40 }
  0x94   : > { %s10381_s28 = sand.u32 1, %s10105_s19   ;;  %p14920_p0 = scmp.ne.s32.totalorder %s14911_s24, 0 }
  0x95   : > { %s9107_s29 = sshll.u32 %s10381_s28, 8  ;;  %s253_s10 = scalar_lea.sflag [#allocation5], %s10381_s28 }
  0x96   : > { %s10387_s7 = scalar_lea.vmem [#allocation4], %s9107_s29 }
  0x97   : > { %10084 = dma.done.wait (%p14920_p0), %s253_s10, 4096  }
  0x98   : > { %10086 = vsyncadd (%p14920_p0), %s253_s10, 4294963200  ;;  %p14921_p11 = scmp.eq.s32.totalorder %s10191_s22, 0 }
  0x9a   : > { %10088 = dma.done.wait (%p14921_p11), [#allocation8], 816   ;;  %p14922_p4 = pmov %p14921_p11 }
  0x9c   : > { %10090 = vsyncadd (%p14922_p4), [#allocation8], 4294966480  ;;  %p14923_p8 = pmov %p14922_p4 }
  0x9d   : > { %p14924_p6 = pmov %p14922_p4 }
  0x9e   : > { %10092 = dma.done.wait (%p14923_p8), [#allocation11], 272  }
  0x9f   : > { %10094 = vsyncadd (%p14924_p6), [#allocation11], 4294967024  ;;  %vm300_vm0 = vcmask 261120   ;;  %v10126_v0 = vmov 0   ;;  %vm306_vm1 = vcmask 253952   ;;  %vm859_vm4 = vcmask 1043456  }
  0xa0   : > { %301 = vst.msk [vmem:[#allocation2] sm:$0xff] %vm300_vm0, %v10126_v0  ;;  %302 = vst.msk [vmem:[#allocation2 + $0x8] sm:$0xff] %vm300_vm0, %v10126_v0  ;;  %vm307_vm2 = vsmask.f32 256  ;;  %vm364_vm3 = vsmask.f32 7938 }
  0xa1   : > { %304 = vst.msk [vmem:[#allocation2 + $0x110] sm:$0xff] %vm300_vm0, %v10126_v0  ;;  %305 = vst.msk [vmem:[#allocation2 + $0x118] sm:$0xff] %vm300_vm0, %v10126_v0  ;;  %vm613_vm6 = vcmask 64512   ;;  %v749_v3 = vld [vmem:[#allocation7] sm:$0xf]  ;;  %vm618_vm8 = vcmask 57344  }
  0xa2   : > { %vm10406_vm5 = vmand %vm306_vm1, %vm307_vm2  ;;  %v312_v4 = vld [vmem:[#allocation2 + $0x10] sm:$0x1]  ;;  %v420_v5 = vld [vmem:[%s10387_s7] sm:$0xff]  ;;  %9723 = vmatprep.subr.msk.bf16.mxu0 %vm859_vm4, %v749_v3  ;;  %v861_v6 = vsel %vm859_vm4, %v749_v3, 0  ;;  %vm1184_vm11 = vcmask 588800   ;;  %s10127_s24 = smov 112  }
  0xa3   : > { %vm10412_vm7 = vmand %vm300_vm0, %vm364_vm3  ;;  %v313_v9 = vsel %vm10406_vm5, 0, %v312_v4  ;;  %v421_v10 = vld [vmem:[%s10387_s7 + $0x8] sm:$0xff]  ;;  %9424 = vmatpush3.bf16.msra.mxu0 %v861_v6  ;;  %v369_v14 = vld [vmem:[#allocation2 + $0x18] sm:$0xff]  ;;  %s10128_s26 = smov 120   ;;  %s10129_s13 = smov 104   ;;  %vm3267_vm12 = vcmask 130048  }
  0xa4   : > { %314 = vst [vmem:[#allocation2 + $0x10] sm:$0x1] %v313_v9  ;;  %v452_v13 = vpack.c.bf16 %v421_v10, %v420_v5  ;;  %v315_v15 = vld [vmem:[#allocation2 + $0x20] sm:$0x1]  ;;  %v422_v16 = vld [vmem:[%s10387_s7 + $0x10] sm:$0xff]  ;;  %v370_v17 = vsel %vm10412_vm7, 0, %v369_v14  ;;  %vm10450_vm9 = vmand %vm613_vm6, %vm364_vm3 }
  0xa5   : > { %v316_v18 = vsel %vm10406_vm5, 0, %v315_v15  ;;  %v423_v19 = vld [vmem:[%s10387_s7 + $0x18] sm:$0xff]  ;;  %v372_v20 = vld [vmem:[#allocation2 + $0x28] sm:$0xff]  ;;  %v318_v21 = vld [vmem:[#allocation2 + $0x30] sm:$0x1]  ;;  %371 = vst [vmem:[#allocation2 + $0x18] sm:$0xff] %v370_v17 }
  0xa6   : > { %v469_v22 = vshrl.u32 %v452_v13, 16  ;;  %v472_v23 = vshll.u32 %v452_v13, 16  ;;  %317 = vst [vmem:[#allocation2 + $0x20] sm:$0x1] %v316_v18  ;;  %v453_v24 = vpack.c.bf16 %v423_v19, %v422_v16  ;;  %v373_v25 = vsel %vm10412_vm7, 0, %v372_v20  ;;  %v424_v26 = vld [vmem:[%s10387_s7 + $0x20] sm:$0xff]  ;;  %vm10462_vm10 = vmand %vm618_vm8, %vm307_vm2 }
  0xa7   : > { %v309_v7 = vld [vmem:[#allocation2] sm:$0x1]  ;;  %v366_v8 = vld [vmem:[#allocation2 + $0x8] sm:$0xff]  ;;  %v375_v28 = vld [vmem:[#allocation2 + $0x38] sm:$0xff]  ;;  %374 = vst [vmem:[#allocation2 + $0x28] sm:$0xff] %v373_v25  ;;  %v319_v29 = vsel %vm10406_vm5, 0, %v318_v21 }
  0xa8   : > { %v310_v11 = vsel %vm10406_vm5, 0, %v309_v7  ;;  %v10426_v12 = vsel %vm10412_vm7, 0, %v366_v8  ;;  %v425_v27 = vld [vmem:[%s10387_s7 + $0x28] sm:$0xff]  ;;  %v376_v31 = vsel %vm10412_vm7, 0, %v375_v28  ;;  %v321_v32 = vld [vmem:[#allocation2 + $0x40] sm:$0x1] }
  0xa9   : > { %311 = vst [vmem:[#allocation2] sm:$0x1] %v310_v11  ;;  %368 = vst [vmem:[#allocation2 + $0x8] sm:$0xff] %v10426_v12  ;;  %v454_v30 = vpack.c.bf16 %v425_v27, %v424_v26  ;;  %v426_v33 = vld [vmem:[%s10387_s7 + $0x30] sm:$0xff]  ;;  %v427_v34 = vld [vmem:[%s10387_s7 + $0x38] sm:$0xff]  ;;  %v471_v35 = vrot.slane %v469_v22, 7 }
  0xaa   : > { %v476_v36 = vshrl.u32 %v453_v24, 16  ;;  %v479_v37 = vshll.u32 %v453_v24, 16  ;;  %320 = vst [vmem:[#allocation2 + $0x30] sm:$0x1] %v319_v29  ;;  %377 = vst [vmem:[#allocation2 + $0x38] sm:$0xff] %v376_v31  ;;  %v322_v38 = vsel %vm10406_vm5, 0, %v321_v32  ;;  %v455_v44 = vpack.c.bf16 %v427_v34, %v426_v33 }
  0xab   : > { %v378_v39 = vld [vmem:[#allocation2 + $0x48] sm:$0xff]  ;;  %v428_v40 = vld [vmem:[%s10387_s7 + $0x40] sm:$0xff]  ;;  %v483_v42 = vshrl.u32 %v454_v30, 16  ;;  %v486_v43 = vshll.u32 %v454_v30, 16  ;;  %323 = vst [vmem:[#allocation2 + $0x40] sm:$0x1] %v322_v38  ;;  %v474_v48 = vor.u32 %v472_v23, %v471_v35 }
  0xac   : > { %v379_v45 = vsel %vm10412_vm7, 0, %v378_v39  ;;  %v324_v46 = vld [vmem:[#allocation2 + $0x50] sm:$0x1]  ;;  %v429_v47 = vld [vmem:[%s10387_s7 + $0x48] sm:$0xff]  ;;  %v478_v49 = vrot.slane %v476_v36, 7  ;;  %v381_v52 = vld [vmem:[#allocation2 + $0x58] sm:$0xff] }
  0xad   : > { %380 = vst [vmem:[#allocation2 + $0x48] sm:$0xff] %v379_v45  ;;  %v325_v50 = vsel %vm10406_vm5, 0, %v324_v46  ;;  %v456_v51 = vpack.c.bf16 %v429_v47, %v428_v40  ;;  %v327_v53 = vld [vmem:[#allocation2 + $0x60] sm:$0x1]  ;;  %v430_v54 = vld [vmem:[%s10387_s7 + $0x50] sm:$0xff]  ;;  %v485_v57 = vrot.slane %v483_v42, 7 }
  0xae   : > { %v615_v55 = vld [vmem:[#allocation2 + $0x10] sm:$0xff]  ;;  %v490_v58 = vshrl.u32 %v455_v44, 16  ;;  %v493_v59 = vshll.u32 %v455_v44, 16  ;;  %326 = vst [vmem:[#allocation2 + $0x50] sm:$0x1] %v325_v50  ;;  %v382_v60 = vsel %vm10412_vm7, 0, %v381_v52  ;;  %v481_v0 = vor.u32 %v479_v37, %v478_v49 }
  0xaf   : > { %v431_v61 = vld [vmem:[%s10387_s7 + $0x58] sm:$0xff]  ;;  %v616_v63 = vsel %vm10450_vm9, %v474_v48, %v615_v55  ;;  %v497_v3 = vshrl.u32 %v456_v51, 16  ;;  %v500_v4 = vshll.u32 %v456_v51, 16  ;;  %383 = vst [vmem:[#allocation2 + $0x58] sm:$0xff] %v382_v60  ;;  %v384_v5 = vld [vmem:[#allocation2 + $0x68] sm:$0xff]  ;;  %v623_v8 = vld [vmem:[#allocation2 + $0x20] sm:$0xff]  ;;  %v488_v9 = vor.u32 %v486_v43, %v485_v57 }
  0xb0   : > { %v713_v62 = vld [vmem:[#allocation2] sm:$0xff]  ;;  %v330_v6 = vld [vmem:[#allocation2 + $0x70] sm:$0x1]  ;;  %617 = vst [vmem:[#allocation2 + $0x10] sm:$0xff] %v616_v63  ;;  %v620_v7 = vld [vmem:[#allocation2 + $0x18] sm:$0x1]  ;;  %v457_v13 = vpack.c.bf16 %v431_v61, %v430_v54  ;;  %v10481_v16 = vsel %vm10450_vm9, %v481_v0, %v623_v8 }
  0xb1   : > { %9425 = vmatprep.mubr.msk.bf16.mxu0 %vm613_vm6, %v713_v62  ;;  %v492_v10 = vrot.slane %v490_v58, 7  ;;  %v328_v11 = vsel %vm10406_vm5, 0, %v327_v53  ;;  %v432_v14 = vld [vmem:[%s10387_s7 + $0x60] sm:$0xff]  ;;  %v621_v15 = vsel %vm10462_vm10, %v471_v35, %v620_v7  ;;  %v626_v17 = vld [vmem:[#allocation2 + $0x28] sm:$0x1]  ;;  %v499_v18 = vrot.slane %v497_v3, 7 }
  0xb2   : > { %9426 = vmatmul.mubr.msk.bf16.vlgmr.msra.gmra.mrb[0].mxu0 %vm613_vm6, %v10426_v12  ;;  %329 = vst [vmem:[#allocation2 + $0x60] sm:$0x1] %v328_v11  ;;  %v385_v19 = vsel %vm10412_vm7, 0, %v384_v5  ;;  %v433_v20 = vld [vmem:[%s10387_s7 + $0x68] sm:$0xff]  ;;  %v387_v21 = vld [vmem:[#allocation2 + $0x78] sm:$0xff]  ;;  %625 = vst [vmem:[#allocation2 + $0x20] sm:$0xff] %v10481_v16  ;;  %v627_v12 = vsel %vm10462_vm10, %v478_v49, %v626_v17 }
  0xb3   : > { %9429 = vmatprep.mubr.msk.bf16.mxu0 %vm613_vm6, %v616_v63  ;;  %622 = vst [vmem:[#allocation2 + $0x18] sm:$0x1] %v621_v15  ;;  %v629_v22 = vld [vmem:[#allocation2 + $0x30] sm:$0xff]  ;;  %v632_v23 = vld [vmem:[#allocation2 + $0x38] sm:$0x1]  ;;  %v495_v24 = vor.u32 %v493_v59, %v492_v10  ;;  %v504_v25 = vshrl.u32 %v457_v13, 16  ;;  %v502_v31 = vor.u32 %v500_v4, %v499_v18  ;;  %v458_v38 = vpack.c.bf16 %v433_v20, %v432_v14 }
  0xb4   : > { %v507_v26 = vshll.u32 %v457_v13, 16  ;;  %386 = vst [vmem:[#allocation2 + $0x68] sm:$0xff] %v385_v19  ;;  %v434_v27 = vld [vmem:[%s10387_s7 + $0x70] sm:$0xff]  ;;  %628 = vst [vmem:[#allocation2 + $0x28] sm:$0x1] %v627_v12  ;;  %v10493_v28 = vsel %vm10450_vm9, %v488_v9, %v629_v22  ;;  %v633_v29 = vsel %vm10462_vm10, %v485_v57, %v632_v23  ;;  %v635_v30 = vld [vmem:[#allocation2 + $0x40] sm:$0xff] }
  0xb5   : > { %v331_v32 = vsel %vm10406_vm5, 0, %v330_v6  ;;  %v333_v33 = vld [vmem:[#allocation2 + $0x80] sm:$0x1]  ;;  %v435_v34 = vld [vmem:[%s10387_s7 + $0x78] sm:$0xff]  ;;  %631 = vst [vmem:[#allocation2 + $0x30] sm:$0xff] %v10493_v28  ;;  %v10503_v35 = vsel %vm10450_vm9, %v495_v24, %v635_v30  ;;  %v506_v37 = vrot.slane %v504_v25, 7 }
  0xb6   : > { %634 = vst [vmem:[#allocation2 + $0x38] sm:$0x1] %v633_v29  ;;  %v638_v36 = vld [vmem:[#allocation2 + $0x48] sm:$0x1]  ;;  %332 = vst [vmem:[#allocation2 + $0x70] sm:$0x1] %v331_v32  ;;  %v459_v46 = vpack.c.bf16 %v435_v34, %v434_v27 }
  0xb7   : > { %v388_v39 = vsel %vm10412_vm7, 0, %v387_v21  ;;  %v390_v40 = vld [vmem:[#allocation2 + $0x88] sm:$0xff]  ;;  %v436_v42 = vld [vmem:[%s10387_s7 + $0x80] sm:$0xff]  ;;  %637 = vst [vmem:[#allocation2 + $0x40] sm:$0xff] %v10503_v35  ;;  %v639_v43 = vsel %vm10462_vm10, %v492_v10, %v638_v36  ;;  %v641_v44 = vld [vmem:[#allocation2 + $0x50] sm:$0xff]  ;;  %v334_v45 = vsel %vm10406_vm5, 0, %v333_v33  ;;  %v509_v52 = vor.u32 %v507_v26, %v506_v37 }
  0xb8   : > { %389 = vst [vmem:[#allocation2 + $0x78] sm:$0xff] %v388_v39  ;;  %v391_v47 = vsel %vm10412_vm7, 0, %v390_v40  ;;  %v336_v48 = vld [vmem:[#allocation2 + $0x90] sm:$0x1]  ;;  %v437_v49 = vld [vmem:[%s10387_s7 + $0x88] sm:$0xff]  ;;  %v642_v50 = vsel %vm10450_vm9, %v502_v31, %v641_v44  ;;  %v511_v53 = vshrl.u32 %v458_v38, 16 }
  0xb9   : > { %640 = vst [vmem:[#allocation2 + $0x48] sm:$0x1] %v639_v43  ;;  %v644_v51 = vld [vmem:[#allocation2 + $0x58] sm:$0x1]  ;;  %v514_v54 = vshll.u32 %v458_v38, 16  ;;  %392 = vst [vmem:[#allocation2 + $0x88] sm:$0xff] %v391_v47  ;;  %v460_v63 = vpack.c.bf16 %v437_v49, %v436_v42 }
  0xba   : > { %335 = vst [vmem:[#allocation2 + $0x80] sm:$0x1] %v334_v45  ;;  %v393_v55 = vld [vmem:[#allocation2 + $0x98] sm:$0xff]  ;;  %643 = vst [vmem:[#allocation2 + $0x50] sm:$0xff] %v642_v50  ;;  %v645_v57 = vsel %vm10462_vm10, %v499_v18, %v644_v51  ;;  %v518_v58 = vshrl.u32 %v459_v46, 16  ;;  %v521_v59 = vshll.u32 %v459_v46, 16 }
  0xbb   : > { %v337_v60 = vsel %vm10406_vm5, 0, %v336_v48  ;;  %646 = vst [vmem:[#allocation2 + $0x58] sm:$0x1] %v645_v57  ;;  %v647_v61 = vld [vmem:[#allocation2 + $0x60] sm:$0xff]  ;;  %v513_v62 = vrot.slane %v511_v53, 7  ;;  %v394_v0 = vsel %vm10412_vm7, 0, %v393_v55 }
  0xbc   : > { %338 = vst [vmem:[#allocation2 + $0x90] sm:$0x1] %v337_v60  ;;  %v716_v3 = vld [vmem:[#allocation2 + $0x18] sm:$0xff]  ;;  %v648_v4 = vsel %vm10450_vm9, %v509_v52, %v647_v61  ;;  %v650_v5 = vld [vmem:[#allocation2 + $0x68] sm:$0x1]  ;;  %v520_v6 = vrot.slane %v518_v58, 7 }
  0xbd   : > { %395 = vst [vmem:[#allocation2 + $0x98] sm:$0xff] %v394_v0  ;;  %9430 = vmatmul.mubr.msk.bf16.gmra.mrb[4].mxu0 %vm613_vm6, %v716_v3  ;;  %649 = vst [vmem:[#allocation2 + $0x60] sm:$0xff] %v648_v4  ;;  %v651_v7 = vsel %vm10462_vm10, %v506_v37, %v650_v5  ;;  %v516_v8 = vor.u32 %v514_v54, %v513_v62  ;;  %v525_v9 = vshrl.u32 %v460_v63, 16  ;;  %v528_v10 = vshll.u32 %v460_v63, 16  ;;  %v653_v11 = vld [vmem:[#allocation2 + $0x70] sm:$0xff]  ;;  %v718_v22 = vld [vmem:[#allocation2 + $0x28] sm:$0xff] }
  0xbe   : > { %9433 = vmatprep.mubr.msk.bf16.mxu0 %vm613_vm6, %v10481_v16  ;;  %652 = vst [vmem:[#allocation2 + $0x68] sm:$0x1] %v651_v7  ;;  %v523_v13 = vor.u32 %v521_v59, %v520_v6  ;;  %v720_v27 = vld [vmem:[#allocation2 + $0x38] sm:$0xff]  ;;  %v396_v34 = vld [vmem:[#allocation2 + $0xa8] sm:$0xff]  ;;  %v438_v36 = vld [vmem:[%s10387_s7 + $0x90] sm:$0xff]  ;;  %s10130_s16 = smov 96  }
  0xbf   : > { %v654_v14 = vsel %vm10450_vm9, %v516_v8, %v653_v11  ;;  %v656_v15 = vld [vmem:[#allocation2 + $0x78] sm:$0x1]  ;;  %v527_v17 = vrot.slane %v525_v9, 7  ;;  %v339_v40 = vld [vmem:[#allocation2 + $0xa0] sm:$0x1]  ;;  %v441_v54 = vld [vmem:[%s10387_s7 + $0xa8] sm:$0xff] }
  0xc0   : > { %655 = vst [vmem:[#allocation2 + $0x70] sm:$0xff] %v654_v14  ;;  %v657_v18 = vsel %vm10462_vm10, %v513_v62, %v656_v15  ;;  %v662_v20 = vld [vmem:[#allocation2 + $0x88] sm:$0x1]  ;;  %v439_v37 = vld [vmem:[%s10387_s7 + $0x98] sm:$0xff]  ;;  %v340_v42 = vsel %vm10406_vm5, 0, %v339_v40  ;;  %v440_v53 = vld [vmem:[%s10387_s7 + $0xa0] sm:$0xff] }
  0xc1   : > { %v659_v19 = vld [vmem:[#allocation2 + $0x80] sm:$0xff]  ;;  %658 = vst [vmem:[#allocation2 + $0x78] sm:$0x1] %v657_v18  ;;  %v663_v16 = vsel %vm10462_vm10, %v520_v6, %v662_v20  ;;  %v530_v12 = vor.u32 %v528_v10, %v527_v17  ;;  %v722_v29 = vld [vmem:[#allocation2 + $0x48] sm:$0xff]  ;;  %v461_v38 = vpack.c.bf16 %v439_v37, %v438_v36  ;;  %341 = vst [vmem:[#allocation2 + $0xa0] sm:$0x1] %v340_v42 }
  0xc2   : > { %v660_v21 = vsel %vm10450_vm9, %v523_v13, %v659_v19  ;;  %664 = vst [vmem:[#allocation2 + $0x88] sm:$0x1] %v663_v16  ;;  %v724_v30 = vld [vmem:[#allocation2 + $0x58] sm:$0xff]  ;;  %v462_v55 = vpack.c.bf16 %v441_v54, %v440_v53  ;;  %v342_v58 = vld [vmem:[#allocation2 + $0xb0] sm:$0x1]  ;;  %v402_v6 = vld [vmem:[#allocation2 + $0xc8] sm:$0xff] }
  0xc3   : > { %661 = vst [vmem:[#allocation2 + $0x80] sm:$0xff] %v660_v21  ;;  %v665_v23 = vld [vmem:[#allocation2 + $0x90] sm:$0xff]  ;;  %v532_v39 = vshrl.u32 %v461_v38, 16  ;;  %v535_v46 = vshll.u32 %v461_v38, 16  ;;  %v399_v51 = vld [vmem:[#allocation2 + $0xb8] sm:$0xff]  ;;  %v343_v59 = vsel %vm10406_vm5, 0, %v342_v58 }
  0xc4   : > { %v666_v24 = vsel %vm10450_vm9, %v530_v12, %v665_v23  ;;  %v668_v25 = vld [vmem:[#allocation2 + $0x98] sm:$0x1]  ;;  %v400_v52 = vsel %vm10412_vm7, 0, %v399_v51  ;;  %v539_v57 = vshrl.u32 %v462_v55, 16  ;;  %344 = vst [vmem:[#allocation2 + $0xb0] sm:$0x1] %v343_v59 }
  0xc5   : > { %667 = vst [vmem:[#allocation2 + $0x90] sm:$0xff] %v666_v24  ;;  %v669_v26 = vsel %vm10462_vm10, %v527_v17, %v668_v25  ;;  %9434 = vmatmul.mubr.msk.bf16.gmra.mrb[8].mxu0 %vm613_vm6, %v718_v22  ;;  %v726_v31 = vld [vmem:[#allocation2 + $0x68] sm:$0xff]  ;;  %v534_v43 = vrot.slane %v532_v39, 7  ;;  %401 = vst [vmem:[#allocation2 + $0xb8] sm:$0xff] %v400_v52  ;;  %v542_v63 = vshll.u32 %v462_v55, 16  ;;  %v403_v7 = vsel %vm10412_vm7, 0, %v402_v6 }
  0xc6   : > { %670 = vst [vmem:[#allocation2 + $0x98] sm:$0x1] %v669_v26  ;;  %9437 = vmatprep.mubr.msk.bf16.mxu0 %vm613_vm6, %v10493_v28  ;;  %v541_v60 = vrot.slane %v539_v57, 7  ;;  %404 = vst [vmem:[#allocation2 + $0xc8] sm:$0xff] %v403_v7  ;;  %v442_v8 = vld [vmem:[%s10387_s7 + $0xb0] sm:$0xff]  ;;  %v443_v9 = vld [vmem:[%s10387_s7 + $0xb8] sm:$0xff] }
  0xc7   : > { %v537_v47 = vor.u32 %v535_v46, %v534_v43  ;;  %v463_v10 = vpack.c.bf16 %v443_v9, %v442_v8  ;;  %v345_v13 = vld [vmem:[#allocation2 + $0xc0] sm:$0x1]  ;;  %v405_v22 = vld [vmem:[#allocation2 + $0xd8] sm:$0xff]  ;;  %v445_v25 = vld [vmem:[%s10387_s7 + $0xc8] sm:$0xff]  ;;  %s10131_s8 = smov 88   ;;  %s10132_s6 = smov 80  }
  0xc8   : > { %v728_v28 = vld [vmem:[#allocation2 + $0x78] sm:$0xff]  ;;  %v671_v48 = vld [vmem:[#allocation2 + $0xa0] sm:$0xff]  ;;  %v544_v0 = vor.u32 %v542_v63, %v541_v60  ;;  %v406_v23 = vsel %vm10412_vm7, 0, %v405_v22  ;;  %v408_v38 = vld [vmem:[#allocation2 + $0xe8] sm:$0xff]  ;;  %s10133_s9 = smov 72   ;;  %s10134_s11 = smov 64  }
  0xc9   : > { %v730_v32 = vld [vmem:[#allocation2 + $0x88] sm:$0xff]  ;;  %v672_v49 = vsel %vm10450_vm9, %v537_v47, %v671_v48  ;;  %v546_v11 = vshrl.u32 %v463_v10, 16  ;;  %v549_v19 = vshll.u32 %v463_v10, 16  ;;  %407 = vst [vmem:[#allocation2 + $0xd8] sm:$0xff] %v406_v23  ;;  %v409_v39 = vsel %vm10412_vm7, 0, %v408_v38  ;;  %v446_v40 = vld [vmem:[%s10387_s7 + $0xd0] sm:$0xff] }
  0xca   : > { %673 = vst [vmem:[#allocation2 + $0xa0] sm:$0xff] %v672_v49  ;;  %410 = vst [vmem:[#allocation2 + $0xe8] sm:$0xff] %v409_v39  ;;  %v447_v42 = vld [vmem:[%s10387_s7 + $0xd8] sm:$0xff]  ;;  %v448_v58 = vld [vmem:[%s10387_s7 + $0xe0] sm:$0xff]  ;;  %s10135_s12 = smov 8   ;;  %vm3127_vm13 = vcmask 122944  }
  0xcb   : > { %v677_v3 = vld [vmem:[#allocation2 + $0xb0] sm:$0xff]  ;;  %v548_v15 = vrot.slane %v546_v11, 7  ;;  %v411_v55 = vld [vmem:[#allocation2 + $0xf8] sm:$0xff]  ;;  %v449_v59 = vld [vmem:[%s10387_s7 + $0xe8] sm:$0xff]  ;;  %vm3122_vm14 = vcmask 130112   ;;  %s10136_s15 = smov 16  }
  0xcc   : > { %v680_v61 = vld [vmem:[#allocation2 + $0xb8] sm:$0x1]  ;;  %v412_v57 = vsel %vm10412_vm7, 0, %v411_v55  ;;  %vm12046_vm15 = vmand %vm3127_vm13, %vm307_vm2  ;;  %s10137_s23 = smov 24   ;;  %s14626_s27 = scalar_lea.vmem [#allocation13], %s9107_s29 }
  0xcd   : > { %9438 = vmatmul.mubr.msk.bf16.gmra.mrb[12].mxu0 %vm613_vm6, %v720_v27  ;;  %v732_v33 = vld [vmem:[#allocation2 + $0x98] sm:$0xff]  ;;  %v681_v62 = vsel %vm10462_vm10, %v541_v60, %v680_v61  ;;  %v686_v17 = vld [vmem:[#allocation2 + $0xc8] sm:$0x1]  ;;  %v551_v20 = vor.u32 %v549_v19, %v548_v15  ;;  %413 = vst [vmem:[#allocation2 + $0xf8] sm:$0xff] %v412_v57  ;;  %v466_v60 = vpack.c.bf16 %v449_v59, %v448_v58  ;;  %vm12051_vm1 = vmand %vm3122_vm14, %vm364_vm3  ;;  %s9272_s29 = sshll.u32 %s10191_s22, 12  ;;  %s8985_s10 = sshll.u32 %s14626_s27, 4  ;;  %s14824_s10 = int_to_ptr.vmem [resolvable:$true] %s8985_s10 }
  0xce   : > { %9441 = vmatprep.mubr.msk.bf16.mxu0 %vm613_vm6, %v10503_v35  ;;  %v397_v35 = vsel %vm10412_vm7, 0, %v396_v34  ;;  %682 = vst [vmem:[#allocation2 + $0xb8] sm:$0x1] %v681_v62  ;;  %v687_v18 = vsel %vm10462_vm10, %v548_v15, %v686_v17  ;;  %v354_v62 = vld [vmem:[#allocation2 + $0xf0] sm:$0x1]  ;;  %v414_v15 = vld [vmem:[#allocation2 + $0x108] sm:$0xff] }
  0xcf   : > { %398 = vst [vmem:[#allocation2 + $0xa8] sm:$0xff] %v397_v35  ;;  %688 = vst [vmem:[#allocation2 + $0xc8] sm:$0x1] %v687_v18  ;;  %v567_v61 = vshrl.u32 %v466_v60, 16  ;;  %v355_v63 = vsel %vm10406_vm5, 0, %v354_v62  ;;  %v415_v17 = vsel %vm10412_vm7, 0, %v414_v15 }
  0xd0   : > { %356 = vst [vmem:[#allocation2 + $0xf0] sm:$0x1] %v355_v63  ;;  %416 = vst [vmem:[#allocation2 + $0x108] sm:$0xff] %v415_v17  ;;  %v450_v18 = vld [vmem:[%s10387_s7 + $0xf0] sm:$0xff]  ;;  %v451_v19 = vld [vmem:[%s10387_s7 + $0xf8] sm:$0xff]  ;;  %s8972_s22 = scalar_lea.sflag [#allocation6], %s10381_s28 }
  0xd1   : > { %v698_v48 = vld [vmem:[#allocation2 + $0xe8] sm:$0x1]  ;;  %v417_v1 = vld [vmem:[#allocation2 + $0x118] sm:$0xff] }
  0xd2   : > { %v418_v62 = vsel %vm10412_vm7, 0, %v417_v1  ;;  %vm5633_vm7 = vcmask 195712  }
  0xd3   : > { %419 = vst [vmem:[#allocation2 + $0x118] sm:$0xff] %v418_v62 }
  0xd5   : > { %9442 = vmatmul.mubr.msk.bf16.gmra.mrb[16].mxu0 %vm613_vm6, %v722_v29  ;;  %v736_v5 = vld [vmem:[#allocation2 + $0xb8] sm:$0xff]  ;;  %v348_v29 = vld [vmem:[#allocation2 + $0xd0] sm:$0x1] }
  0xd6   : > { %9445 = vmatprep.mubr.msk.bf16.mxu0 %vm613_vm6, %v642_v50  ;;  %v674_v44 = vld [vmem:[#allocation2 + $0xa8] sm:$0x1] }
  0xd7   : > { %v675_v45 = vsel %vm10462_vm10, %v534_v43, %v674_v44  ;;  %v738_v12 = vld [vmem:[#allocation2 + $0xc8] sm:$0xff]  ;;  %v465_v43 = vpack.c.bf16 %v447_v42, %v446_v40  ;;  %v701_v9 = vld [vmem:[#allocation2 + $0xf0] sm:$0xff] }
  0xd8   : > { %676 = vst [vmem:[#allocation2 + $0xa8] sm:$0x1] %v675_v45  ;;  %v351_v45 = vld [vmem:[#allocation2 + $0xe0] sm:$0x1] }
  0xd9   : > { %v560_v44 = vshrl.u32 %v465_v43, 16  ;;  %v352_v46 = vsel %vm10406_vm5, 0, %v351_v45 }
  0xda   : > { %353 = vst [vmem:[#allocation2 + $0xe0] sm:$0x1] %v352_v46 }
  0xdb   : > { %v562_v47 = vrot.slane %v560_v44, 7 }
  0xdd   : > { %9446 = vmatmul.mubr.msk.bf16.gmra.mrb[20].mxu0 %vm613_vm6, %v724_v30  ;;  %v349_v30 = vsel %vm10406_vm5, 0, %v348_v29 }
  0xde   : > { %9449 = vmatprep.mubr.msk.bf16.mxu0 %vm613_vm6, %v648_v4  ;;  %v678_v4 = vsel %vm10450_vm9, %v544_v0, %v677_v3  ;;  %350 = vst [vmem:[#allocation2 + $0xd0] sm:$0x1] %v349_v30  ;;  %v569_v0 = vrot.slane %v567_v61, 7  ;;  %v704_v3 = vld [vmem:[#allocation2 + $0xf8] sm:$0x1] }
  0xdf   : > { %v734_v50 = vld [vmem:[#allocation2 + $0xa8] sm:$0xff]  ;;  %679 = vst [vmem:[#allocation2 + $0xb0] sm:$0xff] %v678_v4 }
  0xe0   : > { %v710_v30 = vld [vmem:[#allocation2 + $0x108] sm:$0x1] }
  0xe1   : > { %v695_v52 = vld [vmem:[#allocation2 + $0xe0] sm:$0xff] }
  0xe5   : > { %9450 = vmatmul.mubr.msk.bf16.gmra.mrb[24].mxu0 %vm613_vm6, %v726_v31  ;;  %v689_v35 = vld [vmem:[#allocation2 + $0xd0] sm:$0xff] }
  0xe6   : > { %9453 = vmatprep.mubr.msk.bf16.mxu0 %vm613_vm6, %v654_v14  ;;  %v346_v14 = vsel %vm10406_vm5, 0, %v345_v13 }
  0xe7   : > { %347 = vst [vmem:[#allocation2 + $0xc0] sm:$0x1] %v346_v14 }
  0xed   : > { %9454 = vmatmul.mubr.msk.bf16.gmra.mrb[28].mxu0 %vm613_vm6, %v728_v28  ;;  %v692_v28 = vld [vmem:[#allocation2 + $0xd8] sm:$0x1] }
  0xee   : > { %9457 = vmatprep.mubr.msk.bf16.mxu0 %vm613_vm6, %v660_v21  ;;  %v683_v21 = vld [vmem:[#allocation2 + $0xc0] sm:$0xff] }
  0xef   : > { %v684_v16 = vsel %vm10450_vm9, %v551_v20, %v683_v21  ;;  %v467_v21 = vpack.c.bf16 %v451_v19, %v450_v18 }
  0xf0   : > { %685 = vst [vmem:[#allocation2 + $0xc0] sm:$0xff] %v684_v16 }
  0xf5   : > { %9458 = vmatmul.mubr.msk.bf16.gmra.mrb[32].mxu0 %vm613_vm6, %v730_v32 }
  0xf6   : > { %9461 = vmatprep.mubr.msk.bf16.mxu0 %vm613_vm6, %v666_v24  ;;  %v444_v24 = vld [vmem:[%s10387_s7 + $0xc0] sm:$0xff] }
  0xf7   : > { %v464_v26 = vpack.c.bf16 %v445_v25, %v444_v24  ;;  %v574_v24 = vshrl.u32 %v467_v21, 16 }
  0xf9   : > { %v553_v27 = vshrl.u32 %v464_v26, 16  ;;  %v576_v29 = vrot.slane %v574_v24, 7 }
  0xfb   : > { %v555_v31 = vrot.slane %v553_v27, 7 }
  0xfd   : > { %9462 = vmatmul.mubr.msk.bf16.gmra.mrb[36].mxu0 %vm613_vm6, %v732_v33  ;;  %v693_v32 = vsel %vm10462_vm10, %v555_v31, %v692_v28  ;;  %v556_v33 = vshll.u32 %v464_v26, 16  ;;  %v357_v26 = vld [vmem:[#allocation2 + $0x100] sm:$0x1]  ;;  %v711_v28 = vsel %vm10462_vm10, %v576_v29, %v710_v30 }
  0xfe   : > { %9465 = vmatprep.mubr.msk.bf16.mxu0 %vm613_vm6, %v672_v49  ;;  %694 = vst [vmem:[#allocation2 + $0xd8] sm:$0x1] %v693_v32  ;;  %v699_v49 = vsel %vm10462_vm10, %v562_v47, %v698_v48  ;;  %v358_v27 = vsel %vm10406_vm5, 0, %v357_v26  ;;  %712 = vst [vmem:[#allocation2 + $0x108] sm:$0x1] %v711_v28 }
  0xff   : > { %v558_v34 = vor.u32 %v556_v33, %v555_v31  ;;  %700 = vst [vmem:[#allocation2 + $0xe8] sm:$0x1] %v699_v49  ;;  %359 = vst [vmem:[#allocation2 + $0x100] sm:$0x1] %v358_v27 }
 0x101   : > { %v690_v36 = vsel %vm10450_vm9, %v558_v34, %v689_v35  ;;  %v577_v34 = vshll.u32 %v467_v21, 16 }
 0x102   : > { %691 = vst [vmem:[#allocation2 + $0xd0] sm:$0xff] %v690_v36 }
 0x103   : > { %v579_v39 = vor.u32 %v577_v34, %v576_v29 }
 0x105   : > { %9466 = vmatmul.mubr.msk.bf16.gmra.mrb[40].mxu0 %vm613_vm6, %v734_v50  ;;  %v740_v37 = vld [vmem:[#allocation2 + $0xd8] sm:$0xff]  ;;  %v563_v50 = vshll.u32 %v465_v43, 16  ;;  %v746_v43 = vld [vmem:[#allocation2 + $0x108] sm:$0xff] }
 0x106   : > { %9469 = vmatprep.mubr.msk.bf16.mxu0 %vm613_vm6, %v678_v4  ;;  %v742_v54 = vld [vmem:[#allocation2 + $0xe8] sm:$0xff]  ;;  %v705_v4 = vsel %vm10462_vm10, %v569_v0, %v704_v3  ;;  %v707_v56 = vld [vmem:[#allocation2 + $0x100] sm:$0xff]  ;;  %vm8151_vm10 = vcmask 261312  }
 0x107   : > { %v565_v51 = vor.u32 %v563_v50, %v562_v47  ;;  %706 = vst [vmem:[#allocation2 + $0xf8] sm:$0x1] %v705_v4  ;;  %v708_v40 = vsel %vm10450_vm9, %v579_v39, %v707_v56 }
 0x108   : > { %709 = vst [vmem:[#allocation2 + $0x100] sm:$0xff] %v708_v40 }
 0x109   : > { %v696_v53 = vsel %vm10450_vm9, %v565_v51, %v695_v52  ;;  %v360_v52 = vld [vmem:[#allocation2 + $0x110] sm:$0x1] }
 0x10a   : > { %697 = vst [vmem:[#allocation2 + $0xe0] sm:$0xff] %v696_v53 }
 0x10d   : > { %9470 = vmatmul.mubr.msk.bf16.gmra.mrb[44].mxu0 %vm613_vm6, %v736_v5  ;;  %v570_v5 = vshll.u32 %v466_v60, 16 }
 0x10e   : > { %9473 = vmatprep.mubr.msk.bf16.mxu0 %vm613_vm6, %v684_v16  ;;  %v744_v14 = vld [vmem:[#allocation2 + $0xf8] sm:$0xff] }
 0x10f   : > { %v572_v7 = vor.u32 %v570_v5, %v569_v0 }
 0x111   : > { %v702_v11 = vsel %vm10450_vm9, %v572_v7, %v701_v9  ;;  %vm13170_vm9 = vmand %vm5633_vm7, %vm364_vm3 }
 0x112   : > { %703 = vst [vmem:[#allocation2 + $0xf0] sm:$0xff] %v702_v11 }
 0x115   : > { %9474 = vmatmul.mubr.msk.bf16.gmra.mrb[48].mxu0 %vm613_vm6, %v738_v12 }
 0x116   : > { %9477 = vmatprep.mubr.msk.bf16.mxu0 %vm613_vm6, %v690_v36 }
 0x11d   : > { %9478 = vmatmul.mubr.msk.bf16.gmra.mrb[52].mxu0 %vm613_vm6, %v740_v37 }
 0x11e   : > { %9481 = vmatprep.mubr.msk.bf16.mxu0 %vm613_vm6, %v696_v53 }
 0x125   : > { %9482 = vmatmul.mubr.msk.bf16.gmra.mrb[56].mxu0 %vm613_vm6, %v742_v54  ;;  %v361_v54 = vsel %vm10406_vm5, 0, %v360_v52  ;;  %vm5782_vm5 = vcmask 195584  }
 0x126   : > { %9485 = vmatprep.mubr.msk.bf16.mxu0 %vm613_vm6, %v702_v11  ;;  %362 = vst [vmem:[#allocation2 + $0x110] sm:$0x1] %v361_v54 }
 0x12d   : > { %9486 = vmatmul.mubr.msk.bf16.gmra.mrb[60].mxu0 %vm613_vm6, %v744_v14  ;;  %v747_v61 = vld [vmem:[#allocation2 + $0x110] sm:$0xff] }
 0x12e   : > { %9489 = vmatprep.mubr.msk.bf16.mxu0 %vm613_vm6, %v708_v40 }
 0x135   : > { %9490 = vmatmul.mubr.msk.bf16.gmra.mrb[64].mxu0 %vm613_vm6, %v746_v43 }
 0x136   : > { %9493 = vmatprep.mubr.msk.bf16.mxu0 %vm613_vm6, %v747_v61 }
 0x13d   : > { %9494 = vmatmul.mubr.msk.bf16.gmra.mrb[68].mxu0 %vm613_vm6, %v418_v62 }
 0x185   : > { %v9427_v6 = vpop.f32.mrb[0].mxu0 }
 0x186   : > { %1187 = vst.msk [vmem:[#allocation3 + $0x10] sm:$0xff] %vm1184_vm11, %v9427_v6  ;;  %v897_v8 = vpop.f32.mrb[1].mxu0 }
 0x187   : > { %1185 = vst.msk [vmem:[#allocation3] sm:$0xff] %vm1184_vm11, %v897_v8  ;;  %v9428_v10 = vpop.f32.mrb[2].mxu0 }
 0x188   : > { %v900_v13 = vpop.f32.mrb[3].mxu0 }
 0x189   : > { %1186 = vst.msk [vmem:[#allocation3 + $0x8] sm:$0xff] %vm1184_vm11, %v900_v13 }
 0x190   : > { %v9431_v20 = vpop.f32.mrb[4].mxu0  ;;  %v1521_v22 = vld [vmem:[#allocation3 + $0xa] sm:$0xff]  ;;  %v1328_v23 = vld [vmem:[#allocation3 + $0x1] sm:$0xff] }
 0x191   : > { %1191 = vst.msk [vmem:[#allocation3 + $0x30] sm:$0xff] %vm1184_vm11, %v9431_v20  ;;  %v913_v16 = vpop.f32.mrb[5].mxu0  ;;  %1586 = vrot.lane.b32.xlu1 %v1521_v22, %s10127_s24  ;;  %1392 = vrot.lane.b32.xlu0 %v1328_v23, %s10128_s26  ;;  %v1329_v31 = vld [vmem:[#allocation3 + $0x9] sm:$0xff] }
 0x192   : > { %1189 = vst.msk [vmem:[#allocation3 + $0x20] sm:$0xff] %vm1184_vm11, %v913_v16  ;;  %v9432_v12 = vpop.f32.mrb[6].mxu0  ;;  %v1520_v35 = vld [vmem:[#allocation3 + $0x2] sm:$0xff] }
 0x193   : > { %v916_v25 = vpop.f32.mrb[7].mxu0 }
 0x194   : > { %1190 = vst.msk [vmem:[#allocation3 + $0x28] sm:$0xff] %vm1184_vm11, %v916_v25 }
 0x195   : > { %1394 = vrot.lane.b32.xlu0 %v1329_v31, %s10128_s26 }
 0x198   : > { %v9435_v32 = vpop.f32.mrb[8].mxu0 }
 0x199   : > { %1195 = vst.msk [vmem:[#allocation3 + $0x50] sm:$0xff] %vm1184_vm11, %v9435_v32  ;;  %v929_v33 = vpop.f32.mrb[9].mxu0  ;;  %1584 = vrot.lane.b32.xlu0 %v1520_v35, %s10127_s24  ;;  %v1713_v42 = vld [vmem:[#allocation3 + $0x20] sm:$0xff] }
 0x19a   : > { %1193 = vst.msk [vmem:[#allocation3 + $0x40] sm:$0xff] %vm1184_vm11, %v929_v33  ;;  %v9436_v36 = vpop.f32.mrb[10].mxu0 }
 0x19b   : > { %v1330_v37 = vld [vmem:[#allocation3 + $0x21] sm:$0xff]  ;;  %v932_v38 = vpop.f32.mrb[11].mxu0  ;;  %v1331_v44 = vld [vmem:[#allocation3 + $0x29] sm:$0xff] }
 0x19c   : > { %1396 = vrot.lane.b32.xlu1 %v1330_v37, %s10128_s26  ;;  %1194 = vst.msk [vmem:[#allocation3 + $0x48] sm:$0xff] %vm1184_vm11, %v932_v38  ;;  %v1522_v47 = vld [vmem:[#allocation3 + $0x22] sm:$0xff]  ;;  %v1523_v48 = vld [vmem:[#allocation3 + $0x2a] sm:$0xff] }
 0x19d   : > { %1777 = vrot.lane.b32.xlu0 %v1713_v42, %s10129_s13  ;;  %v1714_v50 = vld [vmem:[#allocation3 + $0x28] sm:$0xff] }
 0x1a0   : > { %1398 = vrot.lane.b32.xlu1 %v1331_v44, %s10128_s26  ;;  %v9439_v45 = vpop.f32.mrb[12].mxu0 }
 0x1a1   : > { %1199 = vst.msk [vmem:[#allocation3 + $0x70] sm:$0xff] %vm1184_vm11, %v9439_v45  ;;  %v945_v46 = vpop.f32.mrb[13].mxu0  ;;  %1588 = vrot.lane.b32.xlu0 %v1522_v47, %s10127_s24  ;;  %v1715_v58 = vld [vmem:[#allocation3 + $0x40] sm:$0xff] }
 0x1a2   : > { %1197 = vst.msk [vmem:[#allocation3 + $0x60] sm:$0xff] %vm1184_vm11, %v945_v46  ;;  %v9440_v41 = vpop.f32.mrb[14].mxu0 }
 0x1a3   : > { %v948_v49 = vpop.f32.mrb[15].mxu0  ;;  %v1333_v0 = vld [vmem:[#allocation3 + $0x49] sm:$0xff]  ;;  %v1332_v4 = vld [vmem:[#allocation3 + $0x41] sm:$0xff] }
 0x1a4   : > { %1590 = vrot.lane.b32.xlu1 %v1523_v48, %s10127_s24  ;;  %1198 = vst.msk [vmem:[#allocation3 + $0x68] sm:$0xff] %vm1184_vm11, %v948_v49  ;;  %v1525_v2 = vld [vmem:[#allocation3 + $0x4a] sm:$0xff]  ;;  %v1524_v7 = vld [vmem:[#allocation3 + $0x42] sm:$0xff] }
 0x1a5   : > { %1969 = vrot.lane.b32.xlu0 %v1330_v37, %s10130_s16  ;;  %v1716_v9 = vld [vmem:[#allocation3 + $0x48] sm:$0xff] }
 0x1a8   : > { %1779 = vrot.lane.b32.xlu1 %v1714_v50, %s10129_s13  ;;  %v9443_v51 = vpop.f32.mrb[16].mxu0 }
 0x1a9   : > { %1203 = vst.msk [vmem:[#allocation3 + $0x90] sm:$0xff] %vm1184_vm11, %v9443_v51  ;;  %v961_v53 = vpop.f32.mrb[17].mxu0  ;;  %2161 = vrot.lane.b32.xlu0 %v1522_v47, %s10131_s8  ;;  %v1717_v17 = vld [vmem:[#allocation3 + $0x60] sm:$0xff] }
 0x1aa   : > { %1201 = vst.msk [vmem:[#allocation3 + $0x80] sm:$0xff] %vm1184_vm11, %v961_v53  ;;  %v9444_v55 = vpop.f32.mrb[18].mxu0 }
 0x1ab   : > { %v964_v57 = vpop.f32.mrb[19].mxu0  ;;  %v1335_v21 = vld [vmem:[#allocation3 + $0x69] sm:$0xff]  ;;  %v1334_v12 = vld [vmem:[#allocation3 + $0x61] sm:$0xff] }
 0x1ac   : > { %1971 = vrot.lane.b32.xlu1 %v1331_v44, %s10130_s16  ;;  %1202 = vst.msk [vmem:[#allocation3 + $0x88] sm:$0xff] %vm1184_vm11, %v964_v57  ;;  %v1527_v22 = vld [vmem:[#allocation3 + $0x6a] sm:$0xff]  ;;  %v1526_v25 = vld [vmem:[#allocation3 + $0x62] sm:$0xff] }
 0x1ad   : > { %1781 = vrot.lane.b32.xlu0 %v1715_v58, %s10129_s13  ;;  %v1718_v27 = vld [vmem:[#allocation3 + $0x68] sm:$0xff] }
 0x1b0   : > { %2163 = vrot.lane.b32.xlu1 %v1523_v48, %s10131_s8  ;;  %v9447_v59 = vpop.f32.mrb[20].mxu0 }
 0x1b1   : > { %1207 = vst.msk [vmem:[#allocation3 + $0xb0] sm:$0xff] %vm1184_vm11, %v9447_v59  ;;  %v977_v60 = vpop.f32.mrb[21].mxu0  ;;  %2354 = vrot.lane.b32.xlu0 %v1715_v58, %s10132_s6  ;;  %v1719_v30 = vld [vmem:[#allocation3 + $0x80] sm:$0xff] }
 0x1b2   : > { %1205 = vst.msk [vmem:[#allocation3 + $0xa0] sm:$0xff] %vm1184_vm11, %v977_v60  ;;  %v9448_v63 = vpop.f32.mrb[22].mxu0 }
 0x1b3   : > { %v980_v3 = vpop.f32.mrb[23].mxu0  ;;  %v1337_v31 = vld [vmem:[#allocation3 + $0x89] sm:$0xff]  ;;  %v1336_v32 = vld [vmem:[#allocation3 + $0x81] sm:$0xff] }
 0x1b4   : > { %1402 = vrot.lane.b32.xlu1 %v1333_v0, %s10128_s26  ;;  %1206 = vst.msk [vmem:[#allocation3 + $0xa8] sm:$0xff] %vm1184_vm11, %v980_v3  ;;  %v1529_v33 = vld [vmem:[#allocation3 + $0x8a] sm:$0xff]  ;;  %v1528_v37 = vld [vmem:[#allocation3 + $0x82] sm:$0xff] }
 0x1b5   : > { %1400 = vrot.lane.b32.xlu0 %v1332_v4, %s10128_s26  ;;  %v1720_v38 = vld [vmem:[#allocation3 + $0x88] sm:$0xff] }
 0x1b8   : > { %1594 = vrot.lane.b32.xlu1 %v1525_v2, %s10127_s24  ;;  %v9451_v5 = vpop.f32.mrb[24].mxu0 }
 0x1b9   : > { %1211 = vst.msk [vmem:[#allocation3 + $0xd0] sm:$0xff] %vm1184_vm11, %v9451_v5  ;;  %v993_v6 = vpop.f32.mrb[25].mxu0  ;;  %1592 = vrot.lane.b32.xlu0 %v1524_v7, %s10127_s24  ;;  %v1721_v39 = vld [vmem:[#allocation3 + $0xa0] sm:$0xff] }
 0x1ba   : > { %1209 = vst.msk [vmem:[#allocation3 + $0xc0] sm:$0xff] %vm1184_vm11, %v993_v6  ;;  %v9452_v8 = vpop.f32.mrb[26].mxu0 }
 0x1bb   : > { %v996_v10 = vpop.f32.mrb[27].mxu0  ;;  %v1339_v56 = vld [vmem:[#allocation3 + $0xa9] sm:$0xff]  ;;  %v1338_v40 = vld [vmem:[#allocation3 + $0xa1] sm:$0xff] }
 0x1bc   : > { %1783 = vrot.lane.b32.xlu1 %v1716_v9, %s10129_s13  ;;  %1210 = vst.msk [vmem:[#allocation3 + $0xc8] sm:$0xff] %vm1184_vm11, %v996_v10  ;;  %v1531_v43 = vld [vmem:[#allocation3 + $0xaa] sm:$0xff]  ;;  %v1530_v47 = vld [vmem:[#allocation3 + $0xa2] sm:$0xff] }
 0x1bd   : > { %1973 = vrot.lane.b32.xlu0 %v1332_v4, %s10130_s16  ;;  %v1722_v41 = vld [vmem:[#allocation3 + $0xa8] sm:$0xff] }
 0x1c0   : > { %1975 = vrot.lane.b32.xlu1 %v1333_v0, %s10130_s16  ;;  %v9455_v11 = vpop.f32.mrb[28].mxu0 }
 0x1c1   : > { %1215 = vst.msk [vmem:[#allocation3 + $0xf0] sm:$0xff] %vm1184_vm11, %v9455_v11  ;;  %v1009_v13 = vpop.f32.mrb[29].mxu0  ;;  %2165 = vrot.lane.b32.xlu0 %v1524_v7, %s10131_s8  ;;  %v1723_v51 = vld [vmem:[#allocation3 + $0xc0] sm:$0xff] }
 0x1c2   : > { %1213 = vst.msk [vmem:[#allocation3 + $0xe0] sm:$0xff] %vm1184_vm11, %v1009_v13  ;;  %v9456_v14 = vpop.f32.mrb[30].mxu0 }
 0x1c3   : > { %v1012_v15 = vpop.f32.mrb[31].mxu0  ;;  %v1341_v57 = vld [vmem:[#allocation3 + $0xc9] sm:$0xff]  ;;  %v1340_v1 = vld [vmem:[#allocation3 + $0xc1] sm:$0xff] }
 0x1c4   : > { %2167 = vrot.lane.b32.xlu1 %v1525_v2, %s10131_s8  ;;  %1214 = vst.msk [vmem:[#allocation3 + $0xe8] sm:$0xff] %vm1184_vm11, %v1012_v15  ;;  %v1533_v61 = vld [vmem:[#allocation3 + $0xca] sm:$0xff]  ;;  %v1532_v2 = vld [vmem:[#allocation3 + $0xc2] sm:$0xff] }
 0x1c5   : > { %1785 = vrot.lane.b32.xlu0 %v1717_v17, %s10129_s13  ;;  %v1724_v5 = vld [vmem:[#allocation3 + $0xc8] sm:$0xff] }
 0x1c8   : > { %2356 = vrot.lane.b32.xlu1 %v1716_v9, %s10132_s6  ;;  %v9459_v18 = vpop.f32.mrb[32].mxu0 }
 0x1c9   : > { %1219 = vst.msk [vmem:[#allocation3 + $0x110] sm:$0xff] %vm1184_vm11, %v9459_v18  ;;  %v1025_v19 = vpop.f32.mrb[33].mxu0  ;;  %2358 = vrot.lane.b32.xlu0 %v1717_v17, %s10132_s6  ;;  %v1725_v10 = vld [vmem:[#allocation3 + $0xe0] sm:$0xff] }
 0x1ca   : > { %1217 = vst.msk [vmem:[#allocation3 + $0x100] sm:$0xff] %vm1184_vm11, %v1025_v19  ;;  %v9460_v20 = vpop.f32.mrb[34].mxu0 }
 0x1cb   : > { %v1028_v16 = vpop.f32.mrb[35].mxu0  ;;  %v1343_v17 = vld [vmem:[#allocation3 + $0xe9] sm:$0xff]  ;;  %v1342_v20 = vld [vmem:[#allocation3 + $0xe1] sm:$0xff] }
 0x1cc   : > { %1406 = vrot.lane.b32.xlu1 %v1335_v21, %s10128_s26  ;;  %1218 = vst.msk [vmem:[#allocation3 + $0x108] sm:$0xff] %vm1184_vm11, %v1028_v16  ;;  %v1535_v16 = vld [vmem:[#allocation3 + $0xea] sm:$0xff] }
 0x1cd   : > { %1404 = vrot.lane.b32.xlu0 %v1334_v12, %s10128_s26 }
 0x1d0   : > { %1598 = vrot.lane.b32.xlu1 %v1527_v22, %s10127_s24  ;;  %v9463_v23 = vpop.f32.mrb[36].mxu0 }
 0x1d1   : > { %1223 = vst.msk [vmem:[#allocation3 + $0x130] sm:$0xff] %vm1184_vm11, %v9463_v23  ;;  %v1041_v24 = vpop.f32.mrb[37].mxu0  ;;  %1596 = vrot.lane.b32.xlu0 %v1526_v25, %s10127_s24 }
 0x1d2   : > { %1221 = vst.msk [vmem:[#allocation3 + $0x120] sm:$0xff] %vm1184_vm11, %v1041_v24  ;;  %v9464_v26 = vpop.f32.mrb[38].mxu0 }
 0x1d3   : > { %v1044_v29 = vpop.f32.mrb[39].mxu0  ;;  %v1534_v26 = vld [vmem:[#allocation3 + $0xe2] sm:$0xff] }
 0x1d4   : > { %1787 = vrot.lane.b32.xlu1 %v1718_v27, %s10129_s13  ;;  %1222 = vst.msk [vmem:[#allocation3 + $0x128] sm:$0xff] %vm1184_vm11, %v1044_v29 }
 0x1d5   : > { %1977 = vrot.lane.b32.xlu0 %v1334_v12, %s10130_s16 }
 0x1d8   : > { %1979 = vrot.lane.b32.xlu1 %v1335_v21, %s10130_s16  ;;  %v9467_v28 = vpop.f32.mrb[40].mxu0 }
 0x1d9   : > { %2169 = vrot.lane.b32.xlu0 %v1526_v25, %s10131_s8  ;;  %1227 = vst.msk [vmem:[#allocation3 + $0x150] sm:$0xff] %vm1184_vm11, %v9467_v28  ;;  %v1057_v34 = vpop.f32.mrb[41].mxu0 }
 0x1da   : > { %1225 = vst.msk [vmem:[#allocation3 + $0x140] sm:$0xff] %vm1184_vm11, %v1057_v34  ;;  %v9468_v35 = vpop.f32.mrb[42].mxu0 }
 0x1db   : > { %v1060_v36 = vpop.f32.mrb[43].mxu0 }
 0x1dc   : > { %2171 = vrot.lane.b32.xlu1 %v1527_v22, %s10131_s8  ;;  %1226 = vst.msk [vmem:[#allocation3 + $0x148] sm:$0xff] %vm1184_vm11, %v1060_v36 }
 0x1dd   : > { %1789 = vrot.lane.b32.xlu0 %v1719_v30, %s10129_s13 }
 0x1e0   : > { %2360 = vrot.lane.b32.xlu1 %v1718_v27, %s10132_s6  ;;  %v9471_v42 = vpop.f32.mrb[44].mxu0  ;;  %v1726_v27 = vld [vmem:[#allocation3 + $0xe8] sm:$0xff] }
 0x1e1   : > { %2362 = vrot.lane.b32.xlu0 %v1719_v30, %s10132_s6  ;;  %1231 = vst.msk [vmem:[#allocation3 + $0x170] sm:$0xff] %vm1184_vm11, %v9471_v42  ;;  %v1073_v44 = vpop.f32.mrb[45].mxu0  ;;  %v1537_v42 = vld [vmem:[#allocation3 + $0x10a] sm:$0xff] }
 0x1e2   : > { %1229 = vst.msk [vmem:[#allocation3 + $0x160] sm:$0xff] %vm1184_vm11, %v1073_v44  ;;  %v9472_v45 = vpop.f32.mrb[46].mxu0 }
 0x1e3   : > { %v1076_v46 = vpop.f32.mrb[47].mxu0 }
 0x1e4   : > { %1410 = vrot.lane.b32.xlu1 %v1337_v31, %s10128_s26  ;;  %1230 = vst.msk [vmem:[#allocation3 + $0x168] sm:$0xff] %vm1184_vm11, %v1076_v46 }
 0x1e5   : > { %1408 = vrot.lane.b32.xlu0 %v1336_v32, %s10128_s26 }
 0x1e8   : > { %1602 = vrot.lane.b32.xlu1 %v1529_v33, %s10127_s24  ;;  %v9475_v60 = vpop.f32.mrb[48].mxu0 }
 0x1e9   : > { %1600 = vrot.lane.b32.xlu0 %v1528_v37, %s10127_s24  ;;  %1235 = vst.msk [vmem:[#allocation3 + $0x190] sm:$0xff] %vm1184_vm11, %v9475_v60  ;;  %v1089_v62 = vpop.f32.mrb[49].mxu0 }
 0x1ea   : > { %1233 = vst.msk [vmem:[#allocation3 + $0x180] sm:$0xff] %vm1184_vm11, %v1089_v62  ;;  %v9476_v63 = vpop.f32.mrb[50].mxu0  ;;  %v10873_v62 = vld [vmem:[#allocation3 + $0x120] sm:$0xff] }
 0x1eb   : > { %v1092_v3 = vpop.f32.mrb[51].mxu0 }
 0x1ec   : > { %1791 = vrot.lane.b32.xlu1 %v1720_v38, %s10129_s13  ;;  %1234 = vst.msk [vmem:[#allocation3 + $0x188] sm:$0xff] %vm1184_vm11, %v1092_v3 }
 0x1ed   : > { %1981 = vrot.lane.b32.xlu0 %v1336_v32, %s10130_s16  ;;  %v1727_v32 = vld [vmem:[#allocation3 + $0x100] sm:$0xff] }
 0x1f0   : > { %1983 = vrot.lane.b32.xlu1 %v1337_v31, %s10130_s16  ;;  %v9479_v21 = vpop.f32.mrb[52].mxu0 }
 0x1f1   : > { %2173 = vrot.lane.b32.xlu0 %v1528_v37, %s10131_s8  ;;  %1239 = vst.msk [vmem:[#allocation3 + $0x1b0] sm:$0xff] %vm1184_vm11, %v9479_v21  ;;  %v1105_v12 = vpop.f32.mrb[53].mxu0  ;;  %v1345_v37 = vld [vmem:[#allocation3 + $0x109] sm:$0xff]  ;;  %v1346_v21 = vld [vmem:[#allocation3 + $0x121] sm:$0xff] }
 0x1f2   : > { %1237 = vst.msk [vmem:[#allocation3 + $0x1a0] sm:$0xff] %vm1184_vm11, %v1105_v12  ;;  %v9480_v22 = vpop.f32.mrb[54].mxu0  ;;  %v1539_v12 = vld [vmem:[#allocation3 + $0x12a] sm:$0xff] }
 0x1f3   : > { %v1108_v24 = vpop.f32.mrb[55].mxu0 }
 0x1f4   : > { %2175 = vrot.lane.b32.xlu1 %v1529_v33, %s10131_s8  ;;  %1238 = vst.msk [vmem:[#allocation3 + $0x1a8] sm:$0xff] %vm1184_vm11, %v1108_v24 }
 0x1f5   : > { %1793 = vrot.lane.b32.xlu0 %v1721_v39, %s10129_s13 }
 0x1f8   : > { %2364 = vrot.lane.b32.xlu1 %v1720_v38, %s10132_s6 }
 0x1f9   : > { %2366 = vrot.lane.b32.xlu0 %v1721_v39, %s10132_s6 }
 0x1fc   : > { %1414 = vrot.lane.b32.xlu1 %v1339_v56, %s10128_s26 }
 0x1fd   : > { %1412 = vrot.lane.b32.xlu0 %v1338_v40, %s10128_s26 }
 0x200   : > { %1606 = vrot.lane.b32.xlu1 %v1531_v43, %s10127_s24 }
 0x201   : > { %1604 = vrot.lane.b32.xlu0 %v1530_v47, %s10127_s24 }
 0x203   : > { %v10743_v48 = vpop.permute.xlu0 %1392  ;;  %v10749_v50 = vpop.permute.xlu1 %1586 }
 0x204   : > { %1795 = vrot.lane.b32.xlu1 %v1722_v41, %s10129_s13 }
 0x205   : > { %1985 = vrot.lane.b32.xlu0 %v1338_v40, %s10130_s16  ;;  %v9483_v40 = vpop.f32.mrb[56].mxu0 }
 0x206   : > { %1243 = vst.msk [vmem:[#allocation3 + $0x1d0] sm:$0xff] %vm1184_vm11, %v9483_v40 }
 0x207   : > { %v10747_v49 = vpop.permute.xlu0 %1394 }
 0x208   : > { %1987 = vrot.lane.b32.xlu1 %v1339_v56, %s10130_s16  ;;  %v1344_v56 = vld [vmem:[#allocation3 + $0x101] sm:$0xff] }
 0x209   : > { %2177 = vrot.lane.b32.xlu0 %v1530_v47, %s10131_s8 }
 0x20b   : > { %v10753_v52 = vpop.permute.xlu0 %1584 }
 0x20c   : > { %2179 = vrot.lane.b32.xlu1 %v1531_v43, %s10131_s8  ;;  %v1121_v43 = vpop.f32.mrb[57].mxu0 }
 0x20d   : > { %1797 = vrot.lane.b32.xlu0 %v1723_v51, %s10129_s13  ;;  %1241 = vst.msk [vmem:[#allocation3 + $0x1c0] sm:$0xff] %vm1184_vm11, %v1121_v43  ;;  %v9484_v44 = vpop.f32.mrb[58].mxu0 }
 0x20e   : > { %v10755_v53 = vpop.permute.xlu1 %1396  ;;  %v1124_v46 = vpop.f32.mrb[59].mxu0 }
 0x20f   : > { %v10759_v54 = vpop.permute.xlu0 %1777  ;;  %1242 = vst.msk [vmem:[#allocation3 + $0x1c8] sm:$0xff] %vm1184_vm11, %v1124_v46  ;;  %v10920_v46 = vld [vmem:[#allocation3 + $0x140] sm:$0xff] }
 0x210   : > { %2368 = vrot.lane.b32.xlu1 %v1722_v41, %s10132_s6  ;;  %v1536_v41 = vld [vmem:[#allocation3 + $0x102] sm:$0xff] }
 0x211   : > { %2370 = vrot.lane.b32.xlu0 %v1723_v51, %s10132_s6  ;;  %v10856_v51 = vld [vmem:[#allocation3 + $0x108] sm:$0xff] }
 0x212   : > { %v10761_v55 = vpop.permute.xlu1 %1398 }
 0x213   : > { %v10765_v58 = vpop.permute.xlu0 %1588 }
 0x214   : > { %1418 = vrot.lane.b32.xlu1 %v1341_v57, %s10128_s26 }
 0x215   : > { %1416 = vrot.lane.b32.xlu0 %v1340_v1, %s10128_s26 }
 0x216   : > { %v10767_v59 = vpop.permute.xlu1 %1590 }
 0x217   : > { %v10773_v0 = vpop.permute.xlu0 %1969 }
 0x218   : > { %1610 = vrot.lane.b32.xlu1 %v1533_v61, %s10127_s24 }
 0x219   : > { %1608 = vrot.lane.b32.xlu0 %v1532_v2, %s10127_s24 }
 0x21a   : > { %v10775_v4 = vpop.permute.xlu1 %1779 }
 0x21b   : > { %v10780_v6 = vpop.permute.xlu0 %2161 }
 0x21c   : > { %1799 = vrot.lane.b32.xlu1 %v1724_v5, %s10129_s13 }
 0x21d   : > { %1989 = vrot.lane.b32.xlu0 %v1340_v1, %s10130_s16 }
 0x21e   : > { %v10782_v7 = vpop.permute.xlu1 %1971 }
 0x21f   : > { %v10786_v8 = vpop.permute.xlu0 %1781 }
 0x220   : > { %1991 = vrot.lane.b32.xlu1 %v1341_v57, %s10130_s16 }
 0x221   : > { %2181 = vrot.lane.b32.xlu0 %v1532_v2, %s10131_s8 }
 0x222   : > { %v10788_v9 = vpop.permute.xlu1 %2163 }
 0x223   : > { %v10792_v11 = vpop.permute.xlu0 %2354 }
 0x224   : > { %2183 = vrot.lane.b32.xlu1 %v1533_v61, %s10131_s8  ;;  %14933 = vst [vmem:[#allocation18_spill] sm:$0xff] %v10792_v11 }
 0x225   : > { %1801 = vrot.lane.b32.xlu0 %v1725_v10, %s10129_s13 }
 0x226   : > { %v10794_v13 = vpop.permute.xlu1 %1402 }
 0x227   : > { %v10798_v14 = vpop.permute.xlu0 %1400 }
 0x228   : > { %2372 = vrot.lane.b32.xlu1 %v1724_v5, %s10132_s6 }
 0x229   : > { %2374 = vrot.lane.b32.xlu0 %v1725_v10, %s10132_s6  ;;  %v1347_v10 = vld [vmem:[#allocation3 + $0x129] sm:$0xff] }
 0x22a   : > { %v10800_v15 = vpop.permute.xlu1 %1594 }
 0x22b   : > { %v10804_v18 = vpop.permute.xlu0 %1592 }
 0x22c   : > { %1422 = vrot.lane.b32.xlu1 %v1343_v17, %s10128_s26 }
 0x22d   : > { %1420 = vrot.lane.b32.xlu0 %v1342_v20, %s10128_s26 }
 0x22e   : > { %v10806_v19 = vpop.permute.xlu1 %1783 }
 0x22f   : > { %v10812_v23 = vpop.permute.xlu0 %1973 }
 0x230   : > { %1614 = vrot.lane.b32.xlu1 %v1535_v16, %s10127_s24 }
 0x231   : > { %1612 = vrot.lane.b32.xlu0 %v1534_v26, %s10127_s24 }
 0x232   : > { %v10814_v25 = vpop.permute.xlu1 %1975 }
 0x233   : > { %v10819_v29 = vpop.permute.xlu0 %2165 }
 0x234   : > { %1803 = vrot.lane.b32.xlu1 %v1726_v27, %s10129_s13  ;;  %14934 = vst [vmem:[#allocation19_spill] sm:$0xff] %v10819_v29 }
 0x235   : > { %1993 = vrot.lane.b32.xlu0 %v1342_v20, %s10130_s16 }
 0x236   : > { %v10821_v30 = vpop.permute.xlu1 %2167 }
 0x237   : > { %14935 = vst [vmem:[#allocation20_spill] sm:$0xff] %v10821_v30  ;;  %v10825_v31 = vpop.permute.xlu0 %1785 }
 0x238   : > { %1995 = vrot.lane.b32.xlu1 %v1343_v17, %s10130_s16  ;;  %14936 = vst [vmem:[#allocation21_spill] sm:$0xff] %v10825_v31 }
 0x239   : > { %2185 = vrot.lane.b32.xlu0 %v1534_v26, %s10131_s8 }
 0x23a   : > { %v10827_v28 = vpop.permute.xlu1 %2356 }
 0x23b   : > { %14937 = vst [vmem:[#allocation22_spill] sm:$0xff] %v10827_v28  ;;  %v10831_v33 = vpop.permute.xlu0 %2358 }
 0x23c   : > { %2187 = vrot.lane.b32.xlu1 %v1535_v16, %s10131_s8  ;;  %14938 = vst [vmem:[#allocation23_spill] sm:$0xff] %v10831_v33  ;;  %v9487_v16 = vpop.f32.mrb[60].mxu0  ;;  %v11176_v33 = vld [vmem:[#allocation3 + $0x1ca] sm:$0xff] }
 0x23d   : > { %1805 = vrot.lane.b32.xlu0 %v1727_v32, %s10129_s13  ;;  %1247 = vst.msk [vmem:[#allocation3 + $0x1f0] sm:$0xff] %vm1184_vm11, %v9487_v16  ;;  %v1137_v22 = vpop.f32.mrb[61].mxu0 }
 0x23e   : > { %v10833_v34 = vpop.permute.xlu1 %1406  ;;  %1245 = vst.msk [vmem:[#allocation3 + $0x1e0] sm:$0xff] %vm1184_vm11, %v1137_v22  ;;  %v9488_v24 = vpop.f32.mrb[62].mxu0 }
 0x23f   : > { %14939 = vst [vmem:[#allocation24_spill] sm:$0xff] %v10833_v34  ;;  %v10837_v35 = vpop.permute.xlu0 %1404 }
 0x240   : > { %2376 = vrot.lane.b32.xlu1 %v1726_v27, %s10132_s6  ;;  %14940 = vst [vmem:[#allocation25_spill] sm:$0xff] %v10837_v35  ;;  %v1140_v27 = vpop.f32.mrb[63].mxu0 }
 0x241   : > { %2378 = vrot.lane.b32.xlu0 %v1727_v32, %s10132_s6  ;;  %1246 = vst.msk [vmem:[#allocation3 + $0x1e8] sm:$0xff] %vm1184_vm11, %v1140_v27  ;;  %v9491_v22 = vpop.f32.mrb[64].mxu0 }
 0x242   : > { %v10839_v36 = vpop.permute.xlu1 %1598  ;;  %1251 = vst.msk [vmem:[#allocation3 + $0x210] sm:$0xff] %vm1184_vm11, %v9491_v22  ;;  %v1153_v24 = vpop.f32.mrb[65].mxu0 }
 0x243   : > { %14941 = vst [vmem:[#allocation26_spill] sm:$0xff] %v10839_v36  ;;  %v10843_v38 = vpop.permute.xlu0 %1596  ;;  %1249 = vst.msk [vmem:[#allocation3 + $0x200] sm:$0xff] %vm1184_vm11, %v1153_v24  ;;  %v9492_v27 = vpop.f32.mrb[66].mxu0  ;;  %v1540_v24 = vld [vmem:[#allocation3 + $0x142] sm:$0xff] }
 0x244   : > { %1426 = vrot.lane.b32.xlu1 %v1345_v37, %s10128_s26  ;;  %14942 = vst [vmem:[#allocation27_spill] sm:$0xff] %v10843_v38  ;;  %v10956_v27 = vld [vmem:[#allocation3 + $0x148] sm:$0xff] }
 0x245   : > { %1424 = vrot.lane.b32.xlu0 %v1344_v56, %s10128_s26 }
 0x246   : > { %v10845_v39 = vpop.permute.xlu1 %1787 }
 0x247   : > { %14943 = vst [vmem:[#allocation28_spill] sm:$0xff] %v10845_v39  ;;  %v10851_v45 = vpop.permute.xlu0 %1977 }
 0x248   : > { %1618 = vrot.lane.b32.xlu1 %v1537_v42, %s10127_s24  ;;  %14944 = vst [vmem:[#allocation29_spill] sm:$0xff] %v10851_v45  ;;  %v11210_v45 = vld [vmem:[#allocation3 + $0x1e0] sm:$0xff]  ;;  %v11226_v36 = vld [vmem:[#allocation3 + $0x1e9] sm:$0xff] }
 0x249   : > { %1616 = vrot.lane.b32.xlu0 %v1536_v41, %s10127_s24  ;;  %15027 = vst [vmem:[#allocation112_spill] sm:$0xff] %v11210_v45  ;;  %v11224_v38 = vld [vmem:[#allocation3 + $0x1e1] sm:$0xff] }
 0x24a   : > { %v10853_v47 = vpop.permute.xlu1 %1979  ;;  %v11236_v28 = vld [vmem:[#allocation3 + $0x1e2] sm:$0xff] }
 0x24b   : > { %14945 = vst [vmem:[#allocation30_spill] sm:$0xff] %v10853_v47  ;;  %v10861_v57 = vpop.permute.xlu0 %2169  ;;  %v11174_v47 = vld [vmem:[#allocation3 + $0x1c1] sm:$0xff] }
 0x24c   : > { %1807 = vrot.lane.b32.xlu1 %v10856_v51, %s10129_s13  ;;  %14946 = vst [vmem:[#allocation31_spill] sm:$0xff] %v10861_v57  ;;  %v11150_v57 = vld [vmem:[#allocation3 + $0x1c0] sm:$0xff] }
 0x24d   : > { %1997 = vrot.lane.b32.xlu0 %v1344_v56, %s10130_s16  ;;  %v10903_v56 = vld [vmem:[#allocation3 + $0x128] sm:$0xff]  ;;  %15013 = vst [vmem:[#allocation98_spill] sm:$0xff] %v11150_v57 }
 0x24e   : > { %v10863_v1 = vpop.permute.xlu1 %2171 }
 0x24f   : > { %14947 = vst [vmem:[#allocation32_spill] sm:$0xff] %v10863_v1  ;;  %v10867_v60 = vpop.permute.xlu0 %1789  ;;  %v11114_v1 = vld [vmem:[#allocation3 + $0x1a1] sm:$0xff] }
 0x250   : > { %1999 = vrot.lane.b32.xlu1 %v1345_v37, %s10130_s16  ;;  %14948 = vst [vmem:[#allocation33_spill] sm:$0xff] %v10867_v60  ;;  %v1538_v37 = vld [vmem:[#allocation3 + $0x122] sm:$0xff] }
 0x251   : > { %2189 = vrot.lane.b32.xlu0 %v1536_v41, %s10131_s8  ;;  %v11128_v60 = vld [vmem:[#allocation3 + $0x1a8] sm:$0xff] }
 0x252   : > { %v10869_v61 = vpop.permute.xlu1 %2360  ;;  %15008 = vst [vmem:[#allocation93_spill] sm:$0xff] %v11128_v60 }
 0x253   : > { %14949 = vst [vmem:[#allocation34_spill] sm:$0xff] %v10869_v61  ;;  %v10875_v63 = vpop.permute.xlu0 %2362  ;;  %v11106_v61 = vld [vmem:[#allocation3 + $0x1a9] sm:$0xff] }
 0x254   : > { %2191 = vrot.lane.b32.xlu1 %v1537_v42, %s10131_s8  ;;  %14950 = vst [vmem:[#allocation35_spill] sm:$0xff] %v10875_v63  ;;  %v11030_v63 = vld [vmem:[#allocation3 + $0x180] sm:$0xff] }
 0x255   : > { %1809 = vrot.lane.b32.xlu0 %v10873_v62, %s10129_s13 }
 0x256   : > { %v10877_v3 = vpop.permute.xlu1 %1410 }
 0x257   : > { %14951 = vst [vmem:[#allocation36_spill] sm:$0xff] %v10877_v3  ;;  %v10883_v2 = vpop.permute.xlu0 %1408  ;;  %v11126_v3 = vld [vmem:[#allocation3 + $0x1a2] sm:$0xff] }
 0x258   : > { %2380 = vrot.lane.b32.xlu1 %v10856_v51, %s10132_s6  ;;  %14952 = vst [vmem:[#allocation37_spill] sm:$0xff] %v10883_v2  ;;  %v11166_v2 = vld [vmem:[#allocation3 + $0x1c9] sm:$0xff] }
 0x259   : > { %2382 = vrot.lane.b32.xlu0 %v10873_v62, %s10132_s6 }
 0x25a   : > { %v10885_v5 = vpop.permute.xlu1 %1602 }
 0x25b   : > { %14953 = vst [vmem:[#allocation38_spill] sm:$0xff] %v10885_v5  ;;  %v10890_v17 = vpop.permute.xlu0 %1600  ;;  %v11068_v5 = vld [vmem:[#allocation3 + $0x188] sm:$0xff] }
 0x25c   : > { %1430 = vrot.lane.b32.xlu1 %v1347_v10, %s10128_s26  ;;  %14954 = vst [vmem:[#allocation39_spill] sm:$0xff] %v10890_v17  ;;  %14994 = vst [vmem:[#allocation79_spill] sm:$0xff] %v11068_v5  ;;  %v11090_v17 = vld [vmem:[#allocation3 + $0x1a0] sm:$0xff] }
 0x25d   : > { %1428 = vrot.lane.b32.xlu0 %v1346_v21, %s10128_s26  ;;  %14999 = vst [vmem:[#allocation84_spill] sm:$0xff] %v11090_v17 }
 0x25e   : > { %v10892_v20 = vpop.permute.xlu1 %1791 }
 0x25f   : > { %14955 = vst [vmem:[#allocation40_spill] sm:$0xff] %v10892_v20  ;;  %v10898_v26 = vpop.permute.xlu0 %1981  ;;  %v11116_v20 = vld [vmem:[#allocation3 + $0x1aa] sm:$0xff] }
 0x260   : > { %1622 = vrot.lane.b32.xlu1 %v1539_v12, %s10127_s24  ;;  %14956 = vst [vmem:[#allocation41_spill] sm:$0xff] %v10898_v26 }
 0x261   : > { %1620 = vrot.lane.b32.xlu0 %v1538_v37, %s10127_s24 }
 0x262   : > { %v10900_v32 = vpop.permute.xlu1 %1983 }
 0x263   : > { %14957 = vst [vmem:[#allocation42_spill] sm:$0xff] %v10900_v32  ;;  %v10908_v40 = vpop.permute.xlu0 %2173  ;;  %v11066_v32 = vld [vmem:[#allocation3 + $0x182] sm:$0xff] }
 0x264   : > { %1811 = vrot.lane.b32.xlu1 %v10903_v56, %s10129_s13  ;;  %14958 = vst [vmem:[#allocation43_spill] sm:$0xff] %v10908_v40  ;;  %v1541_v40 = vld [vmem:[#allocation3 + $0x14a] sm:$0xff] }
 0x265   : > { %2001 = vrot.lane.b32.xlu0 %v1346_v21, %s10130_s16 }
 0x266   : > { %v10910_v42 = vpop.permute.xlu1 %2175 }
 0x267   : > { %14959 = vst [vmem:[#allocation44_spill] sm:$0xff] %v10910_v42  ;;  %v10914_v43 = vpop.permute.xlu0 %1793 }
 0x268   : > { %2003 = vrot.lane.b32.xlu1 %v1347_v10, %s10130_s16  ;;  %14960 = vst [vmem:[#allocation45_spill] sm:$0xff] %v10914_v43  ;;  %v11011_v43 = vld [vmem:[#allocation3 + $0x168] sm:$0xff] }
 0x269   : > { %2193 = vrot.lane.b32.xlu0 %v1538_v37, %s10131_s8 }
 0x26a   : > { %v10916_v44 = vpop.permute.xlu1 %2364 }
 0x26b   : > { %14961 = vst [vmem:[#allocation46_spill] sm:$0xff] %v10916_v44  ;;  %v10922_v41 = vpop.permute.xlu0 %2366 }
 0x26c   : > { %2195 = vrot.lane.b32.xlu1 %v1539_v12, %s10131_s8  ;;  %14962 = vst [vmem:[#allocation47_spill] sm:$0xff] %v10922_v41  ;;  %v10936_v12 = vld [vmem:[#allocation3 + $0x149] sm:$0xff]  ;;  %v1156_v41 = vpop.f32.mrb[67].mxu0 }
 0x26d   : > { %1813 = vrot.lane.b32.xlu0 %v10920_v46, %s10129_s13  ;;  %1250 = vst.msk [vmem:[#allocation3 + $0x208] sm:$0xff] %vm1184_vm11, %v1156_v41 }
 0x26e   : > { %v10924_v16 = vpop.permute.xlu1 %1414 }
 0x26f   : > { %14963 = vst [vmem:[#allocation48_spill] sm:$0xff] %v10924_v16  ;;  %v10930_v10 = vpop.permute.xlu0 %1412 }
 0x270   : > { %2384 = vrot.lane.b32.xlu1 %v10903_v56, %s10132_s6  ;;  %14964 = vst [vmem:[#allocation49_spill] sm:$0xff] %v10930_v10 }
 0x271   : > { %2386 = vrot.lane.b32.xlu0 %v10920_v46, %s10132_s6 }
 0x272   : > { %v10932_v21 = vpop.permute.xlu1 %1606 }
 0x273   : > { %14965 = vst [vmem:[#allocation50_spill] sm:$0xff] %v10932_v21  ;;  %v10942_v37 = vpop.permute.xlu0 %1604  ;;  %v10946_v21 = vld [vmem:[#allocation3 + $0x141] sm:$0xff] }
 0x274   : > { %1434 = vrot.lane.b32.xlu1 %v10936_v12, %s10128_s26  ;;  %14966 = vst [vmem:[#allocation51_spill] sm:$0xff] %v10942_v37  ;;  %v1744_v30 = vld [vmem:[#allocation3 + $0x208] sm:$0xff] }
 0x275   : > { %1432 = vrot.lane.b32.xlu0 %v10946_v21, %s10128_s26  ;;  %v11282_v35 = vld [vmem:[#allocation3 + $0x202] sm:$0xff] }
 0x276   : > { %v10944_v44 = vpop.permute.xlu1 %1795 }
 0x277   : > { %14967 = vst [vmem:[#allocation52_spill] sm:$0xff] %v10944_v44  ;;  %v10952_v22 = vpop.permute.xlu0 %1985  ;;  %v10975_v44 = vld [vmem:[#allocation3 + $0x160] sm:$0xff] }
 0x278   : > { %1626 = vrot.lane.b32.xlu1 %v1541_v40, %s10127_s24  ;;  %14968 = vst [vmem:[#allocation53_spill] sm:$0xff] %v10952_v22 }
 0x279   : > { %1624 = vrot.lane.b32.xlu0 %v1540_v24, %s10127_s24 }
 0x27a   : > { %v10954_v42 = vpop.permute.xlu1 %1987 }
 0x27b   : > { %14969 = vst [vmem:[#allocation54_spill] sm:$0xff] %v10954_v42  ;;  %v10961_v37 = vpop.permute.xlu0 %2177 }
 0x27c   : > { %1815 = vrot.lane.b32.xlu1 %v10956_v27, %s10129_s13  ;;  %14970 = vst [vmem:[#allocation55_spill] sm:$0xff] %v10961_v37 }
 0x27d   : > { %2005 = vrot.lane.b32.xlu0 %v10946_v21, %s10130_s16 }
 0x27e   : > { %v10963_v41 = vpop.permute.xlu1 %2179 }
 0x27f   : > { %14971 = vst [vmem:[#allocation56_spill] sm:$0xff] %v10963_v41  ;;  %v10969_v22 = vpop.permute.xlu0 %1797  ;;  %v9495_v41 = vpop.f32.mrb[68].mxu0 }
 0x280   : > { %2007 = vrot.lane.b32.xlu1 %v10936_v12, %s10130_s16  ;;  %14972 = vst [vmem:[#allocation57_spill] sm:$0xff] %v10969_v22  ;;  %1255 = vst.msk [vmem:[#allocation3 + $0x230] sm:$0xff] %vm1184_vm11, %v9495_v41  ;;  %v1169_v16 = vpop.f32.mrb[69].mxu0 }
 0x281   : > { %2197 = vrot.lane.b32.xlu0 %v1540_v24, %s10131_s8  ;;  %1253 = vst.msk [vmem:[#allocation3 + $0x220] sm:$0xff] %vm1184_vm11, %v1169_v16  ;;  %v9496_v24 = vpop.f32.mrb[70].mxu0  ;;  %v11002_v16 = vld [vmem:[#allocation3 + $0x161] sm:$0xff] }
 0x282   : > { %v10971_v42 = vpop.permute.xlu1 %2368  ;;  %v1543_v24 = vld [vmem:[#allocation3 + $0x16a] sm:$0xff] }
 0x283   : > { %14973 = vst [vmem:[#allocation58_spill] sm:$0xff] %v10971_v42  ;;  %v10977_v10 = vpop.permute.xlu0 %2370  ;;  %v1172_v42 = vpop.f32.mrb[71].mxu0 }
 0x284   : > { %2199 = vrot.lane.b32.xlu1 %v1541_v40, %s10131_s8  ;;  %14974 = vst [vmem:[#allocation59_spill] sm:$0xff] %v10977_v10  ;;  %1254 = vst.msk [vmem:[#allocation3 + $0x228] sm:$0xff] %vm1184_vm11, %v1172_v42  ;;  %v10994_v10 = vld [vmem:[#allocation3 + $0x169] sm:$0xff] }
 0x285   : > { %1817 = vrot.lane.b32.xlu0 %v10975_v44, %s10129_s13 }
 0x286   : > { %v10979_v37 = vpop.permute.xlu1 %1418 }
 0x287   : > { %14975 = vst [vmem:[#allocation60_spill] sm:$0xff] %v10979_v37  ;;  %v10987_v40 = vpop.permute.xlu0 %1416 }
 0x288   : > { %2388 = vrot.lane.b32.xlu1 %v10956_v27, %s10132_s6  ;;  %14976 = vst [vmem:[#allocation61_spill] sm:$0xff] %v10987_v40  ;;  %v1542_v40 = vld [vmem:[#allocation3 + $0x162] sm:$0xff] }
 0x289   : > { %2390 = vrot.lane.b32.xlu0 %v10975_v44, %s10132_s6 }
 0x28a   : > { %v10989_v22 = vpop.permute.xlu1 %1610 }
 0x28b   : > { %14977 = vst [vmem:[#allocation62_spill] sm:$0xff] %v10989_v22  ;;  %v10998_v41 = vpop.permute.xlu0 %1608 }
 0x28c   : > { %1438 = vrot.lane.b32.xlu1 %v10994_v10, %s10128_s26  ;;  %14978 = vst [vmem:[#allocation63_spill] sm:$0xff] %v10998_v41 }
 0x28d   : > { %1436 = vrot.lane.b32.xlu0 %v11002_v16, %s10128_s26 }
 0x28e   : > { %v11000_v37 = vpop.permute.xlu1 %1799 }
 0x28f   : > { %14979 = vst [vmem:[#allocation64_spill] sm:$0xff] %v11000_v37  ;;  %v11007_v42 = vpop.permute.xlu0 %1989 }
 0x290   : > { %1630 = vrot.lane.b32.xlu1 %v1543_v24, %s10127_s24  ;;  %14980 = vst [vmem:[#allocation65_spill] sm:$0xff] %v11007_v42 }
 0x291   : > { %1628 = vrot.lane.b32.xlu0 %v1542_v40, %s10127_s24 }
 0x292   : > { %v11009_v22 = vpop.permute.xlu1 %1991 }
 0x293   : > { %14981 = vst [vmem:[#allocation66_spill] sm:$0xff] %v11009_v22  ;;  %v11016_v41 = vpop.permute.xlu0 %2181 }
 0x294   : > { %1819 = vrot.lane.b32.xlu1 %v11011_v43, %s10129_s13  ;;  %14982 = vst [vmem:[#allocation67_spill] sm:$0xff] %v11016_v41 }
 0x295   : > { %2009 = vrot.lane.b32.xlu0 %v11002_v16, %s10130_s16 }
 0x296   : > { %v11018_v37 = vpop.permute.xlu1 %2183 }
 0x297   : > { %14983 = vst [vmem:[#allocation68_spill] sm:$0xff] %v11018_v37  ;;  %v11024_v42 = vpop.permute.xlu0 %1801 }
 0x298   : > { %2011 = vrot.lane.b32.xlu1 %v10994_v10, %s10130_s16  ;;  %14984 = vst [vmem:[#allocation69_spill] sm:$0xff] %v11024_v42 }
 0x299   : > { %2201 = vrot.lane.b32.xlu0 %v1542_v40, %s10131_s8  ;;  %v11046_v40 = vld [vmem:[#allocation3 + $0x189] sm:$0xff] }
 0x29a   : > { %v11026_v22 = vpop.permute.xlu1 %2372 }
 0x29b   : > { %14985 = vst [vmem:[#allocation70_spill] sm:$0xff] %v11026_v22  ;;  %v11032_v26 = vpop.permute.xlu0 %2374  ;;  %v11054_v22 = vld [vmem:[#allocation3 + $0x181] sm:$0xff] }
 0x29c   : > { %2203 = vrot.lane.b32.xlu1 %v1543_v24, %s10131_s8  ;;  %14986 = vst [vmem:[#allocation71_spill] sm:$0xff] %v11032_v26 }
 0x29d   : > { %1821 = vrot.lane.b32.xlu0 %v11030_v63, %s10129_s13 }
 0x29e   : > { %v11034_v41 = vpop.permute.xlu1 %1422 }
 0x29f   : > { %14987 = vst [vmem:[#allocation72_spill] sm:$0xff] %v11034_v41  ;;  %v11040_v37 = vpop.permute.xlu0 %1420  ;;  %v11056_v41 = vld [vmem:[#allocation3 + $0x18a] sm:$0xff] }
 0x2a0   : > { %2392 = vrot.lane.b32.xlu1 %v11011_v43, %s10132_s6  ;;  %14988 = vst [vmem:[#allocation73_spill] sm:$0xff] %v11040_v37 }
 0x2a1   : > { %2394 = vrot.lane.b32.xlu0 %v11030_v63, %s10132_s6 }
 0x2a2   : > { %v11042_v42 = vpop.permute.xlu1 %1614 }
 0x2a3   : > { %14989 = vst [vmem:[#allocation74_spill] sm:$0xff] %v11042_v42  ;;  %v11050_v24 = vpop.permute.xlu0 %1612 }
 0x2a4   : > { %1442 = vrot.lane.b32.xlu1 %v11046_v40, %s10128_s26  ;;  %14990 = vst [vmem:[#allocation75_spill] sm:$0xff] %v11050_v24 }
 0x2a5   : > { %1440 = vrot.lane.b32.xlu0 %v11054_v22, %s10128_s26 }
 0x2a6   : > { %v11052_v26 = vpop.permute.xlu1 %1803 }
 0x2a7   : > { %14991 = vst [vmem:[#allocation76_spill] sm:$0xff] %v11052_v26  ;;  %v11062_v42 = vpop.permute.xlu0 %1993 }
 0x2a8   : > { %1634 = vrot.lane.b32.xlu1 %v11056_v41, %s10127_s24  ;;  %14992 = vst [vmem:[#allocation77_spill] sm:$0xff] %v11062_v42 }
 0x2a9   : > { %1632 = vrot.lane.b32.xlu0 %v11066_v32, %s10127_s24 }
 0x2aa   : > { %v11064_v37 = vpop.permute.xlu1 %1995 }
 0x2ab   : > { %14993 = vst [vmem:[#allocation78_spill] sm:$0xff] %v11064_v37  ;;  %v11074_v24 = vpop.permute.xlu0 %2185 }
 0x2ac   : > { %1823 = vrot.lane.b32.xlu1 %v11068_v5, %s10129_s13  ;;  %14995 = vst [vmem:[#allocation80_spill] sm:$0xff] %v11074_v24 }
 0x2ad   : > { %2013 = vrot.lane.b32.xlu0 %v11054_v22, %s10130_s16 }
 0x2ae   : > { %v11076_v26 = vpop.permute.xlu1 %2187 }
 0x2af   : > { %14996 = vst [vmem:[#allocation81_spill] sm:$0xff] %v11076_v26  ;;  %v11082_v42 = vpop.permute.xlu0 %1805 }
 0x2b0   : > { %2015 = vrot.lane.b32.xlu1 %v11046_v40, %s10130_s16  ;;  %14997 = vst [vmem:[#allocation82_spill] sm:$0xff] %v11082_v42 }
 0x2b1   : > { %2205 = vrot.lane.b32.xlu0 %v11066_v32, %s10131_s8 }
 0x2b2   : > { %v11084_v37 = vpop.permute.xlu1 %2376 }
 0x2b3   : > { %14998 = vst [vmem:[#allocation83_spill] sm:$0xff] %v11084_v37  ;;  %v11092_v24 = vpop.permute.xlu0 %2378 }
 0x2b4   : > { %2207 = vrot.lane.b32.xlu1 %v11056_v41, %s10131_s8  ;;  %15000 = vst [vmem:[#allocation85_spill] sm:$0xff] %v11092_v24 }
 0x2b5   : > { %1825 = vrot.lane.b32.xlu0 %v11090_v17, %s10129_s13 }
 0x2b6   : > { %v11094_v26 = vpop.permute.xlu1 %1426 }
 0x2b7   : > { %15001 = vst [vmem:[#allocation86_spill] sm:$0xff] %v11094_v26  ;;  %v11100_v42 = vpop.permute.xlu0 %1424 }
 0x2b8   : > { %2396 = vrot.lane.b32.xlu1 %v11068_v5, %s10132_s6  ;;  %15002 = vst [vmem:[#allocation87_spill] sm:$0xff] %v11100_v42 }
 0x2b9   : > { %2398 = vrot.lane.b32.xlu0 %v11090_v17, %s10132_s6  ;;  %v11248_v17 = vld [vmem:[#allocation3 + $0x1e8] sm:$0xff] }
 0x2ba   : > { %v11102_v37 = vpop.permute.xlu1 %1618 }
 0x2bb   : > { %15003 = vst [vmem:[#allocation88_spill] sm:$0xff] %v11102_v37  ;;  %v11110_v24 = vpop.permute.xlu0 %1616 }
 0x2bc   : > { %1446 = vrot.lane.b32.xlu1 %v11106_v61, %s10128_s26  ;;  %15004 = vst [vmem:[#allocation89_spill] sm:$0xff] %v11110_v24 }
 0x2bd   : > { %1444 = vrot.lane.b32.xlu0 %v11114_v1, %s10128_s26 }
 0x2be   : > { %v11112_v26 = vpop.permute.xlu1 %1807 }
 0x2bf   : > { %15005 = vst [vmem:[#allocation90_spill] sm:$0xff] %v11112_v26  ;;  %v11122_v37 = vpop.permute.xlu0 %1997 }
 0x2c0   : > { %1638 = vrot.lane.b32.xlu1 %v11116_v20, %s10127_s24  ;;  %15006 = vst [vmem:[#allocation91_spill] sm:$0xff] %v11122_v37 }
 0x2c1   : > { %1636 = vrot.lane.b32.xlu0 %v11126_v3, %s10127_s24 }
 0x2c2   : > { %v11124_v42 = vpop.permute.xlu1 %1999 }
 0x2c3   : > { %15007 = vst [vmem:[#allocation92_spill] sm:$0xff] %v11124_v42  ;;  %v11134_v24 = vpop.permute.xlu0 %2189 }
 0x2c4   : > { %1827 = vrot.lane.b32.xlu1 %v11128_v60, %s10129_s13  ;;  %15009 = vst [vmem:[#allocation94_spill] sm:$0xff] %v11134_v24 }
 0x2c5   : > { %2017 = vrot.lane.b32.xlu0 %v11114_v1, %s10130_s16 }
 0x2c6   : > { %v11136_v26 = vpop.permute.xlu1 %2191 }
 0x2c7   : > { %15010 = vst [vmem:[#allocation95_spill] sm:$0xff] %v11136_v26  ;;  %v11142_v42 = vpop.permute.xlu0 %1809 }
 0x2c8   : > { %2019 = vrot.lane.b32.xlu1 %v11106_v61, %s10130_s16  ;;  %15011 = vst [vmem:[#allocation96_spill] sm:$0xff] %v11142_v42 }
 0x2c9   : > { %2209 = vrot.lane.b32.xlu0 %v11126_v3, %s10131_s8 }
 0x2ca   : > { %v11144_v37 = vpop.permute.xlu1 %2380 }
 0x2cb   : > { %15012 = vst [vmem:[#allocation97_spill] sm:$0xff] %v11144_v37  ;;  %v11152_v24 = vpop.permute.xlu0 %2382 }
 0x2cc   : > { %2211 = vrot.lane.b32.xlu1 %v11116_v20, %s10131_s8  ;;  %15014 = vst [vmem:[#allocation99_spill] sm:$0xff] %v11152_v24 }
 0x2cd   : > { %1829 = vrot.lane.b32.xlu0 %v11150_v57, %s10129_s13 }
 0x2ce   : > { %v11154_v26 = vpop.permute.xlu1 %1430 }
 0x2cf   : > { %15015 = vst [vmem:[#allocation100_spill] sm:$0xff] %v11154_v26  ;;  %v11160_v42 = vpop.permute.xlu0 %1428 }
 0x2d0   : > { %2400 = vrot.lane.b32.xlu1 %v11128_v60, %s10132_s6  ;;  %15016 = vst [vmem:[#allocation101_spill] sm:$0xff] %v11160_v42  ;;  %v11188_v60 = vld [vmem:[#allocation3 + $0x1c8] sm:$0xff] }
 0x2d1   : > { %2402 = vrot.lane.b32.xlu0 %v11150_v57, %s10132_s6  ;;  %v11186_v57 = vld [vmem:[#allocation3 + $0x1c2] sm:$0xff]  ;;  %15022 = vst [vmem:[#allocation107_spill] sm:$0xff] %v11188_v60 }
 0x2d2   : > { %v11162_v37 = vpop.permute.xlu1 %1622 }
 0x2d3   : > { %15017 = vst [vmem:[#allocation102_spill] sm:$0xff] %v11162_v37  ;;  %v11170_v24 = vpop.permute.xlu0 %1620 }
 0x2d4   : > { %1450 = vrot.lane.b32.xlu1 %v11166_v2, %s10128_s26  ;;  %15018 = vst [vmem:[#allocation103_spill] sm:$0xff] %v11170_v24 }
 0x2d5   : > { %1448 = vrot.lane.b32.xlu0 %v11174_v47, %s10128_s26 }
 0x2d6   : > { %v11172_v26 = vpop.permute.xlu1 %1811 }
 0x2d7   : > { %15019 = vst [vmem:[#allocation104_spill] sm:$0xff] %v11172_v26  ;;  %v11182_v37 = vpop.permute.xlu0 %2001 }
 0x2d8   : > { %1642 = vrot.lane.b32.xlu1 %v11176_v33, %s10127_s24  ;;  %15020 = vst [vmem:[#allocation105_spill] sm:$0xff] %v11182_v37 }
 0x2d9   : > { %1640 = vrot.lane.b32.xlu0 %v11186_v57, %s10127_s24 }
 0x2da   : > { %v11184_v42 = vpop.permute.xlu1 %2003 }
 0x2db   : > { %15021 = vst [vmem:[#allocation106_spill] sm:$0xff] %v11184_v42  ;;  %v11194_v24 = vpop.permute.xlu0 %2193 }
 0x2dc   : > { %1831 = vrot.lane.b32.xlu1 %v11188_v60, %s10129_s13  ;;  %15023 = vst [vmem:[#allocation108_spill] sm:$0xff] %v11194_v24 }
 0x2dd   : > { %2021 = vrot.lane.b32.xlu0 %v11174_v47, %s10130_s16 }
 0x2de   : > { %v11196_v26 = vpop.permute.xlu1 %2195 }
 0x2df   : > { %15024 = vst [vmem:[#allocation109_spill] sm:$0xff] %v11196_v26  ;;  %v11202_v42 = vpop.permute.xlu0 %1813 }
 0x2e0   : > { %2023 = vrot.lane.b32.xlu1 %v11166_v2, %s10130_s16  ;;  %15025 = vst [vmem:[#allocation110_spill] sm:$0xff] %v11202_v42 }
 0x2e1   : > { %2213 = vrot.lane.b32.xlu0 %v11186_v57, %s10131_s8 }
 0x2e2   : > { %v11204_v37 = vpop.permute.xlu1 %2384 }
 0x2e3   : > { %15026 = vst [vmem:[#allocation111_spill] sm:$0xff] %v11204_v37  ;;  %v11212_v24 = vpop.permute.xlu0 %2386 }
 0x2e4   : > { %2215 = vrot.lane.b32.xlu1 %v11176_v33, %s10131_s8  ;;  %15028 = vst [vmem:[#allocation113_spill] sm:$0xff] %v11212_v24 }
 0x2e5   : > { %1833 = vrot.lane.b32.xlu0 %v11210_v45, %s10129_s13 }
 0x2e6   : > { %v11214_v26 = vpop.permute.xlu1 %1434 }
 0x2e7   : > { %15029 = vst [vmem:[#allocation114_spill] sm:$0xff] %v11214_v26  ;;  %v11220_v42 = vpop.permute.xlu0 %1432 }
 0x2e8   : > { %2404 = vrot.lane.b32.xlu1 %v11188_v60, %s10132_s6  ;;  %15030 = vst [vmem:[#allocation115_spill] sm:$0xff] %v11220_v42  ;;  %v11238_v60 = vld [vmem:[#allocation3 + $0x1ea] sm:$0xff] }
 0x2e9   : > { %1452 = vrot.lane.b32.xlu0 %v11224_v38, %s10128_s26 }
 0x2ea   : > { %v11222_v37 = vpop.permute.xlu1 %1626 }
 0x2eb   : > { %15031 = vst [vmem:[#allocation116_spill] sm:$0xff] %v11222_v37  ;;  %v11232_v24 = vpop.permute.xlu0 %1624 }
 0x2ec   : > { %1454 = vrot.lane.b32.xlu1 %v11226_v36, %s10128_s26  ;;  %15032 = vst [vmem:[#allocation117_spill] sm:$0xff] %v11232_v24 }
 0x2ed   : > { %1644 = vrot.lane.b32.xlu0 %v11236_v28, %s10127_s24 }
 0x2ee   : > { %v11234_v26 = vpop.permute.xlu1 %1815 }
 0x2ef   : > { %15033 = vst [vmem:[#allocation118_spill] sm:$0xff] %v11234_v26  ;;  %v11244_v37 = vpop.permute.xlu0 %2005 }
 0x2f0   : > { %1646 = vrot.lane.b32.xlu1 %v11238_v60, %s10127_s24  ;;  %15034 = vst [vmem:[#allocation119_spill] sm:$0xff] %v11244_v37  ;;  %v1743_v37 = vld [vmem:[#allocation3 + $0x200] sm:$0xff] }
 0x2f1   : > { %2025 = vrot.lane.b32.xlu0 %v11224_v38, %s10130_s16 }
 0x2f2   : > { %v11246_v42 = vpop.permute.xlu1 %2007 }
 0x2f3   : > { %15035 = vst [vmem:[#allocation120_spill] sm:$0xff] %v11246_v42  ;;  %v11254_v24 = vpop.permute.xlu0 %2197 }
 0x2f4   : > { %1835 = vrot.lane.b32.xlu1 %v11248_v17, %s10129_s13  ;;  %15036 = vst [vmem:[#allocation121_spill] sm:$0xff] %v11254_v24 }
 0x2f5   : > { %2217 = vrot.lane.b32.xlu0 %v11236_v28, %s10131_s8 }
 0x2f6   : > { %v11256_v26 = vpop.permute.xlu1 %2199 }
 0x2f7   : > { %15037 = vst [vmem:[#allocation122_spill] sm:$0xff] %v11256_v26  ;;  %v11262_v42 = vpop.permute.xlu0 %1817  ;;  %v11273_v26 = vld [vmem:[#allocation3 + $0x201] sm:$0xff] }
 0x2f8   : > { %2027 = vrot.lane.b32.xlu1 %v11226_v36, %s10130_s16  ;;  %15038 = vst [vmem:[#allocation123_spill] sm:$0xff] %v11262_v42 }
 0x2f9   : > { %1837 = vrot.lane.b32.xlu0 %v1743_v37, %s10129_s13 }
 0x2fa   : > { %v11264_v39 = vpop.permute.xlu1 %2388 }
 0x2fb   : > { %15039 = vst [vmem:[#allocation124_spill] sm:$0xff] %v11264_v39  ;;  %v11269_v29 = vpop.permute.xlu0 %2390 }
 0x2fc   : > { %2219 = vrot.lane.b32.xlu1 %v11238_v60, %s10131_s8  ;;  %15040 = vst [vmem:[#allocation125_spill] sm:$0xff] %v11269_v29  ;;  %v11286_v29 = vld [vmem:[#allocation3 + $0x209] sm:$0xff] }
 0x2fd   : > { %2029 = vrot.lane.b32.xlu0 %v11273_v26, %s10130_s16 }
 0x2fe   : > { %v11271_v24 = vpop.permute.xlu1 %1438 }
 0x2ff   : > { %15041 = vst [vmem:[#allocation126_spill] sm:$0xff] %v11271_v24  ;;  %v11278_v42 = vpop.permute.xlu0 %1436 }
 0x300   : > { %1839 = vrot.lane.b32.xlu1 %v1744_v30, %s10129_s13  ;;  %15042 = vst [vmem:[#allocation127_spill] sm:$0xff] %v11278_v42  ;;  %v11296_v42 = vld [vmem:[#allocation3 + $0x20a] sm:$0xff] }
 0x301   : > { %2221 = vrot.lane.b32.xlu0 %v11282_v35, %s10131_s8 }
 0x302   : > { %v11280_v39 = vpop.permute.xlu1 %1630 }
 0x303   : > { %15043 = vst [vmem:[#allocation128_spill] sm:$0xff] %v11280_v39  ;;  %v11290_v24 = vpop.permute.xlu0 %1628 }
 0x304   : > { %2031 = vrot.lane.b32.xlu1 %v11286_v29, %s10130_s16  ;;  %15044 = vst [vmem:[#allocation129_spill] sm:$0xff] %v11290_v24  ;;  %v2320_v24 = vld [vmem:[#allocation3 + $0x220] sm:$0xff] }
 0x305   : > { %2406 = vrot.lane.b32.xlu0 %v11210_v45, %s10132_s6 }
 0x306   : > { %v11292_v34 = vpop.permute.xlu1 %1819 }
 0x307   : > { %15045 = vst [vmem:[#allocation130_spill] sm:$0xff] %v11292_v34  ;;  %v11300_v39 = vpop.permute.xlu0 %2009 }
 0x308   : > { %2223 = vrot.lane.b32.xlu1 %v11296_v42, %s10131_s8  ;;  %15046 = vst [vmem:[#allocation131_spill] sm:$0xff] %v11300_v39  ;;  %v2482_v39 = vld [vmem:[#allocation3 + $0x41] sm:$0xff] }
 0x309   : > { %2410 = vrot.lane.b32.xlu0 %v1743_v37, %s10132_s6  ;;  %v2321_v37 = vld [vmem:[#allocation3 + $0x228] sm:$0xff] }
 0x30a   : > { %v11302_v31 = vpop.permute.xlu1 %2011 }
 0x30b   : > { %15047 = vst [vmem:[#allocation132_spill] sm:$0xff] %v11302_v31  ;;  %v11307_v11 = vpop.permute.xlu0 %2201 }
 0x30c   : > { %2408 = vrot.lane.b32.xlu1 %v11248_v17, %s10132_s6  ;;  %15048 = vst [vmem:[#allocation133_spill] sm:$0xff] %v11307_v11 }
 0x30d   : > { %2414 = vrot.lane.b32.xlu0 %v2320_v24, %s10132_s6  ;;  %v2483_v24 = vld [vmem:[#allocation3 + $0x49] sm:$0xff] }
 0x30e   : > { %v11309_v34 = vpop.permute.xlu1 %2203 }
 0x30f   : > { %15049 = vst [vmem:[#allocation134_spill] sm:$0xff] %v11309_v34  ;;  %v11313_v45 = vpop.permute.xlu0 %1821  ;;  %v2484_v34 = vld [vmem:[#allocation3 + $0x61] sm:$0xff] }
 0x310   : > { %2412 = vrot.lane.b32.xlu1 %v1744_v30, %s10132_s6  ;;  %15050 = vst [vmem:[#allocation135_spill] sm:$0xff] %v11313_v45  ;;  %v2486_v45 = vld [vmem:[#allocation3 + $0x81] sm:$0xff] }
 0x311   : > { %2546 = vrot.lane.b32.xlu0 %v2482_v39, %s10133_s9  ;;  %v2485_v39 = vld [vmem:[#allocation3 + $0x69] sm:$0xff] }
 0x312   : > { %v11315_v5 = vpop.permute.xlu1 %2392 }
 0x313   : > { %15051 = vst [vmem:[#allocation136_spill] sm:$0xff] %v11315_v5  ;;  %v11319_v31 = vpop.permute.xlu0 %2394 }
 0x314   : > { %2416 = vrot.lane.b32.xlu1 %v2321_v37, %s10132_s6  ;;  %15052 = vst [vmem:[#allocation137_spill] sm:$0xff] %v11319_v31 }
 0x315   : > { %2550 = vrot.lane.b32.xlu0 %v2484_v34, %s10133_s9  ;;  %v2487_v34 = vld [vmem:[#allocation3 + $0x89] sm:$0xff] }
 0x316   : > { %v11321_v11 = vpop.permute.xlu1 %1442 }
 0x317   : > { %15053 = vst [vmem:[#allocation138_spill] sm:$0xff] %v11321_v11  ;;  %v11325_v30 = vpop.permute.xlu0 %1440  ;;  %v2488_v11 = vld [vmem:[#allocation3 + $0xa1] sm:$0xff] }
 0x318   : > { %2548 = vrot.lane.b32.xlu1 %v2483_v24, %s10133_s9  ;;  %15054 = vst [vmem:[#allocation139_spill] sm:$0xff] %v11325_v30 }
 0x319   : > { %2554 = vrot.lane.b32.xlu0 %v2486_v45, %s10133_s9  ;;  %v2489_v45 = vld [vmem:[#allocation3 + $0xa9] sm:$0xff] }
 0x31a   : > { %v11327_v5 = vpop.permute.xlu1 %1634 }
 0x31b   : > { %15055 = vst [vmem:[#allocation140_spill] sm:$0xff] %v11327_v5  ;;  %v11331_v37 = vpop.permute.xlu0 %1632  ;;  %v2490_v5 = vld [vmem:[#allocation3 + $0xc1] sm:$0xff] }
 0x31c   : > { %2552 = vrot.lane.b32.xlu1 %v2485_v39, %s10133_s9  ;;  %15056 = vst [vmem:[#allocation141_spill] sm:$0xff] %v11331_v37 }
 0x31d   : > { %2558 = vrot.lane.b32.xlu0 %v2488_v11, %s10133_s9  ;;  %v2491_v11 = vld [vmem:[#allocation3 + $0xc9] sm:$0xff] }
 0x31e   : > { %v11333_v31 = vpop.permute.xlu1 %1823 }
 0x31f   : > { %15057 = vst [vmem:[#allocation142_spill] sm:$0xff] %v11333_v31  ;;  %v11337_v24 = vpop.permute.xlu0 %2013  ;;  %v2492_v31 = vld [vmem:[#allocation3 + $0xe1] sm:$0xff] }
 0x320   : > { %2556 = vrot.lane.b32.xlu1 %v2487_v34, %s10133_s9  ;;  %15058 = vst [vmem:[#allocation143_spill] sm:$0xff] %v11337_v24 }
 0x321   : > { %2562 = vrot.lane.b32.xlu0 %v2490_v5, %s10133_s9  ;;  %v2493_v5 = vld [vmem:[#allocation3 + $0xe9] sm:$0xff] }
 0x322   : > { %v11339_v30 = vpop.permute.xlu1 %2015 }
 0x323   : > { %15059 = vst [vmem:[#allocation144_spill] sm:$0xff] %v11339_v30  ;;  %v11343_v39 = vpop.permute.xlu0 %2205  ;;  %v2494_v30 = vld [vmem:[#allocation3 + $0x101] sm:$0xff] }
 0x324   : > { %2560 = vrot.lane.b32.xlu1 %v2489_v45, %s10133_s9  ;;  %15060 = vst [vmem:[#allocation145_spill] sm:$0xff] %v11343_v39 }
 0x325   : > { %2566 = vrot.lane.b32.xlu0 %v2492_v31, %s10133_s9  ;;  %v2495_v31 = vld [vmem:[#allocation3 + $0x109] sm:$0xff] }
 0x326   : > { %v11345_v37 = vpop.permute.xlu1 %2207 }
 0x327   : > { %15061 = vst [vmem:[#allocation146_spill] sm:$0xff] %v11345_v37  ;;  %v11349_v34 = vpop.permute.xlu0 %1825  ;;  %v2496_v37 = vld [vmem:[#allocation3 + $0x121] sm:$0xff] }
 0x328   : > { %2564 = vrot.lane.b32.xlu1 %v2491_v11, %s10133_s9  ;;  %15062 = vst [vmem:[#allocation147_spill] sm:$0xff] %v11349_v34 }
 0x329   : > { %2570 = vrot.lane.b32.xlu0 %v2494_v30, %s10133_s9  ;;  %v2497_v30 = vld [vmem:[#allocation3 + $0x129] sm:$0xff] }
 0x32a   : > { %v11351_v24 = vpop.permute.xlu1 %2396 }
 0x32b   : > { %15063 = vst [vmem:[#allocation148_spill] sm:$0xff] %v11351_v24  ;;  %v11355_v45 = vpop.permute.xlu0 %2398  ;;  %v9849_v24 = vld [vmem:[#allocation3 + $0xe0] sm:$0xff] }
 0x32c   : > { %2568 = vrot.lane.b32.xlu1 %v2493_v5, %s10133_s9  ;;  %15064 = vst [vmem:[#allocation149_spill] sm:$0xff] %v11355_v45 }
 0x32d   : > { %2574 = vrot.lane.b32.xlu0 %v2496_v37, %s10133_s9 }
 0x32e   : > { %v11357_v39 = vpop.permute.xlu1 %1446 }
 0x32f   : > { %15065 = vst [vmem:[#allocation150_spill] sm:$0xff] %v11357_v39  ;;  %v11361_v11 = vpop.permute.xlu0 %1444  ;;  %v9848_v39 = vld [vmem:[#allocation3 + $0xe8] sm:$0xff] }
 0x330   : > { %2572 = vrot.lane.b32.xlu1 %v2495_v31, %s10133_s9  ;;  %15066 = vst [vmem:[#allocation151_spill] sm:$0xff] %v11361_v11 }
 0x331   : > { %2578 = vrot.lane.b32.xlu0 %v10946_v21, %s10133_s9 }
 0x332   : > { %v11363_v34 = vpop.permute.xlu1 %1638 }
 0x333   : > { %15067 = vst [vmem:[#allocation152_spill] sm:$0xff] %v11363_v34  ;;  %v11368_v5 = vpop.permute.xlu0 %1636  ;;  %v9844_v34 = vld [vmem:[#allocation3 + $0xa8] sm:$0xff] }
 0x334   : > { %2576 = vrot.lane.b32.xlu1 %v2497_v30, %s10133_s9  ;;  %15068 = vst [vmem:[#allocation153_spill] sm:$0xff] %v11368_v5  ;;  %v9839_v5 = vld [vmem:[#allocation3 + $0x40] sm:$0xff] }
 0x335   : > { %2582 = vrot.lane.b32.xlu0 %v11002_v16, %s10133_s9 }
 0x336   : > { %v11370_v45 = vpop.permute.xlu1 %1827 }
 0x337   : > { %15069 = vst [vmem:[#allocation154_spill] sm:$0xff] %v11370_v45  ;;  %v11376_v37 = vpop.permute.xlu0 %2017 }
 0x338   : > { %2580 = vrot.lane.b32.xlu1 %v10936_v12, %s10133_s9  ;;  %15070 = vst [vmem:[#allocation155_spill] sm:$0xff] %v11376_v37 }
 0x339   : > { %2586 = vrot.lane.b32.xlu0 %v11054_v22, %s10133_s9 }
 0x33a   : > { %v11378_v31 = vpop.permute.xlu1 %2019 }
 0x33b   : > { %15071 = vst [vmem:[#allocation156_spill] sm:$0xff] %v11378_v31  ;;  %v11384_v21 = vpop.permute.xlu0 %2209 }
 0x33c   : > { %2584 = vrot.lane.b32.xlu1 %v10994_v10, %s10133_s9  ;;  %15072 = vst [vmem:[#allocation157_spill] sm:$0xff] %v11384_v21  ;;  %v9837_v21 = vld [vmem:[#allocation3 + $0x28] sm:$0xff] }
 0x33d   : > { %2590 = vrot.lane.b32.xlu0 %v11114_v1, %s10133_s9 }
 0x33e   : > { %v11386_v30 = vpop.permute.xlu1 %2211 }
 0x33f   : > { %15073 = vst [vmem:[#allocation158_spill] sm:$0xff] %v11386_v30  ;;  %v11392_v12 = vpop.permute.xlu0 %1829 }
 0x340   : > { %2588 = vrot.lane.b32.xlu1 %v11046_v40, %s10133_s9  ;;  %15074 = vst [vmem:[#allocation159_spill] sm:$0xff] %v11392_v12  ;;  %v9836_v12 = vld [vmem:[#allocation3 + $0x20] sm:$0xff] }
 0x341   : > { %2594 = vrot.lane.b32.xlu0 %v11174_v47, %s10133_s9  ;;  %v9831_v47 = vld [vmem:[#allocation7 + $0x10] sm:$0xff]  }
 0x342   : > { %v11394_v16 = vpop.permute.xlu1 %2400  ;;  %9497 = vmatprep.subr.bf16.mxu1 %v9831_v47 }
 0x343   : > { %15075 = vst [vmem:[#allocation160_spill] sm:$0xff] %v11394_v16  ;;  %v11400_v10 = vpop.permute.xlu0 %2402  ;;  %9498 = vmatpush3.bf16.msra.mxu1 %v9831_v47 }
 0x344   : > { %2592 = vrot.lane.b32.xlu1 %v11106_v61, %s10133_s9  ;;  %15076 = vst [vmem:[#allocation161_spill] sm:$0xff] %v11400_v10  ;;  %v2512_v10 = vld [vmem:[#allocation3 + $0x221] sm:$0xff] }
 0x345   : > { %2598 = vrot.lane.b32.xlu0 %v11224_v38, %s10133_s9  ;;  %v3222_v38 = vld [vmem:[#allocation2] sm:$0xff] }
 0x346   : > { %v11402_v22 = vpop.permute.xlu1 %1450  ;;  %9499 = vmatprep.mubr.msk.bf16.mxu1 %vm3267_vm12, %v3222_v38  ;;  %v2675_v38 = vld [vmem:[#allocation3 + $0x4a] sm:$0xff] }
 0x347   : > { %15077 = vst [vmem:[#allocation162_spill] sm:$0xff] %v11402_v22  ;;  %v11408_v1 = vpop.permute.xlu0 %1448 }
 0x348   : > { %2596 = vrot.lane.b32.xlu1 %v11166_v2, %s10133_s9  ;;  %15078 = vst [vmem:[#allocation163_spill] sm:$0xff] %v11408_v1 }
 0x349   : > { %2602 = vrot.lane.b32.xlu0 %v11273_v26, %s10133_s9 }
 0x34a   : > { %v11410_v40 = vpop.permute.xlu1 %1642 }
 0x34b   : > { %15079 = vst [vmem:[#allocation164_spill] sm:$0xff] %v11410_v40  ;;  %v11416_v61 = vpop.permute.xlu0 %1640 }
 0x34c   : > { %2600 = vrot.lane.b32.xlu1 %v11226_v36, %s10133_s9  ;;  %15080 = vst [vmem:[#allocation165_spill] sm:$0xff] %v11416_v61  ;;  %v3223_v36 = vld [vmem:[#allocation2 + $0x8] sm:$0xff] }
 0x34d   : > { %2606 = vrot.lane.b32.xlu0 %v2512_v10, %s10133_s9  ;;  %v2674_v61 = vld [vmem:[#allocation3 + $0x42] sm:$0xff]  ;;  %9500 = vmatmul.mubr.msk.bf16.vlgmr.msra.gmra.mrb[0].mxu1 %vm3267_vm12, %v3223_v36 }
 0x34e   : > { %v11418_v22 = vpop.permute.xlu1 %1831  ;;  %v2513_v10 = vld [vmem:[#allocation3 + $0x229] sm:$0xff] }
 0x34f   : > { %15081 = vst [vmem:[#allocation166_spill] sm:$0xff] %v11418_v22  ;;  %v11423_v2 = vpop.permute.xlu0 %2021  ;;  %v2676_v22 = vld [vmem:[#allocation3 + $0x62] sm:$0xff] }
 0x350   : > { %2604 = vrot.lane.b32.xlu1 %v11286_v29, %s10133_s9  ;;  %15082 = vst [vmem:[#allocation167_spill] sm:$0xff] %v11423_v2  ;;  %v2678_v36 = vld [vmem:[#allocation3 + $0x82] sm:$0xff] }
 0x351   : > { %2738 = vrot.lane.b32.xlu0 %v2674_v61, %s10134_s11  ;;  %v2677_v61 = vld [vmem:[#allocation3 + $0x6a] sm:$0xff] }
 0x352   : > { %v11426_v26 = vpop.permute.xlu1 %2023 }
 0x353   : > { %15083 = vst [vmem:[#allocation168_spill] sm:$0xff] %v11426_v26  ;;  %v11431_v47 = vpop.permute.xlu0 %2213 }
 0x354   : > { %2608 = vrot.lane.b32.xlu1 %v2513_v10, %s10133_s9  ;;  %15084 = vst [vmem:[#allocation169_spill] sm:$0xff] %v11431_v47 }
 0x355   : > { %2742 = vrot.lane.b32.xlu0 %v2676_v22, %s10134_s11  ;;  %v2679_v22 = vld [vmem:[#allocation3 + $0x8a] sm:$0xff] }
 0x356   : > { %v11433_v29 = vpop.permute.xlu1 %2215 }
 0x357   : > { %15085 = vst [vmem:[#allocation170_spill] sm:$0xff] %v11433_v29  ;;  %v11437_v2 = vpop.permute.xlu0 %1833  ;;  %v2680_v29 = vld [vmem:[#allocation3 + $0xa2] sm:$0xff] }
 0x358   : > { %2740 = vrot.lane.b32.xlu1 %v2675_v38, %s10134_s11  ;;  %15086 = vst [vmem:[#allocation171_spill] sm:$0xff] %v11437_v2 }
 0x359   : > { %2746 = vrot.lane.b32.xlu0 %v2678_v36, %s10134_s11  ;;  %v2681_v36 = vld [vmem:[#allocation3 + $0xaa] sm:$0xff] }
 0x35a   : > { %v11439_v26 = vpop.permute.xlu1 %2404 }
 0x35b   : > { %15087 = vst [vmem:[#allocation172_spill] sm:$0xff] %v11439_v26  ;;  %v11443_v10 = vpop.permute.xlu0 %1452  ;;  %v2682_v26 = vld [vmem:[#allocation3 + $0xc2] sm:$0xff] }
 0x35c   : > { %2744 = vrot.lane.b32.xlu1 %v2677_v61, %s10134_s11  ;;  %15088 = vst [vmem:[#allocation173_spill] sm:$0xff] %v11443_v10 }
 0x35d   : > { %2750 = vrot.lane.b32.xlu0 %v2680_v29, %s10134_s11  ;;  %v2683_v29 = vld [vmem:[#allocation3 + $0xca] sm:$0xff] }
 0x35e   : > { %v11445_v47 = vpop.permute.xlu1 %1454 }
 0x35f   : > { %15089 = vst [vmem:[#allocation174_spill] sm:$0xff] %v11445_v47  ;;  %v11449_v38 = vpop.permute.xlu0 %1644  ;;  %v2684_v47 = vld [vmem:[#allocation3 + $0xe2] sm:$0xff] }
 0x360   : > { %2748 = vrot.lane.b32.xlu1 %v2679_v22, %s10134_s11  ;;  %15090 = vst [vmem:[#allocation175_spill] sm:$0xff] %v11449_v38 }
 0x361   : > { %2754 = vrot.lane.b32.xlu0 %v2682_v26, %s10134_s11  ;;  %v2685_v26 = vld [vmem:[#allocation3 + $0xea] sm:$0xff] }
 0x362   : > { %v11451_v2 = vpop.permute.xlu1 %1646 }
 0x363   : > { %15091 = vst [vmem:[#allocation176_spill] sm:$0xff] %v11451_v2  ;;  %v11455_v61 = vpop.permute.xlu0 %2025  ;;  %v2686_v2 = vld [vmem:[#allocation3 + $0x102] sm:$0xff] }
 0x364   : > { %2752 = vrot.lane.b32.xlu1 %v2681_v36, %s10134_s11  ;;  %15092 = vst [vmem:[#allocation177_spill] sm:$0xff] %v11455_v61 }
 0x365   : > { %2758 = vrot.lane.b32.xlu0 %v2684_v47, %s10134_s11  ;;  %v2687_v47 = vld [vmem:[#allocation3 + $0x10a] sm:$0xff] }
 0x366   : > { %v11457_v10 = vpop.permute.xlu1 %1835 }
 0x367   : > { %15093 = vst [vmem:[#allocation178_spill] sm:$0xff] %v11457_v10  ;;  %v11461_v22 = vpop.permute.xlu0 %2217  ;;  %v2688_v10 = vld [vmem:[#allocation3 + $0x122] sm:$0xff] }
 0x368   : > { %2756 = vrot.lane.b32.xlu1 %v2683_v29, %s10134_s11  ;;  %15094 = vst [vmem:[#allocation179_spill] sm:$0xff] %v11461_v22 }
 0x369   : > { %2762 = vrot.lane.b32.xlu0 %v2686_v2, %s10134_s11  ;;  %v2689_v2 = vld [vmem:[#allocation3 + $0x12a] sm:$0xff] }
 0x36a   : > { %v11463_v38 = vpop.permute.xlu1 %2027 }
 0x36b   : > { %15095 = vst [vmem:[#allocation180_spill] sm:$0xff] %v11463_v38  ;;  %v11467_v36 = vpop.permute.xlu0 %1837  ;;  %v2690_v38 = vld [vmem:[#allocation3 + $0x142] sm:$0xff] }
 0x36c   : > { %2760 = vrot.lane.b32.xlu1 %v2685_v26, %s10134_s11  ;;  %15096 = vst [vmem:[#allocation181_spill] sm:$0xff] %v11467_v36 }
 0x36d   : > { %2766 = vrot.lane.b32.xlu0 %v2688_v10, %s10134_s11  ;;  %v2691_v10 = vld [vmem:[#allocation3 + $0x14a] sm:$0xff] }
 0x36e   : > { %v11469_v61 = vpop.permute.xlu1 %2219 }
 0x36f   : > { %15097 = vst [vmem:[#allocation182_spill] sm:$0xff] %v11469_v61  ;;  %v11473_v29 = vpop.permute.xlu0 %2029  ;;  %v2692_v61 = vld [vmem:[#allocation3 + $0x162] sm:$0xff] }
 0x370   : > { %2764 = vrot.lane.b32.xlu1 %v2687_v47, %s10134_s11  ;;  %15098 = vst [vmem:[#allocation183_spill] sm:$0xff] %v11473_v29 }
 0x371   : > { %2770 = vrot.lane.b32.xlu0 %v2690_v38, %s10134_s11  ;;  %v2693_v38 = vld [vmem:[#allocation3 + $0x16a] sm:$0xff] }
 0x372   : > { %v11475_v22 = vpop.permute.xlu1 %1839 }
 0x373   : > { %15099 = vst [vmem:[#allocation184_spill] sm:$0xff] %v11475_v22  ;;  %v11479_v26 = vpop.permute.xlu0 %2221  ;;  %v11550_v22 = vld [vmem:[#allocation9] ss:$0 sm:$0xff] }
 0x374   : > { %2768 = vrot.lane.b32.xlu1 %v2689_v2, %s10134_s11  ;;  %15100 = vst [vmem:[#allocation185_spill] sm:$0xff] %v11479_v26  ;;  %v1298_v16 = vadd.f32 %v9836_v12, %v11550_v22  ;;  %v1299_v31 = vadd.f32 %v9837_v21, %v11550_v22  ;;  %v1300_v45 = vadd.f32 %v9839_v5, %v11550_v22  ;;  %v9843_v21 = vld [vmem:[#allocation3 + $0x80] sm:$0xff] }
 0x375   : > { %2774 = vrot.lane.b32.xlu0 %v2692_v61, %s10134_s11  ;;  %v11575_v5 = vadd.f32 %v9844_v34, %v11550_v22  ;;  %v11589_v34 = vadd.f32 %v9848_v39, %v11550_v22 }
 0x376   : > { %v11481_v36 = vpop.permute.xlu1 %2031 }
 0x377   : > { %15101 = vst [vmem:[#allocation186_spill] sm:$0xff] %v11481_v36  ;;  %v11485_v47 = vpop.permute.xlu0 %2406 }
 0x378   : > { %2772 = vrot.lane.b32.xlu1 %v2691_v10, %s10134_s11  ;;  %15102 = vst [vmem:[#allocation187_spill] sm:$0xff] %v11485_v47 }
 0x379   : > { %2778 = vrot.lane.b32.xlu0 %v11066_v32, %s10134_s11 }
 0x37a   : > { %v11487_v29 = vpop.permute.xlu1 %2223 }
 0x37b   : > { %15103 = vst [vmem:[#allocation188_spill] sm:$0xff] %v11487_v29  ;;  %v11492_v2 = vpop.permute.xlu0 %2410 }
 0x37c   : > { %2776 = vrot.lane.b32.xlu1 %v2693_v38, %s10134_s11  ;;  %15104 = vst [vmem:[#allocation189_spill] sm:$0xff] %v11492_v2 }
 0x37d   : > { %2782 = vrot.lane.b32.xlu0 %v11126_v3, %s10134_s11 }
 0x37e   : > { %v11494_v26 = vpop.permute.xlu1 %2408 }
 0x37f   : > { %15105 = vst [vmem:[#allocation190_spill] sm:$0xff] %v11494_v26  ;;  %v11500_v61 = vpop.permute.xlu0 %2414  ;;  %v1258_v26 = vld [vmem:[#allocation3] sm:$0xff] }
 0x380   : > { %2780 = vrot.lane.b32.xlu1 %v11056_v41, %s10134_s11  ;;  %15106 = vst [vmem:[#allocation191_spill] sm:$0xff] %v11500_v61  ;;  %v2705_v61 = vld [vmem:[#allocation3 + $0x22a] sm:$0xff]  ;;  %v1296_v1 = vadd.f32 %v11550_v22, %v1258_v26 }
 0x381   : > { %2786 = vrot.lane.b32.xlu0 %v11186_v57, %s10134_s11 }
 0x382   : > { %v11502_v10 = vpop.permute.xlu1 %2412 }
 0x383   : > { %15107 = vst [vmem:[#allocation192_spill] sm:$0xff] %v11502_v10  ;;  %v11508_v32 = vpop.permute.xlu0 %2546 }
 0x384   : > { %2784 = vrot.lane.b32.xlu1 %v11116_v20, %s10134_s11 }
 0x385   : > { %2790 = vrot.lane.b32.xlu0 %v11236_v28, %s10134_s11 }
 0x386   : > { %v11510_v38 = vpop.permute.xlu1 %2416 }
 0x387   : > { %15108 = vst [vmem:[#allocation193_spill] sm:$0xff] %v11510_v38  ;;  %v11516_v3 = vpop.permute.xlu0 %2550  ;;  %v2704_v38 = vld [vmem:[#allocation3 + $0x222] sm:$0xff] }
 0x388   : > { %2788 = vrot.lane.b32.xlu1 %v11176_v33, %s10134_s11 }
 0x389   : > { %2794 = vrot.lane.b32.xlu0 %v11282_v35, %s10134_s11 }
 0x38a   : > { %v11518_v41 = vpop.permute.xlu1 %2548 }
 0x38b   : > { %v11524_v57 = vpop.permute.xlu0 %2554 }
 0x38c   : > { %2792 = vrot.lane.b32.xlu1 %v11238_v60, %s10134_s11 }
 0x38d   : > { %2798 = vrot.lane.b32.xlu0 %v2704_v38, %s10134_s11 }
 0x38e   : > { %v11526_v20 = vpop.permute.xlu1 %2552 }
 0x38f   : > { %v11531_v28 = vpop.permute.xlu0 %2558 }
 0x390   : > { %2796 = vrot.lane.b32.xlu1 %v11296_v42, %s10134_s11  ;;  %v1259_v42 = vld [vmem:[#allocation3 + $0x8] sm:$0xff] }
 0x392   : > { %v11533_v33 = vpop.permute.xlu1 %2556 }
 0x393   : > { %v11536_v35 = vpop.permute.xlu0 %2562 }
 0x394   : > { %2800 = vrot.lane.b32.xlu1 %v2705_v61, %s10134_s11  ;;  %v1297_v61 = vadd.f32 %v11550_v22, %v1259_v42 }
 0x396   : > { %v11538_v60 = vpop.permute.xlu1 %2560  ;;  %v1489_v40 = vadd.f32 %v10747_v49, %v1297_v61  ;;  %v1488_v49 = vadd.f32 %v10743_v48, %v1296_v1  ;;  %v9841_v61 = vld [vmem:[#allocation3 + $0x68] sm:$0xff] }
 0x397   : > { %v11540_v29 = vpop.permute.xlu0 %2566  ;;  %v1303_v12 = vadd.f32 %v9841_v61, %v11550_v22  ;;  %v9846_v48 = vld [vmem:[#allocation3 + $0xc8] sm:$0xff]  ;;  %v9847_v61 = vld [vmem:[#allocation3 + $0xc0] sm:$0xff] }
 0x398   : > { %15109 = vst [vmem:[#allocation194_spill] sm:$0xff] %v11540_v29  ;;  %v11581_v1 = vadd.f32 %v9846_v48, %v11550_v22  ;;  %v1490_v48 = vadd.f32 %v10755_v53, %v1298_v16  ;;  %v1491_v29 = vadd.f32 %v10761_v55, %v1299_v31  ;;  %v11615_v53 = vadd.f32 %v11550_v22, %v10873_v62 }
 0x399   : > { %v11621_v31 = vadd.f32 %v11550_v22, %v10956_v27  ;;  %v1492_v16 = vadd.f32 %v10798_v14, %v1300_v45  ;;  %v11632_v62 = vadd.f32 %v11550_v22, %v10975_v44  ;;  %v11650_v45 = vadd.f32 %v11550_v22, %v11030_v63 }
 0x39a   : > { %v11542_v10 = vpop.permute.xlu1 %2564  ;;  %v1682_v55 = vadd.f32 %v10765_v58, %v1490_v48 }
 0x39b   : > { %v11544_v36 = vpop.permute.xlu0 %2570  ;;  %v1684_v44 = vadd.f32 %v10804_v18, %v1492_v16  ;;  %v15119_v18 = vld [vmem:[#allocation24_spill] sm:$0xff] }
 0x39c   : > { %15110 = vst [vmem:[#allocation195_spill] sm:$0xff] %v11544_v36  ;;  %v1680_v36 = vadd.f32 %v10753_v52, %v1488_v49  ;;  %v9850_v52 = vld [vmem:[#allocation3 + $0x100] sm:$0xff]  ;;  %v11611_v49 = vadd.f32 %v11550_v22, %v10903_v56  ;;  %v1495_v48 = vadd.f32 %v15119_v18, %v1303_v12 }
 0x39d   : > { %v15128_v12 = vld [vmem:[#allocation26_spill] sm:$0xff] }
 0x39e   : > { %v11546_v38 = vpop.permute.xlu1 %2568 }
 0x39f   : > { %15111 = vst [vmem:[#allocation196_spill] sm:$0xff] %v11546_v38  ;;  %v11548_v2 = vpop.permute.xlu0 %2574 }
 0x3a0   : > { %15112 = vst [vmem:[#allocation197_spill] sm:$0xff] %v11548_v2  ;;  %v9838_v2 = vld [vmem:[#allocation3 + $0x48] sm:$0xff] }
 0x3a1   : > { %v1301_v37 = vadd.f32 %v9838_v2, %v11550_v22  ;;  %v11572_v2 = vadd.f32 %v9843_v21, %v11550_v22  ;;  %v1681_v21 = vadd.f32 %v10749_v50, %v1489_v40  ;;  %v11603_v50 = vadd.f32 %v9850_v52, %v11550_v22  ;;  %v15120_v52 = vld [vmem:[#allocation25_spill] sm:$0xff] }
 0x3a2   : > { %v11552_v47 = vpop.permute.xlu1 %2572  ;;  %v1873_v40 = vadd.f32 %v10759_v54, %v1680_v36  ;;  %v11625_v54 = vadd.f32 %v11550_v22, %v10920_v46  ;;  %v11641_v46 = vadd.f32 %v11550_v22, %v11011_v43  ;;  %v15116_v43 = vld [vmem:[#allocation79_spill] sm:$0xff] }
 0x3a3   : > { %15113 = vst [vmem:[#allocation198_spill] sm:$0xff] %v11552_v47  ;;  %v11558_v30 = vpop.permute.xlu0 %2578  ;;  %v9840_v47 = vld [vmem:[#allocation3 + $0x60] sm:$0xff]  ;;  %v1493_v27 = vadd.f32 %v10794_v13, %v1301_v37  ;;  %v11657_v37 = vadd.f32 %v11550_v22, %v15116_v43 }
 0x3a4   : > { %15114 = vst [vmem:[#allocation199_spill] sm:$0xff] %v11558_v30  ;;  %v1302_v42 = vadd.f32 %v9840_v47, %v11550_v22  ;;  %v9842_v30 = vld [vmem:[#allocation3 + $0x88] sm:$0xff]  ;;  %v9845_v47 = vld [vmem:[#allocation3 + $0xa0] sm:$0xff] }
 0x3a5   : > { %v11569_v11 = vadd.f32 %v9842_v30, %v11550_v22  ;;  %v11584_v30 = vadd.f32 %v9847_v61, %v11550_v22  ;;  %v11600_v61 = vadd.f32 %v11550_v22, %v10856_v51  ;;  %v1683_v51 = vadd.f32 %v10767_v59, %v1491_v29  ;;  %v15117_v29 = vld [vmem:[#allocation18_spill] sm:$0xff] }
 0x3a6   : > { %v11564_v26 = vpop.permute.xlu1 %2576  ;;  %v1875_v59 = vadd.f32 %v10786_v8, %v1682_v55  ;;  %v1685_v8 = vadd.f32 %v10800_v15, %v1493_v27  ;;  %v1494_v63 = vadd.f32 %v15120_v52, %v1302_v42  ;;  %v15122_v15 = vld [vmem:[#allocation20_spill] sm:$0xff]  ;;  %v15129_v42 = vld [vmem:[#allocation27_spill] sm:$0xff]  ;;  %v15134_v52 = vld [vmem:[#allocation93_spill] sm:$0xff] }
 0x3a7   : > { %15115 = vst [vmem:[#allocation200_spill] sm:$0xff] %v11564_v26  ;;  %v11578_v26 = vadd.f32 %v9845_v47, %v11550_v22  ;;  %v11592_v47 = vadd.f32 %v9849_v24, %v11550_v22  ;;  %v11594_v38 = vpop.permute.xlu0 %2582  ;;  %v1874_v24 = vadd.f32 %v10775_v4, %v1681_v21  ;;  %v2065_v4 = vadd.f32 %v10773_v0, %v1873_v40 }
 0x3a8   : > { %v1876_v36 = vadd.f32 %v10806_v19, %v1683_v51  ;;  %v2067_v19 = vadd.f32 %v10812_v23, %v1875_v59  ;;  %v15124_v23 = vld [vmem:[#allocation28_spill] sm:$0xff]  ;;  %v15127_v59 = vld [vmem:[#allocation22_spill] sm:$0xff] }
 0x3a9   : > { %v2066_v56 = vadd.f32 %v10782_v7, %v1874_v24  ;;  %v2257_v7 = vadd.f32 %v10780_v6, %v2065_v4  ;;  %v1878_v51 = vadd.f32 %v15124_v23, %v1685_v8  ;;  %v15125_v4 = vld [vmem:[#allocation84_spill] sm:$0xff]  ;;  %v15136_v23 = vld [vmem:[#allocation33_spill] sm:$0xff] }
 0x3aa   : > { %v11605_v39 = vpop.permute.xlu1 %2580  ;;  %v2068_v13 = vadd.f32 %v10814_v25, %v1876_v36  ;;  %v15123_v25 = vld [vmem:[#allocation19_spill] sm:$0xff]  ;;  %v1687_v36 = vadd.f32 %v15128_v12, %v1495_v48  ;;  %v15140_v12 = vld [vmem:[#allocation32_spill] sm:$0xff] }
 0x3ab   : > { %v11634_v58 = vpop.permute.xlu0 %2586  ;;  %v2258_v14 = vadd.f32 %v10788_v9, %v2066_v56  ;;  %v11660_v6 = vadd.f32 %v15117_v29, %v2257_v7  ;;  %v15118_v9 = vld [vmem:[#allocation21_spill] sm:$0xff]  ;;  %v2259_v55 = vadd.f32 %v15123_v25, %v2067_v19  ;;  %v11672_v56 = vadd.f32 %v11550_v22, %v15125_v4  ;;  %v15132_v19 = vld [vmem:[#allocation30_spill] sm:$0xff] }
 0x3ac   : > { %v1877_v21 = vadd.f32 %v15118_v9, %v1684_v44  ;;  %v2260_v24 = vadd.f32 %v15122_v15, %v2068_v13  ;;  %v1686_v7 = vadd.f32 %v15129_v42, %v1494_v63  ;;  %v15130_v44 = vld [vmem:[#allocation29_spill] sm:$0xff]  ;;  %v15131_v13 = vld [vmem:[#allocation23_spill] sm:$0xff]  ;;  %v2070_v8 = vadd.f32 %v15132_v19, %v1878_v51  ;;  %v15137_v63 = vld [vmem:[#allocation36_spill] sm:$0xff] }
 0x3ad   : > { %v11677_v27 = vadd.f32 %v15127_v59, %v2258_v14  ;;  %v11683_v29 = vadd.f32 %v15131_v13, %v2259_v55  ;;  %v15133_v9 = vld [vmem:[#allocation37_spill] sm:$0xff]  ;;  %v11690_v15 = vadd.f32 %v11550_v22, %v15134_v52  ;;  %v15135_v14 = vld [vmem:[#allocation31_spill] sm:$0xff]  ;;  %v1497_v4 = vadd.f32 %v15137_v63, %v11569_v11  ;;  %v15141_v42 = vld [vmem:[#allocation34_spill] sm:$0xff] }
 0x3ae   : > { %v11643_v0 = vpop.permute.xlu1 %2584  ;;  %v2069_v43 = vadd.f32 %v15130_v44, %v1877_v21  ;;  %v1496_v18 = vadd.f32 %v15133_v9, %v11572_v2  ;;  %v1879_v48 = vadd.f32 %v15136_v23, %v1686_v7  ;;  %v15138_v21 = vld [vmem:[#allocation40_spill] sm:$0xff]  ;;  %v2262_v51 = vadd.f32 %v15140_v12, %v2070_v8  ;;  %v15142_v2 = vld [vmem:[#allocation39_spill] sm:$0xff]  ;;  %v15143_v19 = vld [vmem:[#allocation98_spill] sm:$0xff] }
 0x3af   : > { %v11665_v40 = vpop.permute.xlu0 %2590  ;;  %v1880_v59 = vadd.f32 %v15138_v21, %v1687_v36  ;;  %v11701_v44 = vadd.f32 %v15141_v42, %v2260_v24  ;;  %v11706_v9 = vadd.f32 %v11550_v22, %v15143_v19  ;;  %v15145_v7 = vld [vmem:[#allocation38_spill] sm:$0xff]  ;;  %v15147_v36 = vld [vmem:[#allocation41_spill] sm:$0xff]  ;;  %v15148_v63 = vld [vmem:[#allocation107_spill] sm:$0xff] }
 0x3b0   : > { %15121 = vst [vmem:[#allocation79_spill] sm:$0xff] %v11665_v40  ;;  %v2261_v25 = vadd.f32 %v15135_v14, %v2069_v43  ;;  %v1688_v13 = vadd.f32 %v15142_v2, %v1496_v18  ;;  %v1689_v52 = vadd.f32 %v15145_v7, %v1497_v4  ;;  %v15146_v11 = vld [vmem:[#allocation42_spill] sm:$0xff]  ;;  %v2071_v23 = vadd.f32 %v15147_v36, %v1879_v48  ;;  %v15149_v24 = vld [vmem:[#allocation35_spill] sm:$0xff]  ;;  %v15150_v18 = vld [vmem:[#allocation45_spill] sm:$0xff] }
 0x3b1   : > { %v2072_v14 = vadd.f32 %v15146_v11, %v1880_v59  ;;  %v11715_v8 = vadd.f32 %v11550_v22, %v15148_v63  ;;  %v15151_v42 = vld [vmem:[#allocation48_spill] sm:$0xff]  ;;  %v15152_v19 = vld [vmem:[#allocation49_spill] sm:$0xff]  ;;  %v15154_v59 = vld [vmem:[#allocation43_spill] sm:$0xff] }
 0x3b2   : > { %v11674_v16 = vpop.permute.xlu1 %2588  ;;  %v11718_v21 = vadd.f32 %v15149_v24, %v2261_v25  ;;  %v1881_v12 = vadd.f32 %v15150_v18, %v1688_v13  ;;  %v1499_v2 = vadd.f32 %v15151_v42, %v11575_v5  ;;  %v15153_v4 = vld [vmem:[#allocation44_spill] sm:$0xff]  ;;  %v2263_v11 = vadd.f32 %v15154_v59, %v2071_v23  ;;  %v15159_v24 = vld [vmem:[#allocation46_spill] sm:$0xff]  ;;  %v15161_v42 = vld [vmem:[#allocation51_spill] sm:$0xff] }
 0x3b3   : > { %15126 = vst [vmem:[#allocation18_spill] sm:$0xff] %v11674_v16  ;;  %v11697_v55 = vpop.permute.xlu0 %2594  ;;  %v2264_v7 = vadd.f32 %v15153_v4, %v2072_v14  ;;  %v15155_v48 = vld [vmem:[#allocation52_spill] sm:$0xff]  ;;  %v11735_v13 = vadd.f32 %v15159_v24, %v2262_v51  ;;  %v15160_v18 = vld [vmem:[#allocation50_spill] sm:$0xff]  ;;  %v11749_v51 = vadd.f32 %v11550_v22, %v11248_v17  ;;  %v15168_v24 = vld [vmem:[#allocation47_spill] sm:$0xff] }
 0x3b4   : > { %15139 = vst [vmem:[#allocation21_spill] sm:$0xff] %v11697_v55  ;;  %v1498_v55 = vadd.f32 %v15152_v19, %v11578_v26  ;;  %v1882_v36 = vadd.f32 %v15155_v48, %v1689_v52  ;;  %v1691_v5 = vadd.f32 %v15160_v18, %v1499_v2  ;;  %v15162_v26 = vld [vmem:[#allocation53_spill] sm:$0xff]  ;;  %v15164_v23 = vld [vmem:[#allocation54_spill] sm:$0xff]  ;;  %v15165_v52 = vld [vmem:[#allocation60_spill] sm:$0xff]  ;;  %v11752_v2 = vadd.f32 %v15168_v24, %v2263_v11 }
 0x3b5   : > { %v2073_v19 = vadd.f32 %v15162_v26, %v1881_v12  ;;  %v1501_v59 = vadd.f32 %v15165_v52, %v11581_v1  ;;  %15167 = vst [vmem:[#allocation28_spill] sm:$0xff] %v11749_v51  ;;  %v15170_v12 = vld [vmem:[#allocation57_spill] sm:$0xff]  ;;  %v15171_v26 = vld [vmem:[#allocation64_spill] sm:$0xff]  ;;  %v15174_v52 = vld [vmem:[#allocation63_spill] sm:$0xff] }
 0x3b6   : > { %v11708_v43 = vpop.permute.xlu1 %2592  ;;  %v1690_v40 = vadd.f32 %v15161_v42, %v1498_v55  ;;  %v2074_v4 = vadd.f32 %v15164_v23, %v1882_v36  ;;  %v15169_v55 = vld [vmem:[#allocation55_spill] sm:$0xff]  ;;  %v15172_v36 = vld [vmem:[#allocation56_spill] sm:$0xff]  ;;  %v15178_v24 = vld [vmem:[#allocation66_spill] sm:$0xff] }
 0x3b7   : > { %15144 = vst [vmem:[#allocation24_spill] sm:$0xff] %v11708_v43  ;;  %v15156_v43 = vld [vmem:[#allocation112_spill] sm:$0xff]  ;;  %v11732_v25 = vpop.permute.xlu0 %2598  ;;  %v2265_v18 = vadd.f32 %v15169_v55, %v2073_v19  ;;  %v15179_v55 = vld [vmem:[#allocation65_spill] sm:$0xff] }
 0x3b8   : > { %v11730_v63 = vadd.f32 %v11550_v22, %v15156_v43  ;;  %15158 = vst [vmem:[#allocation20_spill] sm:$0xff] %v11732_v25  ;;  %v15166_v43 = vld [vmem:[#allocation61_spill] sm:$0xff]  ;;  %v1883_v42 = vadd.f32 %v15170_v12, %v1690_v40  ;;  %v1884_v25 = vadd.f32 %v15171_v26, %v1691_v5  ;;  %v2266_v23 = vadd.f32 %v15172_v36, %v2074_v4  ;;  %v15177_v22 = vld [vmem:[#allocation58_spill] sm:$0xff]  ;;  %v15180_v5 = vld [vmem:[#allocation72_spill] sm:$0xff] }
 0x3b9   : > { %v1500_v48 = vadd.f32 %v15166_v43, %v11584_v30  ;;  %v15175_v30 = vld [vmem:[#allocation73_spill] sm:$0xff]  ;;  %v11765_v11 = vadd.f32 %v15177_v22, %v2264_v7  ;;  %v1503_v12 = vadd.f32 %v15180_v5, %v11589_v34  ;;  %v15186_v7 = vld [vmem:[#allocation68_spill] sm:$0xff]  ;;  %v15190_v5 = vld [vmem:[#allocation78_spill] sm:$0xff] }
 0x3ba   : > { %15157 = vst [vmem:[#allocation25_spill] sm:$0xff] %v11730_v63  ;;  %v11740_v14 = vpop.permute.xlu1 %2596  ;;  %v1502_v43 = vadd.f32 %v15175_v30, %v11592_v47  ;;  %v2076_v19 = vadd.f32 %v15178_v24, %v1884_v25  ;;  %v2075_v40 = vadd.f32 %v15179_v55, %v1883_v42  ;;  %v15184_v47 = vld [vmem:[#allocation76_spill] sm:$0xff]  ;;  %v15188_v24 = vld [vmem:[#allocation74_spill] sm:$0xff]  ;;  %v15189_v55 = vld [vmem:[#allocation87_spill] sm:$0xff] }
 0x3bb   : > { %15163 = vst [vmem:[#allocation19_spill] sm:$0xff] %v11740_v14  ;;  %v15173_v14 = vld [vmem:[#allocation62_spill] sm:$0xff]  ;;  %v1692_v16 = vadd.f32 %v15174_v52, %v1500_v48  ;;  %v11762_v17 = vpop.permute.xlu0 %2602  ;;  %v15183_v48 = vld [vmem:[#allocation69_spill] sm:$0xff]  ;;  %v15185_v52 = vld [vmem:[#allocation75_spill] sm:$0xff]  ;;  %v1695_v42 = vadd.f32 %v15188_v24, %v1503_v12  ;;  %v1504_v34 = vadd.f32 %v15189_v55, %v11603_v50 }
 0x3bc   : > { %v1693_v1 = vadd.f32 %v15173_v14, %v1501_v59  ;;  %15176 = vst [vmem:[#allocation84_spill] sm:$0xff] %v11762_v17  ;;  %v15182_v14 = vld [vmem:[#allocation59_spill] sm:$0xff]  ;;  %v1694_v30 = vadd.f32 %v15185_v52, %v1502_v43  ;;  %v2268_v22 = vadd.f32 %v15186_v7, %v2076_v19  ;;  %v15191_v51 = vld [vmem:[#allocation77_spill] sm:$0xff]  ;;  %v15195_v43 = vld [vmem:[#allocation70_spill] sm:$0xff] }
 0x3bd   : > { %v11774_v59 = vadd.f32 %v15182_v14, %v2265_v18  ;;  %v1885_v26 = vadd.f32 %v15183_v48, %v1692_v16  ;;  %v15187_v17 = vld [vmem:[#allocation67_spill] sm:$0xff]  ;;  %v15192_v14 = vld [vmem:[#allocation82_spill] sm:$0xff]  ;;  %v11792_v19 = vadd.f32 %v15195_v43, %v2266_v23  ;;  %v15198_v50 = vld [vmem:[#allocation89_spill] sm:$0xff] }
 0x3be   : > { %v11771_v4 = vpop.permute.xlu1 %2600  ;;  %v1886_v36 = vadd.f32 %v15184_v47, %v1693_v1  ;;  %v2267_v25 = vadd.f32 %v15187_v17, %v2075_v40  ;;  %v1887_v63 = vadd.f32 %v15192_v14, %v1694_v30  ;;  %v15193_v16 = vld [vmem:[#allocation86_spill] sm:$0xff]  ;;  %v15196_v17 = vld [vmem:[#allocation71_spill] sm:$0xff]  ;;  %v1696_v52 = vadd.f32 %v15198_v50, %v1504_v34  ;;  %v15200_v30 = vld [vmem:[#allocation80_spill] sm:$0xff] }
 0x3bf   : > { %15181 = vst [vmem:[#allocation22_spill] sm:$0xff] %v11771_v4  ;;  %v2077_v18 = vadd.f32 %v15191_v51, %v1885_v26  ;;  %v1505_v1 = vadd.f32 %v15193_v16, %v11600_v61  ;;  %v11789_v48 = vpop.permute.xlu0 %2606  ;;  %v15197_v12 = vld [vmem:[#allocation90_spill] sm:$0xff]  ;;  %v15199_v51 = vld [vmem:[#allocation81_spill] sm:$0xff]  ;;  %v15201_v24 = vld [vmem:[#allocation88_spill] sm:$0xff] }
 0x3c0   : > { %v2078_v4 = vadd.f32 %v15190_v5, %v1886_v36  ;;  %15194 = vst [vmem:[#allocation26_spill] sm:$0xff] %v11789_v48  ;;  %v11795_v40 = vadd.f32 %v15196_v17, %v2267_v25  ;;  %v1888_v47 = vadd.f32 %v15197_v12, %v1695_v42  ;;  %v15202_v55 = vld [vmem:[#allocation91_spill] sm:$0xff]  ;;  %v15203_v14 = vld [vmem:[#allocation92_spill] sm:$0xff]  ;;  %v15206_v42 = vld [vmem:[#allocation101_spill] sm:$0xff] }
 0x3c1   : > { %v2269_v7 = vadd.f32 %v15200_v30, %v2077_v18  ;;  %v1697_v61 = vadd.f32 %v15201_v24, %v1505_v1  ;;  %v2079_v5 = vadd.f32 %v15202_v55, %v1887_v63  ;;  %v15204_v16 = vld [vmem:[#allocation96_spill] sm:$0xff]  ;;  %v1506_v34 = vadd.f32 %v15206_v42, %v11615_v53  ;;  %v15207_v12 = vld [vmem:[#allocation83_spill] sm:$0xff]  ;;  %v15209_v18 = vld [vmem:[#allocation94_spill] sm:$0xff] }
 0x3c2   : > { %v11799_v36 = vpop.permute.xlu1 %2604  ;;  %v2270_v26 = vadd.f32 %v15199_v51, %v2078_v4  ;;  %v2080_v23 = vadd.f32 %v15203_v14, %v1888_v47  ;;  %v1889_v43 = vadd.f32 %v15204_v16, %v1696_v52  ;;  %v15205_v25 = vld [vmem:[#allocation100_spill] sm:$0xff]  ;;  %v11812_v50 = vadd.f32 %v15207_v12, %v2268_v22  ;;  %v15208_v4 = vld [vmem:[#allocation85_spill] sm:$0xff]  ;;  %v15211_v47 = vld [vmem:[#allocation95_spill] sm:$0xff] }
 0x3c3   : > { %v1507_v17 = vadd.f32 %v15205_v25, %v11611_v49  ;;  %v11815_v51 = vadd.f32 %v15208_v4, %v2269_v7  ;;  %v2271_v1 = vadd.f32 %v15209_v18, %v2079_v5  ;;  %v15210_v30 = vld [vmem:[#allocation104_spill] sm:$0xff]  ;;  %v2739_v24 = vpop.permute.xlu0 %2738  ;;  %v15212_v52 = vld [vmem:[#allocation102_spill] sm:$0xff]  ;;  %v15213_v16 = vld [vmem:[#allocation103_spill] sm:$0xff] }
 0x3c4   : > { %v1890_v63 = vadd.f32 %v15210_v30, %v1697_v61  ;;  %v2272_v55 = vadd.f32 %v15211_v47, %v2080_v23  ;;  %v1698_v49 = vadd.f32 %v15213_v16, %v1506_v34  ;;  %v15214_v25 = vld [vmem:[#allocation105_spill] sm:$0xff]  ;;  %v15216_v7 = vld [vmem:[#allocation99_spill] sm:$0xff]  ;;  %v15217_v5 = vld [vmem:[#allocation106_spill] sm:$0xff]  ;;  %v2642_v61 = vadd.f32 %v11508_v32, %v11660_v6 }
 0x3c5   : > { %v1699_v14 = vadd.f32 %v15212_v52, %v1507_v17  ;;  %v2081_v48 = vadd.f32 %v15214_v25, %v1889_v43  ;;  %v15215_v22 = vld [vmem:[#allocation97_spill] sm:$0xff]  ;;  %v11829_v12 = vadd.f32 %v15216_v7, %v2271_v1  ;;  %v15218_v23 = vld [vmem:[#allocation108_spill] sm:$0xff]  ;;  %v15219_v17 = vld [vmem:[#allocation110_spill] sm:$0xff] }
 0x3c6   : > { %v11823_v53 = vpop.permute.xlu1 %2608  ;;  %v11826_v42 = vadd.f32 %v15215_v22, %v2270_v26  ;;  %v2082_v4 = vadd.f32 %v15217_v5, %v1890_v63  ;;  %v1891_v30 = vadd.f32 %v15219_v17, %v1698_v49  ;;  %v15220_v34 = vld [vmem:[#allocation115_spill] sm:$0xff]  ;;  %v15221_v47 = vld [vmem:[#allocation118_spill] sm:$0xff]  ;;  %v15222_v16 = vld [vmem:[#allocation109_spill] sm:$0xff]  ;;  %v2643_v63 = vadd.f32 %v11518_v41, %v11677_v27 }
 0x3c7   : > { %v2273_v18 = vadd.f32 %v15218_v23, %v2081_v48  ;;  %v1508_v43 = vadd.f32 %v15220_v34, %v11625_v54  ;;  %v1892_v52 = vadd.f32 %v15221_v47, %v1699_v14  ;;  %v15223_v25 = vld [vmem:[#allocation114_spill] sm:$0xff]  ;;  %v2834_v22 = vadd.f32 %v2739_v24, %v2642_v61  ;;  %v2743_v7 = vpop.permute.xlu0 %2742  ;;  %v15224_v32 = vld [vmem:[#allocation111_spill] sm:$0xff]  ;;  %v15225_v48 = vld [vmem:[#allocation117_spill] sm:$0xff] }
 0x3c8   : > { %v2274_v26 = vadd.f32 %v15222_v16, %v2082_v4  ;;  %v1509_v1 = vadd.f32 %v15223_v25, %v11621_v31  ;;  %v11845_v6 = vadd.f32 %v15224_v32, %v2272_v55  ;;  %v15226_v5 = vld [vmem:[#allocation120_spill] sm:$0xff]  ;;  %v15227_v54 = vld [vmem:[#allocation119_spill] sm:$0xff]  ;;  %v15228_v34 = vld [vmem:[#allocation113_spill] sm:$0xff]  ;;  %v2644_v41 = vadd.f32 %v11516_v3, %v11683_v29 }
 0x3c9   : > { %v1700_v49 = vadd.f32 %v15225_v48, %v1508_v43  ;;  %v2084_v23 = vadd.f32 %v15226_v5, %v1892_v52  ;;  %v2083_v17 = vadd.f32 %v15227_v54, %v1891_v30  ;;  %v11851_v4 = vadd.f32 %v15228_v34, %v2273_v18  ;;  %v15229_v47 = vld [vmem:[#allocation116_spill] sm:$0xff]  ;;  %v15230_v24 = vld [vmem:[#allocation122_spill] sm:$0xff]  ;;  %v15231_v55 = vld [vmem:[#allocation121_spill] sm:$0xff] }
 0x3ca   : > { %v2741_v14 = vpop.permute.xlu1 %2740  ;;  %v1701_v31 = vadd.f32 %v15229_v47, %v1509_v1  ;;  %v15232_v25 = vld [vmem:[#allocation123_spill] sm:$0xff]  ;;  %v15233_v52 = vld [vmem:[#allocation126_spill] sm:$0xff]  ;;  %v2645_v30 = vadd.f32 %v11526_v20, %v11701_v44  ;;  %v2866_v18 = vmax.f32 %v2834_v22, 0.0  ;;  %v2836_v48 = vadd.f32 %v2743_v7, %v2644_v41  ;;  %v15234_v54 = vld [vmem:[#allocation124_spill] sm:$0xff] }
 0x3cb   : > { %v2835_v27 = vadd.f32 %v2741_v14, %v2643_v63  ;;  %v2276_v61 = vadd.f32 %v15230_v24, %v2084_v23  ;;  %v2275_v16 = vadd.f32 %v15231_v55, %v2083_v17  ;;  %v1893_v43 = vadd.f32 %v15232_v25, %v1700_v49  ;;  %v2747_v1 = vpop.permute.xlu0 %2746  ;;  %v15235_v3 = vld [vmem:[#allocation127_spill] sm:$0xff]  ;;  %v15236_v63 = vld [vmem:[#allocation130_spill] sm:$0xff]  ;;  %v15238_v20 = vld [vmem:[#allocation128_spill] sm:$0xff] }
 0x3cc   : > { %v1511_v32 = vadd.f32 %v15233_v52, %v11641_v46  ;;  %v11864_v34 = vadd.f32 %v15234_v54, %v2274_v26  ;;  %v1510_v29 = vadd.f32 %v15235_v3, %v11632_v62  ;;  %v1894_v23 = vadd.f32 %v15236_v63, %v1701_v31  ;;  %v15237_v46 = vld [vmem:[#allocation125_spill] sm:$0xff]  ;;  %v15240_v26 = vld [vmem:[#allocation132_spill] sm:$0xff]  ;;  %v15241_v24 = vld [vmem:[#allocation131_spill] sm:$0xff] }
 0x3cd   : > { %v2867_v5 = vmax.f32 %v2835_v27, 0.0  ;;  %v2646_v49 = vadd.f32 %v11524_v57, %v11718_v21  ;;  %v11872_v14 = vadd.f32 %v15237_v46, %v2275_v16  ;;  %v15239_v47 = vld [vmem:[#allocation129_spill] sm:$0xff]  ;;  %v2085_v55 = vadd.f32 %v15241_v24, %v1893_v43  ;;  %v15242_v16 = vld [vmem:[#allocation134_spill] sm:$0xff] }
 0x3ce   : > { %v2745_v17 = vpop.permute.xlu1 %2744  ;;  %v1703_v44 = vadd.f32 %v15238_v20, %v1511_v32  ;;  %v1702_v41 = vadd.f32 %v15239_v47, %v1510_v29  ;;  %v2086_v27 = vadd.f32 %v15240_v26, %v1894_v23  ;;  %v2647_v31 = vadd.f32 %v11533_v33, %v11735_v13  ;;  %v15243_v3 = vld [vmem:[#allocation133_spill] sm:$0xff]  ;;  %v15246_v13 = vld [vmem:[#allocation138_spill] sm:$0xff] }
 0x3cf   : > { %v2898_v22 = vpack.c.bf16 %v2867_v5, %v2866_v18  ;;  %v2837_v7 = vadd.f32 %v2745_v17, %v2645_v30  ;;  %v2838_v62 = vadd.f32 %v2747_v1, %v2646_v49  ;;  %v2868_v25 = vmax.f32 %v2836_v48, 0.0  ;;  %v2751_v52 = vpop.permute.xlu0 %2750  ;;  %v15244_v18 = vld [vmem:[#allocation135_spill] sm:$0xff]  ;;  %v15245_v49 = vld [vmem:[#allocation136_spill] sm:$0xff] }
 0x3d0   : > { %v2278_v54 = vadd.f32 %v15242_v16, %v2086_v27  ;;  %v2277_v32 = vadd.f32 %v15243_v3, %v2085_v55  ;;  %v1895_v30 = vadd.f32 %v15244_v18, %v1702_v41  ;;  %v2648_v5 = vadd.f32 %v11531_v28, %v11752_v2  ;;  %v15249_v27 = vld [vmem:[#allocation139_spill] sm:$0xff] }
 0x3d1   : > { %v2915_v57 = vshrl.u32 %v2898_v22, 16  ;;  %v2869_v21 = vmax.f32 %v2837_v7, 0.0  ;;  %v2918_v43 = vshll.u32 %v2898_v22, 16  ;;  %v11886_v33 = vadd.f32 %v15245_v49, %v2276_v61  ;;  %v15247_v22 = vld [vmem:[#allocation137_spill] sm:$0xff]  ;;  %v15248_v61 = vld [vmem:[#allocation140_spill] sm:$0xff] }
 0x3d2   : > { %v2749_v29 = vpop.permute.xlu1 %2748  ;;  %v1513_v48 = vadd.f32 %v15246_v13, %v11657_v37  ;;  %v2649_v17 = vadd.f32 %v11538_v60, %v11765_v11  ;;  %v2870_v46 = vmax.f32 %v2838_v62, 0.0  ;;  %v2840_v7 = vadd.f32 %v2751_v52, %v2648_v5  ;;  %v15252_v5 = vld [vmem:[#allocation141_spill] sm:$0xff] }
 0x3d3   : > { %v2917_v63 = vrot.slane %v2915_v57, 7  ;;  %v2899_v1 = vpack.c.bf16 %v2869_v21, %v2868_v25  ;;  %v2839_v23 = vadd.f32 %v2749_v29, %v2647_v31  ;;  %v2755_v28 = vpop.permute.xlu0 %2754  ;;  %v11894_v41 = vadd.f32 %v15247_v22, %v2277_v32  ;;  %v15250_v25 = vld [vmem:[#allocation142_spill] sm:$0xff]  ;;  %v15251_v21 = vld [vmem:[#allocation143_spill] sm:$0xff] }
 0x3d4   : > { %v1705_v26 = vadd.f32 %v15248_v61, %v1513_v48  ;;  %v1512_v37 = vadd.f32 %v15249_v27, %v11650_v45  ;;  %v2650_v60 = vadd.f32 %v11536_v35, %v11774_v59  ;;  %v1896_v57 = vadd.f32 %v15250_v25, %v1703_v44  ;;  %v15255_v44 = vld [vmem:[#allocation194_spill] sm:$0xff]  ;;  %v15262_v25 = vld [vmem:[#allocation195_spill] sm:$0xff] }
 0x3d5   : > { %v2922_v20 = vshrl.u32 %v2899_v1, 16  ;;  %v2871_v47 = vmax.f32 %v2839_v23, 0.0  ;;  %3028 = vrot.lane.b32.xlu1 %v2917_v63, %s10135_s12  ;;  %v2920_v2 = vor.u32 %v2918_v43, %v2917_v63  ;;  %v2925_v55 = vshll.u32 %v2899_v1, 16  ;;  %v15253_v63 = vld [vmem:[#allocation144_spill] sm:$0xff]  ;;  %v15254_v1 = vld [vmem:[#allocation145_spill] sm:$0xff] }
 0x3d6   : > { %v2753_v11 = vpop.permute.xlu1 %2752  ;;  %v2087_v52 = vadd.f32 %v15251_v21, %v1895_v30  ;;  %v2651_v16 = vadd.f32 %v11542_v10, %v11792_v19  ;;  %v2842_v3 = vadd.f32 %v2755_v28, %v2650_v60  ;;  %v2872_v32 = vmax.f32 %v2840_v7, 0.0  ;;  %v15259_v60 = vld [vmem:[#allocation148_spill] sm:$0xff] }
 0x3d7   : > { %v2924_v24 = vrot.slane %v2922_v20, 7  ;;  %v2900_v62 = vpack.c.bf16 %v2871_v47, %v2870_v46  ;;  %v2841_v31 = vadd.f32 %v2753_v11, %v2649_v17  ;;  %3026 = vrot.lane.b32.xlu0 %v2920_v2, %s10135_s12  ;;  %v2759_v35 = vpop.permute.xlu0 %2758  ;;  %v1704_v29 = vadd.f32 %v15252_v5, %v1512_v37  ;;  %v15256_v17 = vld [vmem:[#allocation146_spill] sm:$0xff]  ;;  %v15257_v20 = vld [vmem:[#allocation147_spill] sm:$0xff]  ;;  %v15258_v47 = vld [vmem:[#allocation196_spill] sm:$0xff] }
 0x3d8   : > { %v2088_v43 = vadd.f32 %v15253_v63, %v1896_v57  ;;  %v2279_v23 = vadd.f32 %v15254_v1, %v2087_v52  ;;  %v2652_v30 = vadd.f32 %v15255_v44, %v11795_v40  ;;  %v2653_v28 = vadd.f32 %v15258_v47, %v11812_v50  ;;  %v15266_v1 = vld [vmem:[#allocation154_spill] sm:$0xff]  ;;  %v15267_v44 = vld [vmem:[#allocation153_spill] sm:$0xff]  ;;  %v15270_v47 = vld [vmem:[#allocation156_spill] sm:$0xff] }
 0x3d9   : > { %v2929_v45 = vshrl.u32 %v2900_v62, 16  ;;  %v2873_v18 = vmax.f32 %v2841_v31, 0.0  ;;  %3032 = vrot.lane.b32.xlu1 %v2924_v24, %s10135_s12  ;;  %v2927_v59 = vor.u32 %v2925_v55, %v2924_v24  ;;  %v2932_v10 = vshll.u32 %v2900_v62, 16  ;;  %v15260_v24 = vld [vmem:[#allocation149_spill] sm:$0xff]  ;;  %v15261_v62 = vld [vmem:[#allocation150_spill] sm:$0xff] }
 0x3da   : > { %v2757_v49 = vpop.permute.xlu1 %2756  ;;  %v2280_v46 = vadd.f32 %v15256_v17, %v2088_v43  ;;  %v1897_v7 = vadd.f32 %v15257_v20, %v1704_v29  ;;  %v2874_v2 = vmax.f32 %v2842_v3, 0.0  ;;  %v2844_v61 = vadd.f32 %v2759_v35, %v2652_v30  ;;  %v15265_v35 = vld [vmem:[#allocation198_spill] sm:$0xff] }
 0x3db   : > { %v2931_v13 = vrot.slane %v2929_v45, 7  ;;  %v2901_v19 = vpack.c.bf16 %v2873_v18, %v2872_v32  ;;  %v2843_v48 = vadd.f32 %v2757_v49, %v2651_v16  ;;  %3030 = vrot.lane.b32.xlu0 %v2927_v59, %s10135_s12  ;;  %v2763_v40 = vpop.permute.xlu0 %2762  ;;  %v11919_v11 = vadd.f32 %v15259_v60, %v2278_v54  ;;  %v15263_v32 = vld [vmem:[#allocation152_spill] sm:$0xff]  ;;  %v15264_v54 = vld [vmem:[#allocation151_spill] sm:$0xff] }
 0x3dc   : > { %v11922_v55 = vadd.f32 %v15260_v24, %v2279_v23  ;;  %v1515_v31 = vadd.f32 %v15261_v62, %v11690_v15  ;;  %v2654_v50 = vadd.f32 %v15262_v25, %v11815_v51  ;;  %v1514_v18 = vadd.f32 %v15264_v54, %v11672_v56  ;;  %v15268_v49 = vld [vmem:[#allocation155_spill] sm:$0xff]  ;;  %v15273_v24 = vld [vmem:[#allocation158_spill] sm:$0xff] }
 0x3dd   : > { %v2936_v22 = vshrl.u32 %v2901_v19, 16  ;;  %v2875_v27 = vmax.f32 %v2843_v48, 0.0  ;;  %3036 = vrot.lane.b32.xlu1 %v2931_v13, %s10135_s12  ;;  %v2934_v37 = vor.u32 %v2932_v10, %v2931_v13  ;;  %v2939_v52 = vshll.u32 %v2901_v19, 16  ;;  %v15269_v10 = vld [vmem:[#allocation197_spill] sm:$0xff] }
 0x3de   : > { %v2761_v57 = vpop.permute.xlu1 %2760  ;;  %v1707_v45 = vadd.f32 %v15263_v32, %v1515_v31  ;;  %v2655_v59 = vadd.f32 %v15265_v35, %v11826_v42  ;;  %v2846_v5 = vadd.f32 %v2763_v40, %v2654_v50  ;;  %v2876_v15 = vmax.f32 %v2844_v61, 0.0  ;;  %v15274_v31 = vld [vmem:[#allocation160_spill] sm:$0xff]  ;;  %v15275_v50 = vld [vmem:[#allocation159_spill] sm:$0xff] }
 0x3df   : > { %v2938_v21 = vrot.slane %v2936_v22, 7  ;;  %v2902_v16 = vpack.c.bf16 %v2875_v27, %v2874_v2  ;;  %v2845_v3 = vadd.f32 %v2761_v57, %v2653_v28  ;;  %3034 = vrot.lane.b32.xlu0 %v2934_v37, %s10135_s12  ;;  %v2767_v51 = vpop.permute.xlu0 %2766  ;;  %v1898_v23 = vadd.f32 %v15266_v1, %v1705_v26  ;;  %v15271_v2 = vld [vmem:[#allocation157_spill] sm:$0xff]  ;;  %v15272_v26 = vld [vmem:[#allocation200_spill] sm:$0xff] }
 0x3e0   : > { %v1706_v30 = vadd.f32 %v15267_v44, %v1514_v18  ;;  %v2089_v13 = vadd.f32 %v15268_v49, %v1897_v7  ;;  %v2656_v56 = vadd.f32 %v15269_v10, %v11829_v12  ;;  %v2657_v61 = vadd.f32 %v15272_v26, %v11845_v6  ;;  %v15277_v18 = vld [vmem:[#allocation161_spill] sm:$0xff]  ;;  %v15279_v1 = vld [vmem:[#allocation164_spill] sm:$0xff]  ;;  %v15280_v44 = vld [vmem:[#allocation163_spill] sm:$0xff] }
 0x3e1   : > { %v2943_v29 = vshrl.u32 %v2902_v16, 16  ;;  %v2877_v63 = vmax.f32 %v2845_v3, 0.0  ;;  %3040 = vrot.lane.b32.xlu1 %v2938_v21, %s10135_s12  ;;  %v2941_v43 = vor.u32 %v2939_v52, %v2938_v21  ;;  %v2946_v42 = vshll.u32 %v2902_v16, 16  ;;  %v15276_v21 = vld [vmem:[#allocation199_spill] sm:$0xff]  ;;  %v15281_v49 = vld [vmem:[#allocation166_spill] sm:$0xff] }
 0x3e2   : > { %v2765_v19 = vpop.permute.xlu1 %2764  ;;  %v2090_v28 = vadd.f32 %v15270_v47, %v1898_v23  ;;  %v2281_v22 = vadd.f32 %v15271_v2, %v2089_v13  ;;  %v2878_v27 = vmax.f32 %v2846_v5, 0.0  ;;  %v2848_v7 = vadd.f32 %v2767_v51, %v2656_v56 }
 0x3e3   : > { %v2945_v48 = vrot.slane %v2943_v29, 7  ;;  %v2903_v17 = vpack.c.bf16 %v2877_v63, %v2876_v15  ;;  %v2847_v20 = vadd.f32 %v2765_v19, %v2655_v59  ;;  %3038 = vrot.lane.b32.xlu0 %v2941_v43, %s10135_s12  ;;  %v2771_v12 = vpop.permute.xlu0 %2770  ;;  %v11948_v25 = vadd.f32 %v15274_v31, %v2280_v46  ;;  %v15278_v59 = vld [vmem:[#allocation162_spill] sm:$0xff]  ;;  %v15287_v31 = vld [vmem:[#allocation171_spill] sm:$0xff] }
 0x3e4   : > { %v2282_v62 = vadd.f32 %v15273_v24, %v2090_v28  ;;  %v1899_v57 = vadd.f32 %v15275_v50, %v1706_v30  ;;  %v2658_v52 = vadd.f32 %v15276_v21, %v11851_v4  ;;  %v11955_v35 = vadd.f32 %v15277_v18, %v2281_v22  ;;  %v15284_v22 = vld [vmem:[#allocation165_spill] sm:$0xff] }
 0x3e5   : > { %v2950_v40 = vshrl.u32 %v2903_v17, 16  ;;  %v2879_v37 = vmax.f32 %v2847_v20, 0.0  ;;  %3044 = vrot.lane.b32.xlu1 %v2945_v48, %s10135_s12  ;;  %v2948_v60 = vor.u32 %v2946_v42, %v2945_v48  ;;  %v2953_v3 = vshll.u32 %v2903_v17, 16  ;;  %v15282_v48 = vld [vmem:[#allocation168_spill] sm:$0xff]  ;;  %v15283_v17 = vld [vmem:[#allocation167_spill] sm:$0xff]  ;;  %v15289_v21 = vld [vmem:[#allocation173_spill] sm:$0xff] }
 0x3e6   : > { %v2769_v16 = vpop.permute.xlu1 %2768  ;;  %v1517_v5 = vadd.f32 %v15278_v59, %v11715_v8  ;;  %v2659_v46 = vadd.f32 %v11605_v39, %v11864_v34  ;;  %v2850_v15 = vadd.f32 %v2771_v12, %v2658_v52  ;;  %v2880_v29 = vmax.f32 %v2848_v7, 0.0  ;;  %v15291_v59 = vld [vmem:[#allocation172_spill] sm:$0xff] }
 0x3e7   : > { %v2952_v6 = vrot.slane %v2950_v40, 7  ;;  %v2904_v32 = vpack.c.bf16 %v2879_v37, %v2878_v27  ;;  %v2849_v54 = vadd.f32 %v2769_v16, %v2657_v61  ;;  %3042 = vrot.lane.b32.xlu0 %v2948_v60, %s10135_s12  ;;  %v2775_v51 = vpop.permute.xlu0 %2774  ;;  %v1516_v30 = vadd.f32 %v15280_v44, %v11706_v9  ;;  %v15285_v61 = vld [vmem:[#allocation170_spill] sm:$0xff]  ;;  %v15286_v40 = vld [vmem:[#allocation169_spill] sm:$0xff] }
 0x3e8   : > { %v1709_v23 = vadd.f32 %v15279_v1, %v1517_v5  ;;  %v1900_v13 = vadd.f32 %v15281_v49, %v1707_v45  ;;  %v2660_v8 = vadd.f32 %v11594_v38, %v11872_v14  ;;  %v2091_v20 = vadd.f32 %v15283_v17, %v1899_v57  ;;  %v15288_v57 = vld [vmem:[#allocation25_spill] sm:$0xff]  ;;  %v15290_v16 = vld [vmem:[#allocation18_spill] sm:$0xff] }
 0x3e9   : > { %v2957_v63 = vshrl.u32 %v2904_v32, 16  ;;  %v2881_v4 = vmax.f32 %v2849_v54, 0.0  ;;  %3048 = vrot.lane.b32.xlu1 %v2952_v6, %s10135_s12  ;;  %v2955_v43 = vor.u32 %v2953_v3, %v2952_v6  ;;  %v2960_v34 = vshll.u32 %v2904_v32, 16 }
 0x3ea   : > { %v2773_v10 = vpop.permute.xlu1 %2772  ;;  %v2092_v42 = vadd.f32 %v15282_v48, %v1900_v13  ;;  %v2661_v47 = vadd.f32 %v11643_v0, %v11886_v33  ;;  %v2882_v9 = vmax.f32 %v2850_v15, 0.0  ;;  %v2852_v45 = vadd.f32 %v2775_v51, %v2660_v8  ;;  %v15293_v15 = vld [vmem:[#allocation174_spill] sm:$0xff]  ;;  %v15295_v51 = vld [vmem:[#allocation79_spill] sm:$0xff] }
 0x3eb   : > { %v2959_v39 = vrot.slane %v2957_v63, 7  ;;  %v2905_v56 = vpack.c.bf16 %v2881_v4, %v2880_v29  ;;  %v2851_v19 = vadd.f32 %v2773_v10, %v2659_v46  ;;  %3046 = vrot.lane.b32.xlu0 %v2955_v43, %s10135_s12  ;;  %v2779_v38 = vpop.permute.xlu0 %2778  ;;  %v1708_v26 = vadd.f32 %v15284_v22, %v1516_v30  ;;  %v15292_v46 = vld [vmem:[#allocation28_spill] sm:$0xff]  ;;  %v15294_v63 = vld [vmem:[#allocation175_spill] sm:$0xff]  ;;  %v15296_v13 = vld [vmem:[#allocation178_spill] sm:$0xff] }
 0x3ec   : > { %v2284_v27 = vadd.f32 %v15285_v61, %v2092_v42  ;;  %v2283_v7 = vadd.f32 %v15286_v40, %v2091_v20  ;;  %v2662_v37 = vadd.f32 %v11634_v58, %v11894_v41  ;;  %v1518_v52 = vadd.f32 %v15289_v21, %v15288_v57  ;;  %v15297_v10 = vld [vmem:[#allocation177_spill] sm:$0xff]  ;;  %v15299_v20 = vld [vmem:[#allocation176_spill] sm:$0xff] }
 0x3ed   : > { %v2964_v28 = vshrl.u32 %v2905_v56, 16  ;;  %v2883_v2 = vmax.f32 %v2851_v19, 0.0  ;;  %3052 = vrot.lane.b32.xlu1 %v2959_v39, %s10135_s12  ;;  %v2962_v14 = vor.u32 %v2960_v34, %v2959_v39  ;;  %v2967_v0 = vshll.u32 %v2905_v56, 16  ;;  %v15303_v40 = vld [vmem:[#allocation181_spill] sm:$0xff] }
 0x3ee   : > { %v2777_v12 = vpop.permute.xlu1 %2776  ;;  %v1901_v50 = vadd.f32 %v15287_v31, %v1708_v26  ;;  %v2663_v6 = vadd.f32 %v15290_v16, %v11919_v11  ;;  %v2854_v3 = vadd.f32 %v2779_v38, %v2662_v37  ;;  %v2884_v32 = vmax.f32 %v2852_v45, 0.0  ;;  %v15301_v45 = vld [vmem:[#allocation179_spill] sm:$0xff] }
 0x3ef   : > { %v2966_v60 = vrot.slane %v2964_v28, 7  ;;  %v2906_v33 = vpack.c.bf16 %v2883_v2, %v2882_v9  ;;  %v2853_v24 = vadd.f32 %v2777_v12, %v2661_v47  ;;  %3050 = vrot.lane.b32.xlu0 %v2962_v14, %s10135_s12  ;;  %v2783_v58 = vpop.permute.xlu0 %2782  ;;  %v2475_v5 = vadd.f32 %v15291_v59, %v2282_v62  ;;  %v15298_v62 = vld [vmem:[#allocation24_spill] sm:$0xff]  ;;  %v15304_v12 = vld [vmem:[#allocation187_spill] sm:$0xff] }
 0x3f0   : > { %v1519_v29 = vadd.f32 %v15293_v15, %v15292_v46  ;;  %v1710_v4 = vadd.f32 %v15294_v63, %v1518_v52  ;;  %v2664_v43 = vadd.f32 %v15295_v51, %v11922_v55  ;;  %v1902_v8 = vadd.f32 %v15296_v13, %v1709_v23  ;;  %v15300_v9 = vld [vmem:[#allocation180_spill] sm:$0xff]  ;;  %v15302_v23 = vld [vmem:[#allocation21_spill] sm:$0xff]  ;;  %v15306_v52 = vld [vmem:[#allocation182_spill] sm:$0xff] }
 0x3f1   : > { %v2971_v54 = vshrl.u32 %v2906_v33, 16  ;;  %v2885_v18 = vmax.f32 %v2853_v24, 0.0  ;;  %3056 = vrot.lane.b32.xlu1 %v2966_v60, %s10135_s12  ;;  %v2969_v41 = vor.u32 %v2967_v0, %v2966_v60  ;;  %v2974_v44 = vshll.u32 %v2906_v33, 16  ;;  %v15305_v0 = vld [vmem:[#allocation19_spill] sm:$0xff]  ;;  %v15310_v15 = vld [vmem:[#allocation184_spill] sm:$0xff]  ;;  %v15311_v63 = vld [vmem:[#allocation189_spill] sm:$0xff] }
 0x3f2   : > { %v2781_v1 = vpop.permute.xlu1 %2780  ;;  %v2093_v39 = vadd.f32 %v15297_v10, %v1901_v50  ;;  %v2665_v34 = vadd.f32 %v15298_v62, %v11948_v25  ;;  %v2886_v56 = vmax.f32 %v2854_v3, 0.0  ;;  %v2856_v48 = vadd.f32 %v2783_v58, %v2664_v43  ;;  %v15312_v51 = vld [vmem:[#allocation22_spill] sm:$0xff]  ;;  %v15313_v13 = vld [vmem:[#allocation185_spill] sm:$0xff]  ;;  %v15315_v62 = vld [vmem:[#allocation192_spill] sm:$0xff] }
 0x3f3   : > { %v2973_v11 = vrot.slane %v2971_v54, 7  ;;  %v2907_v30 = vpack.c.bf16 %v2885_v18, %v2884_v32  ;;  %v2855_v49 = vadd.f32 %v2781_v1, %v2663_v6  ;;  %3054 = vrot.lane.b32.xlu0 %v2969_v41, %s10135_s12  ;;  %v2787_v55 = vpop.permute.xlu0 %2786  ;;  %v1711_v47 = vadd.f32 %v15299_v20, %v1519_v29  ;;  %v15307_v6 = vld [vmem:[#allocation183_spill] sm:$0xff]  ;;  %v15308_v32 = vld [vmem:[#allocation190_spill] sm:$0xff]  ;;  %v15309_v18 = vld [vmem:[#allocation20_spill] sm:$0xff] }
 0x3f4   : > { %v2094_v28 = vadd.f32 %v15300_v9, %v1902_v8  ;;  %v2285_v2 = vadd.f32 %v15301_v45, %v2093_v39  ;;  %v2666_v38 = vadd.f32 %v15302_v23, %v11955_v35  ;;  %v1903_v37 = vadd.f32 %v15303_v40, %v1710_v4  ;;  %v15314_v10 = vld [vmem:[#allocation186_spill] sm:$0xff] }
 0x3f5   : > { %v2978_v19 = vshrl.u32 %v2907_v30, 16  ;;  %v2887_v42 = vmax.f32 %v2855_v49, 0.0  ;;  %3060 = vrot.lane.b32.xlu1 %v2973_v11, %s10135_s12  ;;  %v2976_v17 = vor.u32 %v2974_v44, %v2973_v11  ;;  %v2981_v25 = vshll.u32 %v2907_v30, 16  ;;  %v15320_v40 = vld [vmem:[#allocation26_spill] sm:$0xff] }
 0x3f6   : > { %v2785_v14 = vpop.permute.xlu1 %2784  ;;  %v2476_v60 = vadd.f32 %v15304_v12, %v2283_v7  ;;  %v2667_v33 = vadd.f32 %v15305_v0, %v2475_v5  ;;  %v2858_v24 = vadd.f32 %v2787_v55, %v2666_v38  ;;  %v2888_v31 = vmax.f32 %v2856_v48, 0.0 }
 0x3f7   : > { %v2980_v22 = vrot.slane %v2978_v19, 7  ;;  %v2908_v26 = vpack.c.bf16 %v2887_v42, %v2886_v56  ;;  %v2857_v61 = vadd.f32 %v2785_v14, %v2665_v34  ;;  %3058 = vrot.lane.b32.xlu0 %v2976_v17, %s10135_s12  ;;  %v2791_v35 = vpop.permute.xlu0 %2790  ;;  %v2286_v16 = vadd.f32 %v15306_v52, %v2094_v28  ;;  %v15316_v56 = vld [vmem:[#allocation84_spill] sm:$0xff]  ;;  %v15318_v28 = vld [vmem:[#allocation191_spill] sm:$0xff] }
 0x3f8   : > { %v2095_v3 = vadd.f32 %v15307_v6, %v1903_v37  ;;  %v2477_v54 = vadd.f32 %v15308_v32, %v2284_v27  ;;  %v2668_v58 = vadd.f32 %v15309_v18, %v2476_v60  ;;  %v1904_v29 = vadd.f32 %v15310_v15, %v1711_v47  ;;  %v15317_v47 = vld [vmem:[#allocation188_spill] sm:$0xff] }
 0x3f9   : > { %v2985_v50 = vshrl.u32 %v2908_v26, 16  ;;  %v2889_v57 = vmax.f32 %v2857_v61, 0.0  ;;  %3064 = vrot.lane.b32.xlu1 %v2980_v22, %s10135_s12  ;;  %v2983_v21 = vor.u32 %v2981_v25, %v2980_v22  ;;  %v2988_v59 = vshll.u32 %v2908_v26, 16  ;;  %v15319_v26 = vld [vmem:[#allocation193_spill] sm:$0xff] }
 0x3fa   : > { %v2789_v41 = vpop.permute.xlu1 %2788  ;;  %v2478_v4 = vadd.f32 %v15311_v63, %v2285_v2  ;;  %v2669_v43 = vadd.f32 %v15312_v51, %v2477_v54  ;;  %v2890_v1 = vmax.f32 %v2858_v24, 0.0  ;;  %v2860_v44 = vadd.f32 %v2791_v35, %v2668_v58 }
 0x3fb   : > { %v2987_v7 = vrot.slane %v2985_v50, 7  ;;  %v2909_v5 = vpack.c.bf16 %v2889_v57, %v2888_v31  ;;  %v2859_v46 = vadd.f32 %v2789_v41, %v2667_v33  ;;  %3062 = vrot.lane.b32.xlu0 %v2983_v21, %s10135_s12  ;;  %v2795_v27 = vpop.permute.xlu0 %2794  ;;  %v2287_v8 = vadd.f32 %v15313_v13, %v2095_v3 }
 0x3fc   : > { %v2096_v39 = vadd.f32 %v15314_v10, %v1904_v29  ;;  %v2479_v34 = vadd.f32 %v15315_v62, %v2286_v16  ;;  %v2670_v19 = vadd.f32 %v15316_v56, %v2478_v4  ;;  %v2892_v38 = vmax.f32 %v2860_v44, 0.0  ;;  %v3124_v62 = vld [vmem:[#allocation2 + $0x10] sm:$0xff] }
 0x3fd   : > { %v2992_v11 = vshrl.u32 %v2909_v5, 16  ;;  %v2891_v30 = vmax.f32 %v2859_v46, 0.0  ;;  %3068 = vrot.lane.b32.xlu1 %v2987_v7, %s10135_s12  ;;  %v2990_v49 = vor.u32 %v2988_v59, %v2987_v7  ;;  %v2995_v55 = vshll.u32 %v2909_v5, 16 }
 0x3fe   : > { %v2793_v48 = vpop.permute.xlu1 %2792  ;;  %v2288_v9 = vadd.f32 %v15317_v47, %v2096_v39  ;;  %v2480_v45 = vadd.f32 %v15318_v28, %v2287_v8  ;;  %v2671_v2 = vadd.f32 %v11799_v36, %v2479_v34  ;;  %v2862_v23 = vadd.f32 %v2795_v27, %v2670_v19  ;;  %v3129_v8 = vld [vmem:[#allocation2 + $0x18] sm:$0x1]  ;;  %v3135_v19 = vld [vmem:[#allocation2 + $0x28] sm:$0x1] }
 0x3ff   : > { %v2994_v42 = vrot.slane %v2992_v11, 7  ;;  %v2910_v17 = vpack.c.bf16 %v2891_v30, %v2890_v1  ;;  %v2861_v20 = vadd.f32 %v2793_v48, %v2669_v43  ;;  %3066 = vrot.lane.b32.xlu0 %v2990_v49, %s10135_s12  ;;  %v2799_v12 = vpop.permute.xlu0 %2798  ;;  %v3141_v47 = vld [vmem:[#allocation2 + $0x38] sm:$0x1] }
 0x400   : > { %v2481_v61 = vadd.f32 %v15319_v26, %v2288_v9  ;;  %v2672_v37 = vadd.f32 %v15320_v40, %v2480_v45  ;;  %v2894_v50 = vmax.f32 %v2862_v23, 0.0  ;;  %v3138_v45 = vld [vmem:[#allocation2 + $0x30] sm:$0xff]  ;;  %v3144_v26 = vld [vmem:[#allocation2 + $0x40] sm:$0xff] }
 0x401   : > { %v2999_v14 = vshrl.u32 %v2910_v17, 16  ;;  %v2893_v22 = vmax.f32 %v2861_v20, 0.0  ;;  %3072 = vrot.lane.b32.xlu1 %v2994_v42, %s10135_s12  ;;  %v2997_v25 = vor.u32 %v2995_v55, %v2994_v42  ;;  %v3002_v33 = vshll.u32 %v2910_v17, 16  ;;  %v3132_v55 = vld [vmem:[#allocation2 + $0x20] sm:$0xff] }
 0x402   : > { %v2797_v60 = vpop.permute.xlu1 %2796  ;;  %v2673_v36 = vadd.f32 %v11823_v53, %v2481_v61  ;;  %v2864_v35 = vadd.f32 %v2799_v12, %v2672_v37  ;;  %v3153_v37 = vld [vmem:[#allocation2 + $0x58] sm:$0x1] }
 0x403   : > { %v3001_v0 = vrot.slane %v2999_v14, 7  ;;  %v2911_v24 = vpack.c.bf16 %v2893_v22, %v2892_v38  ;;  %v2863_v31 = vadd.f32 %v2797_v60, %v2671_v2  ;;  %3070 = vrot.lane.b32.xlu0 %v2997_v25, %s10135_s12  ;;  %v3147_v14 = vld [vmem:[#allocation2 + $0x48] sm:$0x1] }
 0x404   : > { %v2896_v18 = vmax.f32 %v2864_v35, 0.0  ;;  %v3156_v35 = vld [vmem:[#allocation2 + $0x60] sm:$0xff] }
 0x405   : > { %v3006_v57 = vshrl.u32 %v2911_v24, 16  ;;  %v2895_v21 = vmax.f32 %v2863_v31, 0.0  ;;  %3076 = vrot.lane.b32.xlu1 %v3001_v0, %s10135_s12  ;;  %v3004_v52 = vor.u32 %v3002_v33, %v3001_v0  ;;  %v3009_v3 = vshll.u32 %v2911_v24, 16  ;;  %v3150_v0 = vld [vmem:[#allocation2 + $0x50] sm:$0xff] }
 0x406   : > { %v2801_v16 = vpop.permute.xlu1 %2800 }
 0x407   : > { %v3008_v6 = vrot.slane %v3006_v57, 7  ;;  %v2912_v32 = vpack.c.bf16 %v2895_v21, %v2894_v50  ;;  %v2865_v54 = vadd.f32 %v2801_v16, %v2673_v36  ;;  %3074 = vrot.lane.b32.xlu0 %v3004_v52, %s10135_s12  ;;  %v3159_v36 = vld [vmem:[#allocation2 + $0x68] sm:$0x1]  ;;  %v3165_v16 = vld [vmem:[#allocation2 + $0x78] sm:$0x1] }
 0x409   : > { %v3013_v58 = vshrl.u32 %v2912_v32, 16  ;;  %v2897_v41 = vmax.f32 %v2865_v54, 0.0  ;;  %3080 = vrot.lane.b32.xlu1 %v3008_v6, %s10135_s12  ;;  %v3011_v53 = vor.u32 %v3009_v3, %v3008_v6  ;;  %v3016_v59 = vshll.u32 %v2912_v32, 16  ;;  %v3162_v32 = vld [vmem:[#allocation2 + $0x70] sm:$0xff] }
 0x40b   : > { %v3015_v7 = vrot.slane %v3013_v58, 7  ;;  %v2913_v5 = vpack.c.bf16 %v2897_v41, %v2896_v18  ;;  %3078 = vrot.lane.b32.xlu0 %v3011_v53, %s10135_s12  ;;  %v3171_v41 = vld [vmem:[#allocation2 + $0x88] sm:$0x1] }
 0x40d   : > { %v3020_v46 = vshrl.u32 %v2913_v5, 16  ;;  %3084 = vrot.lane.b32.xlu1 %v3015_v7, %s10135_s12  ;;  %v3018_v15 = vor.u32 %v3016_v59, %v3015_v7  ;;  %v3023_v63 = vshll.u32 %v2913_v5, 16  ;;  %v3168_v59 = vld [vmem:[#allocation2 + $0x80] sm:$0xff] }
 0x40f   : > { %v3022_v29 = vrot.slane %v3020_v46, 7  ;;  %3082 = vrot.lane.b32.xlu0 %v3018_v15, %s10135_s12  ;;  %v3177_v15 = vld [vmem:[#allocation2 + $0x98] sm:$0x1] }
 0x411   : > { %3088 = vrot.lane.b32.xlu1 %v3022_v29, %s10135_s12  ;;  %v3025_v4 = vor.u32 %v3023_v63, %v3022_v29 }
 0x413   : > { %3086 = vrot.lane.b32.xlu0 %v3025_v4, %s10135_s12  ;;  %v3174_v4 = vld [vmem:[#allocation2 + $0x90] sm:$0xff] }
 0x420   : > { %v9501_v51 = vpop.f32.mrb[0].mxu1 }
 0x421   : > { %3699 = vst.msk [vmem:[#allocation3 + $0x10] sm:$0xff] %vm1184_vm11, %v9501_v51  ;;  %v3410_v43 = vpop.f32.mrb[1].mxu1 }
 0x422   : > { %3697 = vst.msk [vmem:[#allocation3] sm:$0xff] %vm1184_vm11, %v3410_v43  ;;  %v9502_v1 = vpop.f32.mrb[2].mxu1 }
 0x423   : > { %v3413_v11 = vpop.f32.mrb[3].mxu1 }
 0x424   : > { %3698 = vst.msk [vmem:[#allocation3 + $0x8] sm:$0xff] %vm1184_vm11, %v3413_v11  ;;  %v3183_v11 = vld [vmem:[#allocation2 + $0xa8] sm:$0x1] }
 0x42b   : > { %v3842_v44 = vld [vmem:[#allocation3 + $0x9] sm:$0xff]  ;;  %v3841_v30 = vld [vmem:[#allocation3 + $0x1] sm:$0xff] }
 0x42c   : > { %3907 = vrot.lane.b32.xlu1 %v3842_v44, %s10128_s26  ;;  %3905 = vrot.lane.b32.xlu0 %v3841_v30, %s10128_s26  ;;  %v4034_v27 = vld [vmem:[#allocation3 + $0xa] sm:$0xff]  ;;  %v4033_v49 = vld [vmem:[#allocation3 + $0x2] sm:$0xff] }
 0x430   : > { %4099 = vrot.lane.b32.xlu1 %v4034_v27, %s10127_s24  ;;  %4097 = vrot.lane.b32.xlu0 %v4033_v49, %s10127_s24  ;;  %v3180_v27 = vld [vmem:[#allocation2 + $0xa0] sm:$0xff] }
 0x447   : > { %v3029_v10 = vpop.permute.xlu1 %3028 }
 0x448   : > { %v3130_v34 = vsel %vm12046_vm15, %v3029_v10, %v3129_v8  ;;  %v3189_v10 = vld [vmem:[#allocation2 + $0xb8] sm:$0x1] }
 0x449   : > { %3131 = vst [vmem:[#allocation2 + $0x18] sm:$0x1] %v3130_v34  ;;  %v3027_v56 = vpop.permute.xlu0 %3026 }
 0x44a   : > { %v3125_v48 = vsel %vm12051_vm1, %v3027_v56, %v3124_v62  ;;  %v3186_v56 = vld [vmem:[#allocation2 + $0xb0] sm:$0xff] }
 0x44b   : > { %3126 = vst [vmem:[#allocation2 + $0x10] sm:$0xff] %v3125_v48  ;;  %v3033_v42 = vpop.permute.xlu1 %3032  ;;  %9503 = vmatprep.mubr.msk.bf16.mxu1 %vm3267_vm12, %v3125_v48 }
 0x44c   : > { %v3136_v17 = vsel %vm12046_vm15, %v3033_v42, %v3135_v19 }
 0x44d   : > { %3137 = vst [vmem:[#allocation2 + $0x28] sm:$0x1] %v3136_v17  ;;  %v3031_v20 = vpop.permute.xlu0 %3030 }
 0x44e   : > { %v3133_v9 = vsel %vm12051_vm1, %v3031_v20, %v3132_v55  ;;  %v3195_v55 = vld [vmem:[#allocation2 + $0xc8] sm:$0x1] }
 0x44f   : > { %3134 = vst [vmem:[#allocation2 + $0x20] sm:$0xff] %v3133_v9  ;;  %v3037_v28 = vpop.permute.xlu1 %3036 }
 0x450   : > { %v3142_v2 = vsel %vm12046_vm15, %v3037_v28, %v3141_v47  ;;  %v3225_v23 = vld [vmem:[#allocation2 + $0x18] sm:$0xff]  ;;  %v3192_v47 = vld [vmem:[#allocation2 + $0xc0] sm:$0xff] }
 0x451   : > { %3143 = vst [vmem:[#allocation2 + $0x38] sm:$0x1] %v3142_v2  ;;  %v3035_v38 = vpop.permute.xlu0 %3034  ;;  %9504 = vmatmul.mubr.msk.bf16.gmra.mrb[4].mxu1 %vm3267_vm12, %v3225_v23 }
 0x452   : > { %v3139_v22 = vsel %vm12051_vm1, %v3035_v38, %v3138_v45  ;;  %9507 = vmatprep.mubr.msk.bf16.mxu1 %vm3267_vm12, %v3133_v9  ;;  %v3201_v45 = vld [vmem:[#allocation2 + $0xd8] sm:$0x1]  ;;  %v3198_v38 = vld [vmem:[#allocation2 + $0xd0] sm:$0xff] }
 0x453   : > { %3140 = vst [vmem:[#allocation2 + $0x30] sm:$0xff] %v3139_v22  ;;  %v3041_v25 = vpop.permute.xlu1 %3040 }
 0x454   : > { %v3148_v61 = vsel %vm12046_vm15, %v3041_v25, %v3147_v14  ;;  %v3227_v24 = vld [vmem:[#allocation2 + $0x28] sm:$0xff] }
 0x455   : > { %3149 = vst [vmem:[#allocation2 + $0x48] sm:$0x1] %v3148_v61  ;;  %v3039_v40 = vpop.permute.xlu0 %3038 }
 0x456   : > { %v3145_v12 = vsel %vm12051_vm1, %v3039_v40, %v3144_v26  ;;  %v3207_v26 = vld [vmem:[#allocation2 + $0xe8] sm:$0x1] }
 0x457   : > { %3146 = vst [vmem:[#allocation2 + $0x40] sm:$0xff] %v3145_v12  ;;  %v3045_v60 = vpop.permute.xlu1 %3044 }
 0x458   : > { %v3154_v33 = vsel %vm12046_vm15, %v3045_v60, %v3153_v37  ;;  %v3229_v18 = vld [vmem:[#allocation2 + $0x38] sm:$0xff]  ;;  %v3204_v37 = vld [vmem:[#allocation2 + $0xe0] sm:$0xff] }
 0x459   : > { %3155 = vst [vmem:[#allocation2 + $0x58] sm:$0x1] %v3154_v33  ;;  %v3043_v31 = vpop.permute.xlu0 %3042  ;;  %9508 = vmatmul.mubr.msk.bf16.gmra.mrb[8].mxu1 %vm3267_vm12, %v3227_v24 }
 0x45a   : > { %v3151_v50 = vsel %vm12051_vm1, %v3043_v31, %v3150_v0  ;;  %9511 = vmatprep.mubr.msk.bf16.mxu1 %vm3267_vm12, %v3139_v22  ;;  %v3213_v0 = vld [vmem:[#allocation2 + $0xf8] sm:$0x1]  ;;  %v3210_v31 = vld [vmem:[#allocation2 + $0xf0] sm:$0xff] }
 0x45b   : > { %3152 = vst [vmem:[#allocation2 + $0x50] sm:$0xff] %v3151_v50  ;;  %v3049_v57 = vpop.permute.xlu1 %3048 }
 0x45c   : > { %v3160_v21 = vsel %vm12046_vm15, %v3049_v57, %v3159_v36  ;;  %v3231_v43 = vld [vmem:[#allocation2 + $0x48] sm:$0xff] }
 0x45d   : > { %3161 = vst [vmem:[#allocation2 + $0x68] sm:$0x1] %v3160_v21  ;;  %v3047_v52 = vpop.permute.xlu0 %3046 }
 0x45e   : > { %v3157_v6 = vsel %vm12051_vm1, %v3047_v52, %v3156_v35  ;;  %v3219_v35 = vld [vmem:[#allocation2 + $0x108] sm:$0x1] }
 0x45f   : > { %3158 = vst [vmem:[#allocation2 + $0x60] sm:$0xff] %v3157_v6  ;;  %v3053_v3 = vpop.permute.xlu1 %3052 }
 0x460   : > { %v3166_v54 = vsel %vm12046_vm15, %v3053_v3, %v3165_v16  ;;  %v3233_v48 = vld [vmem:[#allocation2 + $0x58] sm:$0xff]  ;;  %v3216_v16 = vld [vmem:[#allocation2 + $0x100] sm:$0xff] }
 0x461   : > { %3167 = vst [vmem:[#allocation2 + $0x78] sm:$0x1] %v3166_v54  ;;  %v3051_v58 = vpop.permute.xlu0 %3050  ;;  %9512 = vmatmul.mubr.msk.bf16.gmra.mrb[12].mxu1 %vm3267_vm12, %v3229_v18 }
 0x462   : > { %v3163_v53 = vsel %vm12051_vm1, %v3051_v58, %v3162_v32  ;;  %9515 = vmatprep.mubr.msk.bf16.mxu1 %vm3267_vm12, %v3145_v12 }
 0x463   : > { %3164 = vst [vmem:[#allocation2 + $0x70] sm:$0xff] %v3163_v53  ;;  %v3057_v7 = vpop.permute.xlu1 %3056 }
 0x464   : > { %v3172_v5 = vsel %vm12046_vm15, %v3057_v7, %v3171_v41  ;;  %v3235_v22 = vld [vmem:[#allocation2 + $0x68] sm:$0xff] }
 0x465   : > { %3173 = vst [vmem:[#allocation2 + $0x88] sm:$0x1] %v3172_v5  ;;  %v3055_v46 = vpop.permute.xlu0 %3054 }
 0x466   : > { %v12094_v29 = vsel %vm12051_vm1, %v3055_v46, %v3168_v59 }
 0x467   : > { %3170 = vst [vmem:[#allocation2 + $0x80] sm:$0xff] %v12094_v29  ;;  %v3061_v63 = vpop.permute.xlu1 %3060 }
 0x468   : > { %v3178_v51 = vsel %vm12046_vm15, %v3061_v63, %v3177_v15 }
 0x469   : > { %3179 = vst [vmem:[#allocation2 + $0x98] sm:$0x1] %v3178_v51  ;;  %v3059_v1 = vpop.permute.xlu0 %3058  ;;  %9516 = vmatmul.mubr.msk.bf16.gmra.mrb[16].mxu1 %vm3267_vm12, %v3231_v43 }
 0x46a   : > { %v12102_v44 = vsel %vm12051_vm1, %v3059_v1, %v3174_v4  ;;  %9519 = vmatprep.mubr.msk.bf16.mxu1 %vm3267_vm12, %v3151_v50  ;;  %v3237_v50 = vld [vmem:[#allocation2 + $0x78] sm:$0xff] }
 0x46b   : > { %3176 = vst [vmem:[#allocation2 + $0x90] sm:$0xff] %v12102_v44  ;;  %v3065_v30 = vpop.permute.xlu1 %3064 }
 0x46c   : > { %v3184_v49 = vsel %vm12046_vm15, %v3065_v30, %v3183_v11  ;;  %v3239_v54 = vld [vmem:[#allocation2 + $0x88] sm:$0xff] }
 0x46d   : > { %3185 = vst [vmem:[#allocation2 + $0xa8] sm:$0x1] %v3184_v49  ;;  %v3063_v8 = vpop.permute.xlu0 %3062 }
 0x46e   : > { %v12110_v62 = vsel %vm12051_vm1, %v3063_v8, %v3180_v27 }
 0x46f   : > { %3182 = vst [vmem:[#allocation2 + $0xa0] sm:$0xff] %v12110_v62  ;;  %v3069_v34 = vpop.permute.xlu1 %3068 }
 0x470   : > { %v3190_v19 = vsel %vm12046_vm15, %v3069_v34, %v3189_v10  ;;  %v3241_v18 = vld [vmem:[#allocation2 + $0x98] sm:$0xff] }
 0x471   : > { %3191 = vst [vmem:[#allocation2 + $0xb8] sm:$0x1] %v3190_v19  ;;  %v3067_v42 = vpop.permute.xlu0 %3066  ;;  %9520 = vmatmul.mubr.msk.bf16.gmra.mrb[20].mxu1 %vm3267_vm12, %v3233_v48 }
 0x472   : > { %v3187_v17 = vsel %vm12051_vm1, %v3067_v42, %v3186_v56  ;;  %9523 = vmatprep.mubr.msk.bf16.mxu1 %vm3267_vm12, %v3157_v6 }
 0x473   : > { %3188 = vst [vmem:[#allocation2 + $0xb0] sm:$0xff] %v3187_v17  ;;  %v3073_v20 = vpop.permute.xlu1 %3072 }
 0x474   : > { %v3196_v9 = vsel %vm12046_vm15, %v3073_v20, %v3195_v55  ;;  %v3243_v13 = vld [vmem:[#allocation2 + $0xa8] sm:$0xff] }
 0x475   : > { %3197 = vst [vmem:[#allocation2 + $0xc8] sm:$0x1] %v3196_v9  ;;  %v3071_v28 = vpop.permute.xlu0 %3070 }
 0x476   : > { %v3193_v2 = vsel %vm12051_vm1, %v3071_v28, %v3192_v47 }
 0x477   : > { %3194 = vst [vmem:[#allocation2 + $0xc0] sm:$0xff] %v3193_v2  ;;  %v3077_v23 = vpop.permute.xlu1 %3076 }
 0x478   : > { %v3202_v14 = vsel %vm12046_vm15, %v3077_v23, %v3201_v45  ;;  %v3245_v39 = vld [vmem:[#allocation2 + $0xb8] sm:$0xff] }
 0x479   : > { %3203 = vst [vmem:[#allocation2 + $0xd8] sm:$0x1] %v3202_v14  ;;  %v3075_v25 = vpop.permute.xlu0 %3074  ;;  %9524 = vmatmul.mubr.msk.bf16.gmra.mrb[24].mxu1 %vm3267_vm12, %v3235_v22 }
 0x47a   : > { %v3199_v61 = vsel %vm12051_vm1, %v3075_v25, %v3198_v38  ;;  %9527 = vmatprep.mubr.msk.bf16.mxu1 %vm3267_vm12, %v3163_v53 }
 0x47b   : > { %3200 = vst [vmem:[#allocation2 + $0xd0] sm:$0xff] %v3199_v61  ;;  %v3081_v40 = vpop.permute.xlu1 %3080 }
 0x47c   : > { %v3208_v12 = vsel %vm12046_vm15, %v3081_v40, %v3207_v26  ;;  %v3247_v58 = vld [vmem:[#allocation2 + $0xc8] sm:$0xff] }
 0x47d   : > { %3209 = vst [vmem:[#allocation2 + $0xe8] sm:$0x1] %v3208_v12  ;;  %v3079_v60 = vpop.permute.xlu0 %3078 }
 0x47e   : > { %v3205_v33 = vsel %vm12051_vm1, %v3079_v60, %v3204_v37 }
 0x47f   : > { %3206 = vst [vmem:[#allocation2 + $0xe0] sm:$0xff] %v3205_v33  ;;  %v3085_v24 = vpop.permute.xlu1 %3084 }
 0x480   : > { %v3214_v36 = vsel %vm12046_vm15, %v3085_v24, %v3213_v0  ;;  %v3249_v41 = vld [vmem:[#allocation2 + $0xd8] sm:$0xff] }
 0x481   : > { %3215 = vst [vmem:[#allocation2 + $0xf8] sm:$0x1] %v3214_v36  ;;  %v3083_v57 = vpop.permute.xlu0 %3082  ;;  %9528 = vmatmul.mubr.msk.bf16.gmra.mrb[28].mxu1 %vm3267_vm12, %v3237_v50 }
 0x482   : > { %v3211_v21 = vsel %vm12051_vm1, %v3083_v57, %v3210_v31  ;;  %9531 = vmatprep.mubr.msk.bf16.mxu1 %vm3267_vm12, %v12094_v29 }
 0x483   : > { %3212 = vst [vmem:[#allocation2 + $0xf0] sm:$0xff] %v3211_v21  ;;  %v3089_v52 = vpop.permute.xlu1 %3088 }
 0x484   : > { %v3220_v6 = vsel %vm12046_vm15, %v3089_v52, %v3219_v35  ;;  %v3251_v53 = vld [vmem:[#allocation2 + $0xe8] sm:$0xff] }
 0x485   : > { %3221 = vst [vmem:[#allocation2 + $0x108] sm:$0x1] %v3220_v6  ;;  %v3087_v3 = vpop.permute.xlu0 %3086 }
 0x486   : > { %v3217_v32 = vsel %vm12051_vm1, %v3087_v3, %v3216_v16 }
 0x487   : > { %3218 = vst [vmem:[#allocation2 + $0x100] sm:$0xff] %v3217_v32 }
 0x488   : > { %v3253_v7 = vld [vmem:[#allocation2 + $0xf8] sm:$0xff] }
 0x489   : > { %9532 = vmatmul.mubr.msk.bf16.gmra.mrb[32].mxu1 %vm3267_vm12, %v3239_v54 }
 0x48a   : > { %9535 = vmatprep.mubr.msk.bf16.mxu1 %vm3267_vm12, %v12102_v44 }
 0x48c   : > { %v3255_v59 = vld [vmem:[#allocation2 + $0x108] sm:$0xff] }
 0x491   : > { %9536 = vmatmul.mubr.msk.bf16.gmra.mrb[36].mxu1 %vm3267_vm12, %v3241_v18 }
 0x492   : > { %9539 = vmatprep.mubr.msk.bf16.mxu1 %vm3267_vm12, %v12110_v62 }
 0x499   : > { %9540 = vmatmul.mubr.msk.bf16.gmra.mrb[40].mxu1 %vm3267_vm12, %v3243_v13 }
 0x49a   : > { %9543 = vmatprep.mubr.msk.bf16.mxu1 %vm3267_vm12, %v3187_v17 }
 0x4a1   : > { %9544 = vmatmul.mubr.msk.bf16.gmra.mrb[44].mxu1 %vm3267_vm12, %v3245_v39 }
 0x4a2   : > { %9547 = vmatprep.mubr.msk.bf16.mxu1 %vm3267_vm12, %v3193_v2 }
 0x4a9   : > { %9548 = vmatmul.mubr.msk.bf16.gmra.mrb[48].mxu1 %vm3267_vm12, %v3247_v58 }
 0x4aa   : > { %9551 = vmatprep.mubr.msk.bf16.mxu1 %vm3267_vm12, %v3199_v61 }
 0x4b1   : > { %9552 = vmatmul.mubr.msk.bf16.gmra.mrb[52].mxu1 %vm3267_vm12, %v3249_v41 }
 0x4b2   : > { %9555 = vmatprep.mubr.msk.bf16.mxu1 %vm3267_vm12, %v3205_v33 }
 0x4b9   : > { %9556 = vmatmul.mubr.msk.bf16.gmra.mrb[56].mxu1 %vm3267_vm12, %v3251_v53 }
 0x4ba   : > { %9559 = vmatprep.mubr.msk.bf16.mxu1 %vm3267_vm12, %v3211_v21 }
 0x4c1   : > { %9560 = vmatmul.mubr.msk.bf16.gmra.mrb[60].mxu1 %vm3267_vm12, %v3253_v7 }
 0x4c2   : > { %9563 = vmatprep.mubr.msk.bf16.mxu1 %vm3267_vm12, %v3217_v32 }
 0x4c9   : > { %9564 = vmatmul.mubr.msk.bf16.gmra.mrb[64].mxu1 %vm3267_vm12, %v3255_v59 }
 0x524   : > { %v9505_v5 = vpop.f32.mrb[4].mxu1 }
 0x525   : > { %3703 = vst.msk [vmem:[#allocation3 + $0x30] sm:$0xff] %vm1184_vm11, %v9505_v5  ;;  %v3426_v46 = vpop.f32.mrb[5].mxu1 }
 0x526   : > { %3701 = vst.msk [vmem:[#allocation3 + $0x20] sm:$0xff] %vm1184_vm11, %v3426_v46  ;;  %v9506_v15 = vpop.f32.mrb[6].mxu1 }
 0x527   : > { %v3429_v29 = vpop.f32.mrb[7].mxu1 }
 0x528   : > { %3702 = vst.msk [vmem:[#allocation3 + $0x28] sm:$0xff] %vm1184_vm11, %v3429_v29 }
 0x52c   : > { %v9509_v63 = vpop.f32.mrb[8].mxu1 }
 0x52d   : > { %3707 = vst.msk [vmem:[#allocation3 + $0x50] sm:$0xff] %vm1184_vm11, %v9509_v63  ;;  %v3442_v4 = vpop.f32.mrb[9].mxu1  ;;  %v4225_v51 = vld [vmem:[#allocation3 + $0x20] sm:$0xff] }
 0x52e   : > { %3705 = vst.msk [vmem:[#allocation3 + $0x40] sm:$0xff] %vm1184_vm11, %v3442_v4  ;;  %4289 = vrot.lane.b32.xlu0 %v4225_v51, %s10129_s13  ;;  %v9510_v43 = vpop.f32.mrb[10].mxu1 }
 0x52f   : > { %v3445_v1 = vpop.f32.mrb[11].mxu1  ;;  %v3844_v11 = vld [vmem:[#allocation3 + $0x29] sm:$0xff]  ;;  %v3843_v44 = vld [vmem:[#allocation3 + $0x21] sm:$0xff] }
 0x530   : > { %3706 = vst.msk [vmem:[#allocation3 + $0x48] sm:$0xff] %vm1184_vm11, %v3445_v1  ;;  %3911 = vrot.lane.b32.xlu1 %v3844_v11, %s10128_s26  ;;  %v4036_v30 = vld [vmem:[#allocation3 + $0x2a] sm:$0xff]  ;;  %v4035_v8 = vld [vmem:[#allocation3 + $0x22] sm:$0xff] }
 0x531   : > { %v4226_v34 = vld [vmem:[#allocation3 + $0x28] sm:$0xff] }
 0x532   : > { %3909 = vrot.lane.b32.xlu0 %v3843_v44, %s10128_s26 }
 0x534   : > { %4103 = vrot.lane.b32.xlu1 %v4036_v30, %s10127_s24  ;;  %v9513_v27 = vpop.f32.mrb[12].mxu1 }
 0x535   : > { %3711 = vst.msk [vmem:[#allocation3 + $0x70] sm:$0xff] %vm1184_vm11, %v9513_v27  ;;  %v3458_v49 = vpop.f32.mrb[13].mxu1  ;;  %v4227_v55 = vld [vmem:[#allocation3 + $0x40] sm:$0xff] }
 0x536   : > { %3709 = vst.msk [vmem:[#allocation3 + $0x60] sm:$0xff] %vm1184_vm11, %v3458_v49  ;;  %4101 = vrot.lane.b32.xlu0 %v4035_v8, %s10127_s24  ;;  %v9514_v10 = vpop.f32.mrb[14].mxu1 }
 0x537   : > { %v3461_v62 = vpop.f32.mrb[15].mxu1  ;;  %v3846_v17 = vld [vmem:[#allocation3 + $0x49] sm:$0xff]  ;;  %v3845_v9 = vld [vmem:[#allocation3 + $0x41] sm:$0xff] }
 0x538   : > { %3710 = vst.msk [vmem:[#allocation3 + $0x68] sm:$0xff] %vm1184_vm11, %v3461_v62  ;;  %4291 = vrot.lane.b32.xlu1 %v4226_v34, %s10129_s13  ;;  %v4038_v2 = vld [vmem:[#allocation3 + $0x4a] sm:$0xff]  ;;  %v4037_v23 = vld [vmem:[#allocation3 + $0x42] sm:$0xff] }
 0x539   : > { %v4228_v38 = vld [vmem:[#allocation3 + $0x48] sm:$0xff] }
 0x53a   : > { %4481 = vrot.lane.b32.xlu0 %v3843_v44, %s10130_s16 }
 0x53c   : > { %4483 = vrot.lane.b32.xlu1 %v3844_v11, %s10130_s16  ;;  %v9517_v56 = vpop.f32.mrb[16].mxu1 }
 0x53d   : > { %3715 = vst.msk [vmem:[#allocation3 + $0x90] sm:$0xff] %vm1184_vm11, %v9517_v56  ;;  %v3474_v19 = vpop.f32.mrb[17].mxu1  ;;  %v4229_v37 = vld [vmem:[#allocation3 + $0x60] sm:$0xff] }
 0x53e   : > { %3713 = vst.msk [vmem:[#allocation3 + $0x80] sm:$0xff] %vm1184_vm11, %v3474_v19  ;;  %4673 = vrot.lane.b32.xlu0 %v4035_v8, %s10131_s8  ;;  %v9518_v48 = vpop.f32.mrb[18].mxu1 }
 0x53f   : > { %v3477_v42 = vpop.f32.mrb[19].mxu1  ;;  %v3848_v0 = vld [vmem:[#allocation3 + $0x69] sm:$0xff]  ;;  %v3847_v33 = vld [vmem:[#allocation3 + $0x61] sm:$0xff] }
 0x540   : > { %3714 = vst.msk [vmem:[#allocation3 + $0x88] sm:$0xff] %vm1184_vm11, %v3477_v42  ;;  %4675 = vrot.lane.b32.xlu1 %v4036_v30, %s10131_s8  ;;  %v4040_v24 = vld [vmem:[#allocation3 + $0x6a] sm:$0xff]  ;;  %v4039_v50 = vld [vmem:[#allocation3 + $0x62] sm:$0xff] }
 0x541   : > { %v4230_v21 = vld [vmem:[#allocation3 + $0x68] sm:$0xff] }
 0x542   : > { %4293 = vrot.lane.b32.xlu0 %v4227_v55, %s10129_s13 }
 0x544   : > { %3915 = vrot.lane.b32.xlu1 %v3846_v17, %s10128_s26  ;;  %v9521_v20 = vpop.f32.mrb[20].mxu1 }
 0x545   : > { %3719 = vst.msk [vmem:[#allocation3 + $0xb0] sm:$0xff] %vm1184_vm11, %v9521_v20  ;;  %v3490_v47 = vpop.f32.mrb[21].mxu1  ;;  %v4231_v32 = vld [vmem:[#allocation3 + $0x80] sm:$0xff] }
 0x546   : > { %3717 = vst.msk [vmem:[#allocation3 + $0xa0] sm:$0xff] %vm1184_vm11, %v3490_v47  ;;  %3913 = vrot.lane.b32.xlu0 %v3845_v9, %s10128_s26  ;;  %v9522_v28 = vpop.f32.mrb[22].mxu1 }
 0x547   : > { %v3493_v45 = vpop.f32.mrb[23].mxu1  ;;  %v3850_v54 = vld [vmem:[#allocation3 + $0x89] sm:$0xff]  ;;  %v3849_v39 = vld [vmem:[#allocation3 + $0x81] sm:$0xff]  ;;  %v12261_v28 = vpop.permute.xlu0 %3905 }
 0x548   : > { %3718 = vst.msk [vmem:[#allocation3 + $0xa8] sm:$0xff] %vm1184_vm11, %v3493_v45  ;;  %4107 = vrot.lane.b32.xlu1 %v4038_v2, %s10127_s24  ;;  %v4042_v53 = vld [vmem:[#allocation3 + $0x8a] sm:$0xff]  ;;  %v4041_v7 = vld [vmem:[#allocation3 + $0x82] sm:$0xff] }
 0x549   : > { %v4232_v59 = vld [vmem:[#allocation3 + $0x88] sm:$0xff] }
 0x54a   : > { %4105 = vrot.lane.b32.xlu0 %v4037_v23, %s10127_s24 }
 0x54c   : > { %4295 = vrot.lane.b32.xlu1 %v4228_v38, %s10129_s13  ;;  %v9525_v14 = vpop.f32.mrb[24].mxu1  ;;  %v12265_v38 = vpop.permute.xlu1 %3907 }
 0x54d   : > { %3723 = vst.msk [vmem:[#allocation3 + $0xd0] sm:$0xff] %vm1184_vm11, %v9525_v14  ;;  %v3506_v22 = vpop.f32.mrb[25].mxu1  ;;  %v4233_v51 = vld [vmem:[#allocation3 + $0xa0] sm:$0xff] }
 0x54e   : > { %3721 = vst.msk [vmem:[#allocation3 + $0xc0] sm:$0xff] %vm1184_vm11, %v3506_v22  ;;  %4485 = vrot.lane.b32.xlu0 %v3845_v9, %s10130_s16  ;;  %v9526_v25 = vpop.f32.mrb[26].mxu1 }
 0x54f   : > { %v3509_v26 = vpop.f32.mrb[27].mxu1  ;;  %v3852_v11 = vld [vmem:[#allocation3 + $0xa9] sm:$0xff]  ;;  %v3851_v44 = vld [vmem:[#allocation3 + $0xa1] sm:$0xff]  ;;  %v12272_v25 = vpop.permute.xlu0 %4097 }
 0x550   : > { %3722 = vst.msk [vmem:[#allocation3 + $0xc8] sm:$0xff] %vm1184_vm11, %v3509_v26  ;;  %4487 = vrot.lane.b32.xlu1 %v3846_v17, %s10130_s16  ;;  %v4044_v30 = vld [vmem:[#allocation3 + $0xaa] sm:$0xff]  ;;  %v4043_v8 = vld [vmem:[#allocation3 + $0xa2] sm:$0xff] }
 0x551   : > { %v12246_v34 = vld [vmem:[#allocation3 + $0xa8] sm:$0xff] }
 0x552   : > { %4677 = vrot.lane.b32.xlu0 %v4037_v23, %s10131_s8 }
 0x554   : > { %4679 = vrot.lane.b32.xlu1 %v4038_v2, %s10131_s8  ;;  %v9529_v61 = vpop.f32.mrb[28].mxu1 }
 0x555   : > { %3727 = vst.msk [vmem:[#allocation3 + $0xf0] sm:$0xff] %vm1184_vm11, %v9529_v61  ;;  %v3522_v40 = vpop.f32.mrb[29].mxu1  ;;  %v4235_v55 = vld [vmem:[#allocation3 + $0xc0] sm:$0xff] }
 0x556   : > { %3725 = vst.msk [vmem:[#allocation3 + $0xe0] sm:$0xff] %vm1184_vm11, %v3522_v40  ;;  %4297 = vrot.lane.b32.xlu0 %v4229_v37, %s10129_s13  ;;  %v9530_v12 = vpop.f32.mrb[30].mxu1  ;;  %v12277_v40 = vpop.permute.xlu1 %4099 }
 0x557   : > { %v3525_v60 = vpop.f32.mrb[31].mxu1  ;;  %v3854_v17 = vld [vmem:[#allocation3 + $0xc9] sm:$0xff]  ;;  %v3853_v9 = vld [vmem:[#allocation3 + $0xc1] sm:$0xff] }
 0x558   : > { %3726 = vst.msk [vmem:[#allocation3 + $0xe8] sm:$0xff] %vm1184_vm11, %v3525_v60  ;;  %3919 = vrot.lane.b32.xlu1 %v3848_v0, %s10128_s26  ;;  %v4046_v23 = vld [vmem:[#allocation3 + $0xca] sm:$0xff]  ;;  %v4045_v14 = vld [vmem:[#allocation3 + $0xc2] sm:$0xff] }
 0x559   : > { %v12270_v22 = vld [vmem:[#allocation3 + $0xc8] sm:$0xff] }
 0x55a   : > { %3917 = vrot.lane.b32.xlu0 %v3847_v33, %s10128_s26 }
 0x55c   : > { %4111 = vrot.lane.b32.xlu1 %v4040_v24, %s10127_s24  ;;  %v9533_v31 = vpop.f32.mrb[32].mxu1 }
 0x55d   : > { %3731 = vst.msk [vmem:[#allocation3 + $0x110] sm:$0xff] %vm1184_vm11, %v9533_v31  ;;  %v3538_v36 = vpop.f32.mrb[33].mxu1 }
 0x55e   : > { %3729 = vst.msk [vmem:[#allocation3 + $0x100] sm:$0xff] %vm1184_vm11, %v3538_v36  ;;  %4109 = vrot.lane.b32.xlu0 %v4039_v50, %s10127_s24  ;;  %v9534_v57 = vpop.f32.mrb[34].mxu1 }
 0x55f   : > { %v3541_v35 = vpop.f32.mrb[35].mxu1  ;;  %v12297_v36 = vld [vmem:[#allocation3 + $0xe9] sm:$0xff]  ;;  %v12303_v57 = vld [vmem:[#allocation3 + $0xe1] sm:$0xff] }
 0x560   : > { %3730 = vst.msk [vmem:[#allocation3 + $0x108] sm:$0xff] %vm1184_vm11, %v3541_v35  ;;  %4299 = vrot.lane.b32.xlu1 %v4230_v21, %s10129_s13  ;;  %v12309_v21 = vld [vmem:[#allocation3 + $0xea] sm:$0xff] }
 0x562   : > { %4489 = vrot.lane.b32.xlu0 %v3847_v33, %s10130_s16 }
 0x564   : > { %4491 = vrot.lane.b32.xlu1 %v3848_v0, %s10130_s16  ;;  %v9537_v52 = vpop.f32.mrb[36].mxu1 }
 0x565   : > { %3735 = vst.msk [vmem:[#allocation3 + $0x130] sm:$0xff] %vm1184_vm11, %v9537_v52  ;;  %v3554_v16 = vpop.f32.mrb[37].mxu1 }
 0x566   : > { %3733 = vst.msk [vmem:[#allocation3 + $0x120] sm:$0xff] %vm1184_vm11, %v3554_v16  ;;  %4681 = vrot.lane.b32.xlu0 %v4039_v50, %s10131_s8  ;;  %v9538_v6 = vpop.f32.mrb[38].mxu1  ;;  %v12315_v16 = vld [vmem:[#allocation3 + $0xe2] sm:$0xff] }
 0x567   : > { %v3557_v3 = vpop.f32.mrb[39].mxu1 }
 0x568   : > { %3734 = vst.msk [vmem:[#allocation3 + $0x128] sm:$0xff] %vm1184_vm11, %v3557_v3  ;;  %4683 = vrot.lane.b32.xlu1 %v4040_v24, %s10131_s8  ;;  %v12291_v24 = vld [vmem:[#allocation3 + $0xe0] sm:$0xff]  ;;  %v12321_v3 = vld [vmem:[#allocation3 + $0xe8] sm:$0xff] }
 0x56a   : > { %4301 = vrot.lane.b32.xlu0 %v4231_v32, %s10129_s13 }
 0x56c   : > { %3923 = vrot.lane.b32.xlu1 %v3850_v54, %s10128_s26  ;;  %v9541_v18 = vpop.f32.mrb[40].mxu1 }
 0x56d   : > { %3739 = vst.msk [vmem:[#allocation3 + $0x150] sm:$0xff] %vm1184_vm11, %v9541_v18  ;;  %v3570_v13 = vpop.f32.mrb[41].mxu1 }
 0x56e   : > { %3737 = vst.msk [vmem:[#allocation3 + $0x140] sm:$0xff] %vm1184_vm11, %v3570_v13  ;;  %3921 = vrot.lane.b32.xlu0 %v3849_v39, %s10128_s26  ;;  %v9542_v58 = vpop.f32.mrb[42].mxu1 }
 0x56f   : > { %v3573_v41 = vpop.f32.mrb[43].mxu1  ;;  %v12343_v58 = vld [vmem:[#allocation3 + $0x100] sm:$0xff] }
 0x570   : > { %3738 = vst.msk [vmem:[#allocation3 + $0x148] sm:$0xff] %vm1184_vm11, %v3573_v41  ;;  %4115 = vrot.lane.b32.xlu1 %v4042_v53, %s10127_s24 }
 0x572   : > { %4113 = vrot.lane.b32.xlu0 %v4041_v7, %s10127_s24 }
 0x574   : > { %4303 = vrot.lane.b32.xlu1 %v4232_v59, %s10129_s13  ;;  %v9545_v5 = vpop.f32.mrb[44].mxu1  ;;  %v12355_v59 = vld [vmem:[#allocation3 + $0x101] sm:$0xff] }
 0x575   : > { %3743 = vst.msk [vmem:[#allocation3 + $0x170] sm:$0xff] %vm1184_vm11, %v9545_v5  ;;  %v3586_v46 = vpop.f32.mrb[45].mxu1 }
 0x576   : > { %3741 = vst.msk [vmem:[#allocation3 + $0x160] sm:$0xff] %vm1184_vm11, %v3586_v46  ;;  %4493 = vrot.lane.b32.xlu0 %v3849_v39, %s10130_s16  ;;  %v9546_v15 = vpop.f32.mrb[46].mxu1  ;;  %v12361_v46 = vld [vmem:[#allocation3 + $0x10a] sm:$0xff] }
 0x577   : > { %v3589_v29 = vpop.f32.mrb[47].mxu1 }
 0x578   : > { %3742 = vst.msk [vmem:[#allocation3 + $0x168] sm:$0xff] %vm1184_vm11, %v3589_v29  ;;  %4495 = vrot.lane.b32.xlu1 %v3850_v54, %s10130_s16  ;;  %v12367_v29 = vld [vmem:[#allocation3 + $0x102] sm:$0xff] }
 0x57a   : > { %4685 = vrot.lane.b32.xlu0 %v4041_v7, %s10131_s8 }
 0x57c   : > { %4687 = vrot.lane.b32.xlu1 %v4042_v53, %s10131_s8  ;;  %v9549_v63 = vpop.f32.mrb[48].mxu1  ;;  %v12349_v53 = vld [vmem:[#allocation3 + $0x109] sm:$0xff] }
 0x57d   : > { %3747 = vst.msk [vmem:[#allocation3 + $0x190] sm:$0xff] %vm1184_vm11, %v9549_v63  ;;  %v3602_v4 = vpop.f32.mrb[49].mxu1 }
 0x57e   : > { %3745 = vst.msk [vmem:[#allocation3 + $0x180] sm:$0xff] %vm1184_vm11, %v3602_v4  ;;  %4305 = vrot.lane.b32.xlu0 %v4233_v51, %s10129_s13  ;;  %v9550_v43 = vpop.f32.mrb[50].mxu1  ;;  %v12373_v4 = vld [vmem:[#allocation3 + $0x108] sm:$0xff] }
 0x57f   : > { %v3605_v1 = vpop.f32.mrb[51].mxu1 }
 0x580   : > { %3746 = vst.msk [vmem:[#allocation3 + $0x188] sm:$0xff] %vm1184_vm11, %v3605_v1  ;;  %3927 = vrot.lane.b32.xlu1 %v3852_v11, %s10128_s26 }
 0x582   : > { %3925 = vrot.lane.b32.xlu0 %v3851_v44, %s10128_s26 }
 0x584   : > { %4119 = vrot.lane.b32.xlu1 %v4044_v30, %s10127_s24  ;;  %v9553_v27 = vpop.f32.mrb[52].mxu1 }
 0x585   : > { %3751 = vst.msk [vmem:[#allocation3 + $0x1b0] sm:$0xff] %vm1184_vm11, %v9553_v27  ;;  %v3618_v49 = vpop.f32.mrb[53].mxu1 }
 0x586   : > { %3749 = vst.msk [vmem:[#allocation3 + $0x1a0] sm:$0xff] %vm1184_vm11, %v3618_v49  ;;  %4117 = vrot.lane.b32.xlu0 %v4043_v8, %s10127_s24  ;;  %v9554_v10 = vpop.f32.mrb[54].mxu1  ;;  %v12399_v49 = vld [vmem:[#allocation3 + $0x121] sm:$0xff] }
 0x587   : > { %v3621_v62 = vpop.f32.mrb[55].mxu1  ;;  %v12405_v10 = vld [vmem:[#allocation3 + $0x12a] sm:$0xff] }
 0x588   : > { %3750 = vst.msk [vmem:[#allocation3 + $0x1a8] sm:$0xff] %vm1184_vm11, %v3621_v62  ;;  %4307 = vrot.lane.b32.xlu1 %v12246_v34, %s10129_s13 }
 0x58a   : > { %4497 = vrot.lane.b32.xlu0 %v3851_v44, %s10130_s16 }
 0x58c   : > { %4499 = vrot.lane.b32.xlu1 %v3852_v11, %s10130_s16  ;;  %v9557_v56 = vpop.f32.mrb[56].mxu1  ;;  %v12387_v11 = vld [vmem:[#allocation3 + $0x120] sm:$0xff] }
 0x58d   : > { %3755 = vst.msk [vmem:[#allocation3 + $0x1d0] sm:$0xff] %vm1184_vm11, %v9557_v56  ;;  %v3634_v19 = vpop.f32.mrb[57].mxu1  ;;  %v12411_v56 = vld [vmem:[#allocation3 + $0x122] sm:$0xff] }
 0x58e   : > { %3753 = vst.msk [vmem:[#allocation3 + $0x1c0] sm:$0xff] %vm1184_vm11, %v3634_v19  ;;  %4689 = vrot.lane.b32.xlu0 %v4043_v8, %s10131_s8  ;;  %v9558_v48 = vpop.f32.mrb[58].mxu1 }
 0x58f   : > { %v3637_v42 = vpop.f32.mrb[59].mxu1  ;;  %v12417_v48 = vld [vmem:[#allocation3 + $0x128] sm:$0xff] }
 0x590   : > { %3754 = vst.msk [vmem:[#allocation3 + $0x1c8] sm:$0xff] %vm1184_vm11, %v3637_v42  ;;  %4691 = vrot.lane.b32.xlu1 %v4044_v30, %s10131_s8  ;;  %v12393_v30 = vld [vmem:[#allocation3 + $0x129] sm:$0xff] }
 0x592   : > { %4309 = vrot.lane.b32.xlu0 %v4235_v55, %s10129_s13 }
 0x594   : > { %3931 = vrot.lane.b32.xlu1 %v3854_v17, %s10128_s26  ;;  %v9561_v20 = vpop.f32.mrb[60].mxu1 }
 0x595   : > { %3759 = vst.msk [vmem:[#allocation3 + $0x1f0] sm:$0xff] %vm1184_vm11, %v9561_v20  ;;  %v3650_v47 = vpop.f32.mrb[61].mxu1  ;;  %v12431_v20 = vld [vmem:[#allocation3 + $0x140] sm:$0xff] }
 0x596   : > { %3757 = vst.msk [vmem:[#allocation3 + $0x1e0] sm:$0xff] %vm1184_vm11, %v3650_v47  ;;  %3929 = vrot.lane.b32.xlu0 %v3853_v9, %s10128_s26  ;;  %v9562_v45 = vpop.f32.mrb[62].mxu1 }
 0x597   : > { %v3653_v2 = vpop.f32.mrb[63].mxu1 }
 0x598   : > { %3758 = vst.msk [vmem:[#allocation3 + $0x1e8] sm:$0xff] %vm1184_vm11, %v3653_v2  ;;  %4123 = vrot.lane.b32.xlu1 %v4046_v23, %s10127_s24  ;;  %v12443_v2 = vld [vmem:[#allocation3 + $0x141] sm:$0xff] }
 0x59a   : > { %4121 = vrot.lane.b32.xlu0 %v4045_v14, %s10127_s24 }
 0x59c   : > { %4311 = vrot.lane.b32.xlu1 %v12270_v22, %s10129_s13  ;;  %v9565_v26 = vpop.f32.mrb[64].mxu1 }
 0x59d   : > { %3763 = vst.msk [vmem:[#allocation3 + $0x210] sm:$0xff] %vm1184_vm11, %v9565_v26  ;;  %v3666_v61 = vpop.f32.mrb[65].mxu1  ;;  %v3256_v26 = vld [vmem:[#allocation2 + $0x110] sm:$0xff] }
 0x59e   : > { %3761 = vst.msk [vmem:[#allocation3 + $0x200] sm:$0xff] %vm1184_vm11, %v3666_v61  ;;  %4501 = vrot.lane.b32.xlu0 %v3853_v9, %s10130_s16  ;;  %v9566_v37 = vpop.f32.mrb[66].mxu1  ;;  %v12437_v9 = vld [vmem:[#allocation3 + $0x149] sm:$0xff]  ;;  %9567 = vmatprep.mubr.msk.bf16.mxu1 %vm3267_vm12, %v3256_v26 }
 0x59f   : > { %v3669_v12 = vpop.f32.mrb[67].mxu1  ;;  %v12456_v37 = vld [vmem:[#allocation3 + $0x142] sm:$0xff] }
 0x5a0   : > { %3762 = vst.msk [vmem:[#allocation3 + $0x208] sm:$0xff] %vm1184_vm11, %v3669_v12  ;;  %v12282_v60 = vpop.permute.xlu0 %4289  ;;  %4503 = vrot.lane.b32.xlu1 %v3854_v17, %s10130_s16  ;;  %v3257_v12 = vld [vmem:[#allocation2 + $0x118] sm:$0xff] }
 0x5a1   : > { %9568 = vmatmul.mubr.msk.bf16.gmra.mrb[68].mxu1 %vm3267_vm12, %v3257_v12  ;;  %vm14210_vm12 = vmand %vm8151_vm10, %vm364_vm3 }
 0x5a2   : > { %4693 = vrot.lane.b32.xlu0 %v4045_v14, %s10131_s8  ;;  %v12286_v0 = vpop.permute.xlu1 %3911  ;;  %v12449_v14 = vld [vmem:[#allocation3 + $0x14a] sm:$0xff] }
 0x5a4   : > { %v12288_v33 = vpop.permute.xlu0 %3909  ;;  %4695 = vrot.lane.b32.xlu1 %v4046_v23, %s10131_s8 }
 0x5a6   : > { %4313 = vrot.lane.b32.xlu0 %v12291_v24, %s10129_s13  ;;  %v12295_v31 = vpop.permute.xlu1 %4103 }
 0x5a8   : > { %v12299_v50 = vpop.permute.xlu0 %4101  ;;  %3935 = vrot.lane.b32.xlu1 %v12297_v36, %s10128_s26 }
 0x5aa   : > { %3933 = vrot.lane.b32.xlu0 %v12303_v57, %s10128_s26  ;;  %v12307_v35 = vpop.permute.xlu1 %4291 }
 0x5ac   : > { %v12311_v52 = vpop.permute.xlu0 %4481  ;;  %4127 = vrot.lane.b32.xlu1 %v12309_v21, %s10127_s24 }
 0x5ae   : > { %4125 = vrot.lane.b32.xlu0 %v12315_v16, %s10127_s24  ;;  %v12319_v6 = vpop.permute.xlu1 %4483 }
 0x5b0   : > { %v12323_v32 = vpop.permute.xlu0 %4673  ;;  %4315 = vrot.lane.b32.xlu1 %v12321_v3, %s10129_s13 }
 0x5b2   : > { %4505 = vrot.lane.b32.xlu0 %v12303_v57, %s10130_s16  ;;  %v12329_v54 = vpop.permute.xlu1 %4675 }
 0x5b4   : > { %v12331_v18 = vpop.permute.xlu0 %4293  ;;  %4507 = vrot.lane.b32.xlu1 %v12297_v36, %s10130_s16 }
 0x5b6   : > { %4697 = vrot.lane.b32.xlu0 %v12315_v16, %s10131_s8  ;;  %v12337_v13 = vpop.permute.xlu1 %3915 }
 0x5b8   : > { %v12339_v39 = vpop.permute.xlu0 %3913  ;;  %4699 = vrot.lane.b32.xlu1 %v12309_v21, %s10131_s8 }
 0x5ba   : > { %4317 = vrot.lane.b32.xlu0 %v12343_v58, %s10129_s13  ;;  %v12347_v41 = vpop.permute.xlu1 %4107 }
 0x5bb   : > { %15325 = vst [vmem:[#allocation27_spill] sm:$0xff] %v12347_v41 }
 0x5bc   : > { %v12351_v7 = vpop.permute.xlu0 %4105  ;;  %3939 = vrot.lane.b32.xlu1 %v12349_v53, %s10128_s26 }
 0x5bd   : > { %15326 = vst [vmem:[#allocation29_spill] sm:$0xff] %v12351_v7 }
 0x5be   : > { %3937 = vrot.lane.b32.xlu0 %v12355_v59, %s10128_s26  ;;  %v12359_v5 = vpop.permute.xlu1 %4295 }
 0x5c0   : > { %v12363_v15 = vpop.permute.xlu0 %4485  ;;  %4131 = vrot.lane.b32.xlu1 %v12361_v46, %s10127_s24 }
 0x5c2   : > { %4129 = vrot.lane.b32.xlu0 %v12367_v29, %s10127_s24  ;;  %v12371_v63 = vpop.permute.xlu1 %4487 }
 0x5c4   : > { %v12375_v51 = vpop.permute.xlu0 %4677  ;;  %4319 = vrot.lane.b32.xlu1 %v12373_v4, %s10129_s13 }
 0x5c6   : > { %4509 = vrot.lane.b32.xlu0 %v12355_v59, %s10130_s16  ;;  %v12381_v43 = vpop.permute.xlu1 %4679 }
 0x5c8   : > { %v12383_v1 = vpop.permute.xlu0 %4297  ;;  %4511 = vrot.lane.b32.xlu1 %v12349_v53, %s10130_s16 }
 0x5c9   : > { %15327 = vst [vmem:[#allocation23_spill] sm:$0xff] %v12383_v1  ;;  %v12539_v1 = vld [vmem:[#allocation3 + $0x18a] sm:$0xff] }
 0x5ca   : > { %4321 = vrot.lane.b32.xlu0 %v12387_v11, %s10129_s13  ;;  %v12391_v44 = vpop.permute.xlu1 %3919  ;;  %15358 = vst [vmem:[#allocation47_spill] sm:$0xff] %v12539_v1 }
 0x5cb   : > { %15328 = vst [vmem:[#allocation30_spill] sm:$0xff] %v12391_v44 }
 0x5cc   : > { %v12395_v27 = vpop.permute.xlu0 %3917  ;;  %3943 = vrot.lane.b32.xlu1 %v12393_v30, %s10128_s26 }
 0x5cd   : > { %15329 = vst [vmem:[#allocation37_spill] sm:$0xff] %v12395_v27  ;;  %v12495_v27 = vld [vmem:[#allocation3 + $0x16a] sm:$0xff] }
 0x5ce   : > { %3941 = vrot.lane.b32.xlu0 %v12399_v49, %s10128_s26  ;;  %v12403_v8 = vpop.permute.xlu1 %4111 }
 0x5cf   : > { %15330 = vst [vmem:[#allocation93_spill] sm:$0xff] %v12403_v8 }
 0x5d0   : > { %v12407_v62 = vpop.permute.xlu0 %4109  ;;  %4135 = vrot.lane.b32.xlu1 %v12405_v10, %s10127_s24 }
 0x5d1   : > { %15331 = vst [vmem:[#allocation31_spill] sm:$0xff] %v12407_v62 }
 0x5d2   : > { %4133 = vrot.lane.b32.xlu0 %v12411_v56, %s10127_s24  ;;  %v12415_v19 = vpop.permute.xlu1 %4299 }
 0x5d3   : > { %15332 = vst [vmem:[#allocation33_spill] sm:$0xff] %v12415_v19 }
 0x5d4   : > { %v12419_v42 = vpop.permute.xlu0 %4489  ;;  %4323 = vrot.lane.b32.xlu1 %v12417_v48, %s10129_s13 }
 0x5d5   : > { %15333 = vst [vmem:[#allocation36_spill] sm:$0xff] %v12419_v42  ;;  %v12521_v42 = vld [vmem:[#allocation3 + $0x180] sm:$0xff] }
 0x5d6   : > { %4513 = vrot.lane.b32.xlu0 %v12399_v49, %s10130_s16  ;;  %v12425_v55 = vpop.permute.xlu1 %4491  ;;  %15352 = vst [vmem:[#allocation50_spill] sm:$0xff] %v12521_v42 }
 0x5d7   : > { %15334 = vst [vmem:[#allocation40_spill] sm:$0xff] %v12425_v55 }
 0x5d8   : > { %v12427_v17 = vpop.permute.xlu0 %4681  ;;  %4515 = vrot.lane.b32.xlu1 %v12393_v30, %s10130_s16 }
 0x5d9   : > { %15335 = vst [vmem:[#allocation32_spill] sm:$0xff] %v12427_v17  ;;  %v12507_v17 = vld [vmem:[#allocation3 + $0x168] sm:$0xff] }
 0x5da   : > { %4325 = vrot.lane.b32.xlu0 %v12431_v20, %s10129_s13  ;;  %v12435_v47 = vpop.permute.xlu1 %4683 }
 0x5db   : > { %15336 = vst [vmem:[#allocation34_spill] sm:$0xff] %v12435_v47 }
 0x5dc   : > { %v12439_v45 = vpop.permute.xlu0 %4301  ;;  %3947 = vrot.lane.b32.xlu1 %v12437_v9, %s10128_s26 }
 0x5dd   : > { %15337 = vst [vmem:[#allocation39_spill] sm:$0xff] %v12439_v45 }
 0x5de   : > { %3945 = vrot.lane.b32.xlu0 %v12443_v2, %s10128_s26  ;;  %v12447_v23 = vpop.permute.xlu1 %3923 }
 0x5df   : > { %15338 = vst [vmem:[#allocation98_spill] sm:$0xff] %v12447_v23  ;;  %v12463_v23 = vld [vmem:[#allocation3 + $0x148] sm:$0xff] }
 0x5e0   : > { %v12451_v61 = vpop.permute.xlu0 %3921  ;;  %4139 = vrot.lane.b32.xlu1 %v12449_v14, %s10127_s24 }
 0x5e1   : > { %15339 = vst [vmem:[#allocation38_spill] sm:$0xff] %v12451_v61 }
 0x5e2   : > { %4137 = vrot.lane.b32.xlu0 %v12456_v37, %s10127_s24  ;;  %v12460_v45 = vpop.permute.xlu1 %4115 }
 0x5e3   : > { %15340 = vst [vmem:[#allocation42_spill] sm:$0xff] %v12460_v45  ;;  %v12477_v45 = vld [vmem:[#allocation3 + $0x160] sm:$0xff] }
 0x5e4   : > { %v12465_v62 = vpop.permute.xlu0 %4113  ;;  %4327 = vrot.lane.b32.xlu1 %v12463_v23, %s10129_s13 }
 0x5e5   : > { %15341 = vst [vmem:[#allocation41_spill] sm:$0xff] %v12465_v62  ;;  %v12483_v62 = vld [vmem:[#allocation3 + $0x169] sm:$0xff] }
 0x5e6   : > { %4517 = vrot.lane.b32.xlu0 %v12443_v2, %s10130_s16  ;;  %v12471_v26 = vpop.permute.xlu1 %4303 }
 0x5e7   : > { %15342 = vst [vmem:[#allocation107_spill] sm:$0xff] %v12471_v26  ;;  %v12489_v26 = vld [vmem:[#allocation3 + $0x161] sm:$0xff] }
 0x5e8   : > { %v12473_v61 = vpop.permute.xlu0 %4493  ;;  %4519 = vrot.lane.b32.xlu1 %v12437_v9, %s10130_s16 }
 0x5e9   : > { %15343 = vst [vmem:[#allocation35_spill] sm:$0xff] %v12473_v61 }
 0x5ea   : > { %4329 = vrot.lane.b32.xlu0 %v12477_v45, %s10129_s13  ;;  %v12481_v12 = vpop.permute.xlu1 %4495 }
 0x5eb   : > { %15344 = vst [vmem:[#allocation45_spill] sm:$0xff] %v12481_v12  ;;  %v12501_v12 = vld [vmem:[#allocation3 + $0x162] sm:$0xff] }
 0x5ec   : > { %v12485_v8 = vpop.permute.xlu0 %4685  ;;  %3951 = vrot.lane.b32.xlu1 %v12483_v62, %s10128_s26 }
 0x5ed   : > { %15345 = vst [vmem:[#allocation48_spill] sm:$0xff] %v12485_v8 }
 0x5ee   : > { %3949 = vrot.lane.b32.xlu0 %v12489_v26, %s10128_s26  ;;  %v12493_v61 = vpop.permute.xlu1 %4687 }
 0x5ef   : > { %15346 = vst [vmem:[#allocation49_spill] sm:$0xff] %v12493_v61 }
 0x5f0   : > { %v12497_v44 = vpop.permute.xlu0 %4305  ;;  %4143 = vrot.lane.b32.xlu1 %v12495_v27, %s10127_s24 }
 0x5f1   : > { %15347 = vst [vmem:[#allocation44_spill] sm:$0xff] %v12497_v44 }
 0x5f2   : > { %4141 = vrot.lane.b32.xlu0 %v12501_v12, %s10127_s24  ;;  %v12505_v8 = vpop.permute.xlu1 %3927 }
 0x5f3   : > { %15348 = vst [vmem:[#allocation43_spill] sm:$0xff] %v12505_v8 }
 0x5f4   : > { %v12509_v47 = vpop.permute.xlu0 %3925  ;;  %4331 = vrot.lane.b32.xlu1 %v12507_v17, %s10129_s13 }
 0x5f5   : > { %15349 = vst [vmem:[#allocation52_spill] sm:$0xff] %v12509_v47  ;;  %v12527_v47 = vld [vmem:[#allocation3 + $0x189] sm:$0xff] }
 0x5f6   : > { %4521 = vrot.lane.b32.xlu0 %v12489_v26, %s10130_s16  ;;  %v12515_v44 = vpop.permute.xlu1 %4119  ;;  %15354 = vst [vmem:[#allocation53_spill] sm:$0xff] %v12527_v47 }
 0x5f7   : > { %15350 = vst [vmem:[#allocation112_spill] sm:$0xff] %v12515_v44  ;;  %v12533_v44 = vld [vmem:[#allocation3 + $0x181] sm:$0xff] }
 0x5f8   : > { %v12517_v61 = vpop.permute.xlu0 %4117  ;;  %4523 = vrot.lane.b32.xlu1 %v12483_v62, %s10130_s16  ;;  %15356 = vst [vmem:[#allocation60_spill] sm:$0xff] %v12533_v44 }
 0x5f9   : > { %15351 = vst [vmem:[#allocation46_spill] sm:$0xff] %v12517_v61 }
 0x5fa   : > { %4333 = vrot.lane.b32.xlu0 %v12521_v42, %s10129_s13  ;;  %v12525_v8 = vpop.permute.xlu1 %4307  ;;  %v12548_v42 = vld [vmem:[#allocation3 + $0x188] sm:$0xff] }
 0x5fb   : > { %15353 = vst [vmem:[#allocation51_spill] sm:$0xff] %v12525_v8  ;;  %v4057_v8 = vld [vmem:[#allocation3 + $0x182] sm:$0xff]  ;;  %15361 = vst [vmem:[#allocation64_spill] sm:$0xff] %v12548_v42 }
 0x5fc   : > { %v12529_v55 = vpop.permute.xlu0 %4497  ;;  %3955 = vrot.lane.b32.xlu1 %v12527_v47, %s10128_s26 }
 0x5fd   : > { %15355 = vst [vmem:[#allocation54_spill] sm:$0xff] %v12529_v55 }
 0x5fe   : > { %3953 = vrot.lane.b32.xlu0 %v12533_v44, %s10128_s26  ;;  %v12537_v61 = vpop.permute.xlu1 %4499 }
 0x5ff   : > { %15357 = vst [vmem:[#allocation61_spill] sm:$0xff] %v12537_v61 }
 0x600   : > { %v12541_v19 = vpop.permute.xlu0 %4689  ;;  %4147 = vrot.lane.b32.xlu1 %v12539_v1, %s10127_s24  ;;  %v3868_v1 = vld [vmem:[#allocation3 + $0x1a9] sm:$0xff] }
 0x601   : > { %15359 = vst [vmem:[#allocation55_spill] sm:$0xff] %v12541_v19 }
 0x602   : > { %4145 = vrot.lane.b32.xlu0 %v4057_v8, %s10127_s24  ;;  %v12546_v55 = vpop.permute.xlu1 %4691  ;;  %v4249_v8 = vld [vmem:[#allocation3 + $0x1a0] sm:$0xff] }
 0x603   : > { %15360 = vst [vmem:[#allocation57_spill] sm:$0xff] %v12546_v55 }
 0x604   : > { %v12550_v7 = vpop.permute.xlu0 %4309  ;;  %4335 = vrot.lane.b32.xlu1 %v12548_v42, %s10129_s13  ;;  %v3867_v42 = vld [vmem:[#allocation3 + $0x1a1] sm:$0xff] }
 0x605   : > { %15362 = vst [vmem:[#allocation56_spill] sm:$0xff] %v12550_v7 }
 0x606   : > { %4525 = vrot.lane.b32.xlu0 %v12533_v44, %s10130_s16  ;;  %v12556_v61 = vpop.permute.xlu1 %3931 }
 0x607   : > { %15363 = vst [vmem:[#allocation62_spill] sm:$0xff] %v12556_v61  ;;  %v4060_v61 = vld [vmem:[#allocation3 + $0x1aa] sm:$0xff] }
 0x608   : > { %v12558_v19 = vpop.permute.xlu0 %3929  ;;  %4527 = vrot.lane.b32.xlu1 %v12527_v47, %s10130_s16  ;;  %v4059_v47 = vld [vmem:[#allocation3 + $0x1a2] sm:$0xff] }
 0x609   : > { %15364 = vst [vmem:[#allocation63_spill] sm:$0xff] %v12558_v19 }
 0x60a   : > { %4337 = vrot.lane.b32.xlu0 %v4249_v8, %s10129_s13  ;;  %v12563_v55 = vpop.permute.xlu1 %4123 }
 0x60b   : > { %15365 = vst [vmem:[#allocation73_spill] sm:$0xff] %v12563_v55  ;;  %v12577_v55 = vld [vmem:[#allocation3 + $0x1a8] sm:$0xff] }
 0x60c   : > { %v12565_v7 = vpop.permute.xlu0 %4121  ;;  %3959 = vrot.lane.b32.xlu1 %v3868_v1, %s10128_s26  ;;  %15370 = vst [vmem:[#allocation59_spill] sm:$0xff] %v12577_v55 }
 0x60d   : > { %15366 = vst [vmem:[#allocation58_spill] sm:$0xff] %v12565_v7 }
 0x60e   : > { %3957 = vrot.lane.b32.xlu0 %v3867_v42, %s10128_s26  ;;  %v12569_v44 = vpop.permute.xlu1 %4311 }
 0x60f   : > { %15367 = vst [vmem:[#allocation66_spill] sm:$0xff] %v12569_v44 }
 0x610   : > { %v12571_v19 = vpop.permute.xlu0 %4501  ;;  %4151 = vrot.lane.b32.xlu1 %v4060_v61, %s10127_s24  ;;  %v4251_v61 = vld [vmem:[#allocation3 + $0x1c0] sm:$0xff] }
 0x611   : > { %15368 = vst [vmem:[#allocation65_spill] sm:$0xff] %v12571_v19  ;;  %v3870_v19 = vld [vmem:[#allocation3 + $0x1c9] sm:$0xff] }
 0x612   : > { %4149 = vrot.lane.b32.xlu0 %v4059_v47, %s10127_s24  ;;  %v12575_v8 = vpop.permute.xlu1 %4503 }
 0x613   : > { %15369 = vst [vmem:[#allocation72_spill] sm:$0xff] %v12575_v8 }
 0x614   : > { %v12579_v7 = vpop.permute.xlu0 %4693  ;;  %4339 = vrot.lane.b32.xlu1 %v12577_v55, %s10129_s13 }
 0x615   : > { %15371 = vst [vmem:[#allocation69_spill] sm:$0xff] %v12579_v7  ;;  %v3869_v7 = vld [vmem:[#allocation3 + $0x1c1] sm:$0xff] }
 0x616   : > { %4529 = vrot.lane.b32.xlu0 %v3867_v42, %s10130_s16  ;;  %v12584_v44 = vpop.permute.xlu1 %4695 }
 0x617   : > { %15372 = vst [vmem:[#allocation76_spill] sm:$0xff] %v12584_v44  ;;  %v4062_v44 = vld [vmem:[#allocation3 + $0x1ca] sm:$0xff] }
 0x618   : > { %v12586_v41 = vpop.permute.xlu0 %4313  ;;  %4531 = vrot.lane.b32.xlu1 %v3868_v1, %s10130_s16  ;;  %v4061_v1 = vld [vmem:[#allocation3 + $0x1c2] sm:$0xff] }
 0x619   : > { %15373 = vst [vmem:[#allocation75_spill] sm:$0xff] %v12586_v41 }
 0x61a   : > { %4341 = vrot.lane.b32.xlu0 %v4251_v61, %s10129_s13  ;;  %v12590_v47 = vpop.permute.xlu1 %3935 }
 0x61b   : > { %15374 = vst [vmem:[#allocation68_spill] sm:$0xff] %v12590_v47  ;;  %v12604_v47 = vld [vmem:[#allocation3 + $0x1c8] sm:$0xff] }
 0x61c   : > { %v12592_v8 = vpop.permute.xlu0 %3933  ;;  %3963 = vrot.lane.b32.xlu1 %v3870_v19, %s10128_s26  ;;  %15379 = vst [vmem:[#allocation77_spill] sm:$0xff] %v12604_v47 }
 0x61d   : > { %15375 = vst [vmem:[#allocation67_spill] sm:$0xff] %v12592_v8 }
 0x61e   : > { %3961 = vrot.lane.b32.xlu0 %v3869_v7, %s10128_s26  ;;  %v12596_v42 = vpop.permute.xlu1 %4127 }
 0x61f   : > { %15376 = vst [vmem:[#allocation74_spill] sm:$0xff] %v12596_v42 }
 0x620   : > { %v12598_v55 = vpop.permute.xlu0 %4125  ;;  %4155 = vrot.lane.b32.xlu1 %v4062_v44, %s10127_s24  ;;  %v4253_v44 = vld [vmem:[#allocation3 + $0x1e0] sm:$0xff] }
 0x621   : > { %15377 = vst [vmem:[#allocation87_spill] sm:$0xff] %v12598_v55  ;;  %v3872_v55 = vld [vmem:[#allocation3 + $0x1e9] sm:$0xff] }
 0x622   : > { %4153 = vrot.lane.b32.xlu0 %v4061_v1, %s10127_s24  ;;  %v12602_v61 = vpop.permute.xlu1 %4315 }
 0x623   : > { %15378 = vst [vmem:[#allocation78_spill] sm:$0xff] %v12602_v61 }
 0x624   : > { %v12606_v8 = vpop.permute.xlu0 %4505  ;;  %4343 = vrot.lane.b32.xlu1 %v12604_v47, %s10129_s13 }
 0x625   : > { %15380 = vst [vmem:[#allocation82_spill] sm:$0xff] %v12606_v8  ;;  %v3871_v8 = vld [vmem:[#allocation3 + $0x1e1] sm:$0xff] }
 0x626   : > { %4533 = vrot.lane.b32.xlu0 %v3869_v7, %s10130_s16  ;;  %v12611_v42 = vpop.permute.xlu1 %4507 }
 0x627   : > { %15381 = vst [vmem:[#allocation86_spill] sm:$0xff] %v12611_v42  ;;  %v4064_v42 = vld [vmem:[#allocation3 + $0x1ea] sm:$0xff] }
 0x628   : > { %v12613_v41 = vpop.permute.xlu0 %4697  ;;  %4535 = vrot.lane.b32.xlu1 %v3870_v19, %s10130_s16  ;;  %v4063_v19 = vld [vmem:[#allocation3 + $0x1e2] sm:$0xff] }
 0x629   : > { %15382 = vst [vmem:[#allocation70_spill] sm:$0xff] %v12613_v41  ;;  %v4254_v41 = vld [vmem:[#allocation3 + $0x1e8] sm:$0xff] }
 0x62a   : > { %4345 = vrot.lane.b32.xlu0 %v4253_v44, %s10129_s13  ;;  %v12617_v1 = vpop.permute.xlu1 %4699 }
 0x62b   : > { %15383 = vst [vmem:[#allocation71_spill] sm:$0xff] %v12617_v1 }
 0x62c   : > { %v12619_v61 = vpop.permute.xlu0 %4317  ;;  %3967 = vrot.lane.b32.xlu1 %v3872_v55, %s10128_s26 }
 0x62d   : > { %15384 = vst [vmem:[#allocation90_spill] sm:$0xff] %v12619_v61 }
 0x62e   : > { %3965 = vrot.lane.b32.xlu0 %v3871_v8, %s10128_s26  ;;  %v12623_v7 = vpop.permute.xlu1 %3939 }
 0x62f   : > { %15385 = vst [vmem:[#allocation89_spill] sm:$0xff] %v12623_v7 }
 0x630   : > { %v12625_v47 = vpop.permute.xlu0 %3937  ;;  %4159 = vrot.lane.b32.xlu1 %v4064_v42, %s10127_s24 }
 0x631   : > { %15386 = vst [vmem:[#allocation81_spill] sm:$0xff] %v12625_v47  ;;  %v4255_v47 = vld [vmem:[#allocation3 + $0x200] sm:$0xff] }
 0x632   : > { %4157 = vrot.lane.b32.xlu0 %v4063_v19, %s10127_s24  ;;  %v12629_v44 = vpop.permute.xlu1 %4131  ;;  %v4256_v19 = vld [vmem:[#allocation3 + $0x208] sm:$0xff] }
 0x633   : > { %15387 = vst [vmem:[#allocation80_spill] sm:$0xff] %v12629_v44 }
 0x634   : > { %v12631_v1 = vpop.permute.xlu0 %4129  ;;  %4347 = vrot.lane.b32.xlu1 %v4254_v41, %s10129_s13 }
 0x635   : > { %15388 = vst [vmem:[#allocation88_spill] sm:$0xff] %v12631_v1  ;;  %v4447_v1 = vld [vmem:[#allocation3 + $0x201] sm:$0xff] }
 0x636   : > { %4537 = vrot.lane.b32.xlu0 %v3871_v8, %s10130_s16  ;;  %v12635_v61 = vpop.permute.xlu1 %4319  ;;  %v4448_v8 = vld [vmem:[#allocation3 + $0x209] sm:$0xff] }
 0x637   : > { %15389 = vst [vmem:[#allocation91_spill] sm:$0xff] %v12635_v61 }
 0x638   : > { %v12637_v7 = vpop.permute.xlu0 %4509  ;;  %4539 = vrot.lane.b32.xlu1 %v3872_v55, %s10130_s16 }
 0x639   : > { %15390 = vst [vmem:[#allocation92_spill] sm:$0xff] %v12637_v7 }
 0x63a   : > { %4349 = vrot.lane.b32.xlu0 %v4255_v47, %s10129_s13  ;;  %v12641_v42 = vpop.permute.xlu1 %4511 }
 0x63b   : > { %15391 = vst [vmem:[#allocation96_spill] sm:$0xff] %v12641_v42 }
 0x63c   : > { %v12643_v44 = vpop.permute.xlu0 %4321  ;;  %4351 = vrot.lane.b32.xlu1 %v4256_v19, %s10129_s13  ;;  %v4801_v19 = vld [vmem:[#allocation3 + $0x40] sm:$0xff] }
 0x63d   : > { %15392 = vst [vmem:[#allocation100_spill] sm:$0xff] %v12643_v44  ;;  %v4994_v44 = vld [vmem:[#allocation3 + $0x49] sm:$0xff] }
 0x63e   : > { %4541 = vrot.lane.b32.xlu0 %v4447_v1, %s10130_s16  ;;  %v12647_v41 = vpop.permute.xlu1 %3943 }
 0x63f   : > { %15393 = vst [vmem:[#allocation101_spill] sm:$0xff] %v12647_v41 }
 0x640   : > { %v12649_v61 = vpop.permute.xlu0 %3941  ;;  %4543 = vrot.lane.b32.xlu1 %v4448_v8, %s10130_s16  ;;  %v4802_v8 = vld [vmem:[#allocation3 + $0x48] sm:$0xff] }
 0x641   : > { %15394 = vst [vmem:[#allocation83_spill] sm:$0xff] %v12649_v61 }
 0x642   : > { %4701 = vrot.lane.b32.xlu0 %v12367_v29, %s10131_s8  ;;  %v12654_v55 = vpop.permute.xlu1 %4135 }
 0x643   : > { %15395 = vst [vmem:[#allocation85_spill] sm:$0xff] %v12654_v55  ;;  %v4993_v55 = vld [vmem:[#allocation3 + $0x41] sm:$0xff] }
 0x644   : > { %v12656_v47 = vpop.permute.xlu0 %4133  ;;  %4703 = vrot.lane.b32.xlu1 %v12361_v46, %s10131_s8 }
 0x645   : > { %15396 = vst [vmem:[#allocation94_spill] sm:$0xff] %v12656_v47 }
 0x646   : > { %4705 = vrot.lane.b32.xlu0 %v12411_v56, %s10131_s8  ;;  %v12662_v1 = vpop.permute.xlu1 %4323 }
 0x647   : > { %15397 = vst [vmem:[#allocation104_spill] sm:$0xff] %v12662_v1  ;;  %v5185_v1 = vld [vmem:[#allocation3 + $0x42] sm:$0xff] }
 0x648   : > { %v12664_v41 = vpop.permute.xlu0 %4513  ;;  %4865 = vrot.lane.b32.xlu1 %v4801_v19, %s10132_s6  ;;  %v5186_v19 = vld [vmem:[#allocation3 + $0x4a] sm:$0xff] }
 0x649   : > { %15398 = vst [vmem:[#allocation95_spill] sm:$0xff] %v12664_v41  ;;  %v4803_v41 = vld [vmem:[#allocation3 + $0x60] sm:$0xff] }
 0x64a   : > { %4867 = vrot.lane.b32.xlu0 %v4802_v8, %s10132_s6  ;;  %v12668_v61 = vpop.permute.xlu1 %4515 }
 0x64b   : > { %15399 = vst [vmem:[#allocation102_spill] sm:$0xff] %v12668_v61 }
 0x64c   : > { %v12670_v47 = vpop.permute.xlu0 %4325  ;;  %5057 = vrot.lane.b32.xlu1 %v4993_v55, %s10133_s9  ;;  %v4804_v55 = vld [vmem:[#allocation3 + $0x68] sm:$0xff] }
 0x64d   : > { %15400 = vst [vmem:[#allocation103_spill] sm:$0xff] %v12670_v47 }
 0x64e   : > { %5059 = vrot.lane.b32.xlu0 %v4994_v44, %s10133_s9  ;;  %v12674_v7 = vpop.permute.xlu1 %3947 }
 0x64f   : > { %15401 = vst [vmem:[#allocation105_spill] sm:$0xff] %v12674_v7  ;;  %v4995_v7 = vld [vmem:[#allocation3 + $0x61] sm:$0xff] }
 0x650   : > { %v12676_v42 = vpop.permute.xlu0 %3945  ;;  %5249 = vrot.lane.b32.xlu1 %v5185_v1, %s10134_s11  ;;  %v4996_v1 = vld [vmem:[#allocation3 + $0x69] sm:$0xff] }
 0x651   : > { %15402 = vst [vmem:[#allocation97_spill] sm:$0xff] %v12676_v42 }
 0x652   : > { %5251 = vrot.lane.b32.xlu0 %v5186_v19, %s10134_s11  ;;  %v12680_v8 = vpop.permute.xlu1 %4139 }
 0x653   : > { %15403 = vst [vmem:[#allocation99_spill] sm:$0xff] %v12680_v8  ;;  %v5187_v8 = vld [vmem:[#allocation3 + $0x62] sm:$0xff] }
 0x654   : > { %v12682_v61 = vpop.permute.xlu0 %4137  ;;  %4869 = vrot.lane.b32.xlu1 %v4803_v41, %s10132_s6  ;;  %v5188_v41 = vld [vmem:[#allocation3 + $0x6a] sm:$0xff] }
 0x655   : > { %15404 = vst [vmem:[#allocation106_spill] sm:$0xff] %v12682_v61  ;;  %v4805_v61 = vld [vmem:[#allocation3 + $0x80] sm:$0xff] }
 0x656   : > { %4871 = vrot.lane.b32.xlu0 %v4804_v55, %s10132_s6  ;;  %v12686_v44 = vpop.permute.xlu1 %4327 }
 0x657   : > { %15405 = vst [vmem:[#allocation108_spill] sm:$0xff] %v12686_v44 }
 0x658   : > { %v12688_v47 = vpop.permute.xlu0 %4517  ;;  %5061 = vrot.lane.b32.xlu1 %v4995_v7, %s10133_s9  ;;  %v4806_v7 = vld [vmem:[#allocation3 + $0x88] sm:$0xff] }
 0x659   : > { %15406 = vst [vmem:[#allocation110_spill] sm:$0xff] %v12688_v47  ;;  %v4997_v47 = vld [vmem:[#allocation3 + $0x81] sm:$0xff] }
 0x65a   : > { %5063 = vrot.lane.b32.xlu0 %v4996_v1, %s10133_s9  ;;  %v12692_v19 = vpop.permute.xlu1 %4519 }
 0x65b   : > { %15407 = vst [vmem:[#allocation115_spill] sm:$0xff] %v12692_v19 }
 0x65c   : > { %v12694_v42 = vpop.permute.xlu0 %4329  ;;  %5253 = vrot.lane.b32.xlu1 %v5187_v8, %s10134_s11  ;;  %v4998_v8 = vld [vmem:[#allocation3 + $0x89] sm:$0xff] }
 0x65d   : > { %15408 = vst [vmem:[#allocation118_spill] sm:$0xff] %v12694_v42 }
 0x65e   : > { %5255 = vrot.lane.b32.xlu0 %v5188_v41, %s10134_s11  ;;  %v12698_v55 = vpop.permute.xlu1 %3951 }
 0x65f   : > { %15409 = vst [vmem:[#allocation109_spill] sm:$0xff] %v12698_v55  ;;  %v5189_v55 = vld [vmem:[#allocation3 + $0x82] sm:$0xff] }
 0x660   : > { %v12700_v44 = vpop.permute.xlu0 %3949  ;;  %4873 = vrot.lane.b32.xlu1 %v4805_v61, %s10132_s6  ;;  %v5190_v61 = vld [vmem:[#allocation3 + $0x8a] sm:$0xff] }
 0x661   : > { %15410 = vst [vmem:[#allocation114_spill] sm:$0xff] %v12700_v44 }
 0x662   : > { %4875 = vrot.lane.b32.xlu0 %v4806_v7, %s10132_s6  ;;  %v12704_v1 = vpop.permute.xlu1 %4143 }
 0x663   : > { %15411 = vst [vmem:[#allocation111_spill] sm:$0xff] %v12704_v1  ;;  %v4807_v1 = vld [vmem:[#allocation3 + $0xa0] sm:$0xff] }
 0x664   : > { %v12706_v19 = vpop.permute.xlu0 %4141  ;;  %5065 = vrot.lane.b32.xlu1 %v4997_v47, %s10133_s9 }
 0x665   : > { %15412 = vst [vmem:[#allocation117_spill] sm:$0xff] %v12706_v19 }
 0x666   : > { %5067 = vrot.lane.b32.xlu0 %v4998_v8, %s10133_s9  ;;  %v12710_v41 = vpop.permute.xlu1 %4331  ;;  %v4999_v8 = vld [vmem:[#allocation3 + $0xa1] sm:$0xff] }
 0x668   : > { %v12712_v42 = vpop.permute.xlu0 %4521  ;;  %5257 = vrot.lane.b32.xlu1 %v5189_v55, %s10134_s11  ;;  %v5000_v55 = vld [vmem:[#allocation3 + $0xa9] sm:$0xff] }
 0x669   : > { %15413 = vst [vmem:[#allocation120_spill] sm:$0xff] %v12712_v42  ;;  %v9832_v42 = vld [vmem:[#allocation7 + $0x20] sm:$0xff]  }
 0x66a   : > { %5259 = vrot.lane.b32.xlu0 %v5190_v61, %s10134_s11  ;;  %v12716_v7 = vpop.permute.xlu1 %4523  ;;  %9571 = vmatprep.subr.bf16.mxu0 %v9832_v42 }
 0x66b   : > { %15414 = vst [vmem:[#allocation119_spill] sm:$0xff] %v12716_v7  ;;  %v5191_v7 = vld [vmem:[#allocation3 + $0xa2] sm:$0xff]  ;;  %9572 = vmatpush3.bf16.msra.mxu0 %v9832_v42 }
 0x66c   : > { %v12718_v44 = vpop.permute.xlu0 %4333  ;;  %4877 = vrot.lane.b32.xlu1 %v4807_v1, %s10132_s6  ;;  %v5002_v42 = vld [vmem:[#allocation3 + $0xc9] sm:$0xff] }
 0x66d   : > { %15415 = vst [vmem:[#allocation113_spill] sm:$0xff] %v12718_v44 }
 0x66e   : > { %4879 = vrot.lane.b32.xlu0 %v12246_v34, %s10132_s6  ;;  %v12723_v47 = vpop.permute.xlu1 %3955  ;;  %v5192_v34 = vld [vmem:[#allocation3 + $0xaa] sm:$0xff] }
 0x66f   : > { %15416 = vst [vmem:[#allocation116_spill] sm:$0xff] %v12723_v47 }
 0x670   : > { %v12725_v19 = vpop.permute.xlu0 %3953  ;;  %5069 = vrot.lane.b32.xlu1 %v4999_v8, %s10133_s9 }
 0x671   : > { %15417 = vst [vmem:[#allocation122_spill] sm:$0xff] %v12725_v19  ;;  %v4809_v19 = vld [vmem:[#allocation3 + $0xc0] sm:$0xff] }
 0x672   : > { %5071 = vrot.lane.b32.xlu0 %v5000_v55, %s10133_s9  ;;  %v12729_v61 = vpop.permute.xlu1 %4147 }
 0x673   : > { %15418 = vst [vmem:[#allocation121_spill] sm:$0xff] %v12729_v61  ;;  %v5001_v61 = vld [vmem:[#allocation3 + $0xc1] sm:$0xff] }
 0x674   : > { %v12731_v44 = vpop.permute.xlu0 %4145  ;;  %5261 = vrot.lane.b32.xlu1 %v5191_v7, %s10134_s11 }
 0x675   : > { %15419 = vst [vmem:[#allocation123_spill] sm:$0xff] %v12731_v44 }
 0x676   : > { %5263 = vrot.lane.b32.xlu0 %v5192_v34, %s10134_s11  ;;  %v12735_v1 = vpop.permute.xlu1 %4335  ;;  %v5193_v34 = vld [vmem:[#allocation3 + $0xc2] sm:$0xff] }
 0x678   : > { %v12737_v8 = vpop.permute.xlu0 %4525  ;;  %4881 = vrot.lane.b32.xlu1 %v4809_v19, %s10132_s6  ;;  %v5194_v19 = vld [vmem:[#allocation3 + $0xca] sm:$0xff] }
 0x679   : > { %15420 = vst [vmem:[#allocation126_spill] sm:$0xff] %v12737_v8  ;;  %v9833_v8 = vld [vmem:[#allocation7 + $0x28] ss:$0 sps:$4 sm:$0xff]  }
 0x67a   : > { %4883 = vrot.lane.b32.xlu0 %v12270_v22, %s10132_s6  ;;  %v12742_v55 = vpop.permute.xlu1 %4527  ;;  %9724 = vmatprep.subr.msk.bf16.mxu0 %vm859_vm4, %v9833_v8 }
 0x67c   : > { %v12744_v44 = vpop.permute.xlu0 %4337  ;;  %5073 = vrot.lane.b32.xlu1 %v5001_v61, %s10133_s9  ;;  %v5892_v61 = vsel %vm859_vm4, %v9833_v8, 0  ;;  %vm5638_vm4 = vcmask 188544  }
 0x67d   : > { %15421 = vst [vmem:[#allocation124_spill] sm:$0xff] %v12744_v44  ;;  %9574 = vmatpush3.bf16.msra.mxu0 %v5892_v61  ;;  %vm13160_vm8 = vmand %vm5638_vm4, %vm307_vm2 }
 0x67e   : > { %5075 = vrot.lane.b32.xlu0 %v5002_v42, %s10133_s9  ;;  %v12748_v7 = vpop.permute.xlu1 %3959  ;;  %v5733_v42 = vld [vmem:[#allocation2] sm:$0xff] }
 0x67f   : > { %9575 = vmatprep.mubr.msk.bf16.mxu0 %vm5782_vm5, %v5733_v42  ;;  %v3771_v42 = vld [vmem:[#allocation3] sm:$0xff] }
 0x680   : > { %v12750_v47 = vpop.permute.xlu0 %3957  ;;  %5265 = vrot.lane.b32.xlu1 %v5193_v34, %s10134_s11 }
 0x682   : > { %5267 = vrot.lane.b32.xlu0 %v5194_v19, %s10134_s11  ;;  %v12754_v22 = vpop.permute.xlu1 %4151  ;;  %v5734_v19 = vld [vmem:[#allocation2 + $0x8] sm:$0xff] }
 0x683   : > { %15422 = vst [vmem:[#allocation127_spill] sm:$0xff] %v12754_v22  ;;  %9576 = vmatmul.mubr.msk.bf16.vlgmr.msra.gmra.mrb[72].mxu0 %vm5782_vm5, %v5734_v19 }
 0x684   : > { %v12758_v44 = vpop.permute.xlu0 %4149  ;;  %4885 = vrot.lane.b32.xlu1 %v12291_v24, %s10132_s6 }
 0x686   : > { %4887 = vrot.lane.b32.xlu0 %v12321_v3, %s10132_s6  ;;  %v12764_v34 = vpop.permute.xlu1 %4339 }
 0x688   : > { %v12768_v22 = vpop.permute.xlu0 %4529  ;;  %5077 = vrot.lane.b32.xlu1 %v12303_v57, %s10133_s9 }
 0x68a   : > { %5079 = vrot.lane.b32.xlu0 %v12297_v36, %s10133_s9  ;;  %v12774_v24 = vpop.permute.xlu1 %4531 }
 0x68c   : > { %v12776_v8 = vpop.permute.xlu0 %4341  ;;  %5269 = vrot.lane.b32.xlu1 %v12315_v16, %s10134_s11 }
 0x68e   : > { %5271 = vrot.lane.b32.xlu0 %v12309_v21, %s10134_s11  ;;  %v12782_v3 = vpop.permute.xlu1 %3963 }
 0x690   : > { %v12784_v61 = vpop.permute.xlu0 %3961  ;;  %4889 = vrot.lane.b32.xlu1 %v12343_v58, %s10132_s6 }
 0x692   : > { %4891 = vrot.lane.b32.xlu0 %v12373_v4, %s10132_s6  ;;  %v12790_v36 = vpop.permute.xlu1 %4155 }
 0x694   : > { %v12792_v57 = vpop.permute.xlu0 %4153  ;;  %5081 = vrot.lane.b32.xlu1 %v12355_v59, %s10133_s9 }
 0x696   : > { %5083 = vrot.lane.b32.xlu0 %v12349_v53, %s10133_s9  ;;  %v12798_v21 = vpop.permute.xlu1 %4343 }
 0x698   : > { %v12800_v16 = vpop.permute.xlu0 %4533  ;;  %5273 = vrot.lane.b32.xlu1 %v12367_v29, %s10134_s11 }
 0x69a   : > { %5275 = vrot.lane.b32.xlu0 %v12361_v46, %s10134_s11  ;;  %v12806_v58 = vpop.permute.xlu1 %4535 }
 0x69c   : > { %v12808_v4 = vpop.permute.xlu0 %4345  ;;  %4893 = vrot.lane.b32.xlu1 %v12387_v11, %s10132_s6 }
 0x69d   : > { %15423 = vst [vmem:[#allocation130_spill] sm:$0xff] %v12808_v4 }
 0x69e   : > { %4895 = vrot.lane.b32.xlu0 %v12417_v48, %s10132_s6  ;;  %v12814_v53 = vpop.permute.xlu1 %3967 }
 0x69f   : > { %15424 = vst [vmem:[#allocation125_spill] sm:$0xff] %v12814_v53  ;;  %v15491_v53 = vld [vmem:[#allocation74_spill] sm:$0xff] }
 0x6a0   : > { %v12816_v59 = vpop.permute.xlu0 %3965  ;;  %5085 = vrot.lane.b32.xlu1 %v12399_v49, %s10133_s9  ;;  %v12840_v49 = vld [vmem:[#allocation9 + $0x1] ss:$0 sm:$0xff] }
 0x6a1   : > { %15425 = vst [vmem:[#allocation128_spill] sm:$0xff] %v12816_v59 }
 0x6a2   : > { %5087 = vrot.lane.b32.xlu0 %v12393_v30, %s10133_s9  ;;  %v12822_v46 = vpop.permute.xlu1 %4159 }
 0x6a3   : > { %15426 = vst [vmem:[#allocation129_spill] sm:$0xff] %v12822_v46 }
 0x6a4   : > { %v12824_v29 = vpop.permute.xlu0 %4157  ;;  %5277 = vrot.lane.b32.xlu1 %v12411_v56, %s10134_s11  ;;  %v3772_v56 = vld [vmem:[#allocation3 + $0x8] sm:$0xff] }
 0x6a5   : > { %15427 = vst [vmem:[#allocation132_spill] sm:$0xff] %v12824_v29 }
 0x6a6   : > { %5279 = vrot.lane.b32.xlu0 %v12405_v10, %s10134_s11  ;;  %v12830_v11 = vpop.permute.xlu1 %4347 }
 0x6a7   : > { %15428 = vst [vmem:[#allocation131_spill] sm:$0xff] %v12830_v11 }
 0x6a8   : > { %v12832_v48 = vpop.permute.xlu0 %4537  ;;  %4707 = vrot.lane.b32.xlu1 %v12405_v10, %s10131_s8  ;;  %v3809_v10 = vadd.f32 %v12840_v49, %v3771_v42  ;;  %v9569_v42 = vpop.f32.mrb[68].mxu1 }
 0x6a9   : > { %15429 = vst [vmem:[#allocation134_spill] sm:$0xff] %v12832_v48  ;;  %3767 = vst.msk [vmem:[#allocation3 + $0x230] sm:$0xff] %vm1184_vm11, %v9569_v42 }
 0x6aa   : > { %4897 = vrot.lane.b32.xlu0 %v12431_v20, %s10132_s6  ;;  %v12838_v30 = vpop.permute.xlu1 %4539  ;;  %v3810_v20 = vadd.f32 %v12840_v49, %v3772_v56  ;;  %v3682_v56 = vpop.f32.mrb[69].mxu1 }
 0x6ab   : > { %15430 = vst [vmem:[#allocation133_spill] sm:$0xff] %v12838_v30  ;;  %3765 = vst.msk [vmem:[#allocation3 + $0x220] sm:$0xff] %vm1184_vm11, %v3682_v56 }
 0x6ac   : > { %v12842_v19 = vpop.permute.xlu0 %4349  ;;  %4899 = vrot.lane.b32.xlu1 %v12463_v23, %s10132_s6  ;;  %v4001_v23 = vadd.f32 %v12261_v28, %v3809_v10  ;;  %v9570_v28 = vpop.f32.mrb[70].mxu1 }
 0x6ad   : > { %15431 = vst [vmem:[#allocation135_spill] sm:$0xff] %v12842_v19  ;;  %v9852_v28 = vld [vmem:[#allocation3 + $0x20] sm:$0xff] }
 0x6ae   : > { %5089 = vrot.lane.b32.xlu0 %v12443_v2, %s10133_s9  ;;  %v12848_v29 = vpop.permute.xlu1 %4351  ;;  %v4002_v2 = vadd.f32 %v12265_v38, %v3810_v20  ;;  %v3685_v38 = vpop.f32.mrb[71].mxu1 }
 0x6af   : > { %15432 = vst [vmem:[#allocation136_spill] sm:$0xff] %v12848_v29  ;;  %3766 = vst.msk [vmem:[#allocation3 + $0x228] sm:$0xff] %vm1184_vm11, %v3685_v38 }
 0x6b0   : > { %v12851_v46 = vpop.permute.xlu0 %4541  ;;  %5091 = vrot.lane.b32.xlu1 %v12437_v9, %s10133_s9  ;;  %v4194_v20 = vadd.f32 %v12277_v40, %v4002_v2 }
 0x6b1   : > { %15433 = vst [vmem:[#allocation138_spill] sm:$0xff] %v12851_v46  ;;  %v4193_v46 = vadd.f32 %v12272_v25, %v4001_v23 }
 0x6b2   : > { %5281 = vrot.lane.b32.xlu0 %v12456_v37, %s10134_s11  ;;  %v12858_v19 = vpop.permute.xlu1 %4543  ;;  %v4386_v25 = vadd.f32 %v12307_v35, %v4194_v20  ;;  %v9851_v35 = vld [vmem:[#allocation3 + $0x28] sm:$0xff] }
 0x6b3   : > { %15434 = vst [vmem:[#allocation137_spill] sm:$0xff] %v12858_v19 }
 0x6b4   : > { %v12861_v59 = vpop.permute.xlu0 %4701  ;;  %5283 = vrot.lane.b32.xlu1 %v12449_v14, %s10134_s11 }
 0x6b6   : > { %4709 = vrot.lane.b32.xlu0 %v12456_v37, %s10131_s8  ;;  %v12868_v9 = vpop.permute.xlu1 %4703  ;;  %v4385_v37 = vadd.f32 %v12282_v60, %v4193_v46 }
 0x6b8   : > { %v12873_v10 = vpop.permute.xlu0 %4705  ;;  %4711 = vrot.lane.b32.xlu1 %v12449_v14, %s10131_s8  ;;  %v4577_v23 = vadd.f32 %v12311_v52, %v4385_v37  ;;  %v4578_v14 = vadd.f32 %v12319_v6, %v4386_v25  ;;  %v3812_v52 = vadd.f32 %v9851_v35, %v12840_v49 }
 0x6ba   : > { %4901 = vrot.lane.b32.xlu0 %v12477_v45, %s10132_s6  ;;  %v4866_v42 = vpop.permute.xlu1 %4865  ;;  %v4769_v40 = vadd.f32 %v12323_v32, %v4577_v23  ;;  %v4770_v46 = vadd.f32 %v12329_v54, %v4578_v14  ;;  %v4004_v20 = vadd.f32 %v12286_v0, %v3812_v52 }
 0x6bc   : > { %v4868_v56 = vpop.permute.xlu0 %4867  ;;  %4903 = vrot.lane.b32.xlu1 %v12507_v17, %s10132_s6  ;;  %v4961_v45 = vadd.f32 %v4866_v42, %v4769_v40  ;;  %v3811_v17 = vadd.f32 %v9852_v28, %v12840_v49  ;;  %v4196_v25 = vadd.f32 %v12295_v31, %v4004_v20 }
 0x6bd   : > { %v4962_v6 = vadd.f32 %v4868_v56, %v4770_v46 }
 0x6be   : > { %5093 = vrot.lane.b32.xlu0 %v12489_v26, %s10133_s9  ;;  %v5058_v60 = vpop.permute.xlu1 %5057  ;;  %v4003_v26 = vadd.f32 %v12288_v33, %v3811_v17  ;;  %v4388_v35 = vadd.f32 %v12359_v5, %v4196_v25 }
 0x6bf   : > { %v5153_v38 = vadd.f32 %v5058_v60, %v4961_v45 }
 0x6c0   : > { %v5060_v2 = vpop.permute.xlu0 %5059  ;;  %5095 = vrot.lane.b32.xlu1 %v12483_v62, %s10133_s9  ;;  %v4195_v62 = vadd.f32 %v12299_v50, %v4003_v26  ;;  %v4580_v33 = vadd.f32 %v12371_v63, %v4388_v35 }
 0x6c1   : > { %v5154_v37 = vadd.f32 %v5060_v2, %v4962_v6 }
 0x6c2   : > { %v5250_v32 = vpop.permute.xlu1 %5249  ;;  %v4387_v40 = vadd.f32 %v12331_v18, %v4195_v62  ;;  %v4772_v31 = vadd.f32 %v12381_v43, %v4580_v33  ;;  %v9853_v43 = vld [vmem:[#allocation3 + $0x48] sm:$0xff] }
 0x6c3   : > { %v5345_v54 = vadd.f32 %v5250_v32, %v5153_v38 }
 0x6c4   : > { %v5252_v42 = vpop.permute.xlu0 %5251  ;;  %v4579_v0 = vadd.f32 %v12363_v15, %v4387_v40 }
 0x6c5   : > { %v5346_v23 = vadd.f32 %v5252_v42, %v5154_v37  ;;  %v5377_v56 = vmax.f32 %v5345_v54, 0.0  ;;  %v3814_v54 = vadd.f32 %v9853_v43, %v12840_v49 }
 0x6c6   : > { %v4870_v14 = vpop.permute.xlu1 %4869  ;;  %v4771_v52 = vadd.f32 %v12375_v51, %v4579_v0 }
 0x6c7   : > { %v5378_v60 = vmax.f32 %v5346_v23, 0.0  ;;  %v4006_v62 = vadd.f32 %v12337_v13, %v3814_v54  ;;  %v9854_v23 = vld [vmem:[#allocation3 + $0x40] sm:$0xff] }
 0x6c8   : > { %v4872_v46 = vpop.permute.xlu0 %4871  ;;  %v4963_v18 = vadd.f32 %v4870_v14, %v4771_v52  ;;  %v3813_v14 = vadd.f32 %v9854_v23, %v12840_v49  ;;  %v15437_v13 = vld [vmem:[#allocation33_spill] sm:$0xff] }
 0x6c9   : > { %v5409_v45 = vpack.c.bf16 %v5378_v60, %v5377_v56  ;;  %v4964_v38 = vadd.f32 %v4872_v46, %v4772_v31  ;;  %v15435_v60 = vld [vmem:[#allocation27_spill] sm:$0xff]  ;;  %v15445_v54 = vld [vmem:[#allocation53_spill] sm:$0xff] }
 0x6ca   : > { %v5062_v2 = vpop.permute.xlu1 %5061  ;;  %v4005_v56 = vadd.f32 %v12339_v39, %v3813_v14  ;;  %v4198_v46 = vadd.f32 %v15435_v60, %v4006_v62 }
 0x6cb   : > { %v5426_v50 = vshrl.u32 %v5409_v45, 16  ;;  %v5429_v6 = vshll.u32 %v5409_v45, 16  ;;  %v5155_v32 = vadd.f32 %v5062_v2, %v4963_v18  ;;  %v15436_v45 = vld [vmem:[#allocation29_spill] sm:$0xff]  ;;  %v15440_v18 = vld [vmem:[#allocation64_spill] sm:$0xff] }
 0x6cc   : > { %v5064_v28 = vpop.permute.xlu0 %5063  ;;  %v4197_v2 = vadd.f32 %v15436_v45, %v4005_v56  ;;  %v4390_v52 = vadd.f32 %v15437_v13, %v4198_v46 }
 0x6cd   : > { %v5428_v17 = vrot.slane %v5426_v50, 7  ;;  %v5156_v20 = vadd.f32 %v5064_v28, %v4964_v38  ;;  %v15438_v50 = vld [vmem:[#allocation23_spill] sm:$0xff] }
 0x6ce   : > { %v5254_v5 = vpop.permute.xlu1 %5253  ;;  %v4389_v28 = vadd.f32 %v15438_v50, %v4197_v2 }
 0x6cf   : > { %5539 = vrot.lane.b32.xlu1 %v5428_v17, %s10136_s15  ;;  %v5431_v15 = vor.u32 %v5429_v6, %v5428_v17  ;;  %v5347_v26 = vadd.f32 %v5254_v5, %v5155_v32  ;;  %v15439_v17 = vld [vmem:[#allocation40_spill] sm:$0xff]  ;;  %v15442_v32 = vld [vmem:[#allocation34_spill] sm:$0xff] }
 0x6d0   : > { %v5256_v63 = vpop.permute.xlu0 %5255  ;;  %v4582_v6 = vadd.f32 %v15439_v17, %v4390_v52  ;;  %v15441_v5 = vld [vmem:[#allocation36_spill] sm:$0xff]  ;;  %v9855_v52 = vld [vmem:[#allocation3 + $0x68] sm:$0xff] }
 0x6d1   : > { %v5348_v37 = vadd.f32 %v5256_v63, %v5156_v20  ;;  %5537 = vrot.lane.b32.xlu0 %v5431_v15, %s10136_s15  ;;  %v5379_v40 = vmax.f32 %v5347_v26, 0.0  ;;  %v15443_v15 = vld [vmem:[#allocation50_spill] sm:$0xff]  ;;  %v15444_v26 = vld [vmem:[#allocation32_spill] sm:$0xff]  ;;  %v3816_v50 = vadd.f32 %v9855_v52, %v12840_v49 }
 0x6d2   : > { %v4874_v51 = vpop.permute.xlu1 %4873  ;;  %v4774_v20 = vadd.f32 %v15442_v32, %v4582_v6  ;;  %v15448_v17 = vld [vmem:[#allocation30_spill] sm:$0xff]  ;;  %v15450_v32 = vld [vmem:[#allocation93_spill] sm:$0xff] }
 0x6d3   : > { %v5380_v42 = vmax.f32 %v5348_v37, 0.0  ;;  %5287 = vrot.lane.b32.xlu1 %v12495_v27, %s10134_s11  ;;  %v9856_v6 = vld [vmem:[#allocation3 + $0x60] sm:$0xff] }
 0x6d4   : > { %v4876_v25 = vpop.permute.xlu0 %4875  ;;  %v4823_v52 = vld [vmem:[#allocation3 + $0x1a0] sm:$0xff] }
 0x6d5   : > { %5285 = vrot.lane.b32.xlu0 %v12501_v12, %s10134_s11  ;;  %v5410_v0 = vpack.c.bf16 %v5380_v42, %v5379_v40  ;;  %v4966_v43 = vadd.f32 %v4876_v25, %v4774_v20  ;;  %v15446_v40 = vld [vmem:[#allocation60_spill] sm:$0xff] }
 0x6d6   : > { %v5066_v35 = vpop.permute.xlu1 %5065 }
 0x6d7   : > { %4715 = vrot.lane.b32.xlu1 %v12495_v27, %s10131_s8  ;;  %v5433_v39 = vshrl.u32 %v5410_v0, 16  ;;  %v4581_v27 = vadd.f32 %v15441_v5, %v4389_v28  ;;  %v5436_v62 = vshll.u32 %v5410_v0, 16  ;;  %v5205_v28 = vld [vmem:[#allocation3 + $0x182] sm:$0xff] }
 0x6d8   : > { %v5068_v33 = vpop.permute.xlu0 %5067  ;;  %v15449_v5 = vld [vmem:[#allocation37_spill] sm:$0xff] }
 0x6d9   : > { %4713 = vrot.lane.b32.xlu0 %v12501_v12, %s10131_s8  ;;  %v4773_v12 = vadd.f32 %v15444_v26, %v4581_v27  ;;  %v5435_v37 = vrot.slane %v5433_v39, 7  ;;  %v5158_v14 = vadd.f32 %v5068_v33, %v4966_v43  ;;  %v3815_v39 = vadd.f32 %v9856_v6, %v12840_v49  ;;  %v15452_v43 = vld [vmem:[#allocation107_spill] sm:$0xff]  ;;  %v15458_v6 = vld [vmem:[#allocation48_spill] sm:$0xff] }
 0x6da   : > { %v5258_v31 = vpop.permute.xlu1 %5257 }
 0x6db   : > { %4907 = vrot.lane.b32.xlu1 %v15440_v18, %s10132_s6  ;;  %v4965_v23 = vadd.f32 %v4874_v51, %v4773_v12  ;;  %v5438_v45 = vor.u32 %v5436_v62, %v5435_v37  ;;  %v15447_v51 = vld [vmem:[#allocation47_spill] sm:$0xff]  ;;  %v4007_v27 = vadd.f32 %v15449_v5, %v3815_v39 }
 0x6dc   : > { %v5260_v38 = vpop.permute.xlu0 %5259  ;;  %v15451_v12 = vld [vmem:[#allocation31_spill] sm:$0xff] }
 0x6dd   : > { %4905 = vrot.lane.b32.xlu0 %v15443_v15, %s10132_s6  ;;  %v5157_v60 = vadd.f32 %v5066_v35, %v4965_v23  ;;  %v5350_v46 = vadd.f32 %v5260_v38, %v5158_v14  ;;  %v4008_v35 = vadd.f32 %v15448_v17, %v3816_v50  ;;  %v4632_v38 = vld [vmem:[#allocation3 + $0x18a] sm:$0xff] }
 0x6de   : > { %v4878_v63 = vpop.permute.xlu1 %4877  ;;  %v15453_v23 = vld [vmem:[#allocation39_spill] sm:$0xff] }
 0x6df   : > { %5099 = vrot.lane.b32.xlu1 %v15445_v54, %s10133_s9  ;;  %v5349_v13 = vadd.f32 %v5258_v31, %v5157_v60  ;;  %v5382_v0 = vmax.f32 %v5350_v46, 0.0  ;;  %v4200_v20 = vadd.f32 %v15450_v32, %v4008_v35  ;;  %v15456_v50 = vld [vmem:[#allocation35_spill] sm:$0xff] }
 0x6e0   : > { %v4880_v42 = vpop.permute.xlu0 %4879  ;;  %v5016_v35 = vld [vmem:[#allocation3 + $0x1a9] sm:$0xff] }
 0x6e1   : > { %5097 = vrot.lane.b32.xlu0 %v15446_v40, %s10133_s9  ;;  %v5381_v18 = vmax.f32 %v5349_v13, 0.0  ;;  %v4392_v54 = vadd.f32 %v15452_v43, %v4200_v20  ;;  %v15454_v40 = vld [vmem:[#allocation45_spill] sm:$0xff] }
 0x6e2   : > { %v5070_v56 = vpop.permute.xlu1 %5069 }
 0x6e3   : > { %5543 = vrot.lane.b32.xlu1 %v5435_v37, %s10136_s15  ;;  %v5411_v15 = vpack.c.bf16 %v5382_v0, %v5381_v18  ;;  %v4199_v37 = vadd.f32 %v15451_v12, %v4007_v27  ;;  %v4584_v60 = vadd.f32 %v15454_v40, %v4392_v54  ;;  %v5015_v27 = vld [vmem:[#allocation3 + $0x1a1] sm:$0xff] }
 0x6e4   : > { %v5072_v2 = vpop.permute.xlu0 %5071 }
 0x6e5   : > { %5541 = vrot.lane.b32.xlu0 %v5438_v45, %s10136_s15  ;;  %v4391_v14 = vadd.f32 %v15453_v23, %v4199_v37  ;;  %v5440_v46 = vshrl.u32 %v5411_v15, 16  ;;  %v15455_v45 = vld [vmem:[#allocation59_spill] sm:$0xff]  ;;  %v5443_v32 = vshll.u32 %v5411_v15, 16 }
 0x6e6   : > { %v5262_v25 = vpop.permute.xlu1 %5261  ;;  %v9857_v15 = vld [vmem:[#allocation3 + $0x88] sm:$0xff] }
 0x6e7   : > { %5291 = vrot.lane.b32.xlu1 %v15447_v51, %s10134_s11  ;;  %v4583_v0 = vadd.f32 %v15456_v50, %v4391_v14  ;;  %v15457_v51 = vld [vmem:[#allocation49_spill] sm:$0xff]  ;;  %v5442_v18 = vrot.slane %v5440_v46, 7 }
 0x6e8   : > { %v5264_v33 = vpop.permute.xlu0 %5263  ;;  %v4776_v17 = vadd.f32 %v15457_v51, %v4584_v60  ;;  %v5208_v60 = vld [vmem:[#allocation3 + $0x1aa] sm:$0xff] }
 0x6e9   : > { %5289 = vrot.lane.b32.xlu0 %v5205_v28, %s10134_s11  ;;  %v4775_v39 = vadd.f32 %v15458_v6, %v4583_v0  ;;  %v5445_v23 = vor.u32 %v5443_v32, %v5442_v18  ;;  %v15460_v51 = vld [vmem:[#allocation38_spill] sm:$0xff]  ;;  %v15463_v32 = vld [vmem:[#allocation51_spill] sm:$0xff] }
 0x6ea   : > { %v12943_v31 = vpop.permute.xlu1 %4881 }
 0x6eb   : > { %4719 = vrot.lane.b32.xlu1 %v4632_v38, %s10131_s8  ;;  %v4968_v38 = vadd.f32 %v4880_v42, %v4776_v17  ;;  %v4967_v20 = vadd.f32 %v4878_v63, %v4775_v39  ;;  %v3818_v63 = vadd.f32 %v9857_v15, %v12840_v49 }
 0x6ec   : > { %v12948_v26 = vpop.permute.xlu0 %4883 }
 0x6ed   : > { %4717 = vrot.lane.b32.xlu0 %v5205_v28, %s10131_s8  ;;  %v5160_v12 = vadd.f32 %v5072_v2, %v4968_v38  ;;  %v5159_v43 = vadd.f32 %v5070_v56, %v4967_v20  ;;  %v5207_v56 = vld [vmem:[#allocation3 + $0x1a2] sm:$0xff] }
 0x6ee   : > { %v12953_v62 = vpop.permute.xlu1 %5073  ;;  %v15462_v38 = vld [vmem:[#allocation41_spill] sm:$0xff] }
 0x6ef   : > { %4911 = vrot.lane.b32.xlu1 %v15455_v45, %s10132_s6  ;;  %v5352_v54 = vadd.f32 %v5264_v33, %v5160_v12  ;;  %v5351_v40 = vadd.f32 %v5262_v25, %v5159_v43  ;;  %v15459_v33 = vld [vmem:[#allocation98_spill] sm:$0xff]  ;;  %v15464_v43 = vld [vmem:[#allocation44_spill] sm:$0xff] }
 0x6f0   : > { %v12959_v13 = vpop.permute.xlu0 %5075  ;;  %v4010_v45 = vadd.f32 %v15459_v33, %v3818_v63  ;;  %v15466_v63 = vld [vmem:[#allocation77_spill] sm:$0xff]  ;;  %v15467_v33 = vld [vmem:[#allocation54_spill] sm:$0xff] }
 0x6f1   : > { %4909 = vrot.lane.b32.xlu0 %v4823_v52, %s10132_s6  ;;  %v5384_v2 = vmax.f32 %v5352_v54, 0.0  ;;  %v9858_v52 = vld [vmem:[#allocation3 + $0x80] sm:$0xff]  ;;  %v5383_v25 = vmax.f32 %v5351_v40, 0.0 }
 0x6f2   : > { %v12964_v28 = vpop.permute.xlu1 %5265  ;;  %v3817_v50 = vadd.f32 %v9858_v52, %v12840_v49  ;;  %v15468_v52 = vld [vmem:[#allocation57_spill] sm:$0xff] }
 0x6f3   : > { %5103 = vrot.lane.b32.xlu1 %v5016_v35, %s10133_s9  ;;  %v15461_v35 = vld [vmem:[#allocation42_spill] sm:$0xff]  ;;  %v5412_v39 = vpack.c.bf16 %v5384_v2, %v5383_v25 }
 0x6f4   : > { %v5268_v5 = vpop.permute.xlu0 %5267  ;;  %v4009_v17 = vadd.f32 %v15460_v51, %v3817_v50  ;;  %v4202_v6 = vadd.f32 %v15461_v35, %v4010_v45  ;;  %v5018_v25 = vld [vmem:[#allocation3 + $0x1c9] sm:$0xff] }
 0x6f5   : > { %5101 = vrot.lane.b32.xlu0 %v5015_v27, %s10133_s9  ;;  %v5447_v15 = vshrl.u32 %v5412_v39, 16  ;;  %v15469_v51 = vld [vmem:[#allocation55_spill] sm:$0xff] }
 0x6f6   : > { %v12969_v37 = vpop.permute.xlu1 %4885  ;;  %v4201_v27 = vadd.f32 %v15462_v38, %v4009_v17  ;;  %v4394_v20 = vadd.f32 %v15463_v32, %v4202_v6  ;;  %v5450_v32 = vshll.u32 %v5412_v39, 16 }
 0x6f7   : > { %5547 = vrot.lane.b32.xlu1 %v5442_v18, %s10136_s15  ;;  %v5449_v35 = vrot.slane %v5447_v15, 7 }
 0x6f8   : > { %v12972_v14 = vpop.permute.xlu0 %4887  ;;  %v4393_v54 = vadd.f32 %v15464_v43, %v4201_v27  ;;  %v5017_v27 = vld [vmem:[#allocation3 + $0x1c1] sm:$0xff] }
 0x6f9   : > { %5545 = vrot.lane.b32.xlu0 %v5445_v23, %s10136_s15  ;;  %v15465_v23 = vld [vmem:[#allocation61_spill] sm:$0xff] }
 0x6fa   : > { %v12975_v42 = vpop.permute.xlu1 %5077  ;;  %v4586_v40 = vadd.f32 %v15465_v23, %v4394_v20  ;;  %v4585_v45 = vadd.f32 %v15467_v33, %v4393_v54 }
 0x6fb   : > { %5295 = vrot.lane.b32.xlu1 %v5208_v60, %s10134_s11 }
 0x6fc   : > { %v12979_v46 = vpop.permute.xlu0 %5079  ;;  %v4778_v50 = vadd.f32 %v15468_v52, %v4586_v40  ;;  %v4777_v17 = vadd.f32 %v15469_v51, %v4585_v45  ;;  %v15470_v45 = vld [vmem:[#allocation43_spill] sm:$0xff] }
 0x6fd   : > { %5293 = vrot.lane.b32.xlu0 %v5207_v56, %s10134_s11 }
 0x6fe   : > { %v12984_v0 = vpop.permute.xlu1 %5269  ;;  %v4970_v6 = vadd.f32 %v12948_v26, %v4778_v50  ;;  %v4969_v20 = vadd.f32 %v12943_v31, %v4777_v17  ;;  %v5452_v26 = vor.u32 %v5450_v32, %v5449_v35  ;;  %v5210_v31 = vld [vmem:[#allocation3 + $0x1ca] sm:$0xff]  ;;  %v9860_v50 = vld [vmem:[#allocation3 + $0xa0] sm:$0xff]  ;;  %v15471_v17 = vld [vmem:[#allocation52_spill] sm:$0xff] }
 0x6ff   : > { %4723 = vrot.lane.b32.xlu1 %v5208_v60, %s10131_s8  ;;  %v4825_v60 = vld [vmem:[#allocation3 + $0x1c0] sm:$0xff] }
 0x700   : > { %v12989_v18 = vpop.permute.xlu0 %5271  ;;  %v5162_v43 = vadd.f32 %v12959_v13, %v4970_v6  ;;  %v5161_v23 = vadd.f32 %v12953_v62, %v4969_v20  ;;  %v9859_v13 = vld [vmem:[#allocation3 + $0xa8] sm:$0xff]  ;;  %v15472_v6 = vld [vmem:[#allocation112_spill] sm:$0xff] }
 0x701   : > { %4721 = vrot.lane.b32.xlu0 %v5207_v56, %s10131_s8  ;;  %v15473_v20 = vld [vmem:[#allocation46_spill] sm:$0xff] }
 0x702   : > { %v12994_v12 = vpop.permute.xlu1 %4889  ;;  %v5354_v40 = vadd.f32 %v5268_v5, %v5162_v43  ;;  %v5209_v5 = vld [vmem:[#allocation3 + $0x1c2] sm:$0xff] }
 0x703   : > { %4915 = vrot.lane.b32.xlu1 %v15466_v63, %s10132_s6  ;;  %v5353_v63 = vadd.f32 %v12964_v28, %v5161_v23  ;;  %v15474_v23 = vld [vmem:[#allocation66_spill] sm:$0xff] }
 0x704   : > { %v13000_v2 = vpop.permute.xlu0 %4891  ;;  %v5386_v33 = vmax.f32 %v5354_v40, 0.0 }
 0x705   : > { %4913 = vrot.lane.b32.xlu0 %v4825_v60, %s10132_s6  ;;  %v3820_v60 = vadd.f32 %v9859_v13, %v12840_v49  ;;  %v5385_v28 = vmax.f32 %v5353_v63, 0.0  ;;  %v4828_v13 = vld [vmem:[#allocation3 + $0x1e8] sm:$0xff] }
 0x706   : > { %v13005_v56 = vpop.permute.xlu1 %5081 }
 0x707   : > { %5107 = vrot.lane.b32.xlu1 %v5018_v25, %s10133_s9  ;;  %v4012_v52 = vadd.f32 %v15470_v45, %v3820_v60  ;;  %v3819_v25 = vadd.f32 %v9860_v50, %v12840_v49  ;;  %v5413_v32 = vpack.c.bf16 %v5386_v33, %v5385_v28  ;;  %v15475_v60 = vld [vmem:[#allocation56_spill] sm:$0xff]  ;;  %v4827_v33 = vld [vmem:[#allocation3 + $0x1e0] sm:$0xff] }
 0x708   : > { %v13010_v38 = vpop.permute.xlu0 %5083  ;;  %v15476_v50 = vld [vmem:[#allocation72_spill] sm:$0xff] }
 0x709   : > { %5105 = vrot.lane.b32.xlu0 %v5017_v27, %s10133_s9  ;;  %v4204_v27 = vadd.f32 %v15472_v6, %v4012_v52  ;;  %v15478_v28 = vld [vmem:[#allocation76_spill] sm:$0xff] }
 0x70a   : > { %v13015_v54 = vpop.permute.xlu1 %5273 }
 0x70b   : > { %5551 = vrot.lane.b32.xlu1 %v5449_v35, %s10136_s15  ;;  %v4011_v35 = vadd.f32 %v15471_v17, %v3819_v25  ;;  %v4396_v40 = vadd.f32 %v15474_v23, %v4204_v27  ;;  %v5454_v17 = vshrl.u32 %v5413_v32, 16  ;;  %v15479_v27 = vld [vmem:[#allocation69_spill] sm:$0xff] }
 0x70c   : > { %v13019_v15 = vpop.permute.xlu0 %5275 }
 0x70d   : > { %5549 = vrot.lane.b32.xlu0 %v5452_v26, %s10136_s15  ;;  %v4203_v43 = vadd.f32 %v15473_v20, %v4011_v35  ;;  %v4588_v25 = vadd.f32 %v15476_v50, %v4396_v40  ;;  %v5456_v23 = vrot.slane %v5454_v17, 7  ;;  %v5019_v40 = vld [vmem:[#allocation3 + $0x1e1] sm:$0xff] }
 0x70e   : > { %v13023_v39 = vpop.permute.xlu1 %4893 }
 0x70f   : > { %5299 = vrot.lane.b32.xlu1 %v5210_v31, %s10134_s11  ;;  %v4395_v45 = vadd.f32 %v15475_v60, %v4203_v43  ;;  %v4780_v35 = vadd.f32 %v15478_v28, %v4588_v25 }
 0x710   : > { %v13027_v62 = vpop.permute.xlu0 %4895 }
 0x711   : > { %5297 = vrot.lane.b32.xlu0 %v5209_v5, %s10134_s11  ;;  %v4972_v43 = vadd.f32 %v12972_v14, %v4780_v35 }
 0x712   : > { %v13032_v51 = vpop.permute.xlu1 %5085 }
 0x713   : > { %4727 = vrot.lane.b32.xlu1 %v5210_v31, %s10131_s8  ;;  %v15477_v31 = vld [vmem:[#allocation65_spill] sm:$0xff]  ;;  %v5164_v50 = vadd.f32 %v12979_v46, %v4972_v43 }
 0x714   : > { %v13039_v26 = vpop.permute.xlu0 %5087  ;;  %v4587_v52 = vadd.f32 %v15477_v31, %v4395_v45 }
 0x715   : > { %4725 = vrot.lane.b32.xlu0 %v5209_v5, %s10131_s8  ;;  %v5020_v5 = vld [vmem:[#allocation3 + $0x1e9] sm:$0xff] }
 0x716   : > { %v13042_v63 = vpop.permute.xlu1 %5277  ;;  %v4779_v20 = vadd.f32 %v15479_v27, %v4587_v52 }
 0x717   : > { %4919 = vrot.lane.b32.xlu1 %v4828_v13, %s10132_s6  ;;  %v5457_v13 = vshll.u32 %v5413_v32, 16  ;;  %v9861_v32 = vld [vmem:[#allocation3 + $0xc8] sm:$0xff] }
 0x718   : > { %v13054_v60 = vpop.permute.xlu0 %5279  ;;  %v4971_v45 = vadd.f32 %v12969_v37, %v4779_v20  ;;  %v5212_v37 = vld [vmem:[#allocation3 + $0x1ea] sm:$0xff]  ;;  %v3822_v46 = vadd.f32 %v9861_v32, %v12840_v49 }
 0x719   : > { %4917 = vrot.lane.b32.xlu0 %v4827_v33, %s10132_s6  ;;  %v5356_v33 = vadd.f32 %v12989_v18, %v5164_v50  ;;  %v5459_v14 = vor.u32 %v5457_v13, %v5456_v23  ;;  %v15480_v18 = vld [vmem:[#allocation62_spill] sm:$0xff] }
 0x71a   : > { %v13050_v6 = vpop.permute.xlu1 %4707  ;;  %v5163_v25 = vadd.f32 %v12975_v42, %v4971_v45  ;;  %v5211_v42 = vld [vmem:[#allocation3 + $0x1e2] sm:$0xff]  ;;  %v4014_v35 = vadd.f32 %v15480_v18, %v3822_v46  ;;  %v15485_v46 = vld [vmem:[#allocation75_spill] sm:$0xff] }
 0x71b   : > { %5111 = vrot.lane.b32.xlu1 %v5020_v5, %s10133_s9  ;;  %v5388_v28 = vmax.f32 %v5356_v33, 0.0  ;;  %v9862_v5 = vld [vmem:[#allocation3 + $0xc0] sm:$0xff] }
 0x71c   : > { %v5355_v17 = vadd.f32 %v12984_v0, %v5163_v25  ;;  %v13066_v52 = vpop.permute.xlu0 %4897  ;;  %v3821_v27 = vadd.f32 %v9862_v5, %v12840_v49  ;;  %v15481_v0 = vld [vmem:[#allocation63_spill] sm:$0xff]  ;;  %v15483_v25 = vld [vmem:[#allocation58_spill] sm:$0xff] }
 0x71d   : > { %5109 = vrot.lane.b32.xlu0 %v5019_v40, %s10133_s9  ;;  %v15482_v40 = vld [vmem:[#allocation73_spill] sm:$0xff]  ;;  %v9863_v5 = vld [vmem:[#allocation3 + $0xe8] sm:$0xff] }
 0x71e   : > { %v13062_v31 = vpop.permute.xlu1 %4899  ;;  %v5387_v20 = vmax.f32 %v5355_v17, 0.0  ;;  %v4013_v43 = vadd.f32 %v15481_v0, %v3821_v27  ;;  %v4206_v13 = vadd.f32 %v15482_v40, %v4014_v35  ;;  %v4830_v17 = vld [vmem:[#allocation3 + $0x208] sm:$0xff]  ;;  %v3824_v19 = vadd.f32 %v9863_v5, %v12840_v49  ;;  %v15487_v40 = vld [vmem:[#allocation68_spill] sm:$0xff] }
 0x71f   : > { %5555 = vrot.lane.b32.xlu1 %v5456_v23, %s10136_s15  ;;  %v15486_v27 = vld [vmem:[#allocation86_spill] sm:$0xff] }
 0x720   : > { %v5414_v45 = vpack.c.bf16 %v5388_v28, %v5387_v20  ;;  %v13078_v50 = vpop.permute.xlu0 %5089  ;;  %v4205_v33 = vadd.f32 %v15483_v25, %v4013_v43  ;;  %v4829_v43 = vld [vmem:[#allocation3 + $0x200] sm:$0xff] }
 0x721   : > { %5553 = vrot.lane.b32.xlu0 %v5459_v14, %s10136_s15  ;;  %v15484_v14 = vld [vmem:[#allocation78_spill] sm:$0xff] }
 0x722   : > { %v13073_v23 = vpop.permute.xlu1 %5091  ;;  %v4398_v32 = vadd.f32 %v15484_v14, %v4206_v13  ;;  %v4397_v18 = vadd.f32 %v15485_v46, %v4205_v33  ;;  %v5461_v35 = vshrl.u32 %v5414_v45, 16  ;;  %v4016_v13 = vadd.f32 %v15487_v40, %v3824_v19  ;;  %v15489_v14 = vld [vmem:[#allocation71_spill] sm:$0xff]  ;;  %v15494_v40 = vld [vmem:[#allocation89_spill] sm:$0xff] }
 0x723   : > { %5303 = vrot.lane.b32.xlu1 %v5212_v37, %s10134_s11  ;;  %v5464_v11 = vshll.u32 %v5414_v45, 16 }
 0x724   : > { %v4590_v0 = vadd.f32 %v15486_v27, %v4398_v32  ;;  %v13094_v46 = vpop.permute.xlu0 %5281  ;;  %v15490_v32 = vld [vmem:[#allocation67_spill] sm:$0xff]  ;;  %v4208_v48 = vadd.f32 %v15491_v53, %v4016_v13  ;;  %v5463_v4 = vrot.slane %v5461_v35, 7 }
 0x725   : > { %5301 = vrot.lane.b32.xlu0 %v5211_v42, %s10134_s11  ;;  %v9865_v27 = vld [vmem:[#allocation3 + $0x108] sm:$0xff] }
 0x726   : > { %v13087_v28 = vpop.permute.xlu1 %5283  ;;  %v4782_v33 = vadd.f32 %v15489_v14, %v4590_v0  ;;  %v3826_v29 = vadd.f32 %v9865_v27, %v12840_v49  ;;  %v5021_v14 = vld [vmem:[#allocation3 + $0x201] sm:$0xff] }
 0x727   : > { %4731 = vrot.lane.b32.xlu1 %v5212_v37, %s10131_s8  ;;  %v9864_v37 = vld [vmem:[#allocation3 + $0xe0] sm:$0xff] }
 0x728   : > { %v3823_v20 = vadd.f32 %v9864_v37, %v12840_v49  ;;  %v15492_v37 = vld [vmem:[#allocation70_spill] sm:$0xff]  ;;  %v4974_v19 = vadd.f32 %v13000_v2, %v4782_v33  ;;  %v15497_v33 = vld [vmem:[#allocation81_spill] sm:$0xff]  ;;  %v13118_v45 = vpop.permute.xlu0 %4709 }
 0x729   : > { %4729 = vrot.lane.b32.xlu0 %v5211_v42, %s10131_s8  ;;  %v15488_v42 = vld [vmem:[#allocation82_spill] sm:$0xff] }
 0x72a   : > { %v4589_v25 = vadd.f32 %v15488_v42, %v4397_v18  ;;  %v4015_v5 = vadd.f32 %v15490_v32, %v3823_v20  ;;  %v15493_v18 = vld [vmem:[#allocation87_spill] sm:$0xff]  ;;  %v4018_v42 = vadd.f32 %v15494_v40, %v3826_v29  ;;  %v5166_v13 = vadd.f32 %v13010_v38, %v4974_v19  ;;  %v13109_v35 = vpop.permute.xlu1 %4711  ;;  %v15496_v2 = vld [vmem:[#allocation90_spill] sm:$0xff]  ;;  %v15498_v29 = vld [vmem:[#allocation80_spill] sm:$0xff] }
 0x72b   : > { %4923 = vrot.lane.b32.xlu1 %v4830_v17, %s10132_s6  ;;  %v5022_v17 = vld [vmem:[#allocation3 + $0x209] sm:$0xff]  ;;  %v15501_v19 = vld [vmem:[#allocation92_spill] sm:$0xff] }
 0x72c   : > { %v4781_v30 = vadd.f32 %v15492_v37, %v4589_v25  ;;  %v4207_v0 = vadd.f32 %v15493_v18, %v4015_v5  ;;  %v15495_v32 = vld [vmem:[#allocation91_spill] sm:$0xff]  ;;  %v15499_v37 = vld [vmem:[#allocation96_spill] sm:$0xff] }
 0x72d   : > { %4921 = vrot.lane.b32.xlu0 %v4829_v43, %s10132_s6  ;;  %v9866_v43 = vld [vmem:[#allocation3 + $0x100] sm:$0xff]  ;;  %v4400_v27 = vadd.f32 %v15495_v32, %v4208_v48  ;;  %v5358_v48 = vadd.f32 %v13019_v15, %v5166_v13  ;;  %v9867_v15 = vld [vmem:[#allocation3 + $0x128] sm:$0xff] }
 0x72e   : > { %v3825_v20 = vadd.f32 %v9866_v43, %v12840_v49  ;;  %v4973_v53 = vadd.f32 %v12994_v12, %v4781_v30  ;;  %v4399_v25 = vadd.f32 %v15496_v2, %v4207_v0  ;;  %v5466_v30 = vor.u32 %v5464_v11, %v5463_v4  ;;  %v15500_v12 = vld [vmem:[#allocation88_spill] sm:$0xff]  ;;  %v15504_v13 = vld [vmem:[#allocation102_spill] sm:$0xff] }
 0x72f   : > { %5115 = vrot.lane.b32.xlu1 %v5022_v17, %s10133_s9  ;;  %v4210_v17 = vadd.f32 %v15498_v29, %v4018_v42  ;;  %v4592_v18 = vadd.f32 %v15499_v37, %v4400_v27  ;;  %v15502_v0 = vld [vmem:[#allocation104_spill] sm:$0xff]  ;;  %v3828_v27 = vadd.f32 %v9867_v15, %v12840_v49  ;;  %v5390_v2 = vmax.f32 %v5358_v48, 0.0  ;;  %v4902_v48 = vpop.permute.xlu0 %4901  ;;  %v4832_v15 = vld [vmem:[#allocation3 + $0x228] sm:$0xff] }
 0x730   : > { %v4017_v5 = vadd.f32 %v15497_v33, %v3825_v20  ;;  %v5165_v40 = vadd.f32 %v13005_v56, %v4973_v53  ;;  %v4591_v43 = vadd.f32 %v15501_v19, %v4399_v25  ;;  %v15503_v56 = vld [vmem:[#allocation100_spill] sm:$0xff]  ;;  %v5214_v53 = vld [vmem:[#allocation3 + $0x20a] sm:$0xff]  ;;  %v4904_v33 = vpop.permute.xlu1 %4903  ;;  %v15508_v19 = vld [vmem:[#allocation85_spill] sm:$0xff] }
 0x731   : > { %5113 = vrot.lane.b32.xlu0 %v5021_v14, %s10133_s9  ;;  %v4402_v14 = vadd.f32 %v15502_v0, %v4210_v17  ;;  %v4784_v20 = vadd.f32 %v12868_v9, %v4592_v18  ;;  %v15505_v9 = vld [vmem:[#allocation101_spill] sm:$0xff]  ;;  %v15506_v17 = vld [vmem:[#allocation95_spill] sm:$0xff] }
 0x732   : > { %v4209_v38 = vadd.f32 %v15500_v12, %v4017_v5  ;;  %v5357_v42 = vadd.f32 %v13015_v54, %v5165_v40  ;;  %v4783_v11 = vadd.f32 %v12861_v59, %v4591_v43  ;;  %v4020_v54 = vadd.f32 %v15505_v9, %v3828_v27  ;;  %v9868_v5 = vld [vmem:[#allocation3 + $0x120] sm:$0xff] }
 0x733   : > { %5559 = vrot.lane.b32.xlu1 %v5463_v4, %s10136_s15  ;;  %v4594_v4 = vadd.f32 %v15504_v13, %v4402_v14  ;;  %v4976_v25 = vadd.f32 %v13027_v62, %v4784_v20  ;;  %v3827_v29 = vadd.f32 %v9868_v5, %v12840_v49  ;;  %v5213_v18 = vld [vmem:[#allocation3 + $0x202] sm:$0xff]  ;;  %v15507_v62 = vld [vmem:[#allocation83_spill] sm:$0xff] }
 0x734   : > { %v4401_v32 = vadd.f32 %v15503_v56, %v4209_v38  ;;  %v5389_v40 = vmax.f32 %v5357_v42, 0.0  ;;  %v4212_v43 = vadd.f32 %v15508_v19, %v4020_v54  ;;  %v15510_v56 = vld [vmem:[#allocation108_spill] sm:$0xff] }
 0x735   : > { %5557 = vrot.lane.b32.xlu0 %v5466_v30, %s10136_s15  ;;  %v4975_v30 = vadd.f32 %v13023_v39, %v4783_v11  ;;  %v5168_v12 = vadd.f32 %v13039_v26, %v4976_v25  ;;  %v4786_v59 = vadd.f32 %v13050_v6, %v4594_v4  ;;  %v4019_v38 = vadd.f32 %v15507_v62, %v3827_v29  ;;  %v15509_v26 = vld [vmem:[#allocation94_spill] sm:$0xff]  ;;  %v5096_v4 = vpop.permute.xlu1 %5095  ;;  %v5635_v19 = vld [vmem:[#allocation2 + $0x10] sm:$0xff] }
 0x736   : > { %v4593_v37 = vadd.f32 %v15506_v17, %v4401_v32  ;;  %v5415_v14 = vpack.c.bf16 %v5390_v2, %v5389_v40  ;;  %v4404_v32 = vadd.f32 %v15510_v56, %v4212_v43  ;;  %v5024_v17 = vld [vmem:[#allocation3 + $0x229] sm:$0xff] }
 0x737   : > { %5307 = vrot.lane.b32.xlu1 %v5214_v53, %s10134_s11  ;;  %v5167_v20 = vadd.f32 %v13032_v51, %v4975_v30  ;;  %v5360_v42 = vadd.f32 %v13054_v60, %v5168_v12  ;;  %v4978_v39 = vadd.f32 %v13062_v31, %v4786_v59  ;;  %v4211_v6 = vadd.f32 %v15509_v26, %v4019_v38  ;;  %v15511_v51 = vld [vmem:[#allocation103_spill] sm:$0xff]  ;;  %v5023_v59 = vld [vmem:[#allocation3 + $0x221] sm:$0xff] }
 0x738   : > { %v4785_v0 = vadd.f32 %v12873_v10, %v4593_v37  ;;  %v15512_v31 = vld [vmem:[#allocation115_spill] sm:$0xff]  ;;  %v5468_v2 = vshrl.u32 %v5415_v14, 16 }
 0x739   : > { %5305 = vrot.lane.b32.xlu0 %v5213_v18, %s10134_s11  ;;  %v5359_v27 = vadd.f32 %v13042_v63, %v5167_v20  ;;  %v5170_v10 = vadd.f32 %v13073_v23, %v4978_v39  ;;  %v4403_v60 = vadd.f32 %v15511_v51, %v4211_v6  ;;  %v4596_v11 = vadd.f32 %v15512_v31, %v4404_v32  ;;  %v5094_v63 = vpop.permute.xlu0 %5093  ;;  %v15515_v23 = vld [vmem:[#allocation110_spill] sm:$0xff] }
 0x73a   : > { %v4977_v13 = vadd.f32 %v13066_v52, %v4785_v0  ;;  %v5392_v25 = vmax.f32 %v5360_v42, 0.0  ;;  %v5470_v62 = vrot.slane %v5468_v2, 7  ;;  %v5471_v39 = vshll.u32 %v5415_v14, 16  ;;  %v5215_v31 = vld [vmem:[#allocation3 + $0x222] sm:$0xff] }
 0x73b   : > { %4735 = vrot.lane.b32.xlu1 %v5214_v53, %s10131_s8  ;;  %v4831_v53 = vld [vmem:[#allocation3 + $0x220] sm:$0xff]  ;;  %v5362_v54 = vadd.f32 %v13087_v28, %v5170_v10  ;;  %v4595_v5 = vadd.f32 %v15515_v23, %v4403_v60  ;;  %v4788_v29 = vadd.f32 %v13109_v35, %v4596_v11  ;;  %v5391_v37 = vmax.f32 %v5359_v27, 0.0  ;;  %v9869_v10 = vld [vmem:[#allocation3 + $0x148] sm:$0xff] }
 0x73c   : > { %v5169_v9 = vadd.f32 %v13078_v50, %v4977_v13  ;;  %v5640_v50 = vld [vmem:[#allocation2 + $0x18] sm:$0x1]  ;;  %v5216_v13 = vld [vmem:[#allocation3 + $0x22a] sm:$0xff] }
 0x73d   : > { %4733 = vrot.lane.b32.xlu0 %v5213_v18, %s10131_s8  ;;  %v4787_v30 = vadd.f32 %v13118_v45, %v4595_v5  ;;  %v4980_v12 = vadd.f32 %v4904_v33, %v4788_v29  ;;  %v5416_v38 = vpack.c.bf16 %v5392_v25, %v5391_v37  ;;  %v15519_v37 = vld [vmem:[#allocation97_spill] sm:$0xff] }
 0x73e   : > { %v5361_v18 = vadd.f32 %v13094_v46, %v5169_v9  ;;  %v5394_v46 = vmax.f32 %v5362_v54, 0.0  ;;  %v15518_v9 = vld [vmem:[#allocation105_spill] sm:$0xff] }
 0x73f   : > { %4927 = vrot.lane.b32.xlu1 %v4832_v15, %s10132_s6  ;;  %v4979_v0 = vadd.f32 %v4902_v48, %v4787_v30  ;;  %v5172_v20 = vadd.f32 %v5096_v4, %v4980_v12  ;;  %v5475_v56 = vshrl.u32 %v5416_v38, 16  ;;  %v5473_v48 = vor.u32 %v5471_v39, %v5470_v62 }
 0x740   : > { %v5393_v45 = vmax.f32 %v5361_v18, 0.0  ;;  %v3830_v4 = vadd.f32 %v9869_v10, %v12840_v49  ;;  %v5478_v29 = vshll.u32 %v5416_v38, 16 }
 0x741   : > { %4925 = vrot.lane.b32.xlu0 %v4831_v53, %s10132_s6  ;;  %v5540_v28 = vpop.permute.xlu1 %5539  ;;  %v5171_v26 = vadd.f32 %v5094_v63, %v4979_v0  ;;  %v5477_v53 = vrot.slane %v5475_v56, 7  ;;  %v9870_v63 = vld [vmem:[#allocation3 + $0x140] sm:$0xff] }
 0x742   : > { %v5641_v35 = vsel %vm13160_vm8, %v5540_v28, %v5640_v50  ;;  %v5417_v32 = vpack.c.bf16 %v5394_v46, %v5393_v45  ;;  %v4022_v54 = vadd.f32 %v15518_v9, %v3830_v4  ;;  %v3829_v23 = vadd.f32 %v9870_v63, %v12840_v49  ;;  %v15520_v50 = vld [vmem:[#allocation99_spill] sm:$0xff]  ;;  %v15522_v0 = vld [vmem:[#allocation118_spill] sm:$0xff] }
 0x743   : > { %5642 = vst [vmem:[#allocation2 + $0x18] sm:$0x1] %v5641_v35  ;;  %v5538_v43 = vpop.permute.xlu0 %5537  ;;  %5119 = vrot.lane.b32.xlu1 %v5024_v17, %s10133_s9  ;;  %v5643_v4 = vld [vmem:[#allocation2 + $0x20] sm:$0xff] }
 0x744   : > { %v5636_v42 = vsel %vm13170_vm9, %v5538_v43, %v5635_v19  ;;  %v5482_v2 = vshrl.u32 %v5417_v32, 16  ;;  %v4021_v18 = vadd.f32 %v15519_v37, %v3829_v23  ;;  %v4214_v28 = vadd.f32 %v15520_v50, %v4022_v54  ;;  %v9871_v37 = vld [vmem:[#allocation3 + $0x168] sm:$0xff] }
 0x745   : > { %5637 = vst [vmem:[#allocation2 + $0x10] sm:$0xff] %v5636_v42  ;;  %5117 = vrot.lane.b32.xlu0 %v5023_v59, %s10133_s9  ;;  %v5288_v33 = vpop.permute.xlu1 %5287  ;;  %9579 = vmatprep.mubr.msk.bf16.mxu0 %vm5782_vm5, %v5636_v42  ;;  %v5480_v59 = vor.u32 %v5478_v29, %v5477_v53  ;;  %v5485_v43 = vshll.u32 %v5417_v32, 16  ;;  %v15523_v42 = vld [vmem:[#allocation119_spill] sm:$0xff] }
 0x746   : > { %v5364_v6 = vadd.f32 %v5288_v33, %v5172_v20  ;;  %v5484_v30 = vrot.slane %v5482_v2, 7  ;;  %v4406_v19 = vadd.f32 %v12710_v41, %v4214_v28  ;;  %v5646_v41 = vld [vmem:[#allocation2 + $0x28] sm:$0x1] }
 0x747   : > { %v5286_v15 = vpop.permute.xlu0 %5285  ;;  %5563 = vrot.lane.b32.xlu1 %v5470_v62, %s10136_s15  ;;  %v15521_v62 = vld [vmem:[#allocation106_spill] sm:$0xff] }
 0x748   : > { %v5363_v27 = vadd.f32 %v5286_v15, %v5171_v26  ;;  %v5396_v51 = vmax.f32 %v5364_v6, 0.0  ;;  %v4213_v46 = vadd.f32 %v15521_v62, %v4021_v18  ;;  %v4598_v39 = vadd.f32 %v15523_v42, %v4406_v19  ;;  %v15524_v6 = vld [vmem:[#allocation120_spill] sm:$0xff]  ;;  %v9872_v62 = vld [vmem:[#allocation3 + $0x160] sm:$0xff] }
 0x749   : > { %5561 = vrot.lane.b32.xlu0 %v5473_v48, %s10136_s15  ;;  %v4716_v14 = vpop.permute.xlu1 %4715  ;;  %v5487_v26 = vor.u32 %v5485_v43, %v5484_v30  ;;  %v3832_v18 = vadd.f32 %v9871_v37, %v12840_v49  ;;  %v9873_v37 = vld [vmem:[#allocation3 + $0x188] sm:$0xff] }
 0x74a   : > { %v5395_v60 = vmax.f32 %v5363_v27, 0.0  ;;  %v5736_v11 = vld [vmem:[#allocation2 + $0x18] sm:$0xff]  ;;  %v4405_v20 = vadd.f32 %v15522_v0, %v4213_v46  ;;  %v4790_v15 = vadd.f32 %v4716_v14, %v4598_v39  ;;  %v3831_v46 = vadd.f32 %v9872_v62, %v12840_v49 }
 0x74b   : > { %v4714_v25 = vpop.permute.xlu0 %4713  ;;  %5311 = vrot.lane.b32.xlu1 %v5216_v13, %s10134_s11  ;;  %9580 = vmatmul.mubr.msk.bf16.gmra.mrb[76].mxu0 %vm5782_vm5, %v5736_v11 }
 0x74c   : > { %v5418_v5 = vpack.c.bf16 %v5396_v51, %v5395_v60  ;;  %v4597_v56 = vadd.f32 %v15524_v6, %v4405_v20  ;;  %v15527_v20 = vld [vmem:[#allocation111_spill] sm:$0xff] }
 0x74d   : > { %5309 = vrot.lane.b32.xlu0 %v5215_v31, %s10134_s11  ;;  %v4908_v17 = vpop.permute.xlu1 %4907 }
 0x74e   : > { %v5489_v12 = vshrl.u32 %v5418_v5, 16  ;;  %v5492_v48 = vshll.u32 %v5418_v5, 16  ;;  %v4789_v27 = vadd.f32 %v4714_v25, %v4597_v56  ;;  %v4982_v13 = vadd.f32 %v4908_v17, %v4790_v15 }
 0x74f   : > { %v4906_v35 = vpop.permute.xlu0 %4905  ;;  %5567 = vrot.lane.b32.xlu1 %v5477_v53, %s10136_s15 }
 0x750   : > { %v5491_v45 = vrot.slane %v5489_v12, 7  ;;  %v4981_v31 = vadd.f32 %v4906_v35, %v4789_v27  ;;  %v15525_v35 = vld [vmem:[#allocation109_spill] sm:$0xff] }
 0x751   : > { %5565 = vrot.lane.b32.xlu0 %v5480_v59, %s10136_s15  ;;  %v5100_v38 = vpop.permute.xlu1 %5099  ;;  %v4024_v59 = vadd.f32 %v15525_v35, %v3832_v18  ;;  %v13229_v18 = vld [vmem:[#allocation9 + $0x1] ss:$0 sm:$0xff] }
 0x752   : > { %v5494_v60 = vor.u32 %v5492_v48, %v5491_v45  ;;  %v5174_v11 = vadd.f32 %v5100_v38, %v4982_v13  ;;  %v15526_v38 = vld [vmem:[#allocation114_spill] sm:$0xff] }
 0x753   : > { %v5098_v33 = vpop.permute.xlu0 %5097  ;;  %5571 = vrot.lane.b32.xlu1 %v5484_v30, %s10136_s15  ;;  %v4023_v0 = vadd.f32 %v15526_v38, %v3831_v46  ;;  %v4216_v42 = vadd.f32 %v15527_v20, %v4024_v59  ;;  %v15531_v59 = vld [vmem:[#allocation116_spill] sm:$0xff]  ;;  %v9875_v46 = vld [vmem:[#allocation3 + $0x180] sm:$0xff] }
 0x754   : > { %v5173_v2 = vadd.f32 %v5098_v33, %v4981_v31  ;;  %v15528_v33 = vld [vmem:[#allocation117_spill] sm:$0xff] }
 0x755   : > { %5569 = vrot.lane.b32.xlu0 %v5487_v26, %s10136_s15  ;;  %v5544_v32 = vpop.permute.xlu1 %5543  ;;  %v4215_v26 = vadd.f32 %v15528_v33, %v4023_v0  ;;  %v4408_v6 = vadd.f32 %v12735_v1, %v4216_v42  ;;  %v15532_v0 = vld [vmem:[#allocation122_spill] sm:$0xff]  ;;  %v15533_v42 = vld [vmem:[#allocation121_spill] sm:$0xff] }
 0x756   : > { %v5647_v10 = vsel %vm13160_vm8, %v5544_v32, %v5646_v41  ;;  %v9577_v9 = vpop.f32.mrb[72].mxu0  ;;  %v15529_v41 = vld [vmem:[#allocation113_spill] sm:$0xff] }
 0x757   : > { %5648 = vst [vmem:[#allocation2 + $0x28] sm:$0x1] %v5647_v10  ;;  %v5542_v51 = vpop.permute.xlu0 %5541  ;;  %5575 = vrot.lane.b32.xlu1 %v5491_v45, %s10136_s15  ;;  %6217 = vst.msk [vmem:[#allocation3 + $0x10] sm:$0xff] %vm1184_vm11, %v9577_v9  ;;  %v5928_v63 = vpop.f32.mrb[73].mxu0  ;;  %v4407_v32 = vadd.f32 %v15529_v41, %v4215_v26  ;;  %v4600_v27 = vadd.f32 %v12742_v55, %v4408_v6  ;;  %v15530_v10 = vld [vmem:[#allocation126_spill] sm:$0xff]  ;;  %v15534_v26 = vld [vmem:[#allocation123_spill] sm:$0xff] }
 0x758   : > { %v5644_v14 = vsel %vm13170_vm9, %v5542_v51, %v5643_v4  ;;  %6215 = vst.msk [vmem:[#allocation3] sm:$0xff] %vm1184_vm11, %v5928_v63  ;;  %v9578_v5 = vpop.f32.mrb[74].mxu0 }
 0x759   : > { %5645 = vst [vmem:[#allocation2 + $0x20] sm:$0xff] %v5644_v14  ;;  %5573 = vrot.lane.b32.xlu0 %v5494_v60, %s10136_s15  ;;  %v5292_v53 = vpop.permute.xlu1 %5291  ;;  %9583 = vmatprep.mubr.msk.bf16.mxu0 %vm5782_vm5, %v5644_v14  ;;  %v5931_v17 = vpop.f32.mrb[75].mxu0  ;;  %v4599_v4 = vadd.f32 %v15530_v10, %v4407_v32  ;;  %v5652_v60 = vld [vmem:[#allocation2 + $0x38] sm:$0x1] }
 0x75a   : > { %v5366_v25 = vadd.f32 %v5292_v53, %v5174_v11  ;;  %6216 = vst.msk [vmem:[#allocation3 + $0x8] sm:$0xff] %vm1184_vm11, %v5931_v17  ;;  %v5649_v53 = vld [vmem:[#allocation2 + $0x30] sm:$0xff] }
 0x75b   : > { %v5290_v54 = vpop.permute.xlu0 %5289  ;;  %v15535_v32 = vld [vmem:[#allocation124_spill] sm:$0xff] }
 0x75c   : > { %v5365_v23 = vadd.f32 %v5290_v54, %v5173_v2  ;;  %v5398_v50 = vmax.f32 %v5366_v25, 0.0 }
 0x75d   : > { %v4720_v29 = vpop.permute.xlu1 %4719 }
 0x75e   : > { %v5397_v28 = vmax.f32 %v5365_v23, 0.0  ;;  %v5738_v30 = vld [vmem:[#allocation2 + $0x28] sm:$0xff]  ;;  %v4792_v51 = vadd.f32 %v4720_v29, %v4600_v27 }
 0x75f   : > { %v4718_v12 = vpop.permute.xlu0 %4717  ;;  %9584 = vmatmul.mubr.msk.bf16.gmra.mrb[80].mxu0 %vm5782_vm5, %v5738_v30 }
 0x760   : > { %v5419_v19 = vpack.c.bf16 %v5398_v50, %v5397_v28  ;;  %v4791_v11 = vadd.f32 %v4718_v12, %v4599_v4  ;;  %v3834_v50 = vadd.f32 %v13229_v18, %v9873_v37 }
 0x761   : > { %v4912_v43 = vpop.permute.xlu1 %4911 }
 0x762   : > { %v5496_v39 = vshrl.u32 %v5419_v19, 16  ;;  %v5499_v15 = vshll.u32 %v5419_v19, 16  ;;  %v4984_v1 = vadd.f32 %v4912_v43, %v4792_v51  ;;  %v4026_v62 = vadd.f32 %v15531_v59, %v3834_v50 }
 0x763   : > { %v4910_v45 = vpop.permute.xlu0 %4909  ;;  %v3833_v19 = vadd.f32 %v9875_v46, %v13229_v18 }
 0x764   : > { %v5498_v56 = vrot.slane %v5496_v39, 7  ;;  %v4983_v55 = vadd.f32 %v4910_v45, %v4791_v11  ;;  %v4218_v39 = vadd.f32 %v15533_v42, %v4026_v62 }
 0x765   : > { %v5104_v48 = vpop.permute.xlu1 %5103  ;;  %v4025_v20 = vadd.f32 %v15532_v0, %v3833_v19  ;;  %v15536_v19 = vld [vmem:[#allocation127_spill] sm:$0xff] }
 0x766   : > { %5579 = vrot.lane.b32.xlu1 %v5498_v56, %s10136_s15  ;;  %v5501_v49 = vor.u32 %v5499_v15, %v5498_v56  ;;  %v5176_v25 = vadd.f32 %v5104_v48, %v4984_v1  ;;  %v4410_v56 = vadd.f32 %v12764_v34, %v4218_v39 }
 0x767   : > { %v5102_v13 = vpop.permute.xlu0 %5101  ;;  %v4217_v6 = vadd.f32 %v15534_v26, %v4025_v20 }
 0x768   : > { %5577 = vrot.lane.b32.xlu0 %v5501_v49, %s10136_s15  ;;  %v5175_v63 = vadd.f32 %v5102_v13, %v4983_v55  ;;  %v4602_v49 = vadd.f32 %v12774_v24, %v4410_v56 }
 0x769   : > { %v5548_v31 = vpop.permute.xlu1 %5547  ;;  %v4409_v27 = vadd.f32 %v15535_v32, %v4217_v6 }
 0x76a   : > { %v5653_v14 = vsel %vm13160_vm8, %v5548_v31, %v5652_v60  ;;  %v5658_v60 = vld [vmem:[#allocation2 + $0x48] sm:$0x1] }
 0x76b   : > { %5654 = vst [vmem:[#allocation2 + $0x38] sm:$0x1] %v5653_v14  ;;  %v5546_v2 = vpop.permute.xlu0 %5545  ;;  %v4601_v4 = vadd.f32 %v12768_v22, %v4409_v27  ;;  %v5655_v14 = vld [vmem:[#allocation2 + $0x40] sm:$0xff] }
 0x76c   : > { %v5650_v9 = vsel %vm13170_vm9, %v5546_v2, %v5649_v53 }
 0x76d   : > { %5651 = vst [vmem:[#allocation2 + $0x30] sm:$0xff] %v5650_v9  ;;  %v5296_v54 = vpop.permute.xlu1 %5295  ;;  %9587 = vmatprep.mubr.msk.bf16.mxu0 %vm5782_vm5, %v5650_v9 }
 0x76e   : > { %v5368_v23 = vadd.f32 %v5296_v54, %v5176_v25 }
 0x76f   : > { %v5294_v5 = vpop.permute.xlu0 %5293 }
 0x770   : > { %v5367_v29 = vadd.f32 %v5294_v5, %v5175_v63  ;;  %v5400_v28 = vmax.f32 %v5368_v23, 0.0  ;;  %v9876_v5 = vld [vmem:[#allocation3 + $0x1a8] sm:$0xff] }
 0x771   : > { %v4724_v17 = vpop.permute.xlu1 %4723 }
 0x772   : > { %v5399_v30 = vmax.f32 %v5367_v29, 0.0  ;;  %v5740_v12 = vld [vmem:[#allocation2 + $0x38] sm:$0xff]  ;;  %v4794_v51 = vadd.f32 %v4724_v17, %v4602_v49  ;;  %v3836_v29 = vadd.f32 %v9876_v5, %v13229_v18 }
 0x773   : > { %v4722_v35 = vpop.permute.xlu0 %4721  ;;  %9588 = vmatmul.mubr.msk.bf16.gmra.mrb[84].mxu0 %vm5782_vm5, %v5740_v12  ;;  %v9877_v12 = vld [vmem:[#allocation3 + $0x1a0] sm:$0xff] }
 0x774   : > { %v5420_v43 = vpack.c.bf16 %v5400_v28, %v5399_v30  ;;  %v4793_v11 = vadd.f32 %v4722_v35, %v4601_v4  ;;  %v4028_v30 = vadd.f32 %v12748_v7, %v3836_v29  ;;  %v3835_v35 = vadd.f32 %v9877_v12, %v13229_v18  ;;  %v15538_v12 = vld [vmem:[#allocation130_spill] sm:$0xff] }
 0x775   : > { %v4916_v38 = vpop.permute.xlu1 %4915 }
 0x776   : > { %v5503_v45 = vshrl.u32 %v5420_v43, 16  ;;  %v5506_v48 = vshll.u32 %v5420_v43, 16  ;;  %v4986_v34 = vadd.f32 %v4916_v38, %v4794_v51  ;;  %v4027_v46 = vadd.f32 %v12750_v47, %v3835_v35  ;;  %v15539_v35 = vld [vmem:[#allocation133_spill] sm:$0xff] }
 0x777   : > { %v4914_v33 = vpop.permute.xlu0 %4913  ;;  %v4220_v43 = vadd.f32 %v15536_v19, %v4028_v30 }
 0x778   : > { %v5505_v15 = vrot.slane %v5503_v45, 7  ;;  %v4985_v24 = vadd.f32 %v4914_v33, %v4793_v11  ;;  %v4219_v20 = vadd.f32 %v12758_v44, %v4027_v46  ;;  %v9878_v11 = vld [vmem:[#allocation3 + $0x1c8] sm:$0xff] }
 0x779   : > { %v5108_v41 = vpop.permute.xlu1 %5107  ;;  %v4412_v42 = vadd.f32 %v12798_v21, %v4220_v43  ;;  %v5670_v43 = vld [vmem:[#allocation2 + $0x68] sm:$0x1] }
 0x77a   : > { %5583 = vrot.lane.b32.xlu1 %v5505_v15, %s10136_s15  ;;  %v5508_v13 = vor.u32 %v5506_v48, %v5505_v15  ;;  %v5178_v2 = vadd.f32 %v5108_v41, %v4986_v34  ;;  %v4411_v7 = vadd.f32 %v12776_v8, %v4219_v20  ;;  %v5664_v48 = vld [vmem:[#allocation2 + $0x58] sm:$0x1]  ;;  %v5661_v8 = vld [vmem:[#allocation2 + $0x50] sm:$0xff]  ;;  %v3838_v34 = vadd.f32 %v9878_v11, %v13229_v18 }
 0x77b   : > { %v5106_v10 = vpop.permute.xlu0 %5105  ;;  %v4604_v26 = vadd.f32 %v12806_v58, %v4412_v42  ;;  %v5667_v42 = vld [vmem:[#allocation2 + $0x60] sm:$0xff] }
 0x77c   : > { %5581 = vrot.lane.b32.xlu0 %v5508_v13, %s10136_s15  ;;  %v5177_v25 = vadd.f32 %v5106_v10, %v4985_v24  ;;  %v4603_v47 = vadd.f32 %v12800_v16, %v4411_v7 }
 0x77d   : > { %v5552_v31 = vpop.permute.xlu1 %5551 }
 0x77e   : > { %v5659_v1 = vsel %vm13160_vm8, %v5552_v31, %v5658_v60 }
 0x77f   : > { %5660 = vst [vmem:[#allocation2 + $0x48] sm:$0x1] %v5659_v1  ;;  %v5550_v53 = vpop.permute.xlu0 %5549 }
 0x780   : > { %v5656_v55 = vsel %vm13170_vm9, %v5550_v53, %v5655_v14 }
 0x781   : > { %5657 = vst [vmem:[#allocation2 + $0x40] sm:$0xff] %v5656_v55  ;;  %v5300_v22 = vpop.permute.xlu1 %5299  ;;  %9591 = vmatprep.mubr.msk.bf16.mxu0 %vm5782_vm5, %v5656_v55  ;;  %v9879_v55 = vld [vmem:[#allocation3 + $0x1c0] sm:$0xff] }
 0x782   : > { %v5370_v9 = vadd.f32 %v5300_v22, %v5178_v2  ;;  %v4030_v2 = vadd.f32 %v12782_v3, %v3838_v34  ;;  %v3837_v22 = vadd.f32 %v9879_v55, %v13229_v18 }
 0x783   : > { %v5298_v54 = vpop.permute.xlu0 %5297 }
 0x784   : > { %v5369_v63 = vadd.f32 %v5298_v54, %v5177_v25  ;;  %v5402_v17 = vmax.f32 %v5370_v9, 0.0  ;;  %v4029_v54 = vadd.f32 %v12784_v61, %v3837_v22  ;;  %v15540_v61 = vld [vmem:[#allocation134_spill] sm:$0xff] }
 0x785   : > { %v4728_v23 = vpop.permute.xlu1 %4727 }
 0x786   : > { %v5401_v37 = vmax.f32 %v5369_v63, 0.0  ;;  %v5742_v50 = vld [vmem:[#allocation2 + $0x48] sm:$0xff]  ;;  %v4796_v15 = vadd.f32 %v4728_v23, %v4604_v26  ;;  %v4222_v63 = vadd.f32 %v12790_v36, %v4030_v2  ;;  %v4221_v29 = vadd.f32 %v12792_v57, %v4029_v54 }
 0x787   : > { %v4726_v28 = vpop.permute.xlu0 %4725  ;;  %9592 = vmatmul.mubr.msk.bf16.gmra.mrb[88].mxu0 %vm5782_vm5, %v5742_v50 }
 0x788   : > { %v5421_v59 = vpack.c.bf16 %v5402_v17, %v5401_v37  ;;  %v4795_v41 = vadd.f32 %v4726_v28, %v4603_v47  ;;  %v15537_v17 = vld [vmem:[#allocation131_spill] sm:$0xff]  ;;  %v4413_v3 = vadd.f32 %v15538_v12, %v4221_v29  ;;  %v15548_v29 = vld [vmem:[#allocation138_spill] sm:$0xff] }
 0x789   : > { %v4920_v62 = vpop.permute.xlu1 %4919  ;;  %v4414_v37 = vadd.f32 %v15537_v17, %v4222_v63  ;;  %v15547_v63 = vld [vmem:[#allocation137_spill] sm:$0xff] }
 0x78a   : > { %v5510_v38 = vshrl.u32 %v5421_v59, 16  ;;  %v5513_v45 = vshll.u32 %v5421_v59, 16  ;;  %v4988_v21 = vadd.f32 %v4920_v62, %v4796_v15  ;;  %v4605_v19 = vadd.f32 %v15540_v61, %v4413_v3 }
 0x78b   : > { %v4918_v0 = vpop.permute.xlu0 %4917  ;;  %v4606_v59 = vadd.f32 %v15539_v35, %v4414_v37  ;;  %v5673_v35 = vld [vmem:[#allocation2 + $0x70] sm:$0xff] }
 0x78c   : > { %v5512_v39 = vrot.slane %v5510_v38, 7  ;;  %v4987_v58 = vadd.f32 %v4918_v0, %v4795_v41 }
 0x78d   : > { %v5112_v33 = vpop.permute.xlu1 %5111 }
 0x78e   : > { %5587 = vrot.lane.b32.xlu1 %v5512_v39, %s10136_s15  ;;  %v5515_v6 = vor.u32 %v5513_v45, %v5512_v39  ;;  %v5180_v49 = vadd.f32 %v5112_v33, %v4988_v21 }
 0x78f   : > { %v5110_v56 = vpop.permute.xlu0 %5109 }
 0x790   : > { %5585 = vrot.lane.b32.xlu0 %v5515_v6, %s10136_s15  ;;  %v5179_v10 = vadd.f32 %v5110_v56, %v4987_v58  ;;  %v15541_v58 = vld [vmem:[#allocation125_spill] sm:$0xff] }
 0x791   : > { %v5556_v44 = vpop.permute.xlu1 %5555 }
 0x792   : > { %v5665_v32 = vsel %vm13160_vm8, %v5556_v44, %v5664_v48  ;;  %v9880_v44 = vld [vmem:[#allocation3 + $0x1e8] sm:$0xff] }
 0x793   : > { %5666 = vst [vmem:[#allocation2 + $0x58] sm:$0x1] %v5665_v32  ;;  %v5554_v27 = vpop.permute.xlu0 %5553  ;;  %v3840_v41 = vadd.f32 %v9880_v44, %v13229_v18 }
 0x794   : > { %v5662_v13 = vsel %vm13170_vm9, %v5554_v27, %v5661_v8 }
 0x795   : > { %5663 = vst [vmem:[#allocation2 + $0x50] sm:$0xff] %v5662_v13  ;;  %v5304_v16 = vpop.permute.xlu1 %5303  ;;  %9595 = vmatprep.mubr.msk.bf16.mxu0 %vm5782_vm5, %v5662_v13  ;;  %v9881_v13 = vld [vmem:[#allocation3 + $0x1e0] sm:$0xff] }
 0x796   : > { %v5372_v4 = vadd.f32 %v5304_v16, %v5180_v49  ;;  %v4032_v49 = vadd.f32 %v15541_v58, %v3840_v41  ;;  %v3839_v16 = vadd.f32 %v9881_v13, %v13229_v18  ;;  %v5685_v41 = vld [vmem:[#allocation2 + $0x90] sm:$0xff]  ;;  %v5694_v58 = vld [vmem:[#allocation2 + $0xa8] sm:$0x1] }
 0x797   : > { %v5302_v51 = vpop.permute.xlu0 %5301 }
 0x798   : > { %v5371_v60 = vadd.f32 %v5302_v51, %v5179_v10  ;;  %v5404_v1 = vmax.f32 %v5372_v4, 0.0  ;;  %v15542_v51 = vld [vmem:[#allocation128_spill] sm:$0xff] }
 0x799   : > { %v4732_v31 = vpop.permute.xlu1 %4731 }
 0x79a   : > { %v5403_v14 = vmax.f32 %v5371_v60, 0.0  ;;  %v5744_v53 = vld [vmem:[#allocation2 + $0x58] sm:$0xff]  ;;  %v4798_v36 = vadd.f32 %v4732_v31, %v4606_v59  ;;  %v4031_v60 = vadd.f32 %v15542_v51, %v3839_v16 }
 0x79b   : > { %v4730_v24 = vpop.permute.xlu0 %4729  ;;  %9596 = vmatmul.mubr.msk.bf16.gmra.mrb[92].mxu0 %vm5782_vm5, %v5744_v53  ;;  %v15543_v31 = vld [vmem:[#allocation129_spill] sm:$0xff] }
 0x79c   : > { %v5422_v25 = vpack.c.bf16 %v5404_v1, %v5403_v14  ;;  %v4797_v38 = vadd.f32 %v4730_v24, %v4605_v19  ;;  %v4224_v11 = vadd.f32 %v15543_v31, %v4032_v49  ;;  %v15544_v14 = vld [vmem:[#allocation132_spill] sm:$0xff] }
 0x79d   : > { %v4924_v9 = vpop.permute.xlu1 %4923  ;;  %v4223_v53 = vadd.f32 %v15544_v14, %v4031_v60  ;;  %v15545_v24 = vld [vmem:[#allocation136_spill] sm:$0xff]  ;;  %v6360_v60 = vld [vmem:[#allocation3 + $0x9] sm:$0xff] }
 0x79e   : > { %v5517_v23 = vshrl.u32 %v5422_v25, 16  ;;  %v5520_v28 = vshll.u32 %v5422_v25, 16  ;;  %v4990_v0 = vadd.f32 %v4924_v9, %v4798_v36  ;;  %v4416_v2 = vadd.f32 %v15545_v24, %v4224_v11  ;;  %v15546_v9 = vld [vmem:[#allocation135_spill] sm:$0xff]  ;;  %v6359_v11 = vld [vmem:[#allocation3 + $0x1] sm:$0xff] }
 0x79f   : > { %v4922_v5 = vpop.permute.xlu0 %4921  ;;  %v4415_v54 = vadd.f32 %v15546_v9, %v4223_v53  ;;  %v5700_v53 = vld [vmem:[#allocation2 + $0xb8] sm:$0x1] }
 0x7a0   : > { %v5519_v50 = vrot.slane %v5517_v23, 7  ;;  %v4989_v45 = vadd.f32 %v4922_v5, %v4797_v38  ;;  %v4608_v23 = vadd.f32 %v15547_v63, %v4416_v2  ;;  %v5706_v63 = vld [vmem:[#allocation2 + $0xc8] sm:$0x1] }
 0x7a1   : > { %v5116_v30 = vpop.permute.xlu1 %5115  ;;  %v4607_v17 = vadd.f32 %v15548_v29, %v4415_v54 }
 0x7a2   : > { %5591 = vrot.lane.b32.xlu1 %v5519_v50, %s10136_s15  ;;  %v5522_v62 = vor.u32 %v5520_v28, %v5519_v50  ;;  %v5182_v33 = vadd.f32 %v5116_v30, %v4990_v0  ;;  %v5676_v50 = vld [vmem:[#allocation2 + $0x78] sm:$0x1]  ;;  %v5682_v0 = vld [vmem:[#allocation2 + $0x88] sm:$0x1] }
 0x7a3   : > { %v5114_v46 = vpop.permute.xlu0 %5113 }
 0x7a4   : > { %5589 = vrot.lane.b32.xlu0 %v5522_v62, %s10136_s15  ;;  %v5181_v6 = vadd.f32 %v5114_v46, %v4989_v45 }
 0x7a5   : > { %v5560_v57 = vpop.permute.xlu1 %5559 }
 0x7a6   : > { %v5671_v20 = vsel %vm13160_vm8, %v5560_v57, %v5670_v43 }
 0x7a7   : > { %5672 = vst [vmem:[#allocation2 + $0x68] sm:$0x1] %v5671_v20  ;;  %v5558_v39 = vpop.permute.xlu0 %5557 }
 0x7a8   : > { %v5668_v7 = vsel %vm13170_vm9, %v5558_v39, %v5667_v42 }
 0x7a9   : > { %5669 = vst [vmem:[#allocation2 + $0x60] sm:$0xff] %v5668_v7  ;;  %v5308_v26 = vpop.permute.xlu1 %5307  ;;  %9599 = vmatprep.mubr.msk.bf16.mxu0 %vm5782_vm5, %v5668_v7  ;;  %v5679_v7 = vld [vmem:[#allocation2 + $0x80] sm:$0xff] }
 0x7aa   : > { %v5374_v56 = vadd.f32 %v5308_v26, %v5182_v33 }
 0x7ab   : > { %v5306_v47 = vpop.permute.xlu0 %5305 }
 0x7ac   : > { %v5373_v15 = vadd.f32 %v5306_v47, %v5181_v6  ;;  %v5406_v21 = vmax.f32 %v5374_v56, 0.0  ;;  %v5688_v47 = vld [vmem:[#allocation2 + $0x98] sm:$0x1] }
 0x7ad   : > { %v4736_v48 = vpop.permute.xlu1 %4735 }
 0x7ae   : > { %v5405_v32 = vmax.f32 %v5373_v15, 0.0  ;;  %v5746_v8 = vld [vmem:[#allocation2 + $0x68] sm:$0xff]  ;;  %v4800_v37 = vadd.f32 %v4736_v48, %v4608_v23 }
 0x7af   : > { %v4734_v27 = vpop.permute.xlu0 %4733  ;;  %9600 = vmatmul.mubr.msk.bf16.gmra.mrb[96].mxu0 %vm5782_vm5, %v5746_v8 }
 0x7b0   : > { %v5423_v10 = vpack.c.bf16 %v5406_v21, %v5405_v32  ;;  %v4799_v30 = vadd.f32 %v4734_v27, %v4607_v17 }
 0x7b1   : > { %v4928_v4 = vpop.permute.xlu1 %4927 }
 0x7b2   : > { %v5524_v34 = vshrl.u32 %v5423_v10, 16  ;;  %v5527_v22 = vshll.u32 %v5423_v10, 16  ;;  %v4992_v12 = vadd.f32 %v4928_v4, %v4800_v37  ;;  %v5691_v4 = vld [vmem:[#allocation2 + $0xa0] sm:$0xff] }
 0x7b3   : > { %v4926_v1 = vpop.permute.xlu0 %4925 }
 0x7b4   : > { %v5526_v55 = vrot.slane %v5524_v34, 7  ;;  %v4991_v62 = vadd.f32 %v4926_v1, %v4799_v30  ;;  %v6552_v34 = vld [vmem:[#allocation3 + $0xa] sm:$0xff]  ;;  %v6551_v1 = vld [vmem:[#allocation3 + $0x2] sm:$0xff] }
 0x7b5   : > { %v5120_v25 = vpop.permute.xlu1 %5119 }
 0x7b6   : > { %5595 = vrot.lane.b32.xlu1 %v5526_v55, %s10136_s15  ;;  %v5529_v18 = vor.u32 %v5527_v22, %v5526_v55  ;;  %v5184_v46 = vadd.f32 %v5120_v25, %v4992_v12  ;;  %v5697_v55 = vld [vmem:[#allocation2 + $0xb0] sm:$0xff] }
 0x7b7   : > { %v5118_v5 = vpop.permute.xlu0 %5117  ;;  %v5709_v12 = vld [vmem:[#allocation2 + $0xd0] sm:$0xff] }
 0x7b8   : > { %5593 = vrot.lane.b32.xlu0 %v5529_v18, %s10136_s15  ;;  %v5183_v36 = vadd.f32 %v5118_v5, %v4991_v62  ;;  %v5703_v5 = vld [vmem:[#allocation2 + $0xc0] sm:$0xff]  ;;  %v5718_v62 = vld [vmem:[#allocation2 + $0xe8] sm:$0x1] }
 0x7b9   : > { %v5564_v28 = vpop.permute.xlu1 %5563 }
 0x7ba   : > { %v5677_v3 = vsel %vm13160_vm8, %v5564_v28, %v5676_v50  ;;  %v5712_v50 = vld [vmem:[#allocation2 + $0xd8] sm:$0x1] }
 0x7bb   : > { %5678 = vst [vmem:[#allocation2 + $0x78] sm:$0x1] %v5677_v3  ;;  %v5562_v59 = vpop.permute.xlu0 %5561 }
 0x7bc   : > { %v5674_v61 = vsel %vm13170_vm9, %v5562_v59, %v5673_v35 }
 0x7bd   : > { %5675 = vst [vmem:[#allocation2 + $0x70] sm:$0xff] %v5674_v61  ;;  %v5312_v19 = vpop.permute.xlu1 %5311  ;;  %9603 = vmatprep.mubr.msk.bf16.mxu0 %vm5782_vm5, %v5674_v61 }
 0x7be   : > { %v5376_v43 = vadd.f32 %v5312_v19, %v5184_v46  ;;  %v5715_v19 = vld [vmem:[#allocation2 + $0xe0] sm:$0xff] }
 0x7bf   : > { %v5310_v57 = vpop.permute.xlu0 %5309 }
 0x7c0   : > { %v5375_v38 = vadd.f32 %v5310_v57, %v5183_v36  ;;  %v5408_v42 = vmax.f32 %v5376_v43, 0.0 }
 0x7c1   : > { %v5568_v20 = vpop.permute.xlu1 %5567 }
 0x7c2   : > { %v5407_v39 = vmax.f32 %v5375_v38, 0.0  ;;  %v5683_v45 = vsel %vm13160_vm8, %v5568_v20, %v5682_v0  ;;  %v5748_v33 = vld [vmem:[#allocation2 + $0x78] sm:$0xff] }
 0x7c3   : > { %5684 = vst [vmem:[#allocation2 + $0x88] sm:$0x1] %v5683_v45  ;;  %v5566_v26 = vpop.permute.xlu0 %5565  ;;  %9604 = vmatmul.mubr.msk.bf16.gmra.mrb[100].mxu0 %vm5782_vm5, %v5748_v33  ;;  %v5724_v45 = vld [vmem:[#allocation2 + $0xf8] sm:$0x1] }
 0x7c4   : > { %v5424_v6 = vpack.c.bf16 %v5408_v42, %v5407_v39  ;;  %v5680_v56 = vsel %vm13170_vm9, %v5566_v26, %v5679_v7 }
 0x7c5   : > { %5681 = vst [vmem:[#allocation2 + $0x80] sm:$0xff] %v5680_v56  ;;  %v5572_v15 = vpop.permute.xlu1 %5571  ;;  %9607 = vmatprep.mubr.msk.bf16.mxu0 %vm5782_vm5, %v5680_v56 }
 0x7c6   : > { %v5531_v48 = vshrl.u32 %v5424_v6, 16  ;;  %v5689_v44 = vsel %vm13160_vm8, %v5572_v15, %v5688_v47  ;;  %v5534_v8 = vshll.u32 %v5424_v6, 16  ;;  %v5721_v6 = vld [vmem:[#allocation2 + $0xf0] sm:$0xff] }
 0x7c7   : > { %5690 = vst [vmem:[#allocation2 + $0x98] sm:$0x1] %v5689_v44  ;;  %v5570_v21 = vpop.permute.xlu0 %5569 }
 0x7c8   : > { %v5533_v32 = vrot.slane %v5531_v48, 7  ;;  %v5686_v27 = vsel %vm13170_vm9, %v5570_v21, %v5685_v41 }
 0x7c9   : > { %5687 = vst [vmem:[#allocation2 + $0x90] sm:$0xff] %v5686_v27  ;;  %v5576_v49 = vpop.permute.xlu1 %5575 }
 0x7ca   : > { %v5695_v13 = vsel %vm13160_vm8, %v5576_v49, %v5694_v58  ;;  %5599 = vrot.lane.b32.xlu1 %v5533_v32, %s10136_s15  ;;  %v5536_v16 = vor.u32 %v5534_v8, %v5533_v32  ;;  %v5750_v10 = vld [vmem:[#allocation2 + $0x88] sm:$0xff] }
 0x7cb   : > { %5696 = vst [vmem:[#allocation2 + $0xa8] sm:$0x1] %v5695_v13  ;;  %v5574_v51 = vpop.permute.xlu0 %5573  ;;  %9608 = vmatmul.mubr.msk.bf16.gmra.mrb[104].mxu0 %vm5782_vm5, %v5750_v10  ;;  %v5730_v13 = vld [vmem:[#allocation2 + $0x108] sm:$0x1] }
 0x7cc   : > { %v5692_v31 = vsel %vm13170_vm9, %v5574_v51, %v5691_v4  ;;  %5597 = vrot.lane.b32.xlu0 %v5536_v16, %s10136_s15  ;;  %9611 = vmatprep.mubr.msk.bf16.mxu0 %vm5782_vm5, %v5686_v27  ;;  %v5727_v51 = vld [vmem:[#allocation2 + $0x100] sm:$0xff] }
 0x7cd   : > { %5693 = vst [vmem:[#allocation2 + $0xa0] sm:$0xff] %v5692_v31 }
 0x7ce   : > { %6425 = vrot.lane.b32.xlu1 %v6360_v60, %s10128_s26  ;;  %v5752_v14 = vld [vmem:[#allocation2 + $0x98] sm:$0xff] }
 0x7d0   : > { %6423 = vrot.lane.b32.xlu0 %v6359_v11, %s10128_s26 }
 0x7d2   : > { %6617 = vrot.lane.b32.xlu1 %v6552_v34, %s10127_s24  ;;  %v5754_v25 = vld [vmem:[#allocation2 + $0xa8] sm:$0xff] }
 0x7d3   : > { %9612 = vmatmul.mubr.msk.bf16.gmra.mrb[108].mxu0 %vm5782_vm5, %v5752_v14 }
 0x7d4   : > { %9615 = vmatprep.mubr.msk.bf16.mxu0 %vm5782_vm5, %v5692_v31  ;;  %6615 = vrot.lane.b32.xlu0 %v6551_v1, %s10127_s24 }
 0x7d8   : > { %v5580_v24 = vpop.permute.xlu1 %5579 }
 0x7d9   : > { %v5701_v2 = vsel %vm13160_vm8, %v5580_v24, %v5700_v53 }
 0x7da   : > { %5702 = vst [vmem:[#allocation2 + $0xb8] sm:$0x1] %v5701_v2  ;;  %v5578_v22 = vpop.permute.xlu0 %5577 }
 0x7db   : > { %v5698_v9 = vsel %vm13170_vm9, %v5578_v22, %v5697_v55  ;;  %9616 = vmatmul.mubr.msk.bf16.gmra.mrb[112].mxu0 %vm5782_vm5, %v5754_v25 }
 0x7dc   : > { %5699 = vst [vmem:[#allocation2 + $0xb0] sm:$0xff] %v5698_v9  ;;  %9619 = vmatprep.mubr.msk.bf16.mxu0 %vm5782_vm5, %v5698_v9 }
 0x7e1   : > { %v5756_v54 = vld [vmem:[#allocation2 + $0xb8] sm:$0xff] }
 0x7e3   : > { %9620 = vmatmul.mubr.msk.bf16.gmra.mrb[116].mxu0 %vm5782_vm5, %v5756_v54 }
 0x7ec   : > { %v5584_v23 = vpop.permute.xlu1 %5583 }
 0x7ed   : > { %v5707_v18 = vsel %vm13160_vm8, %v5584_v23, %v5706_v63 }
 0x7ee   : > { %5708 = vst [vmem:[#allocation2 + $0xc8] sm:$0x1] %v5707_v18  ;;  %v5582_v29 = vpop.permute.xlu0 %5581 }
 0x7ef   : > { %v5704_v17 = vsel %vm13170_vm9, %v5582_v29, %v5703_v5 }
 0x7f0   : > { %5705 = vst [vmem:[#allocation2 + $0xc0] sm:$0xff] %v5704_v17  ;;  %9623 = vmatprep.mubr.msk.bf16.mxu0 %vm5782_vm5, %v5704_v17 }
 0x7f5   : > { %v5758_v37 = vld [vmem:[#allocation2 + $0xc8] sm:$0xff] }
 0x7f6   : > { %9624 = vmatmul.mubr.msk.bf16.gmra.mrb[120].mxu0 %vm5782_vm5, %v5758_v37 }
 0x800   : > { %v5588_v28 = vpop.permute.xlu1 %5587 }
 0x801   : > { %v5713_v30 = vsel %vm13160_vm8, %v5588_v28, %v5712_v50 }
 0x802   : > { %5714 = vst [vmem:[#allocation2 + $0xd8] sm:$0x1] %v5713_v30  ;;  %v5586_v3 = vpop.permute.xlu0 %5585 }
 0x803   : > { %v5710_v35 = vsel %vm13170_vm9, %v5586_v3, %v5709_v12 }
 0x804   : > { %5711 = vst [vmem:[#allocation2 + $0xd0] sm:$0xff] %v5710_v35  ;;  %9627 = vmatprep.mubr.msk.bf16.mxu0 %vm5782_vm5, %v5710_v35 }
 0x809   : > { %v5760_v59 = vld [vmem:[#allocation2 + $0xd8] sm:$0xff] }
 0x80a   : > { %9628 = vmatmul.mubr.msk.bf16.gmra.mrb[124].mxu0 %vm5782_vm5, %v5760_v59 }
 0x814   : > { %v5592_v46 = vpop.permute.xlu1 %5591 }
 0x815   : > { %v5719_v61 = vsel %vm13160_vm8, %v5592_v46, %v5718_v62 }
 0x816   : > { %5720 = vst [vmem:[#allocation2 + $0xe8] sm:$0x1] %v5719_v61  ;;  %v5590_v36 = vpop.permute.xlu0 %5589 }
 0x817   : > { %v5716_v43 = vsel %vm13170_vm9, %v5590_v36, %v5715_v19 }
 0x818   : > { %5717 = vst [vmem:[#allocation2 + $0xe0] sm:$0xff] %v5716_v43  ;;  %9631 = vmatprep.mubr.msk.bf16.mxu0 %vm5782_vm5, %v5716_v43 }
 0x81d   : > { %v5762_v57 = vld [vmem:[#allocation2 + $0xe8] sm:$0xff] }
 0x81e   : > { %v9581_v38 = vpop.f32.mrb[76].mxu0  ;;  %9632 = vmatmul.mubr.msk.bf16.gmra.mrb[128].mxu0 %vm5782_vm5, %v5762_v57 }
 0x81f   : > { %6221 = vst.msk [vmem:[#allocation3 + $0x30] sm:$0xff] %vm1184_vm11, %v9581_v38  ;;  %v5944_v0 = vpop.f32.mrb[77].mxu0 }
 0x820   : > { %6219 = vst.msk [vmem:[#allocation3 + $0x20] sm:$0xff] %vm1184_vm11, %v5944_v0  ;;  %v9582_v20 = vpop.f32.mrb[78].mxu0 }
 0x821   : > { %v5947_v42 = vpop.f32.mrb[79].mxu0 }
 0x822   : > { %6220 = vst.msk [vmem:[#allocation3 + $0x28] sm:$0xff] %vm1184_vm11, %v5947_v42 }
 0x827   : > { %v6743_v39 = vld [vmem:[#allocation3 + $0x20] sm:$0xff] }
 0x828   : > { %v5596_v33 = vpop.permute.xlu1 %5595  ;;  %6807 = vrot.lane.b32.xlu0 %v6743_v39, %s10129_s13 }
 0x829   : > { %v5725_v7 = vsel %vm13160_vm8, %v5596_v33, %v5724_v45  ;;  %v6362_v26 = vld [vmem:[#allocation3 + $0x29] sm:$0xff]  ;;  %v6361_v15 = vld [vmem:[#allocation3 + $0x21] sm:$0xff] }
 0x82a   : > { %5726 = vst [vmem:[#allocation2 + $0xf8] sm:$0x1] %v5725_v7  ;;  %v5594_v56 = vpop.permute.xlu0 %5593  ;;  %6429 = vrot.lane.b32.xlu1 %v6362_v26, %s10128_s26  ;;  %v6554_v48 = vld [vmem:[#allocation3 + $0x2a] sm:$0xff]  ;;  %v6553_v44 = vld [vmem:[#allocation3 + $0x22] sm:$0xff] }
 0x82b   : > { %v5722_v47 = vsel %vm13170_vm9, %v5594_v56, %v5721_v6  ;;  %v6744_v41 = vld [vmem:[#allocation3 + $0x28] sm:$0xff] }
 0x82c   : > { %5723 = vst [vmem:[#allocation2 + $0xf0] sm:$0xff] %v5722_v47  ;;  %6427 = vrot.lane.b32.xlu0 %v6361_v15, %s10128_s26  ;;  %9635 = vmatprep.mubr.msk.bf16.mxu0 %vm5782_vm5, %v5722_v47 }
 0x82e   : > { %6621 = vrot.lane.b32.xlu1 %v6554_v48, %s10127_s24 }
 0x830   : > { %6619 = vrot.lane.b32.xlu0 %v6553_v44, %s10127_s24 }
 0x831   : > { %v5764_v21 = vld [vmem:[#allocation2 + $0xf8] sm:$0xff] }
 0x832   : > { %v9585_v32 = vpop.f32.mrb[80].mxu0  ;;  %6809 = vrot.lane.b32.xlu1 %v6744_v41, %s10129_s13  ;;  %9636 = vmatmul.mubr.msk.bf16.gmra.mrb[132].mxu0 %vm5782_vm5, %v5764_v21 }
 0x833   : > { %6225 = vst.msk [vmem:[#allocation3 + $0x50] sm:$0xff] %vm1184_vm11, %v9585_v32  ;;  %v5960_v8 = vpop.f32.mrb[81].mxu0 }
 0x834   : > { %6223 = vst.msk [vmem:[#allocation3 + $0x40] sm:$0xff] %vm1184_vm11, %v5960_v8  ;;  %v9586_v27 = vpop.f32.mrb[82].mxu0  ;;  %6999 = vrot.lane.b32.xlu0 %v6361_v15, %s10130_s16 }
 0x835   : > { %v5963_v58 = vpop.f32.mrb[83].mxu0 }
 0x836   : > { %6224 = vst.msk [vmem:[#allocation3 + $0x48] sm:$0xff] %vm1184_vm11, %v5963_v58  ;;  %7001 = vrot.lane.b32.xlu1 %v6362_v26, %s10130_s16 }
 0x838   : > { %7191 = vrot.lane.b32.xlu0 %v6553_v44, %s10131_s8 }
 0x83a   : > { %7193 = vrot.lane.b32.xlu1 %v6554_v48, %s10131_s8 }
 0x83b   : > { %v7319_v49 = vld [vmem:[#allocation3 + $0x40] sm:$0xff] }
 0x83c   : > { %v5600_v16 = vpop.permute.xlu1 %5599  ;;  %7383 = vrot.lane.b32.xlu0 %v7319_v49, %s10132_s6 }
 0x83d   : > { %v5731_v10 = vsel %vm13160_vm8, %v5600_v16, %v5730_v13  ;;  %v6364_v4 = vld [vmem:[#allocation3 + $0x49] sm:$0xff]  ;;  %v6363_v34 = vld [vmem:[#allocation3 + $0x41] sm:$0xff] }
 0x83e   : > { %5732 = vst [vmem:[#allocation2 + $0x108] sm:$0x1] %v5731_v10  ;;  %v5598_v60 = vpop.permute.xlu0 %5597  ;;  %6433 = vrot.lane.b32.xlu1 %v6364_v4, %s10128_s26  ;;  %v6556_v11 = vld [vmem:[#allocation3 + $0x4a] sm:$0xff]  ;;  %v6555_v53 = vld [vmem:[#allocation3 + $0x42] sm:$0xff] }
 0x83f   : > { %v5728_v31 = vsel %vm13170_vm9, %v5598_v60, %v5727_v51  ;;  %v7320_v52 = vld [vmem:[#allocation3 + $0x48] sm:$0xff] }
 0x840   : > { %5729 = vst [vmem:[#allocation2 + $0x100] sm:$0xff] %v5728_v31  ;;  %6811 = vrot.lane.b32.xlu0 %v7319_v49, %s10129_s13  ;;  %9639 = vmatprep.mubr.msk.bf16.mxu0 %vm5782_vm5, %v5728_v31  ;;  %v13448_v0 = vpop.permute.xlu1 %6425 }
 0x842   : > { %6625 = vrot.lane.b32.xlu1 %v6556_v11, %s10127_s24  ;;  %v13442_v57 = vpop.permute.xlu0 %6423 }
 0x844   : > { %6431 = vrot.lane.b32.xlu0 %v6363_v34, %s10128_s26  ;;  %v13457_v45 = vpop.permute.xlu1 %6617 }
 0x845   : > { %v5766_v1 = vld [vmem:[#allocation2 + $0x108] sm:$0xff] }
 0x846   : > { %v9589_v14 = vpop.f32.mrb[84].mxu0  ;;  %7385 = vrot.lane.b32.xlu1 %v7320_v52, %s10132_s6  ;;  %9640 = vmatmul.mubr.msk.bf16.gmra.mrb[136].mxu0 %vm5782_vm5, %v5766_v1  ;;  %v13453_v20 = vpop.permute.xlu0 %6615 }
 0x847   : > { %6229 = vst.msk [vmem:[#allocation3 + $0x70] sm:$0xff] %vm1184_vm11, %v9589_v14  ;;  %v5976_v40 = vpop.f32.mrb[85].mxu0 }
 0x848   : > { %6227 = vst.msk [vmem:[#allocation3 + $0x60] sm:$0xff] %vm1184_vm11, %v5976_v40  ;;  %v9590_v24 = vpop.f32.mrb[86].mxu0  ;;  %6623 = vrot.lane.b32.xlu0 %v6555_v53, %s10127_s24 }
 0x849   : > { %v5979_v2 = vpop.f32.mrb[87].mxu0 }
 0x84a   : > { %6228 = vst.msk [vmem:[#allocation3 + $0x68] sm:$0xff] %vm1184_vm11, %v5979_v2  ;;  %6813 = vrot.lane.b32.xlu1 %v7320_v52, %s10129_s13 }
 0x84c   : > { %7575 = vrot.lane.b32.xlu0 %v6363_v34, %s10133_s9 }
 0x84e   : > { %7577 = vrot.lane.b32.xlu1 %v6364_v4, %s10133_s9 }
 0x84f   : > { %v7321_v25 = vld [vmem:[#allocation3 + $0x60] sm:$0xff] }
 0x850   : > { %7003 = vrot.lane.b32.xlu0 %v6363_v34, %s10130_s16 }
 0x851   : > { %v6366_v63 = vld [vmem:[#allocation3 + $0x69] sm:$0xff]  ;;  %v6365_v18 = vld [vmem:[#allocation3 + $0x61] sm:$0xff] }
 0x852   : > { %7005 = vrot.lane.b32.xlu1 %v6364_v4, %s10130_s16  ;;  %v6558_v23 = vld [vmem:[#allocation3 + $0x6a] sm:$0xff]  ;;  %v6557_v29 = vld [vmem:[#allocation3 + $0x62] sm:$0xff] }
 0x853   : > { %v7322_v5 = vld [vmem:[#allocation3 + $0x68] sm:$0xff] }
 0x854   : > { %7767 = vrot.lane.b32.xlu0 %v6555_v53, %s10134_s11 }
 0x856   : > { %7769 = vrot.lane.b32.xlu1 %v6556_v11, %s10134_s11 }
 0x858   : > { %7195 = vrot.lane.b32.xlu0 %v6555_v53, %s10131_s8 }
 0x85a   : > { %v9593_v55 = vpop.f32.mrb[88].mxu0  ;;  %7197 = vrot.lane.b32.xlu1 %v6556_v11, %s10131_s8 }
 0x85b   : > { %6233 = vst.msk [vmem:[#allocation3 + $0x90] sm:$0xff] %vm1184_vm11, %v9593_v55  ;;  %v5992_v22 = vpop.f32.mrb[89].mxu0 }
 0x85c   : > { %6231 = vst.msk [vmem:[#allocation3 + $0x80] sm:$0xff] %vm1184_vm11, %v5992_v22  ;;  %v9594_v9 = vpop.f32.mrb[90].mxu0  ;;  %7387 = vrot.lane.b32.xlu0 %v7321_v25, %s10132_s6 }
 0x85d   : > { %v5995_v54 = vpop.f32.mrb[91].mxu0 }
 0x85e   : > { %6232 = vst.msk [vmem:[#allocation3 + $0x88] sm:$0xff] %vm1184_vm11, %v5995_v54  ;;  %6437 = vrot.lane.b32.xlu1 %v6366_v63, %s10128_s26 }
 0x860   : > { %6815 = vrot.lane.b32.xlu0 %v7321_v25, %s10129_s13 }
 0x862   : > { %6629 = vrot.lane.b32.xlu1 %v6558_v23, %s10127_s24 }
 0x863   : > { %v7323_v30 = vld [vmem:[#allocation3 + $0x80] sm:$0xff] }
 0x864   : > { %6435 = vrot.lane.b32.xlu0 %v6365_v18, %s10128_s26 }
 0x865   : > { %v6368_v12 = vld [vmem:[#allocation3 + $0x89] sm:$0xff]  ;;  %v6367_v3 = vld [vmem:[#allocation3 + $0x81] sm:$0xff] }
 0x866   : > { %7389 = vrot.lane.b32.xlu1 %v7322_v5, %s10132_s6  ;;  %v7324_v35 = vld [vmem:[#allocation3 + $0x88] sm:$0xff] }
 0x867   : > { %v7708_v58 = vld [vmem:[#allocation3 + $0x8a] sm:$0xff]  ;;  %v7707_v49 = vld [vmem:[#allocation3 + $0x82] sm:$0xff] }
 0x868   : > { %6627 = vrot.lane.b32.xlu0 %v6557_v29, %s10127_s24 }
 0x86a   : > { %6817 = vrot.lane.b32.xlu1 %v7322_v5, %s10129_s13 }
 0x86c   : > { %7579 = vrot.lane.b32.xlu0 %v6365_v18, %s10133_s9 }
 0x86e   : > { %v9597_v17 = vpop.f32.mrb[92].mxu0  ;;  %7581 = vrot.lane.b32.xlu1 %v6366_v63, %s10133_s9 }
 0x86f   : > { %6237 = vst.msk [vmem:[#allocation3 + $0xb0] sm:$0xff] %vm1184_vm11, %v9597_v17  ;;  %v6008_v37 = vpop.f32.mrb[93].mxu0 }
 0x870   : > { %6235 = vst.msk [vmem:[#allocation3 + $0xa0] sm:$0xff] %vm1184_vm11, %v6008_v37  ;;  %v9598_v50 = vpop.f32.mrb[94].mxu0  ;;  %7007 = vrot.lane.b32.xlu0 %v6365_v18, %s10130_s16 }
 0x871   : > { %v6011_v28 = vpop.f32.mrb[95].mxu0 }
 0x872   : > { %6236 = vst.msk [vmem:[#allocation3 + $0xa8] sm:$0xff] %vm1184_vm11, %v6011_v28  ;;  %7009 = vrot.lane.b32.xlu1 %v6366_v63, %s10130_s16 }
 0x874   : > { %7771 = vrot.lane.b32.xlu0 %v6557_v29, %s10134_s11 }
 0x876   : > { %7773 = vrot.lane.b32.xlu1 %v6558_v23, %s10134_s11 }
 0x878   : > { %7199 = vrot.lane.b32.xlu0 %v6557_v29, %s10131_s8 }
 0x879   : > { %v13430_v19 = vld [vmem:[#allocation3 + $0xa1] sm:$0xff]  ;;  %v13434_v36 = vld [vmem:[#allocation3 + $0xa9] sm:$0xff] }
 0x87a   : > { %7201 = vrot.lane.b32.xlu1 %v6558_v23, %s10131_s8 }
 0x87c   : > { %7391 = vrot.lane.b32.xlu0 %v7323_v30, %s10132_s6 }
 0x87e   : > { %6441 = vrot.lane.b32.xlu1 %v6368_v12, %s10128_s26 }
 0x880   : > { %6439 = vrot.lane.b32.xlu0 %v6367_v3, %s10128_s26 }
 0x882   : > { %v9601_v59 = vpop.f32.mrb[96].mxu0  ;;  %7393 = vrot.lane.b32.xlu1 %v7324_v35, %s10132_s6 }
 0x883   : > { %6241 = vst.msk [vmem:[#allocation3 + $0xd0] sm:$0xff] %vm1184_vm11, %v9601_v59  ;;  %v6024_v62 = vpop.f32.mrb[97].mxu0 }
 0x884   : > { %6239 = vst.msk [vmem:[#allocation3 + $0xc0] sm:$0xff] %vm1184_vm11, %v6024_v62  ;;  %v9602_v46 = vpop.f32.mrb[98].mxu0  ;;  %6819 = vrot.lane.b32.xlu0 %v7323_v30, %s10129_s13  ;;  %v7326_v30 = vld [vmem:[#allocation3 + $0xa8] sm:$0xff] }
 0x885   : > { %v6027_v61 = vpop.f32.mrb[99].mxu0 }
 0x886   : > { %6240 = vst.msk [vmem:[#allocation3 + $0xc8] sm:$0xff] %vm1184_vm11, %v6027_v61  ;;  %6821 = vrot.lane.b32.xlu1 %v7324_v35, %s10129_s13 }
 0x888   : > { %6443 = vrot.lane.b32.xlu0 %v13430_v19, %s10128_s26 }
 0x88a   : > { %6445 = vrot.lane.b32.xlu1 %v13434_v36, %s10128_s26 }
 0x88c   : > { %7583 = vrot.lane.b32.xlu0 %v6367_v3, %s10133_s9 }
 0x88d   : > { %v13440_v43 = vld [vmem:[#allocation3 + $0xc1] sm:$0xff]  ;;  %v13446_v38 = vld [vmem:[#allocation3 + $0xc9] sm:$0xff] }
 0x88e   : > { %7585 = vrot.lane.b32.xlu1 %v6368_v12, %s10133_s9 }
 0x890   : > { %6447 = vrot.lane.b32.xlu0 %v13440_v43, %s10128_s26 }
 0x892   : > { %6449 = vrot.lane.b32.xlu1 %v13446_v38, %s10128_s26 }
 0x894   : > { %7011 = vrot.lane.b32.xlu0 %v6367_v3, %s10130_s16 }
 0x896   : > { %v9605_v42 = vpop.f32.mrb[100].mxu0  ;;  %7013 = vrot.lane.b32.xlu1 %v6368_v12, %s10130_s16  ;;  %v7325_v12 = vld [vmem:[#allocation3 + $0xa0] sm:$0xff] }
 0x897   : > { %6245 = vst.msk [vmem:[#allocation3 + $0xf0] sm:$0xff] %vm1184_vm11, %v9605_v42  ;;  %v6040_v39 = vpop.f32.mrb[101].mxu0 }
 0x898   : > { %6243 = vst.msk [vmem:[#allocation3 + $0xe0] sm:$0xff] %vm1184_vm11, %v6040_v39  ;;  %v9606_v33 = vpop.f32.mrb[102].mxu0 }
 0x899   : > { %v6043_v7 = vpop.f32.mrb[103].mxu0 }
 0x89a   : > { %6244 = vst.msk [vmem:[#allocation3 + $0xe8] sm:$0xff] %vm1184_vm11, %v6043_v7  ;;  %v13461_v26 = vpop.permute.xlu0 %6807 }
 0x89c   : > { %v13463_v6 = vpop.permute.xlu1 %6429 }
 0x89e   : > { %v13465_v56 = vpop.permute.xlu0 %6427  ;;  %v9609_v47 = vpop.f32.mrb[104].mxu0 }
 0x89f   : > { %6249 = vst.msk [vmem:[#allocation3 + $0x110] sm:$0xff] %vm1184_vm11, %v9609_v47  ;;  %v6056_v15 = vpop.f32.mrb[105].mxu0 }
 0x8a0   : > { %6247 = vst.msk [vmem:[#allocation3 + $0x100] sm:$0xff] %vm1184_vm11, %v6056_v15  ;;  %v9610_v48 = vpop.f32.mrb[106].mxu0  ;;  %v13469_v44 = vpop.permute.xlu1 %6621 }
 0x8a1   : > { %v6059_v41 = vpop.f32.mrb[107].mxu0  ;;  %v13471_v21 = vld [vmem:[#allocation3 + $0xe9] sm:$0xff]  ;;  %v13473_v32 = vld [vmem:[#allocation3 + $0xe1] sm:$0xff] }
 0x8a2   : > { %6248 = vst.msk [vmem:[#allocation3 + $0x108] sm:$0xff] %vm1184_vm11, %v6059_v41  ;;  %6453 = vrot.lane.b32.xlu1 %v13471_v21, %s10128_s26  ;;  %6451 = vrot.lane.b32.xlu0 %v13473_v32, %s10128_s26  ;;  %v13480_v8 = vpop.permute.xlu0 %6619 }
 0x8a4   : > { %v13482_v27 = vpop.permute.xlu1 %6809 }
 0x8a6   : > { %7777 = vrot.lane.b32.xlu1 %v7708_v58, %s10134_s11  ;;  %7775 = vrot.lane.b32.xlu0 %v7707_v49, %s10134_s11  ;;  %v13486_v13 = vpop.permute.xlu0 %6999  ;;  %v9613_v16 = vpop.f32.mrb[108].mxu0 }
 0x8a7   : > { %6253 = vst.msk [vmem:[#allocation3 + $0x130] sm:$0xff] %vm1184_vm11, %v9613_v16  ;;  %v6072_v10 = vpop.f32.mrb[109].mxu0 }
 0x8a8   : > { %6251 = vst.msk [vmem:[#allocation3 + $0x120] sm:$0xff] %vm1184_vm11, %v6072_v10  ;;  %v9614_v4 = vpop.f32.mrb[110].mxu0  ;;  %v13490_v51 = vpop.permute.xlu1 %7001 }
 0x8a9   : > { %v6075_v60 = vpop.f32.mrb[111].mxu0  ;;  %v13492_v31 = vld [vmem:[#allocation3 + $0x109] sm:$0xff]  ;;  %v13494_v11 = vld [vmem:[#allocation3 + $0x101] sm:$0xff] }
 0x8aa   : > { %6252 = vst.msk [vmem:[#allocation3 + $0x128] sm:$0xff] %vm1184_vm11, %v6075_v60  ;;  %v13497_v34 = vpop.permute.xlu0 %7191  ;;  %6457 = vrot.lane.b32.xlu1 %v13492_v31, %s10128_s26  ;;  %6455 = vrot.lane.b32.xlu0 %v13494_v11, %s10128_s26 }
 0x8ac   : > { %v13503_v52 = vpop.permute.xlu1 %7193 }
 0x8ae   : > { %v13505_v1 = vpop.permute.xlu0 %7383  ;;  %7205 = vrot.lane.b32.xlu1 %v7708_v58, %s10131_s8  ;;  %7203 = vrot.lane.b32.xlu0 %v7707_v49, %s10131_s8  ;;  %v9617_v14 = vpop.f32.mrb[112].mxu0 }
 0x8af   : > { %6257 = vst.msk [vmem:[#allocation3 + $0x150] sm:$0xff] %vm1184_vm11, %v9617_v14  ;;  %v6088_v40 = vpop.f32.mrb[113].mxu0 }
 0x8b0   : > { %6255 = vst.msk [vmem:[#allocation3 + $0x140] sm:$0xff] %vm1184_vm11, %v6088_v40  ;;  %v9618_v53 = vpop.f32.mrb[114].mxu0  ;;  %v13511_v24 = vpop.permute.xlu1 %6433 }
 0x8b1   : > { %v6091_v2 = vpop.f32.mrb[115].mxu0  ;;  %v13513_v55 = vld [vmem:[#allocation3 + $0x129] sm:$0xff]  ;;  %v13515_v22 = vld [vmem:[#allocation3 + $0x121] sm:$0xff] }
 0x8b2   : > { %6256 = vst.msk [vmem:[#allocation3 + $0x148] sm:$0xff] %vm1184_vm11, %v6091_v2  ;;  %v13518_v25 = vpop.permute.xlu0 %6811  ;;  %6461 = vrot.lane.b32.xlu1 %v13513_v55, %s10128_s26  ;;  %6459 = vrot.lane.b32.xlu0 %v13515_v22, %s10128_s26 }
 0x8b4   : > { %v13524_v9 = vpop.permute.xlu1 %6625 }
 0x8b6   : > { %v13526_v54 = vpop.permute.xlu0 %6431  ;;  %6633 = vrot.lane.b32.xlu1 %v7708_v58, %s10127_s24  ;;  %6631 = vrot.lane.b32.xlu0 %v7707_v49, %s10127_s24  ;;  %v9621_v63 = vpop.f32.mrb[116].mxu0 }
 0x8b7   : > { %6261 = vst.msk [vmem:[#allocation3 + $0x170] sm:$0xff] %vm1184_vm11, %v9621_v63  ;;  %v6104_v23 = vpop.f32.mrb[117].mxu0 }
 0x8b8   : > { %6259 = vst.msk [vmem:[#allocation3 + $0x160] sm:$0xff] %vm1184_vm11, %v6104_v23  ;;  %v9622_v18 = vpop.f32.mrb[118].mxu0  ;;  %v13532_v5 = vpop.permute.xlu1 %7385 }
 0x8b9   : > { %v6107_v29 = vpop.f32.mrb[119].mxu0  ;;  %v13534_v17 = vld [vmem:[#allocation3 + $0x149] sm:$0xff]  ;;  %v13536_v37 = vld [vmem:[#allocation3 + $0x141] sm:$0xff] }
 0x8ba   : > { %6260 = vst.msk [vmem:[#allocation3 + $0x168] sm:$0xff] %vm1184_vm11, %v6107_v29  ;;  %v13539_v50 = vpop.permute.xlu0 %6623  ;;  %6465 = vrot.lane.b32.xlu1 %v13534_v17, %s10128_s26  ;;  %6463 = vrot.lane.b32.xlu0 %v13536_v37, %s10128_s26 }
 0x8bc   : > { %v13545_v28 = vpop.permute.xlu1 %6813 }
 0x8be   : > { %v13547_v3 = vpop.permute.xlu0 %7575  ;;  %7397 = vrot.lane.b32.xlu1 %v7326_v30, %s10132_s6  ;;  %7395 = vrot.lane.b32.xlu0 %v7325_v12, %s10132_s6 }
 0x8c0   : > { %v13551_v35 = vpop.permute.xlu1 %7577 }
 0x8c1   : > { %v13553_v59 = vld [vmem:[#allocation3 + $0x169] sm:$0xff]  ;;  %v13555_v62 = vld [vmem:[#allocation3 + $0x161] sm:$0xff] }
 0x8c2   : > { %v13557_v46 = vpop.permute.xlu0 %7003  ;;  %6469 = vrot.lane.b32.xlu1 %v13553_v59, %s10128_s26  ;;  %6467 = vrot.lane.b32.xlu0 %v13555_v62, %s10128_s26 }
 0x8c4   : > { %v13563_v61 = vpop.permute.xlu1 %7005 }
 0x8c6   : > { %v13565_v42 = vpop.permute.xlu0 %7767  ;;  %6825 = vrot.lane.b32.xlu1 %v7326_v30, %s10129_s13  ;;  %6823 = vrot.lane.b32.xlu0 %v7325_v12, %s10129_s13 }
 0x8c8   : > { %v13569_v39 = vpop.permute.xlu1 %7769 }
 0x8c9   : > { %v9625_v33 = vpop.f32.mrb[120].mxu0 }
 0x8ca   : > { %6265 = vst.msk [vmem:[#allocation3 + $0x190] sm:$0xff] %vm1184_vm11, %v9625_v33  ;;  %v6120_v7 = vpop.f32.mrb[121].mxu0  ;;  %v13573_v15 = vpop.permute.xlu0 %7195 }
 0x8cb   : > { %6263 = vst.msk [vmem:[#allocation3 + $0x180] sm:$0xff] %vm1184_vm11, %v6120_v7  ;;  %v9626_v47 = vpop.f32.mrb[122].mxu0 }
 0x8cc   : > { %v6123_v48 = vpop.f32.mrb[123].mxu0  ;;  %v13576_v41 = vpop.permute.xlu1 %7197 }
 0x8cd   : > { %6264 = vst.msk [vmem:[#allocation3 + $0x188] sm:$0xff] %vm1184_vm11, %v6123_v48 }
 0x8ce   : > { %v13578_v58 = vpop.permute.xlu0 %7387 }
 0x8d0   : > { %v13580_v49 = vpop.permute.xlu1 %6437 }
 0x8d1   : > { %15549 = vst [vmem:[#allocation140_spill] sm:$0xff] %v13580_v49 }
 0x8d2   : > { %v13584_v4 = vpop.permute.xlu0 %6815 }
 0x8d4   : > { %v6384_v16 = vld [vmem:[#allocation3 + $0x189] sm:$0xff]  ;;  %v6383_v10 = vld [vmem:[#allocation3 + $0x181] sm:$0xff]  ;;  %v13586_v60 = vpop.permute.xlu1 %6629 }
 0x8d5   : > { %6473 = vrot.lane.b32.xlu1 %v6384_v16, %s10128_s26  ;;  %6471 = vrot.lane.b32.xlu0 %v6383_v10, %s10128_s26  ;;  %15550 = vst [vmem:[#allocation139_spill] sm:$0xff] %v13586_v60  ;;  %v5768_v60 = vld [vmem:[#allocation2 + $0x118] sm:$0xff] }
 0x8d6   : > { %v13592_v40 = vpop.permute.xlu0 %6435 }
 0x8d7   : > { %15551 = vst [vmem:[#allocation142_spill] sm:$0xff] %v13592_v40 }
 0x8d8   : > { %v13595_v2 = vpop.permute.xlu1 %7389 }
 0x8d9   : > { %7589 = vrot.lane.b32.xlu1 %v13434_v36, %s10133_s9  ;;  %7587 = vrot.lane.b32.xlu0 %v13430_v19, %s10133_s9 }
 0x8da   : > { %v13599_v18 = vpop.permute.xlu0 %6627 }
 0x8db   : > { %15552 = vst [vmem:[#allocation143_spill] sm:$0xff] %v13599_v18 }
 0x8dc   : > { %v13601_v29 = vpop.permute.xlu1 %6817 }
 0x8dd   : > { %v9629_v14 = vpop.f32.mrb[124].mxu0 }
 0x8de   : > { %6269 = vst.msk [vmem:[#allocation3 + $0x1b0] sm:$0xff] %vm1184_vm11, %v9629_v14  ;;  %v6136_v53 = vpop.f32.mrb[125].mxu0  ;;  %v13605_v33 = vpop.permute.xlu0 %7579 }
 0x8df   : > { %6267 = vst.msk [vmem:[#allocation3 + $0x1a0] sm:$0xff] %vm1184_vm11, %v6136_v53  ;;  %v9630_v63 = vpop.f32.mrb[126].mxu0 }
 0x8e0   : > { %v6139_v23 = vpop.f32.mrb[127].mxu0  ;;  %v13607_v7 = vpop.permute.xlu1 %7581 }
 0x8e1   : > { %6268 = vst.msk [vmem:[#allocation3 + $0x1a8] sm:$0xff] %vm1184_vm11, %v6139_v23 }
 0x8e2   : > { %v13613_v47 = vpop.permute.xlu0 %7007 }
 0x8e4   : > { %v13615_v48 = vpop.permute.xlu1 %7009 }
 0x8e5   : > { %15553 = vst [vmem:[#allocation141_spill] sm:$0xff] %v13615_v48 }
 0x8e6   : > { %v13620_v63 = vpop.permute.xlu0 %7771 }
 0x8e8   : > { %v6386_v30 = vld [vmem:[#allocation3 + $0x1a9] sm:$0xff]  ;;  %v6385_v12 = vld [vmem:[#allocation3 + $0x1a1] sm:$0xff] }
 0x8e9   : > { %6477 = vrot.lane.b32.xlu1 %v6386_v30, %s10128_s26  ;;  %6475 = vrot.lane.b32.xlu0 %v6385_v12, %s10128_s26 }
 0x8ea   : > { %v13624_v23 = vpop.permute.xlu0 %7199 }
 0x8eb   : > { %15554 = vst [vmem:[#allocation144_spill] sm:$0xff] %v13624_v23 }
 0x8ed   : > { %7017 = vrot.lane.b32.xlu1 %v13434_v36, %s10130_s16  ;;  %7015 = vrot.lane.b32.xlu0 %v13430_v19, %s10130_s16  ;;  %v13622_v36 = vpop.permute.xlu1 %7773 }
 0x8f1   : > { %v9633_v16 = vpop.f32.mrb[128].mxu0  ;;  %v13626_v12 = vpop.permute.xlu1 %7201 }
 0x8f2   : > { %6273 = vst.msk [vmem:[#allocation3 + $0x1d0] sm:$0xff] %vm1184_vm11, %v9633_v16  ;;  %v6152_v10 = vpop.f32.mrb[129].mxu0  ;;  %15555 = vst [vmem:[#allocation145_spill] sm:$0xff] %v13626_v12  ;;  %v7710_v16 = vld [vmem:[#allocation3 + $0xaa] sm:$0xff] }
 0x8f3   : > { %6271 = vst.msk [vmem:[#allocation3 + $0x1c0] sm:$0xff] %vm1184_vm11, %v6152_v10  ;;  %v9634_v14 = vpop.f32.mrb[130].mxu0  ;;  %v7709_v10 = vld [vmem:[#allocation3 + $0xa2] sm:$0xff] }
 0x8f4   : > { %v6155_v53 = vpop.f32.mrb[131].mxu0  ;;  %v5767_v14 = vld [vmem:[#allocation2 + $0x110] sm:$0xff] }
 0x8f5   : > { %6272 = vst.msk [vmem:[#allocation3 + $0x1c8] sm:$0xff] %vm1184_vm11, %v6155_v53  ;;  %v13632_v53 = vpop.permute.xlu0 %7391  ;;  %9643 = vmatprep.mubr.msk.bf16.mxu0 %vm5782_vm5, %v5767_v14  ;;  %v13635_v18 = vpop.permute.xlu1 %6441 }
 0x8f6   : > { %15556 = vst [vmem:[#allocation194_spill] sm:$0xff] %v13632_v53  ;;  %15557 = vst [vmem:[#allocation146_spill] sm:$0xff] %v13635_v18  ;;  %9644 = vmatmul.mubr.msk.bf16.gmra.mrb[140].mxu0 %vm5782_vm5, %v5768_v60 }
 0x8f9   : > { %v13640_v49 = vpop.permute.xlu0 %6439  ;;  %v13642_v23 = vpop.permute.xlu1 %7393 }
 0x8fa   : > { %15558 = vst [vmem:[#allocation147_spill] sm:$0xff] %v13640_v49 }
 0x8fc   : > { %v6388_v19 = vld [vmem:[#allocation3 + $0x1c9] sm:$0xff]  ;;  %v6387_v30 = vld [vmem:[#allocation3 + $0x1c1] sm:$0xff] }
 0x8fd   : > { %6481 = vrot.lane.b32.xlu1 %v6388_v19, %s10128_s26  ;;  %6479 = vrot.lane.b32.xlu0 %v6387_v30, %s10128_s26  ;;  %v13645_v14 = vpop.permute.xlu0 %6819  ;;  %v13647_v18 = vpop.permute.xlu1 %6821 }
 0x901   : > { %7781 = vrot.lane.b32.xlu1 %v7710_v16, %s10134_s11  ;;  %7779 = vrot.lane.b32.xlu0 %v7709_v10, %s10134_s11  ;;  %v13651_v60 = vpop.permute.xlu0 %6443 }
 0x902   : > { %15559 = vst [vmem:[#allocation196_spill] sm:$0xff] %v13651_v60  ;;  %v6302_v60 = vld [vmem:[#allocation3 + $0xc8] sm:$0xff] }
 0x905   : > { %v9637_v40 = vpop.f32.mrb[132].mxu0 }
 0x906   : > { %6277 = vst.msk [vmem:[#allocation3 + $0x1f0] sm:$0xff] %vm1184_vm11, %v9637_v40  ;;  %v6168_v19 = vpop.f32.mrb[133].mxu0  ;;  %v13653_v40 = vpop.permute.xlu1 %6445 }
 0x907   : > { %6275 = vst.msk [vmem:[#allocation3 + $0x1e0] sm:$0xff] %vm1184_vm11, %v6168_v19  ;;  %v9638_v30 = vpop.f32.mrb[134].mxu0  ;;  %15560 = vst [vmem:[#allocation148_spill] sm:$0xff] %v13653_v40  ;;  %v13659_v19 = vpop.permute.xlu0 %7583  ;;  %v6301_v40 = vld [vmem:[#allocation3 + $0xc0] sm:$0xff] }
 0x908   : > { %v6171_v12 = vpop.f32.mrb[135].mxu0 }
 0x909   : > { %6276 = vst.msk [vmem:[#allocation3 + $0x1e8] sm:$0xff] %vm1184_vm11, %v6171_v12 }
 0x90a   : > { %v13662_v30 = vpop.permute.xlu1 %7585 }
 0x910   : > { %v6390_v53 = vld [vmem:[#allocation3 + $0x1e9] sm:$0xff]  ;;  %v6389_v48 = vld [vmem:[#allocation3 + $0x1e1] sm:$0xff] }
 0x911   : > { %6485 = vrot.lane.b32.xlu1 %v6390_v53, %s10128_s26  ;;  %6483 = vrot.lane.b32.xlu0 %v6389_v48, %s10128_s26 }
 0x915   : > { %7209 = vrot.lane.b32.xlu1 %v7710_v16, %s10131_s8  ;;  %7207 = vrot.lane.b32.xlu0 %v7709_v10, %s10131_s8 }
 0x919   : > { %6635 = vrot.lane.b32.xlu0 %v7709_v10, %s10127_s24  ;;  %v9641_v12 = vpop.f32.mrb[136].mxu0  ;;  %6637 = vrot.lane.b32.xlu1 %v7710_v16, %s10127_s24  ;;  %v13668_v16 = vpop.permute.xlu0 %6447 }
 0x91a   : > { %6281 = vst.msk [vmem:[#allocation3 + $0x210] sm:$0xff] %vm1184_vm11, %v9641_v12  ;;  %v6184_v53 = vpop.f32.mrb[137].mxu0  ;;  %15561 = vst [vmem:[#allocation149_spill] sm:$0xff] %v13668_v16  ;;  %v13670_v10 = vpop.permute.xlu1 %6449 }
 0x91b   : > { %6279 = vst.msk [vmem:[#allocation3 + $0x200] sm:$0xff] %vm1184_vm11, %v6184_v53  ;;  %v9642_v48 = vpop.f32.mrb[138].mxu0  ;;  %15562 = vst [vmem:[#allocation150_spill] sm:$0xff] %v13670_v10 }
 0x91c   : > { %v6187_v49 = vpop.f32.mrb[139].mxu0  ;;  %v7712_v48 = vld [vmem:[#allocation3 + $0xca] sm:$0xff] }
 0x91d   : > { %6280 = vst.msk [vmem:[#allocation3 + $0x208] sm:$0xff] %vm1184_vm11, %v6187_v49  ;;  %7399 = vrot.lane.b32.xlu0 %v6301_v40, %s10132_s6  ;;  %7401 = vrot.lane.b32.xlu1 %v6302_v60, %s10132_s6  ;;  %v13678_v12 = vpop.permute.xlu0 %7011 }
 0x91e   : > { %15563 = vst [vmem:[#allocation195_spill] sm:$0xff] %v13678_v12  ;;  %v13680_v49 = vpop.permute.xlu1 %7013 }
 0x91f   : > { %15564 = vst [vmem:[#allocation152_spill] sm:$0xff] %v13680_v49 }
 0x921   : > { %6827 = vrot.lane.b32.xlu0 %v6301_v40, %s10129_s13  ;;  %6829 = vrot.lane.b32.xlu1 %v6302_v60, %s10129_s13  ;;  %v13686_v53 = vpop.permute.xlu0 %6451  ;;  %v7711_v60 = vld [vmem:[#allocation3 + $0xc2] sm:$0xff] }
 0x922   : > { %15565 = vst [vmem:[#allocation151_spill] sm:$0xff] %v13686_v53  ;;  %v13688_v40 = vpop.permute.xlu1 %6453  ;;  %v13706_v53 = vld [vmem:[#allocation3 + $0xe8] sm:$0xff] }
 0x923   : > { %15566 = vst [vmem:[#allocation198_spill] sm:$0xff] %v13688_v40  ;;  %v13704_v40 = vld [vmem:[#allocation3 + $0xe0] sm:$0xff]  ;;  %15570 = vst [vmem:[#allocation197_spill] sm:$0xff] %v13706_v53 }
 0x924   : > { %15569 = vst [vmem:[#allocation155_spill] sm:$0xff] %v13704_v40 }
 0x925   : > { %7591 = vrot.lane.b32.xlu0 %v13440_v43, %s10133_s9  ;;  %7593 = vrot.lane.b32.xlu1 %v13446_v38, %s10133_s9  ;;  %v13692_v10 = vpop.permute.xlu0 %7775 }
 0x926   : > { %v13694_v16 = vpop.permute.xlu1 %7777 }
 0x929   : > { %7019 = vrot.lane.b32.xlu0 %v13440_v43, %s10130_s16  ;;  %7021 = vrot.lane.b32.xlu1 %v13446_v38, %s10130_s16  ;;  %v13700_v43 = vpop.permute.xlu0 %6455 }
 0x92a   : > { %15567 = vst [vmem:[#allocation154_spill] sm:$0xff] %v13700_v43  ;;  %v13702_v38 = vpop.permute.xlu1 %6457  ;;  %v7714_v43 = vld [vmem:[#allocation3 + $0xea] sm:$0xff] }
 0x92b   : > { %15568 = vst [vmem:[#allocation153_spill] sm:$0xff] %v13702_v38  ;;  %v7713_v38 = vld [vmem:[#allocation3 + $0xe2] sm:$0xff] }
 0x92d   : > { %7783 = vrot.lane.b32.xlu0 %v7711_v60, %s10134_s11  ;;  %7785 = vrot.lane.b32.xlu1 %v7712_v48, %s10134_s11  ;;  %v13712_v49 = vpop.permute.xlu0 %7203 }
 0x92e   : > { %v13714_v12 = vpop.permute.xlu1 %7205 }
 0x931   : > { %7211 = vrot.lane.b32.xlu0 %v7711_v60, %s10131_s8  ;;  %7213 = vrot.lane.b32.xlu1 %v7712_v48, %s10131_s8 }
 0x935   : > { %6639 = vrot.lane.b32.xlu0 %v7711_v60, %s10127_s24  ;;  %6641 = vrot.lane.b32.xlu1 %v7712_v48, %s10127_s24  ;;  %v13724_v60 = vpop.permute.xlu0 %6459  ;;  %v13726_v48 = vpop.permute.xlu1 %6461 }
 0x936   : > { %15571 = vst [vmem:[#allocation156_spill] sm:$0xff] %v13724_v60  ;;  %15572 = vst [vmem:[#allocation157_spill] sm:$0xff] %v13726_v48  ;;  %v13748_v60 = vld [vmem:[#allocation3 + $0x108] sm:$0xff] }
 0x937   : > { %15578 = vst [vmem:[#allocation161_spill] sm:$0xff] %v13748_v60 }
 0x939   : > { %7403 = vrot.lane.b32.xlu0 %v13704_v40, %s10132_s6  ;;  %7405 = vrot.lane.b32.xlu1 %v13706_v53, %s10132_s6 }
 0x93d   : > { %6831 = vrot.lane.b32.xlu0 %v13704_v40, %s10129_s13  ;;  %6833 = vrot.lane.b32.xlu1 %v13706_v53, %s10129_s13  ;;  %v13732_v40 = vpop.permute.xlu0 %6631  ;;  %v13734_v53 = vpop.permute.xlu1 %6633 }
 0x93e   : > { %15573 = vst [vmem:[#allocation200_spill] sm:$0xff] %v13732_v40  ;;  %15574 = vst [vmem:[#allocation158_spill] sm:$0xff] %v13734_v53 }
 0x941   : > { %7595 = vrot.lane.b32.xlu0 %v13473_v32, %s10133_s9  ;;  %7597 = vrot.lane.b32.xlu1 %v13471_v21, %s10133_s9  ;;  %v13740_v48 = vpop.permute.xlu0 %6463 }
 0x942   : > { %15575 = vst [vmem:[#allocation160_spill] sm:$0xff] %v13740_v48 }
 0x945   : > { %7023 = vrot.lane.b32.xlu0 %v13473_v32, %s10130_s16  ;;  %7025 = vrot.lane.b32.xlu1 %v13471_v21, %s10130_s16  ;;  %v13742_v32 = vpop.permute.xlu1 %6465  ;;  %v13746_v21 = vld [vmem:[#allocation3 + $0x100] sm:$0xff]  ;;  %v13750_v53 = vpop.permute.xlu0 %7395 }
 0x946   : > { %15576 = vst [vmem:[#allocation159_spill] sm:$0xff] %v13742_v32  ;;  %15577 = vst [vmem:[#allocation199_spill] sm:$0xff] %v13746_v21 }
 0x947   : > { %15579 = vst [vmem:[#allocation162_spill] sm:$0xff] %v13750_v53  ;;  %v13851_v53 = vld [vmem:[#allocation3 + $0x148] sm:$0xff] }
 0x948   : > { %15606 = vst [vmem:[#allocation19_spill] sm:$0xff] %v13851_v53 }
 0x949   : > { %7787 = vrot.lane.b32.xlu0 %v7713_v38, %s10134_s11  ;;  %7789 = vrot.lane.b32.xlu1 %v7714_v43, %s10134_s11  ;;  %v13752_v40 = vpop.permute.xlu1 %7397 }
 0x94a   : > { %15580 = vst [vmem:[#allocation164_spill] sm:$0xff] %v13752_v40  ;;  %v13849_v40 = vld [vmem:[#allocation3 + $0x140] sm:$0xff] }
 0x94b   : > { %15605 = vst [vmem:[#allocation187_spill] sm:$0xff] %v13849_v40 }
 0x94d   : > { %7215 = vrot.lane.b32.xlu0 %v7713_v38, %s10131_s8  ;;  %7217 = vrot.lane.b32.xlu1 %v7714_v43, %s10131_s8 }
 0x951   : > { %6643 = vrot.lane.b32.xlu0 %v7713_v38, %s10127_s24  ;;  %6645 = vrot.lane.b32.xlu1 %v7714_v43, %s10127_s24  ;;  %v13762_v43 = vpop.permute.xlu0 %6467  ;;  %v13764_v38 = vpop.permute.xlu1 %6469 }
 0x952   : > { %15581 = vst [vmem:[#allocation163_spill] sm:$0xff] %v13762_v43  ;;  %15582 = vst [vmem:[#allocation166_spill] sm:$0xff] %v13764_v38  ;;  %v7716_v43 = vld [vmem:[#allocation3 + $0x10a] sm:$0xff] }
 0x955   : > { %7407 = vrot.lane.b32.xlu0 %v13746_v21, %s10132_s6  ;;  %7409 = vrot.lane.b32.xlu1 %v13748_v60, %s10132_s6  ;;  %v13770_v32 = vpop.permute.xlu0 %6823  ;;  %v13772_v48 = vpop.permute.xlu1 %6825 }
 0x956   : > { %15583 = vst [vmem:[#allocation168_spill] sm:$0xff] %v13770_v32  ;;  %15584 = vst [vmem:[#allocation167_spill] sm:$0xff] %v13772_v48  ;;  %v13798_v32 = vld [vmem:[#allocation3 + $0x128] sm:$0xff] }
 0x957   : > { %15592 = vst [vmem:[#allocation172_spill] sm:$0xff] %v13798_v32 }
 0x959   : > { %6835 = vrot.lane.b32.xlu0 %v13746_v21, %s10129_s13  ;;  %6837 = vrot.lane.b32.xlu1 %v13748_v60, %s10129_s13  ;;  %v7715_v60 = vld [vmem:[#allocation3 + $0x102] sm:$0xff]  ;;  %v13778_v21 = vpop.permute.xlu0 %6471  ;;  %v13780_v38 = vpop.permute.xlu1 %6473 }
 0x95a   : > { %15585 = vst [vmem:[#allocation165_spill] sm:$0xff] %v13778_v21  ;;  %15586 = vst [vmem:[#allocation170_spill] sm:$0xff] %v13780_v38  ;;  %v13796_v38 = vld [vmem:[#allocation3 + $0x120] sm:$0xff] }
 0x95b   : > { %15591 = vst [vmem:[#allocation18_spill] sm:$0xff] %v13796_v38 }
 0x95d   : > { %7599 = vrot.lane.b32.xlu0 %v13494_v11, %s10133_s9  ;;  %7601 = vrot.lane.b32.xlu1 %v13492_v31, %s10133_s9  ;;  %v13786_v48 = vpop.permute.xlu0 %7587 }
 0x95e   : > { %15587 = vst [vmem:[#allocation169_spill] sm:$0xff] %v13786_v48 }
 0x961   : > { %7027 = vrot.lane.b32.xlu0 %v13494_v11, %s10130_s16  ;;  %7029 = vrot.lane.b32.xlu1 %v13492_v31, %s10130_s16  ;;  %v13788_v11 = vpop.permute.xlu1 %7589  ;;  %v13792_v31 = vpop.permute.xlu0 %6475 }
 0x962   : > { %15588 = vst [vmem:[#allocation171_spill] sm:$0xff] %v13788_v11  ;;  %15589 = vst [vmem:[#allocation25_spill] sm:$0xff] %v13792_v31 }
 0x965   : > { %7791 = vrot.lane.b32.xlu0 %v7715_v60, %s10134_s11  ;;  %7793 = vrot.lane.b32.xlu1 %v7716_v43, %s10134_s11  ;;  %v13794_v21 = vpop.permute.xlu1 %6477  ;;  %v13804_v48 = vpop.permute.xlu0 %7015 }
 0x966   : > { %15590 = vst [vmem:[#allocation173_spill] sm:$0xff] %v13794_v21  ;;  %15593 = vst [vmem:[#allocation28_spill] sm:$0xff] %v13804_v48  ;;  %v13842_v48 = vld [vmem:[#allocation9 + $0x2] ss:$0 sm:$0xff] }
 0x969   : > { %7219 = vrot.lane.b32.xlu0 %v7715_v60, %s10131_s8  ;;  %7221 = vrot.lane.b32.xlu1 %v7716_v43, %s10131_s8  ;;  %v13806_v11 = vpop.permute.xlu1 %7017 }
 0x96a   : > { %15594 = vst [vmem:[#allocation174_spill] sm:$0xff] %v13806_v11  ;;  %v6290_v11 = vld [vmem:[#allocation3 + $0x8] sm:$0xff] }
 0x96d   : > { %6647 = vrot.lane.b32.xlu0 %v7715_v60, %s10127_s24  ;;  %6649 = vrot.lane.b32.xlu1 %v7716_v43, %s10127_s24 }
 0x96f   : > { %v13812_v60 = vpop.permute.xlu0 %6479  ;;  %v13814_v43 = vpop.permute.xlu1 %6481 }
 0x970   : > { %15595 = vst [vmem:[#allocation175_spill] sm:$0xff] %v13812_v60  ;;  %15596 = vst [vmem:[#allocation79_spill] sm:$0xff] %v13814_v43  ;;  %v7718_v60 = vld [vmem:[#allocation3 + $0x12a] sm:$0xff] }
 0x971   : > { %7411 = vrot.lane.b32.xlu0 %v13796_v38, %s10132_s6  ;;  %7413 = vrot.lane.b32.xlu1 %v13798_v32, %s10132_s6 }
 0x973   : > { %v13824_v21 = vpop.permute.xlu0 %7779  ;;  %v13826_v31 = vpop.permute.xlu1 %7781 }
 0x974   : > { %15597 = vst [vmem:[#allocation178_spill] sm:$0xff] %v13824_v21  ;;  %15598 = vst [vmem:[#allocation177_spill] sm:$0xff] %v13826_v31  ;;  %v6289_v31 = vld [vmem:[#allocation3] sm:$0xff] }
 0x975   : > { %6839 = vrot.lane.b32.xlu0 %v13796_v38, %s10129_s13  ;;  %6841 = vrot.lane.b32.xlu1 %v13798_v32, %s10129_s13  ;;  %v7717_v32 = vld [vmem:[#allocation3 + $0x122] sm:$0xff] }
 0x979   : > { %7603 = vrot.lane.b32.xlu0 %v13515_v22, %s10133_s9  ;;  %7605 = vrot.lane.b32.xlu1 %v13513_v55, %s10133_s9 }
 0x97d   : > { %7031 = vrot.lane.b32.xlu0 %v13515_v22, %s10130_s16  ;;  %7033 = vrot.lane.b32.xlu1 %v13513_v55, %s10130_s16 }
 0x981   : > { %7795 = vrot.lane.b32.xlu0 %v7717_v32, %s10134_s11  ;;  %7797 = vrot.lane.b32.xlu1 %v7718_v60, %s10134_s11 }
 0x983   : > { %v13830_v43 = vpop.permute.xlu0 %6483  ;;  %v13832_v38 = vpop.permute.xlu1 %6485 }
 0x984   : > { %15599 = vst [vmem:[#allocation24_spill] sm:$0xff] %v13830_v43  ;;  %15600 = vst [vmem:[#allocation176_spill] sm:$0xff] %v13832_v38  ;;  %v6328_v43 = vadd.f32 %v13842_v48, %v6290_v11 }
 0x985   : > { %7223 = vrot.lane.b32.xlu0 %v7717_v32, %s10131_s8  ;;  %7225 = vrot.lane.b32.xlu1 %v7718_v60, %s10131_s8 }
 0x987   : > { %v13836_v22 = vpop.permute.xlu0 %7207  ;;  %v13838_v55 = vpop.permute.xlu1 %7209 }
 0x988   : > { %15601 = vst [vmem:[#allocation180_spill] sm:$0xff] %v13836_v22  ;;  %15602 = vst [vmem:[#allocation179_spill] sm:$0xff] %v13838_v55  ;;  %v6327_v55 = vadd.f32 %v13842_v48, %v6289_v31 }
 0x989   : > { %6651 = vrot.lane.b32.xlu0 %v7717_v32, %s10127_s24  ;;  %6653 = vrot.lane.b32.xlu1 %v7718_v60, %s10127_s24  ;;  %v6520_v32 = vadd.f32 %v13448_v0, %v6328_v43 }
 0x98b   : > { %v13845_v21 = vpop.permute.xlu0 %6635  ;;  %v13847_v38 = vpop.permute.xlu1 %6637  ;;  %v6712_v31 = vadd.f32 %v13457_v45, %v6520_v32 }
 0x98c   : > { %15603 = vst [vmem:[#allocation21_spill] sm:$0xff] %v13845_v21  ;;  %15604 = vst [vmem:[#allocation181_spill] sm:$0xff] %v13847_v38  ;;  %v6519_v38 = vadd.f32 %v13442_v57, %v6327_v55 }
 0x98d   : > { %7415 = vrot.lane.b32.xlu0 %v13849_v40, %s10132_s6  ;;  %7417 = vrot.lane.b32.xlu1 %v13851_v53, %s10132_s6  ;;  %v6904_v43 = vadd.f32 %v13482_v27, %v6712_v31  ;;  %v7719_v31 = vld [vmem:[#allocation3 + $0x142] sm:$0xff] }
 0x98e   : > { %v6711_v0 = vadd.f32 %v13453_v20, %v6519_v38 }
 0x98f   : > { %v13859_v60 = vpop.permute.xlu0 %7399  ;;  %v13861_v11 = vpop.permute.xlu1 %7401  ;;  %v7096_v55 = vadd.f32 %v13490_v51, %v6904_v43 }
 0x990   : > { %v6903_v57 = vadd.f32 %v13461_v26, %v6711_v0  ;;  %v7720_v0 = vld [vmem:[#allocation3 + $0x14a] sm:$0xff] }
 0x991   : > { %6843 = vrot.lane.b32.xlu0 %v13849_v40, %s10129_s13  ;;  %6845 = vrot.lane.b32.xlu1 %v13851_v53, %s10129_s13  ;;  %v7288_v20 = vadd.f32 %v13503_v52, %v7096_v55 }
 0x992   : > { %v7095_v32 = vadd.f32 %v13486_v13, %v6903_v57 }
 0x993   : > { %v13869_v21 = vpop.permute.xlu0 %6827  ;;  %v13871_v22 = vpop.permute.xlu1 %6829  ;;  %v7480_v26 = vadd.f32 %v13532_v5, %v7288_v20 }
 0x994   : > { %v7287_v27 = vadd.f32 %v13497_v34, %v7095_v32 }
 0x995   : > { %7607 = vrot.lane.b32.xlu0 %v13536_v37, %s10133_s9  ;;  %7609 = vrot.lane.b32.xlu1 %v13534_v17, %s10133_s9  ;;  %v7672_v52 = vadd.f32 %v13551_v35, %v7480_v26  ;;  %v13922_v26 = vld [vmem:[#allocation3 + $0x168] sm:$0xff] }
 0x996   : > { %v7479_v13 = vadd.f32 %v13505_v1, %v7287_v27  ;;  %v9834_v1 = vld [vmem:[#allocation10] sm:$0xff]   ;;  %v13920_v27 = vld [vmem:[#allocation3 + $0x160] sm:$0xff]  ;;  %15608 = vst [vmem:[#allocation183_spill] sm:$0xff] %v13922_v26 }
 0x997   : > { %v13881_v53 = vpop.permute.xlu0 %7591  ;;  %v13883_v45 = vpop.permute.xlu1 %7593  ;;  %v7864_v34 = vadd.f32 %v13569_v39, %v7672_v52  ;;  %9647 = vmatprep.subr.bf16.mxu1 %v9834_v1  ;;  %v9835_v39 = vld [vmem:[#allocation10 + $0x8] sm:$0xff]   ;;  %15607 = vst [vmem:[#allocation182_spill] sm:$0xff] %v13920_v27 }
 0x998   : > { %9648 = vmatpush3.bf16.msra.mxu1 %v9834_v1 }
 0x999   : > { %7035 = vrot.lane.b32.xlu0 %v13536_v37, %s10130_s16  ;;  %7037 = vrot.lane.b32.xlu1 %v13534_v17, %s10130_s16  ;;  %v7671_v17 = vadd.f32 %v13547_v3, %v7479_v13  ;;  %v7896_v35 = vmax.f32 %v7864_v34, 0.0  ;;  %v9882_v34 = vld [vmem:[#allocation3 + $0x28] sm:$0xff] }
 0x99a   : > { %9649 = vmatprep.subr.bf16.mxu1 %v9835_v39 }
 0x99b   : > { %v13893_v38 = vpop.permute.xlu0 %7019  ;;  %v13895_v51 = vpop.permute.xlu1 %7021  ;;  %v7863_v43 = vadd.f32 %v13565_v42, %v7671_v17 }
 0x99c   : > { %9650 = vmatpush3.bf16.msra.mxu1 %v9835_v39 }
 0x99d   : > { %7799 = vrot.lane.b32.xlu0 %v7719_v31, %s10134_s11  ;;  %7801 = vrot.lane.b32.xlu1 %v7720_v0, %s10134_s11  ;;  %v7895_v3 = vmax.f32 %v7863_v43, 0.0  ;;  %v6330_v43 = vadd.f32 %v9882_v34, %v13842_v48 }
 0x99f   : > { %v13903_v37 = vpop.permute.xlu0 %7783  ;;  %v13905_v5 = vpop.permute.xlu1 %7785  ;;  %v7927_v32 = vpack.c.bf16 %v7896_v35, %v7895_v3  ;;  %v6522_v39 = vadd.f32 %v13463_v6, %v6330_v43 }
 0x9a1   : > { %7227 = vrot.lane.b32.xlu0 %v7719_v31, %s10131_s8  ;;  %7229 = vrot.lane.b32.xlu1 %v7720_v0, %s10131_s8  ;;  %v7944_v13 = vshrl.u32 %v7927_v32, 16 }
 0x9a3   : > { %v13910_v57 = vpop.permute.xlu0 %7211  ;;  %v13912_v55 = vpop.permute.xlu1 %7213  ;;  %v7946_v1 = vrot.slane %v7944_v13, 7  ;;  %v6714_v13 = vadd.f32 %v13469_v44, %v6522_v39 }
 0x9a5   : > { %6655 = vrot.lane.b32.xlu0 %v7719_v31, %s10127_s24  ;;  %6657 = vrot.lane.b32.xlu1 %v7720_v0, %s10127_s24  ;;  %v8251_v31 = vld [vmem:[#allocation2] sm:$0xff]  ;;  %v8252_v0 = vld [vmem:[#allocation2 + $0x8] sm:$0xff]  ;;  %v6906_v43 = vadd.f32 %v13545_v28, %v6714_v13 }
 0x9a6   : > { %9651 = vmatprep.mubr.msk.bf16.mxu1 %vm300_vm0, %v8251_v31  ;;  %v9883_v31 = vld [vmem:[#allocation3 + $0x20] sm:$0xff] }
 0x9a7   : > { %v13916_v42 = vpop.permute.xlu0 %6639  ;;  %v13918_v20 = vpop.permute.xlu1 %6641  ;;  %9652 = vmatmul.mubr.msk.bf16.vlgmr.msra.gmra.mrb[72].mxu1 %vm300_vm0, %v8252_v0  ;;  %v6329_v40 = vadd.f32 %v9883_v31, %v13842_v48  ;;  %v7947_v0 = vshll.u32 %v7927_v32, 16  ;;  %v6956_v32 = vld [vmem:[#allocation3 + $0x169] sm:$0xff] }
 0x9a9   : > { %7419 = vrot.lane.b32.xlu0 %v13920_v27, %s10132_s6  ;;  %7421 = vrot.lane.b32.xlu1 %v13922_v26, %s10132_s6 }
 0x9ab   : > { %v13929_v52 = vpop.permute.xlu0 %7403  ;;  %v13931_v17 = vpop.permute.xlu1 %7405 }
 0x9ad   : > { %6847 = vrot.lane.b32.xlu0 %v13920_v27, %s10129_s13  ;;  %6849 = vrot.lane.b32.xlu1 %v13922_v26, %s10129_s13  ;;  %v6521_v26 = vadd.f32 %v13465_v56, %v6329_v40  ;;  %v7098_v56 = vadd.f32 %v13563_v61, %v6906_v43  ;;  %v6955_v40 = vld [vmem:[#allocation3 + $0x161] sm:$0xff] }
 0x9af   : > { %v13939_v35 = vpop.permute.xlu0 %6831  ;;  %v13941_v3 = vpop.permute.xlu1 %6833  ;;  %v6713_v6 = vadd.f32 %v13480_v8, %v6521_v26  ;;  %v7290_v8 = vadd.f32 %v13576_v41, %v7098_v56  ;;  %v6314_v56 = vld [vmem:[#allocation3 + $0x188] sm:$0xff] }
 0x9b0   : > { %15609 = vst [vmem:[#allocation190_spill] sm:$0xff] %v13941_v3  ;;  %v7949_v3 = vor.u32 %v7947_v0, %v7946_v1 }
 0x9b1   : > { %7611 = vrot.lane.b32.xlu0 %v13555_v62, %s10133_s9  ;;  %7613 = vrot.lane.b32.xlu1 %v13553_v59, %s10133_s9  ;;  %v6905_v59 = vadd.f32 %v13518_v25, %v6713_v6  ;;  %v7482_v25 = vadd.f32 %v13595_v2, %v7290_v8  ;;  %v9884_v8 = vld [vmem:[#allocation3 + $0x48] sm:$0xff] }
 0x9b3   : > { %v13951_v34 = vpop.permute.xlu0 %7595  ;;  %v13953_v27 = vpop.permute.xlu1 %7597  ;;  %v7097_v39 = vadd.f32 %v13557_v46, %v6905_v59  ;;  %v7674_v46 = vadd.f32 %v13607_v7, %v7482_v25  ;;  %v9885_v25 = vld [vmem:[#allocation3 + $0x40] sm:$0xff] }
 0x9b5   : > { %8055 = vrot.lane.b32.xlu0 %v7949_v3, %s10137_s23  ;;  %8057 = vrot.lane.b32.xlu1 %v7946_v1, %s10137_s23  ;;  %v7289_v28 = vadd.f32 %v13573_v15, %v7097_v39  ;;  %v7721_v1 = vld [vmem:[#allocation3 + $0x162] sm:$0xff]  ;;  %v7722_v3 = vld [vmem:[#allocation3 + $0x16a] sm:$0xff]  ;;  %v7866_v15 = vadd.f32 %v13622_v36, %v7674_v46 }
 0x9b7   : > { %v13961_v62 = vpop.permute.xlu0 %7023  ;;  %v13963_v44 = vpop.permute.xlu1 %7025  ;;  %v7481_v31 = vadd.f32 %v13578_v58, %v7289_v28  ;;  %v7898_v58 = vmax.f32 %v7866_v15, 0.0  ;;  %v6332_v28 = vadd.f32 %v9884_v8, %v13842_v48  ;;  %v7532_v15 = vld [vmem:[#allocation3 + $0x189] sm:$0xff] }
 0x9b9   : > { %7039 = vrot.lane.b32.xlu0 %v6955_v40, %s10130_s16  ;;  %7041 = vrot.lane.b32.xlu1 %v6956_v32, %s10130_s16  ;;  %v7673_v41 = vadd.f32 %v13605_v33, %v7481_v31 }
 0x9bb   : > { %v13971_v26 = vpop.permute.xlu0 %7787  ;;  %v13973_v61 = vpop.permute.xlu1 %7789  ;;  %v7865_v13 = vadd.f32 %v13620_v63, %v7673_v41  ;;  %v6313_v63 = vld [vmem:[#allocation3 + $0x180] sm:$0xff] }
 0x9bc   : > { %v7531_v41 = vld [vmem:[#allocation3 + $0x181] sm:$0xff] }
 0x9bd   : > { %7803 = vrot.lane.b32.xlu0 %v7721_v1, %s10134_s11  ;;  %7805 = vrot.lane.b32.xlu1 %v7722_v3, %s10134_s11  ;;  %v7897_v43 = vmax.f32 %v7865_v13, 0.0  ;;  %v6524_v13 = vadd.f32 %v13511_v24, %v6332_v28 }
 0x9bf   : > { %v13981_v0 = vpop.permute.xlu0 %7215  ;;  %v13983_v2 = vpop.permute.xlu1 %7217  ;;  %v7928_v33 = vpack.c.bf16 %v7898_v58, %v7897_v43 }
 0x9c1   : > { %7231 = vrot.lane.b32.xlu0 %v7721_v1, %s10131_s8  ;;  %7233 = vrot.lane.b32.xlu1 %v7722_v3, %s10131_s8  ;;  %v7951_v40 = vshrl.u32 %v7928_v33, 16  ;;  %v7954_v43 = vshll.u32 %v7928_v33, 16  ;;  %v15611_v33 = vld [vmem:[#allocation141_spill] sm:$0xff] }
 0x9c3   : > { %v13988_v7 = vpop.permute.xlu0 %6643  ;;  %v13990_v6 = vpop.permute.xlu1 %6645 }
 0x9c5   : > { %6659 = vrot.lane.b32.xlu0 %v7721_v1, %s10127_s24  ;;  %6661 = vrot.lane.b32.xlu1 %v7722_v3, %s10127_s24  ;;  %v6331_v1 = vadd.f32 %v9885_v25, %v13842_v48  ;;  %v7953_v3 = vrot.slane %v7951_v40, 7 }
 0x9c7   : > { %v13994_v36 = vpop.permute.xlu0 %7407  ;;  %v13996_v59 = vpop.permute.xlu1 %7409  ;;  %v6523_v58 = vadd.f32 %v13526_v54, %v6331_v1  ;;  %v7956_v25 = vor.u32 %v7954_v43, %v7953_v3  ;;  %v15612_v1 = vld [vmem:[#allocation144_spill] sm:$0xff] }
 0x9c9   : > { %7423 = vrot.lane.b32.xlu0 %v6313_v63, %s10132_s6  ;;  %7425 = vrot.lane.b32.xlu1 %v6314_v56, %s10132_s6 }
 0x9cb   : > { %v14000_v32 = vpop.permute.xlu0 %6835  ;;  %v14002_v39 = vpop.permute.xlu1 %6837 }
 0x9cd   : > { %6851 = vrot.lane.b32.xlu0 %v6313_v63, %s10129_s13  ;;  %6853 = vrot.lane.b32.xlu1 %v6314_v56, %s10129_s13  ;;  %v6716_v63 = vadd.f32 %v13524_v9, %v6524_v13  ;;  %v6715_v56 = vadd.f32 %v13539_v50, %v6523_v58  ;;  %v15613_v58 = vld [vmem:[#allocation145_spill] sm:$0xff] }
 0x9cf   : > { %v14008_v31 = vpop.permute.xlu0 %7599  ;;  %v14010_v46 = vpop.permute.xlu1 %7601  ;;  %v6908_v24 = vadd.f32 %v13601_v29, %v6716_v63 }
 0x9d0   : > { %15610 = vst [vmem:[#allocation20_spill] sm:$0xff] %v14010_v46  ;;  %v6907_v46 = vadd.f32 %v13584_v4, %v6715_v56  ;;  %v9645_v4 = vpop.f32.mrb[140].mxu0 }
 0x9d1   : > { %7615 = vrot.lane.b32.xlu0 %v7531_v41, %s10133_s9  ;;  %7617 = vrot.lane.b32.xlu1 %v7532_v15, %s10133_s9  ;;  %v7100_v28 = vadd.f32 %v15611_v33, %v6908_v24  ;;  %6285 = vst.msk [vmem:[#allocation3 + $0x230] sm:$0xff] %vm1184_vm11, %v9645_v4  ;;  %v6200_v29 = vpop.f32.mrb[141].mxu0  ;;  %v7724_v24 = vld [vmem:[#allocation3 + $0x18a] sm:$0xff] }
 0x9d2   : > { %v7099_v54 = vadd.f32 %v13613_v47, %v6907_v46  ;;  %6283 = vst.msk [vmem:[#allocation3 + $0x220] sm:$0xff] %vm1184_vm11, %v6200_v29  ;;  %v14067_v29 = vld [vmem:[#allocation3 + $0x1a0] sm:$0xff] }
 0x9d3   : > { %v14018_v40 = vpop.permute.xlu0 %7027  ;;  %v14020_v8 = vpop.permute.xlu1 %7029  ;;  %v7292_v43 = vadd.f32 %v15613_v58, %v7100_v28  ;;  %15619 = vst [vmem:[#allocation186_spill] sm:$0xff] %v14067_v29 }
 0x9d4   : > { %v7291_v13 = vadd.f32 %v15612_v1, %v7099_v54  ;;  %v9646_v54 = vpop.f32.mrb[142].mxu0 }
 0x9d5   : > { %8059 = vrot.lane.b32.xlu0 %v7956_v25, %s10137_s23  ;;  %8061 = vrot.lane.b32.xlu1 %v7953_v3, %s10137_s23  ;;  %v15614_v3 = vld [vmem:[#allocation194_spill] sm:$0xff]  ;;  %v7484_v46 = vadd.f32 %v13642_v23, %v7292_v43  ;;  %v6203_v33 = vpop.f32.mrb[143].mxu0 }
 0x9d6   : > { %v7483_v47 = vadd.f32 %v15614_v3, %v7291_v13  ;;  %v7723_v25 = vld [vmem:[#allocation3 + $0x182] sm:$0xff]  ;;  %6284 = vst.msk [vmem:[#allocation3 + $0x228] sm:$0xff] %vm1184_vm11, %v6203_v33  ;;  %vm8156_vm11 = vcmask 254144  }
 0x9d7   : > { %v14028_v9 = vpop.permute.xlu0 %7791  ;;  %v14030_v50 = vpop.permute.xlu1 %7793  ;;  %v14069_v3 = vld [vmem:[#allocation3 + $0x1a8] sm:$0xff]  ;;  %vm14217_vm13 = vmand %vm8156_vm11, %vm307_vm2 }
 0x9d8   : > { %15620 = vst [vmem:[#allocation192_spill] sm:$0xff] %v14069_v3 }
 0x9d9   : > { %7043 = vrot.lane.b32.xlu0 %v7531_v41, %s10130_s16  ;;  %7045 = vrot.lane.b32.xlu1 %v7532_v15, %s10130_s16  ;;  %v7675_v41 = vadd.f32 %v13659_v19, %v7483_v47  ;;  %v7676_v15 = vadd.f32 %v13662_v30, %v7484_v46 }
 0x9db   : > { %v14039_v63 = vpop.permute.xlu0 %7219  ;;  %v14041_v56 = vpop.permute.xlu1 %7221  ;;  %v7867_v23 = vadd.f32 %v13692_v10, %v7675_v41  ;;  %v7868_v28 = vadd.f32 %v13694_v16, %v7676_v15  ;;  %v9887_v41 = vld [vmem:[#allocation3 + $0x60] sm:$0xff] }
 0x9dc   : > { %v6333_v15 = vadd.f32 %v9887_v41, %v13842_v48 }
 0x9dd   : > { %7807 = vrot.lane.b32.xlu0 %v7723_v25, %s10134_s11  ;;  %7809 = vrot.lane.b32.xlu1 %v7724_v24, %s10134_s11  ;;  %v7899_v19 = vmax.f32 %v7867_v23, 0.0  ;;  %v7900_v30 = vmax.f32 %v7868_v28, 0.0 }
 0x9df   : > { %v14051_v1 = vpop.permute.xlu0 %6647  ;;  %v14053_v13 = vpop.permute.xlu1 %6649  ;;  %v7929_v10 = vpack.c.bf16 %v7900_v30, %v7899_v19  ;;  %v7533_v19 = vld [vmem:[#allocation3 + $0x1a1] sm:$0xff]  ;;  %v7534_v30 = vld [vmem:[#allocation3 + $0x1a9] sm:$0xff] }
 0x9e1   : > { %7235 = vrot.lane.b32.xlu0 %v7723_v25, %s10131_s8  ;;  %7237 = vrot.lane.b32.xlu1 %v7724_v24, %s10131_s8  ;;  %v7958_v47 = vshrl.u32 %v7929_v10, 16 }
 0x9e3   : > { %v14057_v58 = vpop.permute.xlu0 %7411  ;;  %v14059_v43 = vpop.permute.xlu1 %7413  ;;  %v7960_v33 = vrot.slane %v7958_v47, 7 }
 0x9e4   : > { %15615 = vst [vmem:[#allocation184_spill] sm:$0xff] %v14057_v58  ;;  %15616 = vst [vmem:[#allocation189_spill] sm:$0xff] %v14059_v43  ;;  %v15628_v43 = vld [vmem:[#allocation143_spill] sm:$0xff] }
 0x9e5   : > { %6663 = vrot.lane.b32.xlu0 %v7723_v25, %s10127_s24  ;;  %6665 = vrot.lane.b32.xlu1 %v7724_v24, %s10127_s24  ;;  %v9886_v24 = vld [vmem:[#allocation3 + $0x68] sm:$0xff] }
 0x9e6   : > { %v6334_v54 = vadd.f32 %v9886_v24, %v13842_v48  ;;  %v15627_v24 = vld [vmem:[#allocation139_spill] sm:$0xff] }
 0x9e7   : > { %v14063_v16 = vpop.permute.xlu0 %6839  ;;  %v14065_v4 = vpop.permute.xlu1 %6841 }
 0x9e8   : > { %15617 = vst [vmem:[#allocation22_spill] sm:$0xff] %v14063_v16  ;;  %15618 = vst [vmem:[#allocation185_spill] sm:$0xff] %v14065_v4  ;;  %v15626_v4 = vld [vmem:[#allocation142_spill] sm:$0xff]  ;;  %v7961_v16 = vshll.u32 %v7929_v10, 16  ;;  %v15630_v10 = vld [vmem:[#allocation195_spill] sm:$0xff] }
 0x9e9   : > { %7427 = vrot.lane.b32.xlu0 %v14067_v29, %s10132_s6  ;;  %7429 = vrot.lane.b32.xlu1 %v14069_v3, %s10132_s6 }
 0x9eb   : > { %v14075_v46 = vpop.permute.xlu0 %7603  ;;  %v14077_v25 = vpop.permute.xlu1 %7605 }
 0x9ec   : > { %15621 = vst [vmem:[#allocation84_spill] sm:$0xff] %v14075_v46  ;;  %15622 = vst [vmem:[#allocation188_spill] sm:$0xff] %v14077_v25  ;;  %v15625_v25 = vld [vmem:[#allocation140_spill] sm:$0xff] }
 0x9ed   : > { %6855 = vrot.lane.b32.xlu0 %v14067_v29, %s10129_s13  ;;  %6857 = vrot.lane.b32.xlu1 %v14069_v3, %s10129_s13  ;;  %v6526_v46 = vadd.f32 %v15625_v25, %v6334_v54  ;;  %v6525_v29 = vadd.f32 %v15626_v4, %v6333_v15  ;;  %v15631_v54 = vld [vmem:[#allocation152_spill] sm:$0xff] }
 0x9ef   : > { %v14085_v23 = vpop.permute.xlu0 %7031  ;;  %v14087_v28 = vpop.permute.xlu1 %7033  ;;  %v6718_v3 = vadd.f32 %v15627_v24, %v6526_v46  ;;  %v6717_v41 = vadd.f32 %v15628_v43, %v6525_v29  ;;  %v7725_v24 = vld [vmem:[#allocation3 + $0x1a2] sm:$0xff] }
 0x9f0   : > { %15623 = vst [vmem:[#allocation191_spill] sm:$0xff] %v14085_v23  ;;  %15624 = vst [vmem:[#allocation193_spill] sm:$0xff] %v14087_v28  ;;  %v7963_v28 = vor.u32 %v7961_v16, %v7960_v33 }
 0x9f1   : > { %7619 = vrot.lane.b32.xlu0 %v7533_v19, %s10133_s9  ;;  %7621 = vrot.lane.b32.xlu1 %v7534_v30, %s10133_s9  ;;  %v6909_v58 = vadd.f32 %v13645_v14, %v6717_v41  ;;  %v6910_v25 = vadd.f32 %v13647_v18, %v6718_v3  ;;  %v15634_v18 = vld [vmem:[#allocation162_spill] sm:$0xff]  ;;  %v15635_v3 = vld [vmem:[#allocation164_spill] sm:$0xff] }
 0x9f2   : > { %v7726_v41 = vld [vmem:[#allocation3 + $0x1aa] sm:$0xff] }
 0x9f3   : > { %v14095_v47 = vpop.permute.xlu0 %7795  ;;  %v14097_v23 = vpop.permute.xlu1 %7797  ;;  %v7101_v4 = vadd.f32 %v15630_v10, %v6909_v58  ;;  %v7102_v15 = vadd.f32 %v15631_v54, %v6910_v25  ;;  %v15637_v25 = vld [vmem:[#allocation169_spill] sm:$0xff]  ;;  %v15638_v54 = vld [vmem:[#allocation171_spill] sm:$0xff] }
 0x9f4   : > { %15629 = vst [vmem:[#allocation26_spill] sm:$0xff] %v14097_v23 }
 0x9f5   : > { %8063 = vrot.lane.b32.xlu0 %v7963_v28, %s10137_s23  ;;  %8065 = vrot.lane.b32.xlu1 %v7960_v33, %s10137_s23  ;;  %v7293_v29 = vadd.f32 %v13712_v49, %v7101_v4  ;;  %v7294_v16 = vadd.f32 %v13714_v12, %v7102_v15  ;;  %v15639_v12 = vld [vmem:[#allocation178_spill] sm:$0xff] }
 0x9f7   : > { %v14105_v46 = vpop.permute.xlu0 %7223  ;;  %v14107_v43 = vpop.permute.xlu1 %7225  ;;  %v7485_v14 = vadd.f32 %v15634_v18, %v7293_v29  ;;  %v7486_v33 = vadd.f32 %v15635_v3, %v7294_v16 }
 0x9f8   : > { %15632 = vst [vmem:[#allocation27_spill] sm:$0xff] %v14105_v46  ;;  %15633 = vst [vmem:[#allocation29_spill] sm:$0xff] %v14107_v43  ;;  %v15656_v43 = vld [vmem:[#allocation158_spill] sm:$0xff]  ;;  %v15658_v46 = vld [vmem:[#allocation168_spill] sm:$0xff] }
 0x9f9   : > { %7047 = vrot.lane.b32.xlu0 %v7533_v19, %s10130_s16  ;;  %7049 = vrot.lane.b32.xlu1 %v7534_v30, %s10130_s16  ;;  %v7677_v10 = vadd.f32 %v15637_v25, %v7485_v14  ;;  %v7678_v49 = vadd.f32 %v15638_v54, %v7486_v33  ;;  %v15640_v30 = vld [vmem:[#allocation177_spill] sm:$0xff] }
 0x9fa   : > { %v14141_v54 = vld [vmem:[#allocation3 + $0x1c0] sm:$0xff] }
 0x9fb   : > { %v14115_v28 = vpop.permute.xlu0 %6651  ;;  %v14117_v58 = vpop.permute.xlu1 %6653  ;;  %v7869_v19 = vadd.f32 %v15639_v12, %v7677_v10  ;;  %v7870_v4 = vadd.f32 %v15640_v30, %v7678_v49  ;;  %15647 = vst [vmem:[#allocation32_spill] sm:$0xff] %v14141_v54  ;;  %v14143_v49 = vld [vmem:[#allocation3 + $0x1c8] sm:$0xff] }
 0x9fc   : > { %15636 = vst [vmem:[#allocation33_spill] sm:$0xff] %v14117_v58  ;;  %15648 = vst [vmem:[#allocation53_spill] sm:$0xff] %v14143_v49  ;;  %v15659_v58 = vld [vmem:[#allocation167_spill] sm:$0xff] }
 0x9fd   : > { %7811 = vrot.lane.b32.xlu0 %v7725_v24, %s10134_s11  ;;  %7813 = vrot.lane.b32.xlu1 %v7726_v41, %s10134_s11  ;;  %v7901_v16 = vmax.f32 %v7869_v19, 0.0  ;;  %v7902_v18 = vmax.f32 %v7870_v4, 0.0  ;;  %v9889_v4 = vld [vmem:[#allocation3 + $0x80] sm:$0xff] }
 0x9ff   : > { %v14125_v15 = vpop.permute.xlu0 %7415  ;;  %v14127_v29 = vpop.permute.xlu1 %7417  ;;  %v7930_v33 = vpack.c.bf16 %v7902_v18, %v7901_v16  ;;  %v6335_v16 = vadd.f32 %v9889_v4, %v13842_v48 }
 0xa00   : > { %15641 = vst [vmem:[#allocation23_spill] sm:$0xff] %v14125_v15  ;;  %15642 = vst [vmem:[#allocation40_spill] sm:$0xff] %v14127_v29  ;;  %v7536_v29 = vld [vmem:[#allocation3 + $0x1c9] sm:$0xff] }
 0xa01   : > { %7239 = vrot.lane.b32.xlu0 %v7725_v24, %s10131_s8  ;;  %7241 = vrot.lane.b32.xlu1 %v7726_v41, %s10131_s8  ;;  %v7965_v12 = vshrl.u32 %v7930_v33, 16 }
 0xa03   : > { %v14131_v14 = vpop.permute.xlu0 %6843  ;;  %v14133_v3 = vpop.permute.xlu1 %6845  ;;  %v7967_v18 = vrot.slane %v7965_v12, 7 }
 0xa04   : > { %15643 = vst [vmem:[#allocation64_spill] sm:$0xff] %v14131_v14  ;;  %15644 = vst [vmem:[#allocation36_spill] sm:$0xff] %v14133_v3  ;;  %v15654_v3 = vld [vmem:[#allocation147_spill] sm:$0xff]  ;;  %v7968_v14 = vshll.u32 %v7930_v33, 16 }
 0xa05   : > { %6667 = vrot.lane.b32.xlu0 %v7725_v24, %s10127_s24  ;;  %6669 = vrot.lane.b32.xlu1 %v7726_v41, %s10127_s24  ;;  %v9888_v41 = vld [vmem:[#allocation3 + $0x88] sm:$0xff] }
 0xa06   : > { %v6336_v30 = vadd.f32 %v9888_v41, %v13842_v48  ;;  %v15655_v41 = vld [vmem:[#allocation200_spill] sm:$0xff] }
 0xa07   : > { %v14137_v25 = vpop.permute.xlu0 %7607  ;;  %v14139_v10 = vpop.permute.xlu1 %7609 }
 0xa08   : > { %15645 = vst [vmem:[#allocation34_spill] sm:$0xff] %v14137_v25  ;;  %15646 = vst [vmem:[#allocation50_spill] sm:$0xff] %v14139_v10 }
 0xa09   : > { %7431 = vrot.lane.b32.xlu0 %v14141_v54, %s10132_s6  ;;  %7433 = vrot.lane.b32.xlu1 %v14143_v49, %s10132_s6 }
 0xa0b   : > { %v14149_v19 = vpop.permute.xlu0 %7035  ;;  %v14151_v24 = vpop.permute.xlu1 %7037 }
 0xa0c   : > { %15649 = vst [vmem:[#allocation60_spill] sm:$0xff] %v14149_v19  ;;  %15650 = vst [vmem:[#allocation47_spill] sm:$0xff] %v14151_v24  ;;  %v7535_v19 = vld [vmem:[#allocation3 + $0x1c1] sm:$0xff] }
 0xa0d   : > { %6859 = vrot.lane.b32.xlu0 %v14141_v54, %s10129_s13  ;;  %6861 = vrot.lane.b32.xlu1 %v14143_v49, %s10129_s13  ;;  %v15653_v24 = vld [vmem:[#allocation146_spill] sm:$0xff]  ;;  %v6527_v54 = vadd.f32 %v15654_v3, %v6335_v16  ;;  %v15660_v3 = vld [vmem:[#allocation28_spill] sm:$0xff] }
 0xa0e   : > { %v6528_v15 = vadd.f32 %v15653_v24, %v6336_v30  ;;  %v15661_v30 = vld [vmem:[#allocation174_spill] sm:$0xff] }
 0xa0f   : > { %v14159_v10 = vpop.permute.xlu0 %7799  ;;  %v14161_v25 = vpop.permute.xlu1 %7801  ;;  %v6719_v49 = vadd.f32 %v15655_v41, %v6527_v54 }
 0xa10   : > { %15651 = vst [vmem:[#allocation30_spill] sm:$0xff] %v14159_v10  ;;  %15652 = vst [vmem:[#allocation37_spill] sm:$0xff] %v14161_v25  ;;  %v6720_v4 = vadd.f32 %v15656_v43, %v6528_v15  ;;  %v7970_v25 = vor.u32 %v7968_v14, %v7967_v18  ;;  %v15662_v15 = vld [vmem:[#allocation180_spill] sm:$0xff] }
 0xa11   : > { %7623 = vrot.lane.b32.xlu0 %v7535_v19, %s10133_s9  ;;  %7625 = vrot.lane.b32.xlu1 %v7536_v29, %s10133_s9  ;;  %v6911_v23 = vadd.f32 %v15658_v46, %v6719_v49  ;;  %v7727_v49 = vld [vmem:[#allocation3 + $0x1c2] sm:$0xff] }
 0xa12   : > { %v6912_v24 = vadd.f32 %v15659_v58, %v6720_v4 }
 0xa13   : > { %v14169_v12 = vpop.permute.xlu0 %7227  ;;  %v14171_v10 = vpop.permute.xlu1 %7229  ;;  %v7103_v33 = vadd.f32 %v15660_v3, %v6911_v23 }
 0xa14   : > { %15657 = vst [vmem:[#allocation93_spill] sm:$0xff] %v14171_v10  ;;  %v7104_v16 = vadd.f32 %v15661_v30, %v6912_v24  ;;  %v15663_v10 = vld [vmem:[#allocation179_spill] sm:$0xff] }
 0xa15   : > { %8067 = vrot.lane.b32.xlu0 %v7970_v25, %s10137_s23  ;;  %8069 = vrot.lane.b32.xlu1 %v7967_v18, %s10137_s23  ;;  %v7295_v41 = vadd.f32 %v15662_v15, %v7103_v33  ;;  %v7728_v18 = vld [vmem:[#allocation3 + $0x1ca] sm:$0xff]  ;;  %v8158_v15 = vld [vmem:[#allocation2 + $0x18] sm:$0x1] }
 0xa16   : > { %v7296_v14 = vadd.f32 %v15663_v10, %v7104_v16  ;;  %v8153_v30 = vld [vmem:[#allocation2 + $0x10] sm:$0xff] }
 0xa17   : > { %v14179_v54 = vpop.permute.xlu0 %6655  ;;  %v14181_v43 = vpop.permute.xlu1 %6657  ;;  %v7487_v46 = vadd.f32 %v13859_v60, %v7295_v41 }
 0xa18   : > { %v7488_v58 = vadd.f32 %v13861_v11, %v7296_v14  ;;  %v14221_v14 = vld [vmem:[#allocation3 + $0x1e0] sm:$0xff] }
 0xa19   : > { %7051 = vrot.lane.b32.xlu0 %v7535_v19, %s10130_s16  ;;  %7053 = vrot.lane.b32.xlu1 %v7536_v29, %s10130_s16  ;;  %v7679_v4 = vadd.f32 %v13881_v53, %v7487_v46  ;;  %15671 = vst [vmem:[#allocation45_spill] sm:$0xff] %v14221_v14  ;;  %v14223_v46 = vld [vmem:[#allocation3 + $0x1e8] sm:$0xff] }
 0xa1a   : > { %v7680_v24 = vadd.f32 %v13883_v45, %v7488_v58  ;;  %15672 = vst [vmem:[#allocation59_spill] sm:$0xff] %v14223_v46 }
 0xa1b   : > { %v14189_v25 = vpop.permute.xlu0 %7419  ;;  %v14191_v23 = vpop.permute.xlu1 %7421  ;;  %v7871_v29 = vadd.f32 %v13903_v37, %v7679_v4 }
 0xa1c   : > { %15664 = vst [vmem:[#allocation31_spill] sm:$0xff] %v14191_v23  ;;  %v7872_v60 = vadd.f32 %v13905_v5, %v7680_v24 }
 0xa1d   : > { %7815 = vrot.lane.b32.xlu0 %v7727_v49, %s10134_s11  ;;  %7817 = vrot.lane.b32.xlu1 %v7728_v18, %s10134_s11  ;;  %v7903_v53 = vmax.f32 %v7871_v29, 0.0  ;;  %v9890_v29 = vld [vmem:[#allocation3 + $0xa0] sm:$0xff] }
 0xa1e   : > { %v7904_v45 = vmax.f32 %v7872_v60, 0.0  ;;  %v6337_v60 = vadd.f32 %v9890_v29, %v13842_v48  ;;  %v15679_v29 = vld [vmem:[#allocation21_spill] sm:$0xff] }
 0xa1f   : > { %v14199_v10 = vpop.permute.xlu0 %6847  ;;  %v14201_v11 = vpop.permute.xlu1 %6849 }
 0xa20   : > { %v7931_v33 = vpack.c.bf16 %v7904_v45, %v7903_v53  ;;  %v9891_v53 = vld [vmem:[#allocation3 + $0xa8] sm:$0xff] }
 0xa21   : > { %7243 = vrot.lane.b32.xlu0 %v7727_v49, %s10131_s8  ;;  %7245 = vrot.lane.b32.xlu1 %v7728_v18, %s10131_s8  ;;  %v6338_v45 = vadd.f32 %v9891_v53, %v13842_v48  ;;  %v15680_v53 = vld [vmem:[#allocation181_spill] sm:$0xff] }
 0xa23   : > { %v14205_v19 = vpop.permute.xlu0 %7611  ;;  %v14207_v3 = vpop.permute.xlu1 %7613 }
 0xa24   : > { %15665 = vst [vmem:[#allocation107_spill] sm:$0xff] %v14205_v19  ;;  %15666 = vst [vmem:[#allocation39_spill] sm:$0xff] %v14207_v3  ;;  %v15677_v3 = vld [vmem:[#allocation196_spill] sm:$0xff] }
 0xa25   : > { %6671 = vrot.lane.b32.xlu0 %v7727_v49, %s10127_s24  ;;  %6673 = vrot.lane.b32.xlu1 %v7728_v18, %s10127_s24  ;;  %v7972_v18 = vshrl.u32 %v7931_v33, 16  ;;  %v6529_v19 = vadd.f32 %v15677_v3, %v6337_v60 }
 0xa27   : > { %v8056_v16 = vpop.permute.xlu0 %8055  ;;  %v8058_v41 = vpop.permute.xlu1 %8057 }
 0xa28   : > { %v8154_v58 = vsel %vm14210_vm12, %v8056_v16, %v8153_v30  ;;  %v8159_v49 = vsel %vm14217_vm13, %v8058_v41, %v8158_v15  ;;  %v7974_v30 = vrot.slane %v7972_v18, 7  ;;  %v7537_v41 = vld [vmem:[#allocation3 + $0x1e1] sm:$0xff]  ;;  %v6721_v18 = vadd.f32 %v15679_v29, %v6529_v19 }
 0xa29   : > { %8155 = vst [vmem:[#allocation2 + $0x10] sm:$0xff] %v8154_v58  ;;  %8160 = vst [vmem:[#allocation2 + $0x18] sm:$0x1] %v8159_v49  ;;  %7435 = vrot.lane.b32.xlu0 %v14221_v14, %s10132_s6  ;;  %7437 = vrot.lane.b32.xlu1 %v14223_v46, %s10132_s6  ;;  %v9892_v29 = vld [vmem:[#allocation3 + $0xc0] sm:$0xff] }
 0xa2a   : > { %9655 = vmatprep.mubr.msk.bf16.mxu1 %vm300_vm0, %v8154_v58  ;;  %v7538_v58 = vld [vmem:[#allocation3 + $0x1e9] sm:$0xff]  ;;  %v6913_v3 = vadd.f32 %v13869_v21, %v6721_v18  ;;  %v6339_v18 = vadd.f32 %v9892_v29, %v13842_v48 }
 0xa2b   : > { %v14234_v4 = vpop.permute.xlu0 %7039  ;;  %v14236_v24 = vpop.permute.xlu1 %7041 }
 0xa2c   : > { %15673 = vst [vmem:[#allocation35_spill] sm:$0xff] %v14234_v4  ;;  %15674 = vst [vmem:[#allocation49_spill] sm:$0xff] %v14236_v24  ;;  %v7975_v4 = vshll.u32 %v7931_v33, 16  ;;  %v7105_v33 = vadd.f32 %v13893_v38, %v6913_v3 }
 0xa2d   : > { %6863 = vrot.lane.b32.xlu0 %v14221_v14, %s10129_s13  ;;  %6865 = vrot.lane.b32.xlu1 %v14223_v46, %s10129_s13  ;;  %v15678_v14 = vld [vmem:[#allocation148_spill] sm:$0xff] }
 0xa2e   : > { %v6530_v24 = vadd.f32 %v15678_v14, %v6338_v45  ;;  %v7977_v23 = vor.u32 %v7975_v4, %v7974_v30  ;;  %v7297_v45 = vadd.f32 %v13910_v57, %v7105_v33 }
 0xa2f   : > { %v14244_v16 = vpop.permute.xlu0 %7803  ;;  %v14246_v15 = vpop.permute.xlu1 %7805 }
 0xa30   : > { %15675 = vst [vmem:[#allocation48_spill] sm:$0xff] %v14244_v16  ;;  %15676 = vst [vmem:[#allocation98_spill] sm:$0xff] %v14246_v15  ;;  %v8254_v49 = vld [vmem:[#allocation2 + $0x18] sm:$0xff]  ;;  %v6722_v46 = vadd.f32 %v15680_v53, %v6530_v24  ;;  %v7489_v21 = vadd.f32 %v13929_v52, %v7297_v45  ;;  %v8161_v45 = vld [vmem:[#allocation2 + $0x20] sm:$0xff] }
 0xa31   : > { %7627 = vrot.lane.b32.xlu0 %v7537_v41, %s10133_s9  ;;  %7629 = vrot.lane.b32.xlu1 %v7538_v58, %s10133_s9  ;;  %v15681_v53 = vld [vmem:[#allocation149_spill] sm:$0xff] }
 0xa32   : > { %9656 = vmatmul.mubr.msk.bf16.gmra.mrb[76].mxu1 %vm300_vm0, %v8254_v49  ;;  %v6914_v14 = vadd.f32 %v13871_v22, %v6722_v46  ;;  %v7730_v46 = vld [vmem:[#allocation3 + $0x1ea] sm:$0xff]  ;;  %v6531_v3 = vadd.f32 %v15681_v53, %v6339_v18 }
 0xa33   : > { %v14255_v16 = vpop.permute.xlu0 %7231  ;;  %v14257_v15 = vpop.permute.xlu1 %7233  ;;  %v15684_v18 = vld [vmem:[#allocation190_spill] sm:$0xff] }
 0xa34   : > { %v7106_v60 = vadd.f32 %v13895_v51, %v6914_v14  ;;  %v7729_v51 = vld [vmem:[#allocation3 + $0x1e2] sm:$0xff] }
 0xa35   : > { %8071 = vrot.lane.b32.xlu0 %v7977_v23, %s10137_s23  ;;  %8073 = vrot.lane.b32.xlu1 %v7974_v30, %s10137_s23  ;;  %v7681_v30 = vadd.f32 %v13951_v34, %v7489_v21  ;;  %v15682_v14 = vld [vmem:[#allocation150_spill] sm:$0xff] }
 0xa36   : > { %v7298_v4 = vadd.f32 %v13912_v55, %v7106_v60  ;;  %v8164_v21 = vld [vmem:[#allocation2 + $0x28] sm:$0x1] }
 0xa37   : > { %v14265_v19 = vpop.permute.xlu0 %6659  ;;  %v14267_v24 = vpop.permute.xlu1 %6661  ;;  %v7873_v55 = vadd.f32 %v13971_v26, %v7681_v30  ;;  %v9893_v26 = vld [vmem:[#allocation3 + $0xc8] sm:$0xff] }
 0xa38   : > { %v7490_v22 = vadd.f32 %v13931_v17, %v7298_v4 }
 0xa39   : > { %7055 = vrot.lane.b32.xlu0 %v7537_v41, %s10130_s16  ;;  %7057 = vrot.lane.b32.xlu1 %v7538_v58, %s10130_s16  ;;  %v7905_v58 = vmax.f32 %v7873_v55, 0.0  ;;  %v7347_v55 = vld [vmem:[#allocation3 + $0x200] sm:$0xff] }
 0xa3a   : > { %v7682_v57 = vadd.f32 %v13953_v27, %v7490_v22 }
 0xa3b   : > { %v14275_v23 = vpop.permute.xlu0 %7423  ;;  %v14277_v38 = vpop.permute.xlu1 %7425 }
 0xa3c   : > { %v7874_v52 = vadd.f32 %v13973_v61, %v7682_v57  ;;  %v6340_v61 = vadd.f32 %v9893_v26, %v13842_v48 }
 0xa3d   : > { %7819 = vrot.lane.b32.xlu0 %v7729_v51, %s10134_s11  ;;  %7821 = vrot.lane.b32.xlu1 %v7730_v46, %s10134_s11 }
 0xa3e   : > { %v7906_v34 = vmax.f32 %v7874_v52, 0.0  ;;  %v6532_v33 = vadd.f32 %v15682_v14, %v6340_v61  ;;  %v7348_v52 = vld [vmem:[#allocation3 + $0x208] sm:$0xff] }
 0xa3f   : > { %v14285_v41 = vpop.permute.xlu0 %6851  ;;  %v14287_v17 = vpop.permute.xlu1 %6853  ;;  %v15686_v14 = vld [vmem:[#allocation151_spill] sm:$0xff] }
 0xa40   : > { %v7932_v60 = vpack.c.bf16 %v7906_v34, %v7905_v58  ;;  %v15683_v58 = vld [vmem:[#allocation155_spill] sm:$0xff] }
 0xa41   : > { %7247 = vrot.lane.b32.xlu0 %v7729_v51, %s10131_s8  ;;  %7249 = vrot.lane.b32.xlu1 %v7730_v46, %s10131_s8  ;;  %v6341_v34 = vadd.f32 %v13842_v48, %v15683_v58 }
 0xa42   : > { %v7979_v61 = vshrl.u32 %v7932_v60, 16 }
 0xa43   : > { %v14291_v49 = vpop.permute.xlu0 %7615  ;;  %v14293_v27 = vpop.permute.xlu1 %7617 }
 0xa45   : > { %6675 = vrot.lane.b32.xlu0 %v7729_v51, %s10127_s24  ;;  %6677 = vrot.lane.b32.xlu1 %v7730_v46, %s10127_s24  ;;  %v6723_v51 = vadd.f32 %v13916_v42, %v6531_v3  ;;  %v6724_v46 = vadd.f32 %v13918_v20, %v6532_v33  ;;  %v15685_v20 = vld [vmem:[#allocation197_spill] sm:$0xff]  ;;  %v6533_v33 = vadd.f32 %v15686_v14, %v6341_v34  ;;  %v7540_v34 = vld [vmem:[#allocation3 + $0x209] sm:$0xff] }
 0xa46   : > { %v6342_v3 = vadd.f32 %v13842_v48, %v15685_v20 }
 0xa47   : > { %v8060_v4 = vpop.permute.xlu0 %8059  ;;  %v8062_v22 = vpop.permute.xlu1 %8061  ;;  %v6915_v29 = vadd.f32 %v13939_v35, %v6723_v51  ;;  %v6916_v26 = vadd.f32 %v15684_v18, %v6724_v46  ;;  %v15687_v35 = vld [vmem:[#allocation198_spill] sm:$0xff]  ;;  %v6725_v51 = vadd.f32 %v13988_v7, %v6533_v33 }
 0xa48   : > { %v8162_v30 = vsel %vm14210_vm12, %v8060_v4, %v8161_v45  ;;  %v8165_v57 = vsel %vm14217_vm13, %v8062_v22, %v8164_v21  ;;  %v6534_v21 = vadd.f32 %v15687_v35, %v6342_v3  ;;  %v7981_v22 = vrot.slane %v7979_v61, 7  ;;  %v15691_v33 = vld [vmem:[#allocation154_spill] sm:$0xff] }
 0xa49   : > { %8163 = vst [vmem:[#allocation2 + $0x20] sm:$0xff] %v8162_v30  ;;  %8166 = vst [vmem:[#allocation2 + $0x28] sm:$0x1] %v8165_v57  ;;  %7439 = vrot.lane.b32.xlu0 %v7347_v55, %s10132_s6  ;;  %7441 = vrot.lane.b32.xlu1 %v7348_v52, %s10132_s6  ;;  %v7107_v45 = vadd.f32 %v13961_v62, %v6915_v29  ;;  %v7108_v4 = vadd.f32 %v13963_v44, %v6916_v26  ;;  %v7539_v44 = vld [vmem:[#allocation3 + $0x201] sm:$0xff]  ;;  %v7982_v29 = vshll.u32 %v7932_v60, 16  ;;  %v15690_v60 = vld [vmem:[#allocation20_spill] sm:$0xff] }
 0xa4a   : > { %9659 = vmatprep.mubr.msk.bf16.mxu1 %vm300_vm0, %v8162_v30  ;;  %v6726_v62 = vadd.f32 %v13990_v6, %v6534_v21  ;;  %v15689_v26 = vld [vmem:[#allocation161_spill] sm:$0xff]  ;;  %v15693_v21 = vld [vmem:[#allocation18_spill] sm:$0xff] }
 0xa4b   : > { %v14314_v53 = vpop.permute.xlu0 %7043  ;;  %v14316_v42 = vpop.permute.xlu1 %7045  ;;  %v7299_v30 = vadd.f32 %v13981_v0, %v7107_v45  ;;  %v7300_v57 = vadd.f32 %v13983_v2, %v7108_v4  ;;  %v6917_v0 = vadd.f32 %v14000_v32, %v6725_v51  ;;  %v15688_v2 = vld [vmem:[#allocation199_spill] sm:$0xff]  ;;  %v6344_v6 = vadd.f32 %v13842_v48, %v15689_v26  ;;  %v15692_v4 = vld [vmem:[#allocation153_spill] sm:$0xff]  ;;  %v15694_v51 = vld [vmem:[#allocation172_spill] sm:$0xff] }
 0xa4c   : > { %v6343_v7 = vadd.f32 %v13842_v48, %v15688_v2  ;;  %v6918_v61 = vadd.f32 %v14002_v39, %v6726_v62  ;;  %v7984_v14 = vor.u32 %v7982_v29, %v7981_v22  ;;  %v6345_v39 = vadd.f32 %v13842_v48, %v15693_v21  ;;  %v15698_v2 = vld [vmem:[#allocation184_spill] sm:$0xff] }
 0xa4d   : > { %6867 = vrot.lane.b32.xlu0 %v7347_v55, %s10129_s13  ;;  %6869 = vrot.lane.b32.xlu1 %v7348_v52, %s10129_s13  ;;  %v7491_v52 = vadd.f32 %v13994_v36, %v7299_v30  ;;  %v7492_v18 = vadd.f32 %v13996_v59, %v7300_v57  ;;  %v7109_v32 = vadd.f32 %v14018_v40, %v6917_v0  ;;  %v15705_v21 = vld [vmem:[#allocation188_spill] sm:$0xff]  ;;  %s14822_s13 = scalar_lea.hbm %s14878_s5, %s9272_s29 }
 0xa4e   : > { %v6535_v45 = vadd.f32 %v15691_v33, %v6343_v7  ;;  %v6536_v35 = vadd.f32 %v15692_v4, %v6344_v6  ;;  %v7110_v30 = vadd.f32 %v14020_v8, %v6918_v61  ;;  %v6346_v62 = vadd.f32 %v13842_v48, %v15694_v51  ;;  %v15695_v8 = vld [vmem:[#allocation187_spill] sm:$0xff]  ;;  %v15704_v4 = vld [vmem:[#allocation84_spill] sm:$0xff]  ;;  %v15707_v51 = vld [vmem:[#allocation193_spill] sm:$0xff] }
 0xa4f   : > { %v14329_v46 = vpop.permute.xlu0 %7807  ;;  %v14331_v58 = vpop.permute.xlu1 %7809  ;;  %v7683_v36 = vadd.f32 %v14008_v31, %v7491_v52  ;;  %v7684_v59 = vadd.f32 %v15690_v60, %v7492_v18  ;;  %v7301_v40 = vadd.f32 %v14039_v63, %v7109_v32  ;;  %v15696_v18 = vld [vmem:[#allocation19_spill] sm:$0xff]  ;;  %v15697_v63 = vld [vmem:[#allocation182_spill] sm:$0xff]  ;;  %v15702_v60 = vld [vmem:[#allocation185_spill] sm:$0xff] }
 0xa50   : > { %v8256_v55 = vld [vmem:[#allocation2 + $0x28] sm:$0xff]  ;;  %v6727_v29 = vadd.f32 %v14051_v1, %v6535_v45  ;;  %v6728_v52 = vadd.f32 %v14053_v13, %v6536_v35  ;;  %v6349_v0 = vadd.f32 %v13842_v48, %v15697_v63  ;;  %v15700_v1 = vld [vmem:[#allocation189_spill] sm:$0xff] }
 0xa51   : > { %7631 = vrot.lane.b32.xlu0 %v7539_v44, %s10133_s9  ;;  %7633 = vrot.lane.b32.xlu1 %v7540_v34, %s10133_s9  ;;  %v7875_v31 = vadd.f32 %v14028_v9, %v7683_v36  ;;  %v7876_v57 = vadd.f32 %v14030_v50, %v7684_v59  ;;  %v6347_v9 = vadd.f32 %v13842_v48, %v15695_v8  ;;  %v15701_v13 = vld [vmem:[#allocation22_spill] sm:$0xff]  ;;  %v15703_v32 = vld [vmem:[#allocation157_spill] sm:$0xff]  ;;  %v15708_v8 = vld [vmem:[#allocation160_spill] sm:$0xff] }
 0xa52   : > { %9660 = vmatmul.mubr.msk.bf16.gmra.mrb[80].mxu1 %vm300_vm0, %v8256_v55  ;;  %v7302_v55 = vadd.f32 %v14041_v56, %v7110_v30  ;;  %v6348_v50 = vadd.f32 %v13842_v48, %v15696_v18  ;;  %v15699_v56 = vld [vmem:[#allocation156_spill] sm:$0xff]  ;;  %v6919_v36 = vadd.f32 %v15701_v13, %v6727_v29  ;;  %v6920_v59 = vadd.f32 %v15702_v60, %v6728_v52  ;;  %v15709_v18 = vld [vmem:[#allocation183_spill] sm:$0xff] }
 0xa53   : > { %v14348_v20 = vpop.permute.xlu0 %7235  ;;  %v14350_v3 = vpop.permute.xlu1 %7237  ;;  %v6537_v6 = vadd.f32 %v15699_v56, %v6345_v39  ;;  %v7907_v33 = vmax.f32 %v7875_v31, 0.0  ;;  %v7908_v45 = vmax.f32 %v7876_v57, 0.0  ;;  %v6539_v52 = vadd.f32 %v15708_v8, %v6347_v9  ;;  %v15712_v56 = vld [vmem:[#allocation27_spill] sm:$0xff]  ;;  %v7731_v9 = vld [vmem:[#allocation3 + $0x202] sm:$0xff] }
 0xa54   : > { %v7494_v61 = vadd.f32 %v15700_v1, %v7302_v55  ;;  %v7112_v55 = vadd.f32 %v15707_v51, %v6920_v59  ;;  %v6350_v31 = vadd.f32 %v13842_v48, %v15709_v18  ;;  %v15715_v60 = vld [vmem:[#allocation159_spill] sm:$0xff] }
 0xa55   : > { %8075 = vrot.lane.b32.xlu0 %v7984_v14, %s10137_s23  ;;  %8077 = vrot.lane.b32.xlu1 %v7981_v22, %s10137_s23  ;;  %v7493_v22 = vadd.f32 %v15698_v2, %v7301_v40  ;;  %v6538_v14 = vadd.f32 %v15703_v32, %v6346_v62  ;;  %v15706_v40 = vld [vmem:[#allocation191_spill] sm:$0xff]  ;;  %v6729_v29 = vadd.f32 %v14115_v28, %v6537_v6  ;;  %v15710_v62 = vld [vmem:[#allocation33_spill] sm:$0xff]  ;;  %v15711_v2 = vld [vmem:[#allocation26_spill] sm:$0xff] }
 0xa56   : > { %v7686_v30 = vadd.f32 %v15705_v21, %v7494_v61  ;;  %v7111_v39 = vadd.f32 %v15706_v40, %v6919_v36  ;;  %v15713_v61 = vld [vmem:[#allocation29_spill] sm:$0xff]  ;;  %v15714_v28 = vld [vmem:[#allocation64_spill] sm:$0xff]  ;;  %v7732_v36 = vld [vmem:[#allocation3 + $0x20a] sm:$0xff]  ;;  %v6540_v48 = vadd.f32 %v15715_v60, %v6348_v50  ;;  %v14404_v59 = vpack.c.bf16 %v7908_v45, %v7907_v33 }
 0xa57   : > { %v14374_v7 = vpop.permute.xlu0 %6663  ;;  %v14376_v26 = vpop.permute.xlu1 %6665  ;;  %v7685_v35 = vadd.f32 %v15704_v4, %v7493_v22  ;;  %v6730_v63 = vadd.f32 %v15710_v62, %v6538_v14  ;;  %v7304_v13 = vadd.f32 %v15713_v61, %v7112_v55  ;;  %v6921_v6 = vadd.f32 %v15714_v28, %v6729_v29  ;;  %v15717_v14 = vld [vmem:[#allocation163_spill] sm:$0xff]  ;;  %v15727_v60 = vld [vmem:[#allocation37_spill] sm:$0xff] }
 0xa58   : > { %v7878_v22 = vadd.f32 %v15711_v2, %v7686_v30  ;;  %v7303_v1 = vadd.f32 %v15712_v56, %v7111_v39  ;;  %v6541_v4 = vadd.f32 %v15717_v14, %v6349_v0  ;;  %v15719_v30 = vld [vmem:[#allocation40_spill] sm:$0xff]  ;;  %v15721_v29 = vld [vmem:[#allocation47_spill] sm:$0xff]  ;;  %v6731_v50 = vadd.f32 %v14179_v54, %v6539_v52  ;;  %v15723_v2 = vld [vmem:[#allocation50_spill] sm:$0xff] }
 0xa59   : > { %7059 = vrot.lane.b32.xlu0 %v7539_v44, %s10130_s16  ;;  %7061 = vrot.lane.b32.xlu1 %v7540_v34, %s10130_s16  ;;  %v7877_v57 = vadd.f32 %v14095_v47, %v7685_v35  ;;  %v15716_v47 = vld [vmem:[#allocation36_spill] sm:$0xff]  ;;  %v15718_v35 = vld [vmem:[#allocation23_spill] sm:$0xff]  ;;  %v7496_v40 = vadd.f32 %v15719_v30, %v7304_v13  ;;  %v6732_v33 = vadd.f32 %v14181_v43, %v6540_v48  ;;  %v7986_v61 = vshrl.u32 %v14404_v59, 16  ;;  %v15725_v43 = vld [vmem:[#allocation166_spill] sm:$0xff]  ;;  %s10138_s16 = smov [#allocation13]  }
 0xa5a   : > { %v6922_v32 = vadd.f32 %v15716_v47, %v6730_v63  ;;  %v7495_v21 = vadd.f32 %v15718_v35, %v7303_v1  ;;  %v15720_v39 = vld [vmem:[#allocation60_spill] sm:$0xff]  ;;  %v7910_v62 = vmax.f32 %v7878_v22, 0.0  ;;  %v15722_v63 = vld [vmem:[#allocation34_spill] sm:$0xff]  ;;  %v6923_v28 = vadd.f32 %v14199_v10, %v6731_v50  ;;  %v15729_v35 = vld [vmem:[#allocation35_spill] sm:$0xff] }
 0xa5b   : > { %v14395_v44 = vpop.permute.xlu0 %7427  ;;  %v14397_v34 = vpop.permute.xlu1 %7429  ;;  %v7113_v51 = vadd.f32 %v15720_v39, %v6921_v6  ;;  %v7909_v55 = vmax.f32 %v7877_v57, 0.0  ;;  %v7688_v56 = vadd.f32 %v15723_v2, %v7496_v40  ;;  %v15724_v57 = vld [vmem:[#allocation93_spill] sm:$0xff]  ;;  %v6924_v54 = vadd.f32 %v14201_v11, %v6732_v33  ;;  %v15726_v22 = vld [vmem:[#allocation30_spill] sm:$0xff] }
 0xa5c   : > { %v7114_v8 = vadd.f32 %v15721_v29, %v6922_v32  ;;  %v7687_v0 = vadd.f32 %v15722_v63, %v7495_v21  ;;  %v6542_v52 = vadd.f32 %v15725_v43, %v6350_v31  ;;  %v7989_v47 = vshll.u32 %v14404_v59, 16  ;;  %v15728_v32 = vld [vmem:[#allocation31_spill] sm:$0xff]  ;;  %v15730_v21 = vld [vmem:[#allocation49_spill] sm:$0xff]  ;;  %v15734_v2 = vld [vmem:[#allocation98_spill] sm:$0xff] }
 0xa5d   : > { %7823 = vrot.lane.b32.xlu0 %v7731_v9, %s10134_s11  ;;  %7825 = vrot.lane.b32.xlu1 %v7732_v36, %s10134_s11  ;;  %v7305_v1 = vadd.f32 %v14169_v12, %v7113_v51  ;;  %v7880_v48 = vadd.f32 %v15727_v60, %v7688_v56  ;;  %v7115_v10 = vadd.f32 %v15729_v35, %v6923_v28  ;;  %v7349_v29 = vld [vmem:[#allocation3 + $0x220] sm:$0xff]  ;;  %v15732_v59 = vld [vmem:[#allocation39_spill] sm:$0xff] }
 0xa5e   : > { %v7306_v13 = vadd.f32 %v15724_v57, %v7114_v8  ;;  %v7879_v6 = vadd.f32 %v15726_v22, %v7687_v0  ;;  %v7116_v11 = vadd.f32 %v15730_v21, %v6924_v54  ;;  %v14437_v40 = vpack.c.bf16 %v7910_v62, %v7909_v55  ;;  %v8170_v57 = vld [vmem:[#allocation2 + $0x38] sm:$0x1]  ;;  %v7541_v43 = vld [vmem:[#allocation3 + $0x221] sm:$0xff] }
 0xa5f   : > { %v14416_v45 = vpop.permute.xlu0 %6855  ;;  %v14418_v18 = vpop.permute.xlu1 %6857  ;;  %v7497_v12 = vadd.f32 %v14189_v25, %v7305_v1  ;;  %v6733_v39 = vadd.f32 %v14265_v19, %v6541_v4  ;;  %v6734_v51 = vadd.f32 %v14267_v24, %v6542_v52  ;;  %v7350_v25 = vld [vmem:[#allocation3 + $0x228] sm:$0xff]  ;;  %v7988_v8 = vrot.slane %v7986_v61, 7  ;;  %v15733_v24 = vld [vmem:[#allocation48_spill] sm:$0xff] }
 0xa60   : > { %v7498_v14 = vadd.f32 %v15728_v32, %v7306_v13  ;;  %v7307_v33 = vadd.f32 %v14255_v16, %v7115_v10  ;;  %v7308_v63 = vadd.f32 %v14257_v15, %v7116_v11  ;;  %v7911_v55 = vmax.f32 %v7879_v6, 0.0  ;;  %v8167_v61 = vld [vmem:[#allocation2 + $0x30] sm:$0xff] }
 0xa61   : > { %7251 = vrot.lane.b32.xlu0 %v7731_v9, %s10131_s8  ;;  %7253 = vrot.lane.b32.xlu1 %v7732_v36, %s10131_s8  ;;  %v15731_v36 = vld [vmem:[#allocation107_spill] sm:$0xff]  ;;  %v7912_v62 = vmax.f32 %v7880_v48, 0.0  ;;  %v6925_v0 = vadd.f32 %v14285_v41, %v6733_v39  ;;  %v6926_v19 = vadd.f32 %v14287_v17, %v6734_v51  ;;  %v7996_v39 = vshll.u32 %v14437_v40, 16  ;;  %s10043_s8 = sshll.u32 %s10138_s16, 4  ;;  %s10044_s8 = int_to_ptr.vmem [resolvable:$false] %s10043_s8 }
 0xa62   : > { %v7689_v31 = vadd.f32 %v15731_v36, %v7497_v12  ;;  %v7690_v50 = vadd.f32 %v15732_v59, %v7498_v14  ;;  %v7499_v1 = vadd.f32 %v14275_v23, %v7307_v33  ;;  %v7500_v16 = vadd.f32 %v14277_v38, %v7308_v63  ;;  %v7542_v52 = vld [vmem:[#allocation3 + $0x229] sm:$0xff]  ;;  %p10046_p12 = scmp.lt.s32.totalorder %s14824_s10, %s10044_s8 }
 0xa63   : > { %v7620_v30 = vpop.permute.xlu0 %7619  ;;  %v7622_v9 = vpop.permute.xlu1 %7621  ;;  %v7117_v28 = vadd.f32 %v14314_v53, %v6925_v0  ;;  %v7118_v54 = vadd.f32 %v14316_v42, %v6926_v19  ;;  %v7991_v53 = vor.u32 %v7989_v47, %v7988_v8  ;;  %v7993_v42 = vshrl.u32 %v14437_v40, 16 }
 0xa64   : > { %v7881_v4 = vadd.f32 %v15733_v24, %v7689_v31  ;;  %v7882_v56 = vadd.f32 %v15734_v2, %v7690_v50  ;;  %v7691_v23 = vadd.f32 %v14291_v49, %v7499_v1  ;;  %v7692_v38 = vadd.f32 %v14293_v27, %v7500_v16 }
 0xa65   : > { %7443 = vrot.lane.b32.xlu0 %v7349_v29, %s10132_s6  ;;  %7445 = vrot.lane.b32.xlu1 %v7350_v25, %s10132_s6  ;;  %v7935_v22 = vpack.c.bf16 %v7912_v62, %v7911_v55  ;;  %v7309_v6 = vadd.f32 %v14348_v20, %v7117_v28  ;;  %v7310_v60 = vadd.f32 %v14350_v3, %v7118_v54  ;;  %v7995_v20 = vrot.slane %v7993_v42, 7  ;;  %v7734_v25 = vld [vmem:[#allocation3 + $0x22a] sm:$0xff]  ;;  %s10045_s6 = scalar_lea.vmem %s10044_s8, 8192 }
 0xa66   : > { %v7913_v48 = vmax.f32 %v7881_v4, 0.0  ;;  %v7914_v49 = vmax.f32 %v7882_v56, 0.0  ;;  %v7883_v27 = vadd.f32 %v14329_v46, %v7691_v23  ;;  %v7884_v12 = vadd.f32 %v14331_v58, %v7692_v38  ;;  %v9895_v23 = vld [vmem:[#allocation3 + $0x180] sm:$0xff] }
 0xa67   : > { %v8064_v15 = vpop.permute.xlu0 %8063  ;;  %v8066_v13 = vpop.permute.xlu1 %8065  ;;  %v7501_v47 = vadd.f32 %v14395_v44, %v7309_v6  ;;  %v7502_v35 = vadd.f32 %v14397_v34, %v7310_v60  ;;  %v8000_v3 = vshrl.u32 %v7935_v22, 16  ;;  %v7733_v44 = vld [vmem:[#allocation3 + $0x222] sm:$0xff]  ;;  %v8003_v55 = vshll.u32 %v7935_v22, 16 }
 0xa68   : > { %v8168_v41 = vsel %vm14210_vm12, %v8064_v15, %v8167_v61  ;;  %v8171_v17 = vsel %vm14217_vm13, %v8066_v13, %v8170_v57  ;;  %v7936_v11 = vpack.c.bf16 %v7914_v49, %v7913_v48  ;;  %v7915_v46 = vmax.f32 %v7883_v27, 0.0  ;;  %v15735_v48 = vld [vmem:[#allocation165_spill] sm:$0xff]  ;;  %v15736_v27 = vld [vmem:[#allocation170_spill] sm:$0xff] }
 0xa69   : > { %8169 = vst [vmem:[#allocation2 + $0x30] sm:$0xff] %v8168_v41  ;;  %8172 = vst [vmem:[#allocation2 + $0x38] sm:$0x1] %v8171_v17  ;;  %7635 = vrot.lane.b32.xlu0 %v7541_v43, %s10133_s9  ;;  %7637 = vrot.lane.b32.xlu1 %v7542_v52, %s10133_s9  ;;  %v7693_v10 = vadd.f32 %v7620_v30, %v7501_v47  ;;  %v7694_v21 = vadd.f32 %v7622_v9, %v7502_v35  ;;  %v7916_v36 = vmax.f32 %v7884_v12, 0.0  ;;  %v14500_v52 = vld [vmem:[#allocation9 + $0x2] ss:$0 sm:$0xff] }
 0xa6a   : > { %9663 = vmatprep.mubr.msk.bf16.mxu1 %vm300_vm0, %v8168_v41  ;;  %v7998_v30 = vor.u32 %v7996_v39, %v7995_v20  ;;  %v8007_v9 = vshrl.u32 %v7936_v11, 16  ;;  %v8010_v56 = vshll.u32 %v7936_v11, 16  ;;  %v6351_v38 = vadd.f32 %v9895_v23, %v14500_v52  ;;  %v15738_v23 = vld [vmem:[#allocation192_spill] sm:$0xff] }
 0xa6b   : > { %v14469_v32 = vpop.permute.xlu0 %7047  ;;  %v14471_v14 = vpop.permute.xlu1 %7049  ;;  %v7937_v59 = vpack.c.bf16 %v7916_v36, %v7915_v46  ;;  %v8173_v36 = vld [vmem:[#allocation2 + $0x40] sm:$0xff] }
 0xa6c   : > { %v8009_v62 = vrot.slane %v8007_v9, 7  ;;  %v6543_v49 = vadd.f32 %v15735_v48, %v6351_v38  ;;  %v6354_v38 = vadd.f32 %v14500_v52, %v15738_v23 }
 0xa6d   : > { %8079 = vrot.lane.b32.xlu0 %v7991_v53, %s10137_s23  ;;  %8081 = vrot.lane.b32.xlu1 %v7988_v8, %s10137_s23  ;;  %v8002_v8 = vrot.slane %v8000_v3, 7  ;;  %v8014_v0 = vshrl.u32 %v7937_v59, 16  ;;  %v8017_v13 = vshll.u32 %v7937_v59, 16  ;;  %v9896_v53 = vld [vmem:[#allocation3 + $0x188] sm:$0xff] }
 0xa6e   : > { %v8012_v57 = vor.u32 %v8010_v56, %v8009_v62  ;;  %v6352_v42 = vadd.f32 %v9896_v53, %v14500_v52  ;;  %v15739_v53 = vld [vmem:[#allocation25_spill] sm:$0xff] }
 0xa6f   : > { %v7812_v58 = vpop.permute.xlu0 %7811  ;;  %v7814_v31 = vpop.permute.xlu1 %7813  ;;  %v8005_v2 = vor.u32 %v8003_v55, %v8002_v8  ;;  %v8016_v1 = vrot.slane %v8014_v0, 7 }
 0xa70   : > { %v7885_v51 = vadd.f32 %v7812_v58, %v7693_v10  ;;  %v7886_v29 = vadd.f32 %v7814_v31, %v7694_v21  ;;  %v8258_v34 = vld [vmem:[#allocation2 + $0x38] sm:$0xff]  ;;  %v6544_v12 = vadd.f32 %v15736_v27, %v6352_v42  ;;  %v6735_v10 = vadd.f32 %v14374_v7, %v6543_v49  ;;  %v8176_v31 = vld [vmem:[#allocation2 + $0x48] sm:$0x1] }
 0xa71   : > { %7827 = vrot.lane.b32.xlu0 %v7733_v44, %s10134_s11  ;;  %7829 = vrot.lane.b32.xlu1 %v7734_v25, %s10134_s11  ;;  %v8019_v54 = vor.u32 %v8017_v13, %v8016_v1 }
 0xa72   : > { %9664 = vmatmul.mubr.msk.bf16.gmra.mrb[84].mxu1 %vm300_vm0, %v8258_v34  ;;  %v7917_v50 = vmax.f32 %v7885_v51, 0.0  ;;  %v7918_v33 = vmax.f32 %v7886_v29, 0.0  ;;  %v6736_v21 = vadd.f32 %v14376_v26, %v6544_v12  ;;  %v6927_v11 = vadd.f32 %v14416_v45, %v6735_v10 }
 0xa73   : > { %v14481_v63 = vpop.permute.xlu0 %7239  ;;  %v14483_v40 = vpop.permute.xlu1 %7241 }
 0xa74   : > { %v7938_v19 = vpack.c.bf16 %v7918_v33, %v7917_v50  ;;  %v6928_v46 = vadd.f32 %v14418_v18, %v6736_v21  ;;  %v7119_v51 = vadd.f32 %v14469_v32, %v6927_v11 }
 0xa75   : > { %8083 = vrot.lane.b32.xlu0 %v7998_v30, %s10137_s23  ;;  %8085 = vrot.lane.b32.xlu1 %v7995_v20, %s10137_s23 }
 0xa76   : > { %v8021_v16 = vshrl.u32 %v7938_v19, 16  ;;  %v8024_v6 = vshll.u32 %v7938_v19, 16  ;;  %v7120_v29 = vadd.f32 %v14471_v14, %v6928_v46  ;;  %v7311_v45 = vadd.f32 %v14481_v63, %v7119_v51 }
 0xa77   : > { %v14487_v24 = vpop.permute.xlu0 %6667  ;;  %v14489_v4 = vpop.permute.xlu1 %6669 }
 0xa78   : > { %v8023_v41 = vrot.slane %v8021_v16, 7  ;;  %v7312_v18 = vadd.f32 %v14483_v40, %v7120_v29 }
 0xa79   : > { %8087 = vrot.lane.b32.xlu0 %v8005_v2, %s10137_s23  ;;  %8089 = vrot.lane.b32.xlu1 %v8002_v8, %s10137_s23 }
 0xa7a   : > { %v9653_v28 = vpop.f32.mrb[72].mxu1  ;;  %v8026_v35 = vor.u32 %v8024_v6, %v8023_v41 }
 0xa7b   : > { %v7432_v61 = vpop.permute.xlu0 %7431  ;;  %v7434_v15 = vpop.permute.xlu1 %7433  ;;  %8734 = vst.msk [vmem:[#allocation3 + $0x10] sm:$0xff] %vm613_vm6, %v9653_v28 }
 0xa7c   : > { %v8445_v22 = vpop.f32.mrb[73].mxu1  ;;  %v7503_v34 = vadd.f32 %v7432_v61, %v7311_v45  ;;  %v7504_v32 = vadd.f32 %v7434_v15, %v7312_v18 }
 0xa7d   : > { %8093 = vrot.lane.b32.xlu1 %v8009_v62, %s10137_s23  ;;  %8091 = vrot.lane.b32.xlu0 %v8012_v57, %s10137_s23  ;;  %8732 = vst.msk [vmem:[#allocation3] sm:$0xff] %vm613_vm6, %v8445_v22  ;;  %v9654_v60 = vpop.f32.mrb[74].mxu1  ;;  %v15740_v22 = vld [vmem:[#allocation173_spill] sm:$0xff] }
 0xa7e   : > { %v8448_v47 = vpop.f32.mrb[75].mxu1  ;;  %v6546_v6 = vadd.f32 %v15740_v22, %v6354_v38 }
 0xa7f   : > { %v14495_v17 = vpop.permute.xlu0 %6859  ;;  %v14497_v43 = vpop.permute.xlu1 %6861  ;;  %8733 = vst.msk [vmem:[#allocation3 + $0x8] sm:$0xff] %vm613_vm6, %v8448_v47 }
 0xa80   : > { %v6738_v27 = vadd.f32 %v14489_v4, %v6546_v6  ;;  %v8185_v6 = vld [vmem:[#allocation2 + $0x60] sm:$0xff] }
 0xa81   : > { %8097 = vrot.lane.b32.xlu1 %v8016_v1, %s10137_s23  ;;  %8095 = vrot.lane.b32.xlu0 %v8019_v54, %s10137_s23  ;;  %v15737_v54 = vld [vmem:[#allocation186_spill] sm:$0xff] }
 0xa82   : > { %v6930_v47 = vadd.f32 %v14497_v43, %v6738_v27 }
 0xa83   : > { %v7624_v20 = vpop.permute.xlu0 %7623  ;;  %v7626_v3 = vpop.permute.xlu1 %7625 }
 0xa84   : > { %v7695_v8 = vadd.f32 %v7624_v20, %v7503_v34  ;;  %v7696_v14 = vadd.f32 %v7626_v3, %v7504_v32  ;;  %v8182_v3 = vld [vmem:[#allocation2 + $0x58] sm:$0x1] }
 0xa85   : > { %8101 = vrot.lane.b32.xlu1 %v8023_v41, %s10137_s23  ;;  %8099 = vrot.lane.b32.xlu0 %v8026_v35, %s10137_s23  ;;  %v6353_v41 = vadd.f32 %v14500_v52, %v15737_v54  ;;  %v8179_v35 = vld [vmem:[#allocation2 + $0x50] sm:$0xff] }
 0xa87   : > { %v8068_v58 = vpop.permute.xlu0 %8067  ;;  %v8070_v39 = vpop.permute.xlu1 %8069  ;;  %v6545_v42 = vadd.f32 %v15739_v53, %v6353_v41 }
 0xa88   : > { %v8174_v7 = vsel %vm14210_vm12, %v8068_v58, %v8173_v36  ;;  %v8177_v26 = vsel %vm14217_vm13, %v8070_v39, %v8176_v31 }
 0xa89   : > { %8175 = vst [vmem:[#allocation2 + $0x40] sm:$0xff] %v8174_v7  ;;  %8178 = vst [vmem:[#allocation2 + $0x48] sm:$0x1] %v8177_v26  ;;  %9667 = vmatprep.mubr.msk.bf16.mxu1 %vm300_vm0, %v8174_v7  ;;  %v6737_v49 = vadd.f32 %v14487_v24, %v6545_v42 }
 0xa8b   : > { %v7052_v44 = vpop.permute.xlu0 %7051  ;;  %v7054_v25 = vpop.permute.xlu1 %7053  ;;  %v6929_v12 = vadd.f32 %v14495_v17, %v6737_v49 }
 0xa8c   : > { %v7122_v11 = vadd.f32 %v7054_v25, %v6930_v47 }
 0xa8d   : > { %v7121_v21 = vadd.f32 %v7052_v44, %v6929_v12 }
 0xa8f   : > { %v7816_v30 = vpop.permute.xlu0 %7815  ;;  %v7818_v9 = vpop.permute.xlu1 %7817 }
 0xa90   : > { %v7887_v59 = vadd.f32 %v7816_v30, %v7695_v8  ;;  %v7888_v50 = vadd.f32 %v7818_v9, %v7696_v14  ;;  %v8260_v33 = vld [vmem:[#allocation2 + $0x48] sm:$0xff] }
 0xa91   : > { %9668 = vmatmul.mubr.msk.bf16.gmra.mrb[88].mxu1 %vm300_vm0, %v8260_v33 }
 0xa92   : > { %v7919_v55 = vmax.f32 %v7887_v59, 0.0  ;;  %v7920_v62 = vmax.f32 %v7888_v50, 0.0 }
 0xa93   : > { %v7244_v0 = vpop.permute.xlu0 %7243  ;;  %v7246_v19 = vpop.permute.xlu1 %7245 }
 0xa94   : > { %v7939_v63 = vpack.c.bf16 %v7920_v62, %v7919_v55  ;;  %v7313_v24 = vadd.f32 %v7244_v0, %v7121_v21  ;;  %v7314_v4 = vadd.f32 %v7246_v19, %v7122_v11 }
 0xa96   : > { %v8028_v2 = vshrl.u32 %v7939_v63, 16  ;;  %v8031_v16 = vshll.u32 %v7939_v63, 16  ;;  %v15741_v63 = vld [vmem:[#allocation32_spill] sm:$0xff] }
 0xa97   : > { %v14526_v40 = vpop.permute.xlu0 %6671  ;;  %v14528_v56 = vpop.permute.xlu1 %6673 }
 0xa98   : > { %v8030_v1 = vrot.slane %v8028_v2, 7  ;;  %v6355_v2 = vadd.f32 %v14500_v52, %v15741_v63 }
 0xa9a   : > { %v8033_v61 = vor.u32 %v8031_v16, %v8030_v1  ;;  %8105 = vrot.lane.b32.xlu1 %v8030_v1, %s10137_s23  ;;  %v15742_v1 = vld [vmem:[#allocation53_spill] sm:$0xff] }
 0xa9b   : > { %v7436_v15 = vpop.permute.xlu0 %7435  ;;  %v7438_v57 = vpop.permute.xlu1 %7437  ;;  %v6356_v16 = vadd.f32 %v14500_v52, %v15742_v1 }
 0xa9c   : > { %8103 = vrot.lane.b32.xlu0 %v8033_v61, %s10137_s23  ;;  %v7505_v58 = vadd.f32 %v7436_v15, %v7313_v24  ;;  %v7506_v31 = vadd.f32 %v7438_v57, %v7314_v4  ;;  %v15743_v61 = vld [vmem:[#allocation175_spill] sm:$0xff] }
 0xa9d   : > { %v6547_v15 = vadd.f32 %v15743_v61, %v6355_v2  ;;  %v15744_v57 = vld [vmem:[#allocation79_spill] sm:$0xff] }
 0xa9e   : > { %v6548_v54 = vadd.f32 %v15744_v57, %v6356_v16  ;;  %v8191_v57 = vld [vmem:[#allocation2 + $0x70] sm:$0xff] }
 0xa9f   : > { %v6864_v13 = vpop.permute.xlu0 %6863  ;;  %v6866_v28 = vpop.permute.xlu1 %6865  ;;  %v6739_v38 = vadd.f32 %v14526_v40, %v6547_v15 }
 0xaa0   : > { %v6740_v53 = vadd.f32 %v14528_v56, %v6548_v54 }
 0xaa1   : > { %v6931_v42 = vadd.f32 %v6864_v13, %v6739_v38 }
 0xaa2   : > { %v6932_v22 = vadd.f32 %v6866_v28, %v6740_v53 }
 0xaa3   : > { %v7628_v60 = vpop.permute.xlu0 %7627  ;;  %v7630_v48 = vpop.permute.xlu1 %7629 }
 0xaa4   : > { %v7697_v39 = vadd.f32 %v7628_v60, %v7505_v58  ;;  %v7698_v51 = vadd.f32 %v7630_v48, %v7506_v31  ;;  %v8188_v48 = vld [vmem:[#allocation2 + $0x68] sm:$0x1] }
 0xaa7   : > { %v8072_v20 = vpop.permute.xlu0 %8071  ;;  %v8074_v10 = vpop.permute.xlu1 %8073 }
 0xaa8   : > { %v8180_v46 = vsel %vm14210_vm12, %v8072_v20, %v8179_v35  ;;  %v8183_v36 = vsel %vm14217_vm13, %v8074_v10, %v8182_v3 }
 0xaa9   : > { %8181 = vst [vmem:[#allocation2 + $0x50] sm:$0xff] %v8180_v46  ;;  %8184 = vst [vmem:[#allocation2 + $0x58] sm:$0x1] %v8183_v36  ;;  %9671 = vmatprep.mubr.msk.bf16.mxu1 %vm300_vm0, %v8180_v46 }
 0xaab   : > { %v7056_v17 = vpop.permute.xlu0 %7055  ;;  %v7058_v43 = vpop.permute.xlu1 %7057 }
 0xaac   : > { %v7123_v27 = vadd.f32 %v7056_v17, %v6931_v42  ;;  %v7124_v12 = vadd.f32 %v7058_v43, %v6932_v22 }
 0xaaf   : > { %v7820_v29 = vpop.permute.xlu0 %7819  ;;  %v7822_v7 = vpop.permute.xlu1 %7821 }
 0xab0   : > { %v7889_v26 = vadd.f32 %v7820_v29, %v7697_v39  ;;  %v7890_v45 = vadd.f32 %v7822_v7, %v7698_v51  ;;  %v8262_v18 = vld [vmem:[#allocation2 + $0x58] sm:$0xff]  ;;  %v15746_v29 = vld [vmem:[#allocation59_spill] sm:$0xff] }
 0xab1   : > { %9672 = vmatmul.mubr.msk.bf16.gmra.mrb[92].mxu1 %vm300_vm0, %v8262_v18  ;;  %v15745_v39 = vld [vmem:[#allocation45_spill] sm:$0xff]  ;;  %v6358_v7 = vadd.f32 %v14500_v52, %v15746_v29 }
 0xab2   : > { %v7921_v44 = vmax.f32 %v7889_v26, 0.0  ;;  %v7922_v25 = vmax.f32 %v7890_v45, 0.0  ;;  %v6357_v51 = vadd.f32 %v14500_v52, %v15745_v39  ;;  %v15747_v45 = vld [vmem:[#allocation24_spill] sm:$0xff] }
 0xab3   : > { %v7248_v34 = vpop.permute.xlu0 %7247  ;;  %v7250_v32 = vpop.permute.xlu1 %7249 }
 0xab4   : > { %v7940_v8 = vpack.c.bf16 %v7922_v25, %v7921_v44  ;;  %v7315_v40 = vadd.f32 %v7248_v34, %v7123_v27  ;;  %v7316_v56 = vadd.f32 %v7250_v32, %v7124_v12  ;;  %v6549_v18 = vadd.f32 %v15747_v45, %v6357_v51  ;;  %v15748_v44 = vld [vmem:[#allocation176_spill] sm:$0xff]  ;;  %v8197_v27 = vld [vmem:[#allocation2 + $0x80] sm:$0xff] }
 0xab5   : > { %v6550_v25 = vadd.f32 %v15748_v44, %v6358_v7 }
 0xab6   : > { %v8035_v14 = vshrl.u32 %v7940_v8, 16  ;;  %v8038_v50 = vshll.u32 %v7940_v8, 16 }
 0xab7   : > { %v6676_v30 = vpop.permute.xlu0 %6675  ;;  %v6678_v9 = vpop.permute.xlu1 %6677 }
 0xab8   : > { %v8037_v59 = vrot.slane %v8035_v14, 7  ;;  %v6741_v14 = vadd.f32 %v6676_v30, %v6549_v18  ;;  %v8218_v18 = vld [vmem:[#allocation2 + $0xb8] sm:$0x1] }
 0xaba   : > { %v8040_v33 = vor.u32 %v8038_v50, %v8037_v59  ;;  %8109 = vrot.lane.b32.xlu1 %v8037_v59, %s10137_s23  ;;  %v6742_v59 = vadd.f32 %v6678_v9, %v6550_v25 }
 0xabb   : > { %v7440_v55 = vpop.permute.xlu0 %7439  ;;  %v7442_v62 = vpop.permute.xlu1 %7441 }
 0xabc   : > { %8107 = vrot.lane.b32.xlu0 %v8040_v33, %s10137_s23  ;;  %v7507_v20 = vadd.f32 %v7440_v55, %v7315_v40  ;;  %v7508_v3 = vadd.f32 %v7442_v62, %v7316_v56 }
 0xabf   : > { %v6868_v0 = vpop.permute.xlu0 %6867  ;;  %v6870_v19 = vpop.permute.xlu1 %6869 }
 0xac0   : > { %v6933_v55 = vadd.f32 %v6868_v0, %v6741_v14  ;;  %v6934_v62 = vadd.f32 %v6870_v19, %v6742_v59  ;;  %v8224_v14 = vld [vmem:[#allocation2 + $0xc8] sm:$0x1] }
 0xac3   : > { %v7632_v41 = vpop.permute.xlu0 %7631  ;;  %v7634_v23 = vpop.permute.xlu1 %7633 }
 0xac4   : > { %v7699_v10 = vadd.f32 %v7632_v41, %v7507_v20  ;;  %v7700_v21 = vadd.f32 %v7634_v23, %v7508_v3  ;;  %v8194_v41 = vld [vmem:[#allocation2 + $0x78] sm:$0x1]  ;;  %v8203_v3 = vld [vmem:[#allocation2 + $0x90] sm:$0xff] }
 0xac7   : > { %v8076_v60 = vpop.permute.xlu0 %8075  ;;  %v8078_v49 = vpop.permute.xlu1 %8077 }
 0xac8   : > { %v8186_v47 = vsel %vm14210_vm12, %v8076_v60, %v8185_v6  ;;  %v8189_v35 = vsel %vm14217_vm13, %v8078_v49, %v8188_v48 }
 0xac9   : > { %8187 = vst [vmem:[#allocation2 + $0x60] sm:$0xff] %v8186_v47  ;;  %8190 = vst [vmem:[#allocation2 + $0x68] sm:$0x1] %v8189_v35  ;;  %9675 = vmatprep.mubr.msk.bf16.mxu1 %vm300_vm0, %v8186_v47  ;;  %v8200_v47 = vld [vmem:[#allocation2 + $0x88] sm:$0x1] }
 0xacb   : > { %v7060_v13 = vpop.permute.xlu0 %7059  ;;  %v7062_v28 = vpop.permute.xlu1 %7061 }
 0xacc   : > { %v7125_v52 = vadd.f32 %v7060_v13, %v6933_v55  ;;  %v7126_v16 = vadd.f32 %v7062_v28, %v6934_v62 }
 0xacf   : > { %v7824_v11 = vpop.permute.xlu0 %7823  ;;  %v7826_v46 = vpop.permute.xlu1 %7825 }
 0xad0   : > { %v7891_v36 = vadd.f32 %v7824_v11, %v7699_v10  ;;  %v7892_v24 = vadd.f32 %v7826_v46, %v7700_v21  ;;  %v8264_v4 = vld [vmem:[#allocation2 + $0x68] sm:$0xff]  ;;  %v8206_v21 = vld [vmem:[#allocation2 + $0x98] sm:$0x1] }
 0xad1   : > { %9676 = vmatmul.mubr.msk.bf16.gmra.mrb[96].mxu1 %vm300_vm0, %v8264_v4 }
 0xad2   : > { %v7923_v17 = vmax.f32 %v7891_v36, 0.0  ;;  %v7924_v43 = vmax.f32 %v7892_v24, 0.0 }
 0xad3   : > { %v7252_v58 = vpop.permute.xlu0 %7251  ;;  %v7254_v31 = vpop.permute.xlu1 %7253 }
 0xad4   : > { %v7941_v26 = vpack.c.bf16 %v7924_v43, %v7923_v17  ;;  %v7317_v61 = vadd.f32 %v7252_v58, %v7125_v52  ;;  %v7318_v15 = vadd.f32 %v7254_v31, %v7126_v16  ;;  %v8209_v43 = vld [vmem:[#allocation2 + $0xa0] sm:$0xff]  ;;  %v8212_v31 = vld [vmem:[#allocation2 + $0xa8] sm:$0x1] }
 0xad6   : > { %v8042_v34 = vshrl.u32 %v7941_v26, 16  ;;  %v8045_v33 = vshll.u32 %v7941_v26, 16  ;;  %v8215_v26 = vld [vmem:[#allocation2 + $0xb0] sm:$0xff] }
 0xad7   : > { %v7444_v32 = vpop.permute.xlu0 %7443  ;;  %v7446_v8 = vpop.permute.xlu1 %7445 }
 0xad8   : > { %v8044_v50 = vrot.slane %v8042_v34, 7  ;;  %v7509_v9 = vadd.f32 %v7444_v32, %v7317_v61  ;;  %v7510_v23 = vadd.f32 %v7446_v8, %v7318_v15  ;;  %v8221_v32 = vld [vmem:[#allocation2 + $0xc0] sm:$0xff]  ;;  %v8230_v61 = vld [vmem:[#allocation2 + $0xd8] sm:$0x1] }
 0xada   : > { %v8047_v63 = vor.u32 %v8045_v33, %v8044_v50  ;;  %8113 = vrot.lane.b32.xlu1 %v8044_v50, %s10137_s23 }
 0xadb   : > { %v7636_v2 = vpop.permute.xlu0 %7635  ;;  %v7638_v1 = vpop.permute.xlu1 %7637 }
 0xadc   : > { %8111 = vrot.lane.b32.xlu0 %v8047_v63, %s10137_s23  ;;  %v7701_v38 = vadd.f32 %v7636_v2, %v7509_v9  ;;  %v7702_v53 = vadd.f32 %v7638_v1, %v7510_v23  ;;  %v8875_v9 = vld [vmem:[%s10387_s7] sm:$0xff]  ;;  %v8876_v23 = vld [vmem:[%s10387_s7 + $0x8] sm:$0xff] }
 0xadf   : > { %v8080_v54 = vpop.permute.xlu0 %8079  ;;  %v8082_v30 = vpop.permute.xlu1 %8081 }
 0xae0   : > { %v8192_v0 = vsel %vm14210_vm12, %v8080_v54, %v8191_v57  ;;  %v8195_v19 = vsel %vm14217_vm13, %v8082_v30, %v8194_v41  ;;  %v14614_v54 = vld [vmem:[#allocation12] ss:$0 sm:$0xff]  ;;  %v8227_v41 = vld [vmem:[#allocation2 + $0xd0] sm:$0xff] }
 0xae1   : > { %8193 = vst [vmem:[#allocation2 + $0x70] sm:$0xff] %v8192_v0  ;;  %8196 = vst [vmem:[#allocation2 + $0x78] sm:$0x1] %v8195_v19  ;;  %9679 = vmatprep.mubr.msk.bf16.mxu1 %vm300_vm0, %v8192_v0 }
 0xae3   : > { %v7828_v42 = vpop.permute.xlu0 %7827  ;;  %v7830_v22 = vpop.permute.xlu1 %7829 }
 0xae4   : > { %v7893_v6 = vadd.f32 %v7828_v42, %v7701_v38  ;;  %v7894_v60 = vadd.f32 %v7830_v22, %v7702_v53 }
 0xae6   : > { %v7925_v48 = vmax.f32 %v7893_v6, 0.0  ;;  %v7926_v49 = vmax.f32 %v7894_v60, 0.0 }
 0xae7   : > { %v8084_v12 = vpop.permute.xlu0 %8083  ;;  %v8086_v35 = vpop.permute.xlu1 %8085 }
 0xae8   : > { %v7942_v40 = vpack.c.bf16 %v7926_v49, %v7925_v48  ;;  %v8198_v56 = vsel %vm14210_vm12, %v8084_v12, %v8197_v27  ;;  %v8201_v13 = vsel %vm14217_vm13, %v8086_v35, %v8200_v47  ;;  %v8266_v28 = vld [vmem:[#allocation2 + $0x78] sm:$0xff]  ;;  %v8236_v35 = vld [vmem:[#allocation2 + $0xe8] sm:$0x1] }
 0xae9   : > { %8199 = vst [vmem:[#allocation2 + $0x80] sm:$0xff] %v8198_v56  ;;  %8202 = vst [vmem:[#allocation2 + $0x88] sm:$0x1] %v8201_v13  ;;  %9680 = vmatmul.mubr.msk.bf16.gmra.mrb[100].mxu1 %vm300_vm0, %v8266_v28  ;;  %v8233_v13 = vld [vmem:[#allocation2 + $0xe0] sm:$0xff] }
 0xaea   : > { %v8049_v20 = vshrl.u32 %v7942_v40, 16  ;;  %9683 = vmatprep.mubr.msk.bf16.mxu1 %vm300_vm0, %v8198_v56  ;;  %v8052_v36 = vshll.u32 %v7942_v40, 16 }
 0xaeb   : > { %v8088_v10 = vpop.permute.xlu0 %8087  ;;  %v8090_v11 = vpop.permute.xlu1 %8089 }
 0xaec   : > { %v8051_v46 = vrot.slane %v8049_v20, 7  ;;  %v8204_v24 = vsel %vm14210_vm12, %v8088_v10, %v8203_v3  ;;  %v8207_v4 = vsel %vm14217_vm13, %v8090_v11, %v8206_v21  ;;  %v8877_v3 = vld [vmem:[%s10387_s7 + $0x10] sm:$0xff]  ;;  %v8878_v11 = vld [vmem:[%s10387_s7 + $0x18] sm:$0xff] }
 0xaed   : > { %8205 = vst [vmem:[#allocation2 + $0x90] sm:$0xff] %v8204_v24  ;;  %8208 = vst [vmem:[#allocation2 + $0x98] sm:$0x1] %v8207_v4 }
 0xaee   : > { %v8054_v17 = vor.u32 %v8052_v36, %v8051_v46  ;;  %8117 = vrot.lane.b32.xlu1 %v8051_v46, %s10137_s23 }
 0xaef   : > { %v8092_v58 = vpop.permute.xlu0 %8091  ;;  %v8094_v39 = vpop.permute.xlu1 %8093 }
 0xaf0   : > { %v8210_v51 = vsel %vm14210_vm12, %v8092_v58, %v8209_v43  ;;  %v8213_v29 = vsel %vm14217_vm13, %v8094_v39, %v8212_v31  ;;  %8115 = vrot.lane.b32.xlu0 %v8054_v17, %s10137_s23  ;;  %v8268_v7 = vld [vmem:[#allocation2 + $0x88] sm:$0xff] }
 0xaf1   : > { %8211 = vst [vmem:[#allocation2 + $0xa0] sm:$0xff] %v8210_v51  ;;  %8214 = vst [vmem:[#allocation2 + $0xa8] sm:$0x1] %v8213_v29  ;;  %9684 = vmatmul.mubr.msk.bf16.gmra.mrb[104].mxu1 %vm300_vm0, %v8268_v7 }
 0xaf2   : > { %9687 = vmatprep.mubr.msk.bf16.mxu1 %vm300_vm0, %v8204_v24 }
 0xaf3   : > { %v8096_v45 = vpop.permute.xlu0 %8095  ;;  %v8098_v44 = vpop.permute.xlu1 %8097 }
 0xaf4   : > { %v8216_v25 = vsel %vm14210_vm12, %v8096_v45, %v8215_v26  ;;  %v8219_v34 = vsel %vm14217_vm13, %v8098_v44, %v8218_v18  ;;  %v8270_v55 = vld [vmem:[#allocation2 + $0x98] sm:$0xff]  ;;  %v8239_v26 = vld [vmem:[#allocation2 + $0xf0] sm:$0xff]  ;;  %v8879_v44 = vld [vmem:[%s10387_s7 + $0x20] sm:$0xff] }
 0xaf5   : > { %8217 = vst [vmem:[#allocation2 + $0xb0] sm:$0xff] %v8216_v25  ;;  %8220 = vst [vmem:[#allocation2 + $0xb8] sm:$0x1] %v8219_v34 }
 0xaf7   : > { %v8100_v8 = vpop.permute.xlu0 %8099  ;;  %v8102_v59 = vpop.permute.xlu1 %8101 }
 0xaf8   : > { %v8222_v50 = vsel %vm14210_vm12, %v8100_v8, %v8221_v32  ;;  %v8225_v33 = vsel %vm14217_vm13, %v8102_v59, %v8224_v14  ;;  %v8272_v62 = vld [vmem:[#allocation2 + $0xa8] sm:$0xff] }
 0xaf9   : > { %8223 = vst [vmem:[#allocation2 + $0xc0] sm:$0xff] %v8222_v50  ;;  %8226 = vst [vmem:[#allocation2 + $0xc8] sm:$0x1] %v8225_v33  ;;  %9688 = vmatmul.mubr.msk.bf16.gmra.mrb[108].mxu1 %vm300_vm0, %v8270_v55  ;;  %v8880_v32 = vld [vmem:[%s10387_s7 + $0x28] sm:$0xff] }
 0xafa   : > { %9691 = vmatprep.mubr.msk.bf16.mxu1 %vm300_vm0, %v8210_v51  ;;  %v8242_v51 = vld [vmem:[#allocation2 + $0xf8] sm:$0x1]  ;;  %v8248_v55 = vld [vmem:[#allocation2 + $0x108] sm:$0x1] }
 0xafc   : > { %v8274_v16 = vld [vmem:[#allocation2 + $0xb8] sm:$0xff] }
 0xb00   : > { %v8276_v53 = vld [vmem:[#allocation2 + $0xc8] sm:$0xff] }
 0xb01   : > { %9692 = vmatmul.mubr.msk.bf16.gmra.mrb[112].mxu1 %vm300_vm0, %v8272_v62 }
 0xb02   : > { %9695 = vmatprep.mubr.msk.bf16.mxu1 %vm300_vm0, %v8216_v25 }
 0xb05   : > { %v9657_v63 = vpop.f32.mrb[76].mxu1 }
 0xb06   : > { %8738 = vst.msk [vmem:[#allocation3 + $0x30] sm:$0xff] %vm613_vm6, %v9657_v63  ;;  %v8461_v2 = vpop.f32.mrb[77].mxu1 }
 0xb07   : > { %8736 = vst.msk [vmem:[#allocation3 + $0x20] sm:$0xff] %vm613_vm6, %v8461_v2  ;;  %v9658_v1 = vpop.f32.mrb[78].mxu1  ;;  %v8245_v2 = vld [vmem:[#allocation2 + $0x100] sm:$0xff] }
 0xb08   : > { %v8464_v52 = vpop.f32.mrb[79].mxu1 }
 0xb09   : > { %8737 = vst.msk [vmem:[#allocation3 + $0x28] sm:$0xff] %vm613_vm6, %v8464_v52  ;;  %9696 = vmatmul.mubr.msk.bf16.gmra.mrb[116].mxu1 %vm300_vm0, %v8274_v16 }
 0xb0a   : > { %9699 = vmatprep.mubr.msk.bf16.mxu1 %vm300_vm0, %v8222_v50 }
 0xb0c   : > { %v8106_v15 = vpop.permute.xlu1 %8105 }
 0xb0d   : > { %v8231_v57 = vsel %vm14217_vm13, %v8106_v15, %v8230_v61 }
 0xb0e   : > { %8232 = vst [vmem:[#allocation2 + $0xd8] sm:$0x1] %v8231_v57  ;;  %v8104_v30 = vpop.permute.xlu0 %8103  ;;  %v8285_v57 = vld [vmem:[#allocation2 + $0x110] sm:$0xff] }
 0xb0f   : > { %v8228_v0 = vsel %vm14210_vm12, %v8104_v30, %v8227_v41  ;;  %v8286_v41 = vld [vmem:[#allocation2 + $0x118] sm:$0xff]  ;;  %v8881_v30 = vld [vmem:[%s10387_s7 + $0x30] sm:$0xff] }
 0xb10   : > { %v8804_v19 = vld [vmem:[#allocation3 + $0x21] sm:$0xff]  ;;  %v8805_v38 = vld [vmem:[#allocation3 + $0x29] sm:$0xff]  ;;  %8229 = vst [vmem:[#allocation2 + $0xd0] sm:$0xff] %v8228_v0 }
 0xb11   : > { %v8843_v42 = vadd.f32 %v14614_v54, %v8804_v19  ;;  %v8844_v22 = vadd.f32 %v14614_v54, %v8805_v38  ;;  %9700 = vmatmul.mubr.msk.bf16.gmra.mrb[120].mxu1 %vm300_vm0, %v8276_v53 }
 0xb12   : > { %9703 = vmatprep.mubr.msk.bf16.mxu1 %vm300_vm0, %v8228_v0  ;;  %v8882_v0 = vld [vmem:[%s10387_s7 + $0x38] sm:$0xff] }
 0xb13   : > { %v8907_v6 = vadd.f32 %v8875_v9, %v8843_v42  ;;  %v8908_v60 = vadd.f32 %v8876_v23, %v8844_v22 }
 0xb15   : > { %8939 = vst.msk [vmem:[%s14626_s27] sm:$0xff] %vm613_vm6, %v8907_v6  ;;  %8940 = vst.msk [vmem:[%s14626_s27 + $0x8] sm:$0xff] %vm613_vm6, %v8908_v60  ;;  %v8278_v48 = vld [vmem:[#allocation2 + $0xd8] sm:$0xff] }
 0xb19   : > { %9704 = vmatmul.mubr.msk.bf16.gmra.mrb[124].mxu1 %vm300_vm0, %v8278_v48 }
 0xb25   : > { %v9661_v49 = vpop.f32.mrb[80].mxu1 }
 0xb26   : > { %8742 = vst.msk [vmem:[#allocation3 + $0x50] sm:$0xff] %vm613_vm6, %v9661_v49  ;;  %v8477_v27 = vpop.f32.mrb[81].mxu1  ;;  %v8883_v49 = vld [vmem:[%s10387_s7 + $0x40] sm:$0xff] }
 0xb27   : > { %8740 = vst.msk [vmem:[#allocation3 + $0x40] sm:$0xff] %vm613_vm6, %v8477_v27  ;;  %v9662_v12 = vpop.f32.mrb[82].mxu1 }
 0xb28   : > { %v8480_v47 = vpop.f32.mrb[83].mxu1 }
 0xb29   : > { %8741 = vst.msk [vmem:[#allocation3 + $0x48] sm:$0xff] %vm613_vm6, %v8480_v47  ;;  %v8884_v47 = vld [vmem:[%s10387_s7 + $0x48] sm:$0xff] }
 0xb2c   : > { %v8110_v40 = vpop.permute.xlu1 %8109 }
 0xb2d   : > { %v8237_v56 = vsel %vm14217_vm13, %v8110_v40, %v8236_v35 }
 0xb2e   : > { %8238 = vst [vmem:[#allocation2 + $0xe8] sm:$0x1] %v8237_v56  ;;  %v8108_v28 = vpop.permute.xlu0 %8107 }
 0xb2f   : > { %v8234_v20 = vsel %vm14210_vm12, %v8108_v28, %v8233_v13 }
 0xb30   : > { %8235 = vst [vmem:[#allocation2 + $0xe0] sm:$0xff] %v8234_v20  ;;  %9707 = vmatprep.mubr.msk.bf16.mxu1 %vm300_vm0, %v8234_v20  ;;  %v8806_v10 = vld [vmem:[#allocation3 + $0x41] sm:$0xff]  ;;  %v8807_v21 = vld [vmem:[#allocation3 + $0x49] sm:$0xff] }
 0xb31   : > { %v8845_v46 = vadd.f32 %v14614_v54, %v8806_v10  ;;  %v8846_v36 = vadd.f32 %v14614_v54, %v8807_v21  ;;  %v8885_v21 = vld [vmem:[%s10387_s7 + $0x50] sm:$0xff] }
 0xb33   : > { %v8909_v24 = vadd.f32 %v8877_v3, %v8845_v46  ;;  %v8910_v4 = vadd.f32 %v8878_v11, %v8846_v36  ;;  %v8886_v36 = vld [vmem:[%s10387_s7 + $0x58] sm:$0xff] }
 0xb35   : > { %v8280_v17 = vld [vmem:[#allocation2 + $0xe8] sm:$0xff]  ;;  %8941 = vst.msk [vmem:[%s14626_s27 + $0x10] sm:$0xff] %vm613_vm6, %v8909_v24  ;;  %8942 = vst.msk [vmem:[%s14626_s27 + $0x18] sm:$0xff] %vm613_vm6, %v8910_v4 }
 0xb36   : > { %9708 = vmatmul.mubr.msk.bf16.gmra.mrb[128].mxu1 %vm300_vm0, %v8280_v17 }
 0xb45   : > { %v9665_v43 = vpop.f32.mrb[84].mxu1 }
 0xb46   : > { %8746 = vst.msk [vmem:[#allocation3 + $0x70] sm:$0xff] %vm613_vm6, %v9665_v43  ;;  %v8493_v58 = vpop.f32.mrb[85].mxu1 }
 0xb47   : > { %8744 = vst.msk [vmem:[#allocation3 + $0x60] sm:$0xff] %vm613_vm6, %v8493_v58  ;;  %v9666_v31 = vpop.f32.mrb[86].mxu1 }
 0xb48   : > { %v8496_v39 = vpop.f32.mrb[87].mxu1 }
 0xb49   : > { %8745 = vst.msk [vmem:[#allocation3 + $0x68] sm:$0xff] %vm613_vm6, %v8496_v39 }
 0xb4c   : > { %v8114_v29 = vpop.permute.xlu1 %8113 }
 0xb4d   : > { %v8243_v7 = vsel %vm14217_vm13, %v8114_v29, %v8242_v51 }
 0xb4e   : > { %8244 = vst [vmem:[#allocation2 + $0xf8] sm:$0x1] %v8243_v7  ;;  %v8112_v45 = vpop.permute.xlu0 %8111 }
 0xb4f   : > { %v8240_v18 = vsel %vm14210_vm12, %v8112_v45, %v8239_v26  ;;  %v8887_v45 = vld [vmem:[%s10387_s7 + $0x60] sm:$0xff] }
 0xb50   : > { %8241 = vst [vmem:[#allocation2 + $0xf0] sm:$0xff] %v8240_v18  ;;  %9711 = vmatprep.mubr.msk.bf16.mxu1 %vm300_vm0, %v8240_v18  ;;  %v8808_v25 = vld [vmem:[#allocation3 + $0x61] sm:$0xff]  ;;  %v8809_v34 = vld [vmem:[#allocation3 + $0x69] sm:$0xff] }
 0xb51   : > { %v8847_v8 = vadd.f32 %v14614_v54, %v8808_v25  ;;  %v8848_v14 = vadd.f32 %v14614_v54, %v8809_v34  ;;  %v8888_v34 = vld [vmem:[%s10387_s7 + $0x68] sm:$0xff] }
 0xb53   : > { %v8911_v59 = vadd.f32 %v8879_v44, %v8847_v8  ;;  %v8912_v50 = vadd.f32 %v8880_v32, %v8848_v14 }
 0xb55   : > { %v8282_v33 = vld [vmem:[#allocation2 + $0xf8] sm:$0xff]  ;;  %8943 = vst.msk [vmem:[%s14626_s27 + $0x20] sm:$0xff] %vm613_vm6, %v8911_v59  ;;  %8944 = vst.msk [vmem:[%s14626_s27 + $0x28] sm:$0xff] %vm613_vm6, %v8912_v50 }
 0xb56   : > { %9712 = vmatmul.mubr.msk.bf16.gmra.mrb[132].mxu1 %vm300_vm0, %v8282_v33 }
 0xb60   : > { %v8118_v62 = vpop.permute.xlu1 %8117 }
 0xb61   : > { %v8249_v63 = vsel %vm14217_vm13, %v8118_v62, %v8248_v55  ;;  %v8889_v62 = vld [vmem:[%s10387_s7 + $0x70] sm:$0xff] }
 0xb62   : > { %8250 = vst [vmem:[#allocation2 + $0x108] sm:$0x1] %v8249_v63  ;;  %v8116_v1 = vpop.permute.xlu0 %8115 }
 0xb63   : > { %v8246_v52 = vsel %vm14210_vm12, %v8116_v1, %v8245_v2 }
 0xb64   : > { %8247 = vst [vmem:[#allocation2 + $0x100] sm:$0xff] %v8246_v52  ;;  %v9669_v16 = vpop.f32.mrb[88].mxu1  ;;  %9715 = vmatprep.mubr.msk.bf16.mxu1 %vm300_vm0, %v8246_v52  ;;  %v8890_v52 = vld [vmem:[%s10387_s7 + $0x78] sm:$0xff] }
 0xb65   : > { %8750 = vst.msk [vmem:[#allocation3 + $0x90] sm:$0xff] %vm613_vm6, %v9669_v16  ;;  %v8509_v61 = vpop.f32.mrb[89].mxu1 }
 0xb66   : > { %8748 = vst.msk [vmem:[#allocation3 + $0x80] sm:$0xff] %vm613_vm6, %v8509_v61  ;;  %v9670_v15 = vpop.f32.mrb[90].mxu1 }
 0xb67   : > { %v8512_v5 = vpop.f32.mrb[91].mxu1 }
 0xb68   : > { %8749 = vst.msk [vmem:[#allocation3 + $0x88] sm:$0xff] %vm613_vm6, %v8512_v5 }
 0xb69   : > { %v8284_v37 = vld [vmem:[#allocation2 + $0x108] sm:$0xff] }
 0xb6a   : > { %9716 = vmatmul.mubr.msk.bf16.gmra.mrb[136].mxu1 %vm300_vm0, %v8284_v37 }
 0xb6b   : > { %9719 = vmatprep.mubr.msk.bf16.mxu1 %vm300_vm0, %v8285_v57 }
 0xb6f   : > { %v8810_v9 = vld [vmem:[#allocation3 + $0x81] sm:$0xff]  ;;  %v8811_v23 = vld [vmem:[#allocation3 + $0x89] sm:$0xff] }
 0xb70   : > { %v8849_v19 = vadd.f32 %v14614_v54, %v8810_v9  ;;  %v8850_v38 = vadd.f32 %v14614_v54, %v8811_v23 }
 0xb72   : > { %9720 = vmatmul.mubr.msk.bf16.gmra.mrb[140].mxu1 %vm300_vm0, %v8286_v41  ;;  %v8913_v53 = vadd.f32 %v8881_v30, %v8849_v19  ;;  %v8914_v42 = vadd.f32 %v8882_v0, %v8850_v38  ;;  %v8891_v30 = vld [vmem:[%s10387_s7 + $0x80] sm:$0xff]  ;;  %v8892_v19 = vld [vmem:[%s10387_s7 + $0x88] sm:$0xff] }
 0xb74   : > { %8945 = vst.msk [vmem:[%s14626_s27 + $0x30] sm:$0xff] %vm613_vm6, %v8913_v53  ;;  %8946 = vst.msk [vmem:[%s14626_s27 + $0x38] sm:$0xff] %vm613_vm6, %v8914_v42 }
 0xb84   : > { %v9673_v22 = vpop.f32.mrb[92].mxu1 }
 0xb85   : > { %8754 = vst.msk [vmem:[#allocation3 + $0xb0] sm:$0xff] %vm613_vm6, %v9673_v22  ;;  %v8525_v6 = vpop.f32.mrb[93].mxu1 }
 0xb86   : > { %8752 = vst.msk [vmem:[#allocation3 + $0xa0] sm:$0xff] %vm613_vm6, %v8525_v6  ;;  %v9674_v60 = vpop.f32.mrb[94].mxu1 }
 0xb87   : > { %v8528_v48 = vpop.f32.mrb[95].mxu1 }
 0xb88   : > { %8753 = vst.msk [vmem:[#allocation3 + $0xa8] sm:$0xff] %vm613_vm6, %v8528_v48 }
 0xb8f   : > { %v8812_v27 = vld [vmem:[#allocation3 + $0xa1] sm:$0xff]  ;;  %v8813_v12 = vld [vmem:[#allocation3 + $0xa9] sm:$0xff] }
 0xb90   : > { %v8851_v35 = vadd.f32 %v14614_v54, %v8812_v27  ;;  %v8852_v40 = vadd.f32 %v14614_v54, %v8813_v12 }
 0xb92   : > { %v8915_v56 = vadd.f32 %v8883_v49, %v8851_v35  ;;  %v8916_v13 = vadd.f32 %v8884_v47, %v8852_v40  ;;  %v8893_v49 = vld [vmem:[%s10387_s7 + $0x90] sm:$0xff]  ;;  %v8894_v35 = vld [vmem:[%s10387_s7 + $0x98] sm:$0xff] }
 0xb94   : > { %8947 = vst.msk [vmem:[%s14626_s27 + $0x40] sm:$0xff] %vm613_vm6, %v8915_v56  ;;  %8948 = vst.msk [vmem:[%s14626_s27 + $0x48] sm:$0xff] %vm613_vm6, %v8916_v13 }
 0xba4   : > { %v9677_v28 = vpop.f32.mrb[96].mxu1 }
 0xba5   : > { %8758 = vst.msk [vmem:[#allocation3 + $0xd0] sm:$0xff] %vm613_vm6, %v9677_v28  ;;  %v8541_v20 = vpop.f32.mrb[97].mxu1 }
 0xba6   : > { %8756 = vst.msk [vmem:[#allocation3 + $0xc0] sm:$0xff] %vm613_vm6, %v8541_v20  ;;  %v9678_v3 = vpop.f32.mrb[98].mxu1 }
 0xba7   : > { %v8544_v10 = vpop.f32.mrb[99].mxu1 }
 0xba8   : > { %8757 = vst.msk [vmem:[#allocation3 + $0xc8] sm:$0xff] %vm613_vm6, %v8544_v10 }
 0xbaf   : > { %v8814_v11 = vld [vmem:[#allocation3 + $0xc1] sm:$0xff]  ;;  %v8815_v46 = vld [vmem:[#allocation3 + $0xc9] sm:$0xff] }
 0xbb0   : > { %v8853_v24 = vadd.f32 %v14614_v54, %v8814_v11  ;;  %v8854_v4 = vadd.f32 %v14614_v54, %v8815_v46 }
 0xbb2   : > { %v8917_v17 = vadd.f32 %v8885_v21, %v8853_v24  ;;  %v8918_v43 = vadd.f32 %v8886_v36, %v8854_v4  ;;  %v8895_v21 = vld [vmem:[%s10387_s7 + $0xa0] sm:$0xff]  ;;  %v8896_v24 = vld [vmem:[%s10387_s7 + $0xa8] sm:$0xff] }
 0xbb4   : > { %8949 = vst.msk [vmem:[%s14626_s27 + $0x50] sm:$0xff] %vm613_vm6, %v8917_v17  ;;  %8950 = vst.msk [vmem:[%s14626_s27 + $0x58] sm:$0xff] %vm613_vm6, %v8918_v43 }
 0xbbc   : > { %v9681_v58 = vpop.f32.mrb[100].mxu1 }
 0xbbd   : > { %8762 = vst.msk [vmem:[#allocation3 + $0xf0] sm:$0xff] %vm613_vm6, %v9681_v58  ;;  %v8557_v31 = vpop.f32.mrb[101].mxu1 }
 0xbbe   : > { %8760 = vst.msk [vmem:[#allocation3 + $0xe0] sm:$0xff] %vm613_vm6, %v8557_v31  ;;  %v9682_v39 = vpop.f32.mrb[102].mxu1 }
 0xbbf   : > { %v8560_v51 = vpop.f32.mrb[103].mxu1 }
 0xbc0   : > { %8761 = vst.msk [vmem:[#allocation3 + $0xe8] sm:$0xff] %vm613_vm6, %v8560_v51 }
 0xbc4   : > { %v9685_v29 = vpop.f32.mrb[104].mxu1 }
 0xbc5   : > { %8766 = vst.msk [vmem:[#allocation3 + $0x110] sm:$0xff] %vm613_vm6, %v9685_v29  ;;  %v8573_v7 = vpop.f32.mrb[105].mxu1  ;;  %v8897_v29 = vld [vmem:[%s10387_s7 + $0xb0] sm:$0xff] }
 0xbc6   : > { %8764 = vst.msk [vmem:[#allocation3 + $0x100] sm:$0xff] %vm613_vm6, %v8573_v7  ;;  %v9686_v26 = vpop.f32.mrb[106].mxu1 }
 0xbc7   : > { %v8576_v18 = vpop.f32.mrb[107].mxu1  ;;  %v8816_v44 = vld [vmem:[#allocation3 + $0xe1] sm:$0xff]  ;;  %v8817_v25 = vld [vmem:[#allocation3 + $0xe9] sm:$0xff] }
 0xbc8   : > { %8765 = vst.msk [vmem:[#allocation3 + $0x108] sm:$0xff] %vm613_vm6, %v8576_v18  ;;  %v8855_v32 = vadd.f32 %v14614_v54, %v8816_v44  ;;  %v8856_v8 = vadd.f32 %v14614_v54, %v8817_v25  ;;  %v8898_v18 = vld [vmem:[%s10387_s7 + $0xb8] sm:$0xff] }
 0xbca   : > { %v8919_v14 = vadd.f32 %v8887_v45, %v8855_v32  ;;  %v8920_v59 = vadd.f32 %v8888_v34, %v8856_v8  ;;  %v8899_v8 = vld [vmem:[%s10387_s7 + $0xc0] sm:$0xff] }
 0xbcc   : > { %v9689_v50 = vpop.f32.mrb[108].mxu1  ;;  %8951 = vst.msk [vmem:[%s14626_s27 + $0x60] sm:$0xff] %vm613_vm6, %v8919_v14  ;;  %8952 = vst.msk [vmem:[%s14626_s27 + $0x68] sm:$0xff] %vm613_vm6, %v8920_v59 }
 0xbcd   : > { %8770 = vst.msk [vmem:[#allocation3 + $0x130] sm:$0xff] %vm613_vm6, %v9689_v50  ;;  %v8589_v33 = vpop.f32.mrb[109].mxu1  ;;  %v8900_v50 = vld [vmem:[%s10387_s7 + $0xc8] sm:$0xff] }
 0xbce   : > { %8768 = vst.msk [vmem:[#allocation3 + $0x120] sm:$0xff] %vm613_vm6, %v8589_v33  ;;  %v9690_v55 = vpop.f32.mrb[110].mxu1 }
 0xbcf   : > { %v8592_v63 = vpop.f32.mrb[111].mxu1  ;;  %v8818_v2 = vld [vmem:[#allocation3 + $0x101] sm:$0xff]  ;;  %v8819_v1 = vld [vmem:[#allocation3 + $0x109] sm:$0xff] }
 0xbd0   : > { %8769 = vst.msk [vmem:[#allocation3 + $0x128] sm:$0xff] %vm613_vm6, %v8592_v63  ;;  %v8857_v16 = vadd.f32 %v14614_v54, %v8818_v2  ;;  %v8858_v61 = vadd.f32 %v14614_v54, %v8819_v1 }
 0xbd2   : > { %v8921_v15 = vadd.f32 %v8889_v62, %v8857_v16  ;;  %v8922_v5 = vadd.f32 %v8890_v52, %v8858_v61  ;;  %v8901_v61 = vld [vmem:[%s10387_s7 + $0xd0] sm:$0xff] }
 0xbd4   : > { %v9693_v57 = vpop.f32.mrb[112].mxu1  ;;  %8953 = vst.msk [vmem:[%s14626_s27 + $0x70] sm:$0xff] %vm613_vm6, %v8921_v15  ;;  %8954 = vst.msk [vmem:[%s14626_s27 + $0x78] sm:$0xff] %vm613_vm6, %v8922_v5 }
 0xbd5   : > { %8774 = vst.msk [vmem:[#allocation3 + $0x150] sm:$0xff] %vm613_vm6, %v9693_v57  ;;  %v8605_v37 = vpop.f32.mrb[113].mxu1  ;;  %v8902_v57 = vld [vmem:[%s10387_s7 + $0xd8] sm:$0xff] }
 0xbd6   : > { %8772 = vst.msk [vmem:[#allocation3 + $0x140] sm:$0xff] %vm613_vm6, %v8605_v37  ;;  %v9694_v41 = vpop.f32.mrb[114].mxu1 }
 0xbd7   : > { %v8608_v9 = vpop.f32.mrb[115].mxu1  ;;  %v8820_v23 = vld [vmem:[#allocation3 + $0x121] sm:$0xff]  ;;  %v8821_v0 = vld [vmem:[#allocation3 + $0x129] sm:$0xff] }
 0xbd8   : > { %8773 = vst.msk [vmem:[#allocation3 + $0x148] sm:$0xff] %vm613_vm6, %v8608_v9  ;;  %v8859_v38 = vadd.f32 %v14614_v54, %v8820_v23  ;;  %v8860_v53 = vadd.f32 %v14614_v54, %v8821_v0 }
 0xbda   : > { %v8923_v42 = vadd.f32 %v8891_v30, %v8859_v38  ;;  %v8924_v22 = vadd.f32 %v8892_v19, %v8860_v53  ;;  %v8903_v53 = vld [vmem:[%s10387_s7 + $0xe0] sm:$0xff] }
 0xbdc   : > { %v9697_v6 = vpop.f32.mrb[116].mxu1  ;;  %8955 = vst.msk [vmem:[%s14626_s27 + $0x80] sm:$0xff] %vm613_vm6, %v8923_v42  ;;  %8956 = vst.msk [vmem:[%s14626_s27 + $0x88] sm:$0xff] %vm613_vm6, %v8924_v22 }
 0xbdd   : > { %8778 = vst.msk [vmem:[#allocation3 + $0x170] sm:$0xff] %vm613_vm6, %v9697_v6  ;;  %v8621_v60 = vpop.f32.mrb[117].mxu1  ;;  %v8904_v6 = vld [vmem:[%s10387_s7 + $0xe8] sm:$0xff] }
 0xbde   : > { %8776 = vst.msk [vmem:[#allocation3 + $0x160] sm:$0xff] %vm613_vm6, %v8621_v60  ;;  %v9698_v48 = vpop.f32.mrb[118].mxu1 }
 0xbdf   : > { %v8624_v27 = vpop.f32.mrb[119].mxu1  ;;  %v8822_v12 = vld [vmem:[#allocation3 + $0x141] sm:$0xff]  ;;  %v8823_v47 = vld [vmem:[#allocation3 + $0x149] sm:$0xff] }
 0xbe0   : > { %8777 = vst.msk [vmem:[#allocation3 + $0x168] sm:$0xff] %vm613_vm6, %v8624_v27  ;;  %v8861_v40 = vadd.f32 %v14614_v54, %v8822_v12  ;;  %v8862_v56 = vadd.f32 %v14614_v54, %v8823_v47 }
 0xbe2   : > { %v8925_v13 = vadd.f32 %v8893_v49, %v8861_v40  ;;  %v8926_v28 = vadd.f32 %v8894_v35, %v8862_v56 }
 0xbe4   : > { %v9701_v20 = vpop.f32.mrb[120].mxu1  ;;  %8957 = vst.msk [vmem:[%s14626_s27 + $0x90] sm:$0xff] %vm613_vm6, %v8925_v13  ;;  %8958 = vst.msk [vmem:[%s14626_s27 + $0x98] sm:$0xff] %vm613_vm6, %v8926_v28  ;;  %v8905_v28 = vld [vmem:[%s10387_s7 + $0xf0] sm:$0xff] }
 0xbe5   : > { %8782 = vst.msk [vmem:[#allocation3 + $0x190] sm:$0xff] %vm613_vm6, %v9701_v20  ;;  %v8637_v3 = vpop.f32.mrb[121].mxu1 }
 0xbe6   : > { %8780 = vst.msk [vmem:[#allocation3 + $0x180] sm:$0xff] %vm613_vm6, %v8637_v3  ;;  %v9702_v10 = vpop.f32.mrb[122].mxu1 }
 0xbe7   : > { %v8640_v11 = vpop.f32.mrb[123].mxu1  ;;  %v8824_v46 = vld [vmem:[#allocation3 + $0x161] sm:$0xff]  ;;  %v8825_v36 = vld [vmem:[#allocation3 + $0x169] sm:$0xff] }
 0xbe8   : > { %8781 = vst.msk [vmem:[#allocation3 + $0x188] sm:$0xff] %vm613_vm6, %v8640_v11  ;;  %v8863_v4 = vadd.f32 %v14614_v54, %v8824_v46  ;;  %v8864_v17 = vadd.f32 %v14614_v54, %v8825_v36 }
 0xbea   : > { %v8927_v43 = vadd.f32 %v8895_v21, %v8863_v4  ;;  %v8928_v58 = vadd.f32 %v8896_v24, %v8864_v17  ;;  %v8906_v21 = vld [vmem:[%s10387_s7 + $0xf8] sm:$0xff]  ;;  %s10039_s7 = scalar_lea.vmem %s14824_s10, 4096 }
 0xbeb   : > { %p10040_p3 = scmp.ne.s32.totalorder %s14824_s10, %s10039_s7  ;;  %p10047_p2 = scmp.lt.s32.totalorder %s10045_s6, %s10039_s7 }
 0xbec   : > { %v9705_v31 = vpop.f32.mrb[124].mxu1  ;;  %8959 = vst.msk [vmem:[%s14626_s27 + $0xa0] sm:$0xff] %vm613_vm6, %v8927_v43  ;;  %8960 = vst.msk [vmem:[%s14626_s27 + $0xa8] sm:$0xff] %vm613_vm6, %v8928_v58 }
 0xbed   : > { %8786 = vst.msk [vmem:[#allocation3 + $0x1b0] sm:$0xff] %vm613_vm6, %v9705_v31  ;;  %v8653_v39 = vpop.f32.mrb[125].mxu1  ;;  %p10041_p5 = pnand %p10040_p3, %p10329_p10  ;;  %p10048_p1 = por %p10047_p2, %p10046_p12 }
 0xbee   : > { %8784 = vst.msk [vmem:[#allocation3 + $0x1a0] sm:$0xff] %vm613_vm6, %v8653_v39  ;;  %v9706_v51 = vpop.f32.mrb[126].mxu1 }
 0xbef   : > { %v8656_v7 = vpop.f32.mrb[127].mxu1  ;;  %v8826_v26 = vld [vmem:[#allocation3 + $0x181] sm:$0xff]  ;;  %v8827_v45 = vld [vmem:[#allocation3 + $0x189] sm:$0xff]  ;;  %p10042_p7 = pneg %p10041_p5 }
 0xbf0   : > { %8785 = vst.msk [vmem:[#allocation3 + $0x1a8] sm:$0xff] %vm613_vm6, %v8656_v7  ;;  %v8865_v44 = vadd.f32 %v14614_v54, %v8826_v26  ;;  %v8866_v25 = vadd.f32 %v14614_v54, %v8827_v45 }
 0xbf1   : > { %p10049_p13 = pnand %p10048_p1, %p10042_p7 }
 0xbf2   : > { %v8929_v34 = vadd.f32 %v8897_v29, %v8865_v44  ;;  %v8930_v32 = vadd.f32 %v8898_v18, %v8866_v25 }
 0xbf4   : > { %8961 = vst.msk [vmem:[%s14626_s27 + $0xb0] sm:$0xff] %vm613_vm6, %v8929_v34  ;;  %8962 = vst.msk [vmem:[%s14626_s27 + $0xb8] sm:$0xff] %vm613_vm6, %v8930_v32 }
 0xbf7   : > { %v8828_v14 = vld [vmem:[#allocation3 + $0x1a1] sm:$0xff]  ;;  %v8829_v59 = vld [vmem:[#allocation3 + $0x1a9] sm:$0xff] }
 0xbf8   : > { %v8867_v33 = vadd.f32 %v14614_v54, %v8828_v14  ;;  %v8868_v55 = vadd.f32 %v14614_v54, %v8829_v59 }
 0xbfa   : > { %v8931_v62 = vadd.f32 %v8899_v8, %v8867_v33  ;;  %v8932_v63 = vadd.f32 %v8900_v50, %v8868_v55 }
 0xbfc   : > { %8963 = vst.msk [vmem:[%s14626_s27 + $0xc0] sm:$0xff] %vm613_vm6, %v8931_v62  ;;  %8964 = vst.msk [vmem:[%s14626_s27 + $0xc8] sm:$0xff] %vm613_vm6, %v8932_v63 }
 0xc09   : > { %v9709_v2 = vpop.f32.mrb[128].mxu1 }
 0xc0a   : > { %8790 = vst.msk [vmem:[#allocation3 + $0x1d0] sm:$0xff] %vm613_vm6, %v9709_v2  ;;  %v8669_v1 = vpop.f32.mrb[129].mxu1 }
 0xc0b   : > { %8788 = vst.msk [vmem:[#allocation3 + $0x1c0] sm:$0xff] %vm613_vm6, %v8669_v1  ;;  %v9710_v52 = vpop.f32.mrb[130].mxu1 }
 0xc0c   : > { %v8672_v16 = vpop.f32.mrb[131].mxu1 }
 0xc0d   : > { %8789 = vst.msk [vmem:[#allocation3 + $0x1c8] sm:$0xff] %vm613_vm6, %v8672_v16 }
 0xc14   : > { %v8830_v15 = vld [vmem:[#allocation3 + $0x1c1] sm:$0xff]  ;;  %v8831_v5 = vld [vmem:[#allocation3 + $0x1c9] sm:$0xff] }
 0xc15   : > { %v8869_v37 = vadd.f32 %v14614_v54, %v8830_v15  ;;  %v8870_v41 = vadd.f32 %v14614_v54, %v8831_v5 }
 0xc17   : > { %v8933_v30 = vadd.f32 %v8901_v61, %v8869_v37  ;;  %v8934_v9 = vadd.f32 %v8902_v57, %v8870_v41 }
 0xc19   : > { %8965 = vst.msk [vmem:[%s14626_s27 + $0xd0] sm:$0xff] %vm613_vm6, %v8933_v30  ;;  %8966 = vst.msk [vmem:[%s14626_s27 + $0xd8] sm:$0xff] %vm613_vm6, %v8934_v9 }
 0xc29   : > { %v9713_v23 = vpop.f32.mrb[132].mxu1 }
 0xc2a   : > { %8794 = vst.msk [vmem:[#allocation3 + $0x1f0] sm:$0xff] %vm613_vm6, %v9713_v23  ;;  %v8685_v0 = vpop.f32.mrb[133].mxu1 }
 0xc2b   : > { %8792 = vst.msk [vmem:[#allocation3 + $0x1e0] sm:$0xff] %vm613_vm6, %v8685_v0  ;;  %v9714_v19 = vpop.f32.mrb[134].mxu1 }
 0xc2c   : > { %v8688_v38 = vpop.f32.mrb[135].mxu1 }
 0xc2d   : > { %8793 = vst.msk [vmem:[#allocation3 + $0x1e8] sm:$0xff] %vm613_vm6, %v8688_v38 }
 0xc34   : > { %v8832_v42 = vld [vmem:[#allocation3 + $0x1e1] sm:$0xff]  ;;  %v8833_v22 = vld [vmem:[#allocation3 + $0x1e9] sm:$0xff] }
 0xc35   : > { %v8871_v60 = vadd.f32 %v14614_v54, %v8832_v42  ;;  %v8872_v48 = vadd.f32 %v14614_v54, %v8833_v22 }
 0xc37   : > { %v8935_v49 = vadd.f32 %v8903_v53, %v8871_v60  ;;  %v8936_v27 = vadd.f32 %v8904_v6, %v8872_v48 }
 0xc39   : > { %8967 = vst.msk [vmem:[%s14626_s27 + $0xe0] sm:$0xff] %vm613_vm6, %v8935_v49  ;;  %8968 = vst.msk [vmem:[%s14626_s27 + $0xe8] sm:$0xff] %vm613_vm6, %v8936_v27 }
 0xc3d   : > { %v9717_v12 = vpop.f32.mrb[136].mxu1 }
 0xc3e   : > { %8798 = vst.msk [vmem:[#allocation3 + $0x210] sm:$0xff] %vm613_vm6, %v9717_v12  ;;  %v8701_v47 = vpop.f32.mrb[137].mxu1 }
 0xc3f   : > { %8796 = vst.msk [vmem:[#allocation3 + $0x200] sm:$0xff] %vm613_vm6, %v8701_v47  ;;  %v9718_v35 = vpop.f32.mrb[138].mxu1 }
 0xc40   : > { %v8704_v40 = vpop.f32.mrb[139].mxu1 }
 0xc41   : > { %8797 = vst.msk [vmem:[#allocation3 + $0x208] sm:$0xff] %vm613_vm6, %v8704_v40 }
 0xc45   : > { %v9721_v56 = vpop.f32.mrb[140].mxu1 }
 0xc46   : > { %8802 = vst.msk [vmem:[#allocation3 + $0x230] sm:$0xff] %vm613_vm6, %v9721_v56  ;;  %v8717_v13 = vpop.f32.mrb[141].mxu1 }
 0xc47   : > { %8800 = vst.msk [vmem:[#allocation3 + $0x220] sm:$0xff] %vm613_vm6, %v8717_v13  ;;  %v9722_v20 = vpop.f32.mrb[142].mxu1 }
 0xc48   : > { %v8834_v3 = vld [vmem:[#allocation3 + $0x201] sm:$0xff]  ;;  %v8835_v10 = vld [vmem:[#allocation3 + $0x209] sm:$0xff]  ;;  %v8720_v11 = vpop.f32.mrb[143].mxu1 }
 0xc49   : > { %v8873_v46 = vadd.f32 %v14614_v54, %v8834_v3  ;;  %v8874_v36 = vadd.f32 %v14614_v54, %v8835_v10  ;;  %8801 = vst.msk [vmem:[#allocation3 + $0x228] sm:$0xff] %vm613_vm6, %v8720_v11 }
 0xc4b   : > { %v8937_v24 = vadd.f32 %v8905_v28, %v8873_v46  ;;  %v8938_v4 = vadd.f32 %v8906_v21, %v8874_v36 }
 0xc4d   : > { %8969 = vst.msk [vmem:[%s14626_s27 + $0xf0] sm:$0xff] %vm613_vm6, %v8937_v24  ;;  %8970 = vst.msk [vmem:[%s14626_s27 + $0xf8] sm:$0xff] %vm613_vm6, %v8938_v4 }
 0xc4e   : > { %10052 = shalt.err (!%p10049_p13)
}
 0xc4f   : > { %s10053_s9 = scalar_lea.hbm %s14822_s13, 4096  ;;  %s10057_s23 = scalar_lea.hbm %s14878_s5, 8192 }
 0xc50   : > { %p10054_p9 = scmp.ne.s32.totalorder %s14822_s13, %s10053_s9  ;;  %p10058_p4 = scmp.lt.u32.totalorder %s14822_s13, %s14878_s5 }
 0xc51   : > { %p10059_p8 = scmp.lt.u32.totalorder %s10057_s23, %s10053_s9  ;;  %p10061_p3 = scmp.lt.u32.totalorder %s10053_s9, %s14822_s13 }
 0xc52   : > { %p10055_p0 = pnand %p10054_p9, %p10329_p10 }
 0xc53   : > { %p10060_p6 = por %p10059_p8, %p10058_p4 }
 0xc54   : > { %p10056_p11 = pneg %p10055_p0 }
 0xc55   : > { %p10062_p5 = por %p10061_p3, %p10060_p6 }
 0xc57   : > { %p10063_p7 = pnand %p10062_p5, %p10056_p11 }
 0xc59   : > { %10066 = shalt.err (!%p10063_p7)
}
 0xc5a   : > { %s10139_s24 = smov 128  }
 0xc5b   : > { %9743 = dma.vmem_to_hbm [thread:$0]  (%p10329_p10), %s14824_s10, 4096, %s14822_s13, %s8972_s22, %s10139_s24, %s10139_s24, %s10135_s12  }
 0xc5c PF: > { %s9000_s26 = sand.u32 1, %s10101_s18   ;;  %p15749_p12 = scmp.ne.s32.totalorder %s14912_s25, 0 }
 0xc5d   : > { %p15750_p2 = scmp.ge.s32.totalorder %s10113_s21, 2  ;;  %s9001_s7 = scalar_lea.sflag [#allocation6], %s9000_s26 }
 0xc5f   : > { %p9763_p1 = pnand %p15750_p2, %p15749_p12 }
 0xc61   : > { %10096 = dma.done.wait (!%p9763_p1), %s9001_s7, 4096  }
 0xc62   : > { %10098 = vsyncadd (!%p9763_p1), %s9001_s7, 4294963200  ;;  %p20_p13 = scmp.ge.s32.totalorder %s10319_s14, 4   ;;  %s15751_s18 = smov %s10105_s19 }
 0xc63   : > { %s15752_s19 = smov %s10109_s20  ;;  %s15753_s20 = smov %s10335_s30 }
 0xc64   : > { %s15754_s21 = smov %s10319_s14  ;;  %22 = sbr.rel (!%p20_p13) target bundleno = 7 (0x7), region = 109 }
 0xc6b   :  { %9006 = vsyncpa [#allocation5], 1 }
 0xc6c   :  { %9008 = vsyncpa [#allocation5 + $0x1], 1 }
 0xc6d   :  { %9009 = vsyncpa [#allocation8], 1 }
 0xc6e   :  { %9010 = vsyncpa [#allocation11], 1 }
 0xc6f   :  { %9011 = vsyncpa [#allocation6], 1 }
 0xc70   :  { %9013 = vsyncpa [#allocation6 + $0x1], 1 }

</bundles_post_ra>
